<compile_context>
chip_gen: v5e
topology: v5e:2x2
jax: 0.10.0
libtpu: 0.0.40
codegen_flags: <defaults>
</compile_context>

<pallas_src>
import functools

import jax
import jax.numpy as jnp
from jax.experimental import pallas as pl
from jax.experimental.pallas import tpu as pltpu


# ------------------------------- kernel -------------------------------------

def _bilstm_kernel(T, H, act_fn,
                   x_ref, w_ih_ref, w_hh_ref, b_ref, w_out_ref, b_out_ref,
                   out_ref, hbuf_ref):
    f32 = jnp.float32
    x = x_ref[...].astype(f32)                                     # (T, D)

    # Fused input projection: all gates x both directions x all timesteps.
    xproj = jnp.dot(x, w_ih_ref[...], preferred_element_type=f32) + b_ref[...]  # (T, 8H)

    # Loop-invariant lane mask: which of the 8H gate columns belong to the
    # forward direction (column layout: [i_f,i_b,f_f,f_b,g_f,g_b,o_f,o_b]).
    col = jax.lax.broadcasted_iota(jnp.int32, (1, 8 * H), 1)
    fwd_mask = (col % (2 * H)) < H

    w_hh = w_hh_ref[...]                                           # (2H, 8H) block-diag

    h = jnp.zeros((1, 2 * H), f32)                                 # [h_fwd | h_bwd]
    c = jnp.zeros((1, 2 * H), f32)                                 # [c_fwd | c_bwd]

    for s in range(T):                                             # static, fully unrolled
        r = T - 1 - s
        # forward direction consumes position s, backward consumes position r.
        gx = jnp.where(fwd_mask, xproj[s:s + 1, :], xproj[r:r + 1, :])       # (1, 8H)
        gates = gx + jnp.dot(h, w_hh, preferred_element_type=f32)           # (1, 8H)

        i_g = jax.nn.sigmoid(gates[:, 0:2 * H])
        f_g = jax.nn.sigmoid(gates[:, 2 * H:4 * H])
        g_g = jnp.tanh(gates[:, 4 * H:6 * H])
        o_g = jax.nn.sigmoid(gates[:, 6 * H:8 * H])

        c = f_g * c + i_g * g_g
        h = o_g * jnp.tanh(c)

        # Scatter hidden states into position-ordered (T, 2H) buffer
        # (lane slices are 128-aligned → unmasked stores).
        hbuf_ref[s:s + 1, 0:H] = h[:, 0:H]                         # fwd output @ pos s
        hbuf_ref[r:r + 1, H:2 * H] = h[:, H:2 * H]                 # bwd output @ pos r

    # Output Linear + activation: one (T, 2H) @ (2H, H) matmul, lane-dense store.
    h_all = hbuf_ref[...]
    y = jnp.dot(h_all, w_out_ref[...], preferred_element_type=f32) + b_out_ref[...]
    out_ref[...] = act_fn(y).astype(out_ref.dtype)


# ---------------------------- weight packing ---------------------------------

def _pack_params(p, H):
    """PyTorch-layout LSTM/Linear weights -> fused, MXU-friendly layouts."""
    def gate_blocks(w):           # (4H, X) -> list of 4 (X, H) transposed blocks
        return [w[k * H:(k + 1) * H, :].T for k in range(4)]

    wih_f, wih_b = gate_blocks(p["w_ih_f"]), gate_blocks(p["w_ih_b"])   # (D, H) each
    whh_f, whh_b = gate_blocks(p["w_hh_f"]), gate_blocks(p["w_hh_b"])   # (H, H) each

    # Input weights: columns interleaved per gate as [i_f,i_b,f_f,f_b,g_f,g_b,o_f,o_b].
    w_ih_cat = jnp.concatenate(
        [blk for k in range(4) for blk in (wih_f[k], wih_b[k])], axis=1)     # (D, 8H)

    # Block-diagonal recurrent weight: rows [0:H] act on h_fwd, rows [H:2H] on h_bwd.
    zH = jnp.zeros((H, H), jnp.float32)
    cols = []
    for k in range(4):
        cols.append(jnp.concatenate([whh_f[k], zH], axis=0))                 # fwd gate k
        cols.append(jnp.concatenate([zH, whh_b[k]], axis=0))                 # bwd gate k
    w_hh_bd = jnp.concatenate(cols, axis=1)                                  # (2H, 8H)

    # Biases: b_ih + b_hh folded, interleaved to match the column layout.
    b_f = p["b_ih_f"] + p["b_hh_f"]
    b_b = p["b_ih_b"] + p["b_hh_b"]
    b_cat = jnp.concatenate(
        [jnp.concatenate([b_f[k * H:(k + 1) * H], b_b[k * H:(k + 1) * H]])
         for k in range(4)])[None, :]                                        # (1, 8H)

    w_out = p["w_out"].T                                                     # (2H, H)
    b_out = p["b_out"][None, :]                                              # (1, H)
    return w_ih_cat, w_hh_bd, b_cat, w_out, b_out


# -------------------------------- wrapper ------------------------------------

def keras_like_lstm_forward(x, params, lstm_dim, act_fn):
    """x: (B, T, input_dim), batch_first like PyTorch.  Returns (B, T, lstm_dim)."""
    B, T, D = x.shape
    H = lstm_dim
    w_ih_cat, w_hh_bd, b_cat, w_out, b_out = _pack_params(params, H)

    kernel = functools.partial(_bilstm_kernel, T, H, act_fn)

    def full_vmem(a):
        return pl.BlockSpec(a.shape, lambda b, _n=a.ndim: (0,) * _n,
                            memory_space=pltpu.MemorySpace.VMEM)

    out = pl.pallas_call(
        kernel,
        out_shape=jax.ShapeDtypeStruct((B, T, H), jnp.float32),
        grid=(B,),
        in_specs=[
            pl.BlockSpec((pl.Squeezed(), T, D), lambda b: (b, 0, 0)),   # x: kernel sees (T, D)
            full_vmem(w_ih_cat),
            full_vmem(w_hh_bd),
            full_vmem(b_cat),
            full_vmem(w_out),
            full_vmem(b_out),
        ],
        out_specs=pl.BlockSpec((pl.Squeezed(), T, H), lambda b: (b, 0, 0)),
        scratch_shapes=[pltpu.VMEM((T, 2 * H), jnp.float32)],
        compiler_params=pltpu.CompilerParams(dimension_semantics=("parallel",)),
    )(x, w_ih_cat, w_hh_bd, b_cat, w_out, b_out)
    return out


# --------------------------- pure-JAX reference -------------------------------

def ref_forward(x, p, H, act_fn):
    B, T, D = x.shape

    def run_dir(x_seq, w_ih, w_hh, b_ih, b_hh):
        h = jnp.zeros((B, H), jnp.float32)
        c = jnp.zeros((B, H), jnp.float32)
        outs = []
        for t in range(T):
            g = x_seq[:, t] @ w_ih.T + b_ih + h @ w_hh.T + b_hh
            i = jax.nn.sigmoid(g[:, 0:H])
            f = jax.nn.sigmoid(g[:, H:2 * H])
            gg = jnp.tanh(g[:, 2 * H:3 * H])
            o = jax.nn.sigmoid(g[:, 3 * H:4 * H])
            c = f * c + i * gg
            h = o * jnp.tanh(c)
            outs.append(h)
        return jnp.stack(outs, axis=1)                            # (B, T, H)

    hf = run_dir(x, p["w_ih_f"], p["w_hh_f"], p["b_ih_f"], p["b_hh_f"])
    hb = run_dir(x[:, ::-1], p["w_ih_b"], p["w_hh_b"], p["b_ih_b"], p["b_hh_b"])[:, ::-1]
    h_all = jnp.concatenate([hf, hb], axis=-1)                    # (B, T, 2H)
    y = h_all @ p["w_out"].T + p["b_out"]
    return act_fn(y)


# ---------------------------------- main --------------------------------------

if __name__ == "__main__":
    B, T, D_IN, H = 2, 8, 4, 128   # batch=2, seq=8, input_dim=4, lstm_dim=128 (lane-dense)

    key = jax.random.PRNGKey(0)
    ks = jax.random.split(key, 12)
    sc = 0.1
    params = {
        # PyTorch layouts: weight_ih (4H, D), weight_hh (4H, H), biases (4H,)
        "w_ih_f": sc * jax.random.normal(ks[0], (4 * H, D_IN), jnp.float32),
        "w_hh_f": sc * jax.random.normal(ks[1], (4 * H, H), jnp.float32),
        "b_ih_f": sc * jax.random.normal(ks[2], (4 * H,), jnp.float32),
        "b_hh_f": sc * jax.random.normal(ks[3], (4 * H,), jnp.float32),
        "w_ih_b": sc * jax.random.normal(ks[4], (4 * H, D_IN), jnp.float32),
        "w_hh_b": sc * jax.random.normal(ks[5], (4 * H, H), jnp.float32),
        "b_ih_b": sc * jax.random.normal(ks[6], (4 * H,), jnp.float32),
        "b_hh_b": sc * jax.random.normal(ks[7], (4 * H,), jnp.float32),
        # Linear(2H -> H): weight (H, 2H), bias (H,)
        "w_out": sc * jax.random.normal(ks[8], (H, 2 * H), jnp.float32),
        "b_out": sc * jax.random.normal(ks[9], (H,), jnp.float32),
    }
    x = jax.random.normal(ks[10], (B, T, D_IN), jnp.float32)      # (B, T, D), batch_first

    act = lambda v: jnp.maximum(v, 0.0)   # act_fn = ReLU (module's act_fn is configurable)

    out = keras_like_lstm_forward(x, params, H, act)
    out = jax.block_until_ready(out)

    ref = ref_forward(x, params, H, act)
    err = float(jnp.max(jnp.abs(out - ref)))
    assert out.shape == (B, T, H), out.shape
    assert err < 1e-4, f"max abs error {err}"

    print("KERNEL_OK")
</pallas_src>

<mosaic_0001>
module attributes {stable_mosaic.version = 11 : i64} {
  func.func @_bilstm_kernel(%arg0: i32, %arg1: memref<1x8x4xf32, #tpu.memory_space<vmem>>, %arg2: memref<4x1024xf32, #tpu.memory_space<vmem>>, %arg3: memref<256x1024xf32, #tpu.memory_space<vmem>>, %arg4: memref<1x1024xf32, #tpu.memory_space<vmem>>, %arg5: memref<256x128xf32, #tpu.memory_space<vmem>>, %arg6: memref<1x128xf32, #tpu.memory_space<vmem>>, %arg7: memref<1x8x128xf32, #tpu.memory_space<vmem>>, %arg8: memref<8x256xf32, #tpu.memory_space<vmem>>) attributes {dimension_semantics = [#tpu.dimension_semantics<parallel>], iteration_bounds = array<i64: 2>, scalar_prefetch = 0 : i64, scratch_operands = 1 : i64, tpu.core_type = #tpu.core_type<tc>, window_params = [{transform_indices = @transform_0, window_bounds = array<i64: 1, 8, 4>}, {pipeline_mode = #tpu.pipeline_mode<synchronous>, transform_indices = @transform_1, window_bounds = array<i64: 4, 1024>}, {pipeline_mode = #tpu.pipeline_mode<synchronous>, transform_indices = @transform_2, window_bounds = array<i64: 256, 1024>}, {pipeline_mode = #tpu.pipeline_mode<synchronous>, transform_indices = @transform_3, window_bounds = array<i64: 1, 1024>}, {pipeline_mode = #tpu.pipeline_mode<synchronous>, transform_indices = @transform_4, window_bounds = array<i64: 256, 128>}, {pipeline_mode = #tpu.pipeline_mode<synchronous>, transform_indices = @transform_5, window_bounds = array<i64: 1, 128>}, {transform_indices = @transform_6, window_bounds = array<i64: 1, 8, 128>}]} {
    %c0 = arith.constant 0 : index
    %c0_0 = arith.constant 0 : index
    %c0_1 = arith.constant 0 : index
    %0 = vector.load %arg1[%c0, %c0_0, %c0_1] : memref<1x8x4xf32, #tpu.memory_space<vmem>>, vector<1x8x4xf32>
    %1 = vector.shape_cast %0 : vector<1x8x4xf32> to vector<8x4xf32>
    %c0_2 = arith.constant 0 : index
    %c0_3 = arith.constant 0 : index
    %2 = vector.load %arg2[%c0_2, %c0_3] : memref<4x1024xf32, #tpu.memory_space<vmem>>, vector<4x1024xf32>
    %cst = arith.constant dense<0.000000e+00> : vector<8x1024xf32>
    %3 = tpu.matmul %1, %2, %cst {dimension_numbers = #tpu.dot_dimension_numbers<[1], [0], [0], [1], [0, 0, 1, 1], [], []>} : vector<8x4xf32>, vector<4x1024xf32>, vector<8x1024xf32> -> vector<8x1024xf32>
    %c0_4 = arith.constant 0 : index
    %c0_5 = arith.constant 0 : index
    %4 = vector.load %arg4[%c0_4, %c0_5] : memref<1x1024xf32, #tpu.memory_space<vmem>>, vector<1x1024xf32>
    %5 = vector.broadcast %4 : vector<1x1024xf32> to vector<8x1024xf32>
    %6 = arith.addf %3, %5 : vector<8x1024xf32>
    %7 = tpu.iota {dimensions = array<i32: 1>} : vector<1x1024xi32>
    %c256_i32 = arith.constant 256 : i32
    %c0_i32 = arith.constant 0 : i32
    %8 = arith.cmpi eq, %c256_i32, %c0_i32 : i32
    %c1_i32 = arith.constant 1 : i32
    %9 = arith.select %8, %c1_i32, %c256_i32 : i32
    %10 = vector.broadcast %9 : i32 to vector<1x1024xi32>
    %11 = arith.remsi %7, %10 : vector<1x1024xi32>
    %c0_i32_6 = arith.constant 0 : i32
    %12 = vector.broadcast %c0_i32_6 : i32 to vector<1x1024xi32>
    %13 = arith.cmpi ne, %11, %12 : vector<1x1024xi32>
    %c0_i32_7 = arith.constant 0 : i32
    %14 = vector.broadcast %c0_i32_7 : i32 to vector<1x1024xi32>
    %15 = arith.cmpi slt, %11, %14 : vector<1x1024xi32>
    %c0_i32_8 = arith.constant 0 : i32
    %16 = arith.cmpi slt, %9, %c0_i32_8 : i32
    %17 = vector.broadcast %16 : i1 to vector<1x1024xi1>
    %18 = vector.broadcast %17 : vector<1x1024xi1> to vector<1x1024xi1>
    %19 = arith.xori %15, %18 : vector<1x1024xi1>
    %20 = arith.andi %19, %13 : vector<1x1024xi1>
    %21 = vector.broadcast %9 : i32 to vector<1x1024xi32>
    %22 = arith.addi %11, %21 : vector<1x1024xi32>
    %23 = arith.select %20, %22, %11 : vector<1x1024xi1>, vector<1x1024xi32>
    %c128_i32 = arith.constant 128 : i32
    %24 = vector.broadcast %c128_i32 : i32 to vector<1x1024xi32>
    %25 = arith.cmpi slt, %23, %24 : vector<1x1024xi32>
    %c0_9 = arith.constant 0 : index
    %c0_10 = arith.constant 0 : index
    %26 = vector.load %arg3[%c0_9, %c0_10] : memref<256x1024xf32, #tpu.memory_space<vmem>>, vector<256x1024xf32>
    %cst_11 = arith.constant 0.000000e+00 : f32
    %27 = vector.broadcast %cst_11 : f32 to vector<1x256xf32>
    %cst_12 = arith.constant 0.000000e+00 : f32
    %28 = vector.broadcast %cst_12 : f32 to vector<1x256xf32>
    %29 = vector.extract_strided_slice %6 {offsets = [0, 0], sizes = [1, 1024], strides = [1, 1]} : vector<8x1024xf32> to vector<1x1024xf32>
    %30 = vector.extract_strided_slice %6 {offsets = [7, 0], sizes = [1, 1024], strides = [1, 1]} : vector<8x1024xf32> to vector<1x1024xf32>
    %31 = arith.select %25, %29, %30 : vector<1x1024xi1>, vector<1x1024xf32>
    %cst_13 = arith.constant dense<0.000000e+00> : vector<1x1024xf32>
    %32 = tpu.matmul %27, %26, %cst_13 {dimension_numbers = #tpu.dot_dimension_numbers<[1], [0], [0], [1], [0, 0, 1, 1], [], []>} : vector<1x256xf32>, vector<256x1024xf32>, vector<1x1024xf32> -> vector<1x1024xf32>
    %33 = arith.addf %31, %32 : vector<1x1024xf32>
    %34 = vector.extract_strided_slice %33 {offsets = [0, 0], sizes = [1, 256], strides = [1, 1]} : vector<1x1024xf32> to vector<1x256xf32>
    %35 = arith.negf %34 : vector<1x256xf32>
    %36 = math.exp %35 : vector<1x256xf32>
    %cst_14 = arith.constant 1.000000e+00 : f32
    %37 = vector.broadcast %cst_14 : f32 to vector<1x256xf32>
    %38 = arith.addf %37, %36 : vector<1x256xf32>
    %39 = arith.divf %37, %38 : vector<1x256xf32>
    %40 = vector.extract_strided_slice %33 {offsets = [0, 256], sizes = [1, 256], strides = [1, 1]} : vector<1x1024xf32> to vector<1x256xf32>
    %41 = arith.negf %40 : vector<1x256xf32>
    %42 = math.exp %41 : vector<1x256xf32>
    %cst_15 = arith.constant 1.000000e+00 : f32
    %43 = vector.broadcast %cst_15 : f32 to vector<1x256xf32>
    %44 = arith.addf %43, %42 : vector<1x256xf32>
    %45 = arith.divf %43, %44 : vector<1x256xf32>
    %46 = vector.extract_strided_slice %33 {offsets = [0, 512], sizes = [1, 256], strides = [1, 1]} : vector<1x1024xf32> to vector<1x256xf32>
    %47 = math.tanh %46 : vector<1x256xf32>
    %48 = vector.extract_strided_slice %33 {offsets = [0, 768], sizes = [1, 256], strides = [1, 1]} : vector<1x1024xf32> to vector<1x256xf32>
    %49 = arith.negf %48 : vector<1x256xf32>
    %50 = math.exp %49 : vector<1x256xf32>
    %cst_16 = arith.constant 1.000000e+00 : f32
    %51 = vector.broadcast %cst_16 : f32 to vector<1x256xf32>
    %52 = arith.addf %51, %50 : vector<1x256xf32>
    %53 = arith.divf %51, %52 : vector<1x256xf32>
    %54 = arith.mulf %45, %28 : vector<1x256xf32>
    %55 = arith.mulf %39, %47 : vector<1x256xf32>
    %56 = arith.addf %54, %55 : vector<1x256xf32>
    %57 = math.tanh %56 : vector<1x256xf32>
    %58 = arith.mulf %53, %57 : vector<1x256xf32>
    %59 = vector.extract_strided_slice %58 {offsets = [0, 0], sizes = [1, 128], strides = [1, 1]} : vector<1x256xf32> to vector<1x128xf32>
    %c0_17 = arith.constant 0 : index
    %c0_18 = arith.constant 0 : index
    %60 = vector.load %arg8[%c0_17, %c0_18] : memref<8x256xf32, #tpu.memory_space<vmem>>, vector<1x128xf32>
    tpu.vector_store %arg8[%c0_17, %c0_18], %59 {strides = array<i32>} : memref<8x256xf32, #tpu.memory_space<vmem>>, vector<1x128xf32>,
    %61 = vector.extract_strided_slice %58 {offsets = [0, 128], sizes = [1, 128], strides = [1, 1]} : vector<1x256xf32> to vector<1x128xf32>
    %c7 = arith.constant 7 : index
    %c128 = arith.constant 128 : index
    %62 = vector.load %arg8[%c7, %c128] : memref<8x256xf32, #tpu.memory_space<vmem>>, vector<1x128xf32>
    tpu.vector_store %arg8[%c7, %c128], %61 {strides = array<i32>} : memref<8x256xf32, #tpu.memory_space<vmem>>, vector<1x128xf32>,
    %63 = vector.extract_strided_slice %6 {offsets = [1, 0], sizes = [1, 1024], strides = [1, 1]} : vector<8x1024xf32> to vector<1x1024xf32>
    %64 = vector.extract_strided_slice %6 {offsets = [6, 0], sizes = [1, 1024], strides = [1, 1]} : vector<8x1024xf32> to vector<1x1024xf32>
    %65 = arith.select %25, %63, %64 : vector<1x1024xi1>, vector<1x1024xf32>
    %cst_19 = arith.constant dense<0.000000e+00> : vector<1x1024xf32>
    %66 = tpu.matmul %58, %26, %cst_19 {dimension_numbers = #tpu.dot_dimension_numbers<[1], [0], [0], [1], [0, 0, 1, 1], [], []>} : vector<1x256xf32>, vector<256x1024xf32>, vector<1x1024xf32> -> vector<1x1024xf32>
    %67 = arith.addf %65, %66 : vector<1x1024xf32>
    %68 = vector.extract_strided_slice %67 {offsets = [0, 0], sizes = [1, 256], strides = [1, 1]} : vector<1x1024xf32> to vector<1x256xf32>
    %69 = arith.negf %68 : vector<1x256xf32>
    %70 = math.exp %69 : vector<1x256xf32>
    %cst_20 = arith.constant 1.000000e+00 : f32
    %71 = vector.broadcast %cst_20 : f32 to vector<1x256xf32>
    %72 = arith.addf %71, %70 : vector<1x256xf32>
    %73 = arith.divf %71, %72 : vector<1x256xf32>
    %74 = vector.extract_strided_slice %67 {offsets = [0, 256], sizes = [1, 256], strides = [1, 1]} : vector<1x1024xf32> to vector<1x256xf32>
    %75 = arith.negf %74 : vector<1x256xf32>
    %76 = math.exp %75 : vector<1x256xf32>
    %cst_21 = arith.constant 1.000000e+00 : f32
    %77 = vector.broadcast %cst_21 : f32 to vector<1x256xf32>
    %78 = arith.addf %77, %76 : vector<1x256xf32>
    %79 = arith.divf %77, %78 : vector<1x256xf32>
    %80 = vector.extract_strided_slice %67 {offsets = [0, 512], sizes = [1, 256], strides = [1, 1]} : vector<1x1024xf32> to vector<1x256xf32>
    %81 = math.tanh %80 : vector<1x256xf32>
    %82 = vector.extract_strided_slice %67 {offsets = [0, 768], sizes = [1, 256], strides = [1, 1]} : vector<1x1024xf32> to vector<1x256xf32>
    %83 = arith.negf %82 : vector<1x256xf32>
    %84 = math.exp %83 : vector<1x256xf32>
    %cst_22 = arith.constant 1.000000e+00 : f32
    %85 = vector.broadcast %cst_22 : f32 to vector<1x256xf32>
    %86 = arith.addf %85, %84 : vector<1x256xf32>
    %87 = arith.divf %85, %86 : vector<1x256xf32>
    %88 = arith.mulf %79, %56 : vector<1x256xf32>
    %89 = arith.mulf %73, %81 : vector<1x256xf32>
    %90 = arith.addf %88, %89 : vector<1x256xf32>
    %91 = math.tanh %90 : vector<1x256xf32>
    %92 = arith.mulf %87, %91 : vector<1x256xf32>
    %93 = vector.extract_strided_slice %92 {offsets = [0, 0], sizes = [1, 128], strides = [1, 1]} : vector<1x256xf32> to vector<1x128xf32>
    %c1 = arith.constant 1 : index
    %c0_23 = arith.constant 0 : index
    %94 = vector.load %arg8[%c1, %c0_23] : memref<8x256xf32, #tpu.memory_space<vmem>>, vector<1x128xf32>
    tpu.vector_store %arg8[%c1, %c0_23], %93 {strides = array<i32>} : memref<8x256xf32, #tpu.memory_space<vmem>>, vector<1x128xf32>,
    %95 = vector.extract_strided_slice %92 {offsets = [0, 128], sizes = [1, 128], strides = [1, 1]} : vector<1x256xf32> to vector<1x128xf32>
    %c6 = arith.constant 6 : index
    %c128_24 = arith.constant 128 : index
    %96 = vector.load %arg8[%c6, %c128_24] : memref<8x256xf32, #tpu.memory_space<vmem>>, vector<1x128xf32>
    tpu.vector_store %arg8[%c6, %c128_24], %95 {strides = array<i32>} : memref<8x256xf32, #tpu.memory_space<vmem>>, vector<1x128xf32>,
    %97 = vector.extract_strided_slice %6 {offsets = [2, 0], sizes = [1, 1024], strides = [1, 1]} : vector<8x1024xf32> to vector<1x1024xf32>
    %98 = vector.extract_strided_slice %6 {offsets = [5, 0], sizes = [1, 1024], strides = [1, 1]} : vector<8x1024xf32> to vector<1x1024xf32>
    %99 = arith.select %25, %97, %98 : vector<1x1024xi1>, vector<1x1024xf32>
    %cst_25 = arith.constant dense<0.000000e+00> : vector<1x1024xf32>
    %100 = tpu.matmul %92, %26, %cst_25 {dimension_numbers = #tpu.dot_dimension_numbers<[1], [0], [0], [1], [0, 0, 1, 1], [], []>} : vector<1x256xf32>, vector<256x1024xf32>, vector<1x1024xf32> -> vector<1x1024xf32>
    %101 = arith.addf %99, %100 : vector<1x1024xf32>
    %102 = vector.extract_strided_slice %101 {offsets = [0, 0], sizes = [1, 256], strides = [1, 1]} : vector<1x1024xf32> to vector<1x256xf32>
    %103 = arith.negf %102 : vector<1x256xf32>
    %104 = math.exp %103 : vector<1x256xf32>
    %cst_26 = arith.constant 1.000000e+00 : f32
    %105 = vector.broadcast %cst_26 : f32 to vector<1x256xf32>
    %106 = arith.addf %105, %104 : vector<1x256xf32>
    %107 = arith.divf %105, %106 : vector<1x256xf32>
    %108 = vector.extract_strided_slice %101 {offsets = [0, 256], sizes = [1, 256], strides = [1, 1]} : vector<1x1024xf32> to vector<1x256xf32>
    %109 = arith.negf %108 : vector<1x256xf32>
    %110 = math.exp %109 : vector<1x256xf32>
    %cst_27 = arith.constant 1.000000e+00 : f32
    %111 = vector.broadcast %cst_27 : f32 to vector<1x256xf32>
    %112 = arith.addf %111, %110 : vector<1x256xf32>
    %113 = arith.divf %111, %112 : vector<1x256xf32>
    %114 = vector.extract_strided_slice %101 {offsets = [0, 512], sizes = [1, 256], strides = [1, 1]} : vector<1x1024xf32> to vector<1x256xf32>
    %115 = math.tanh %114 : vector<1x256xf32>
    %116 = vector.extract_strided_slice %101 {offsets = [0, 768], sizes = [1, 256], strides = [1, 1]} : vector<1x1024xf32> to vector<1x256xf32>
    %117 = arith.negf %116 : vector<1x256xf32>
    %118 = math.exp %117 : vector<1x256xf32>
    %cst_28 = arith.constant 1.000000e+00 : f32
    %119 = vector.broadcast %cst_28 : f32 to vector<1x256xf32>
    %120 = arith.addf %119, %118 : vector<1x256xf32>
    %121 = arith.divf %119, %120 : vector<1x256xf32>
    %122 = arith.mulf %113, %90 : vector<1x256xf32>
    %123 = arith.mulf %107, %115 : vector<1x256xf32>
    %124 = arith.addf %122, %123 : vector<1x256xf32>
    %125 = math.tanh %124 : vector<1x256xf32>
    %126 = arith.mulf %121, %125 : vector<1x256xf32>
    %127 = vector.extract_strided_slice %126 {offsets = [0, 0], sizes = [1, 128], strides = [1, 1]} : vector<1x256xf32> to vector<1x128xf32>
    %c2 = arith.constant 2 : index
    %c0_29 = arith.constant 0 : index
    %128 = vector.load %arg8[%c2, %c0_29] : memref<8x256xf32, #tpu.memory_space<vmem>>, vector<1x128xf32>
    tpu.vector_store %arg8[%c2, %c0_29], %127 {strides = array<i32>} : memref<8x256xf32, #tpu.memory_space<vmem>>, vector<1x128xf32>,
    %129 = vector.extract_strided_slice %126 {offsets = [0, 128], sizes = [1, 128], strides = [1, 1]} : vector<1x256xf32> to vector<1x128xf32>
    %c5 = arith.constant 5 : index
    %c128_30 = arith.constant 128 : index
    %130 = vector.load %arg8[%c5, %c128_30] : memref<8x256xf32, #tpu.memory_space<vmem>>, vector<1x128xf32>
    tpu.vector_store %arg8[%c5, %c128_30], %129 {strides = array<i32>} : memref<8x256xf32, #tpu.memory_space<vmem>>, vector<1x128xf32>,
    %131 = vector.extract_strided_slice %6 {offsets = [3, 0], sizes = [1, 1024], strides = [1, 1]} : vector<8x1024xf32> to vector<1x1024xf32>
    %132 = vector.extract_strided_slice %6 {offsets = [4, 0], sizes = [1, 1024], strides = [1, 1]} : vector<8x1024xf32> to vector<1x1024xf32>
    %133 = arith.select %25, %131, %132 : vector<1x1024xi1>, vector<1x1024xf32>
    %cst_31 = arith.constant dense<0.000000e+00> : vector<1x1024xf32>
    %134 = tpu.matmul %126, %26, %cst_31 {dimension_numbers = #tpu.dot_dimension_numbers<[1], [0], [0], [1], [0, 0, 1, 1], [], []>} : vector<1x256xf32>, vector<256x1024xf32>, vector<1x1024xf32> -> vector<1x1024xf32>
    %135 = arith.addf %133, %134 : vector<1x1024xf32>
    %136 = vector.extract_strided_slice %135 {offsets = [0, 0], sizes = [1, 256], strides = [1, 1]} : vector<1x1024xf32> to vector<1x256xf32>
    %137 = arith.negf %136 : vector<1x256xf32>
    %138 = math.exp %137 : vector<1x256xf32>
    %cst_32 = arith.constant 1.000000e+00 : f32
    %139 = vector.broadcast %cst_32 : f32 to vector<1x256xf32>
    %140 = arith.addf %139, %138 : vector<1x256xf32>
    %141 = arith.divf %139, %140 : vector<1x256xf32>
    %142 = vector.extract_strided_slice %135 {offsets = [0, 256], sizes = [1, 256], strides = [1, 1]} : vector<1x1024xf32> to vector<1x256xf32>
    %143 = arith.negf %142 : vector<1x256xf32>
    %144 = math.exp %143 : vector<1x256xf32>
    %cst_33 = arith.constant 1.000000e+00 : f32
    %145 = vector.broadcast %cst_33 : f32 to vector<1x256xf32>
    %146 = arith.addf %145, %144 : vector<1x256xf32>
    %147 = arith.divf %145, %146 : vector<1x256xf32>
    %148 = vector.extract_strided_slice %135 {offsets = [0, 512], sizes = [1, 256], strides = [1, 1]} : vector<1x1024xf32> to vector<1x256xf32>
    %149 = math.tanh %148 : vector<1x256xf32>
    %150 = vector.extract_strided_slice %135 {offsets = [0, 768], sizes = [1, 256], strides = [1, 1]} : vector<1x1024xf32> to vector<1x256xf32>
    %151 = arith.negf %150 : vector<1x256xf32>
    %152 = math.exp %151 : vector<1x256xf32>
    %cst_34 = arith.constant 1.000000e+00 : f32
    %153 = vector.broadcast %cst_34 : f32 to vector<1x256xf32>
    %154 = arith.addf %153, %152 : vector<1x256xf32>
    %155 = arith.divf %153, %154 : vector<1x256xf32>
    %156 = arith.mulf %147, %124 : vector<1x256xf32>
    %157 = arith.mulf %141, %149 : vector<1x256xf32>
    %158 = arith.addf %156, %157 : vector<1x256xf32>
    %159 = math.tanh %158 : vector<1x256xf32>
    %160 = arith.mulf %155, %159 : vector<1x256xf32>
    %161 = vector.extract_strided_slice %160 {offsets = [0, 0], sizes = [1, 128], strides = [1, 1]} : vector<1x256xf32> to vector<1x128xf32>
    %c3 = arith.constant 3 : index
    %c0_35 = arith.constant 0 : index
    %162 = vector.load %arg8[%c3, %c0_35] : memref<8x256xf32, #tpu.memory_space<vmem>>, vector<1x128xf32>
    tpu.vector_store %arg8[%c3, %c0_35], %161 {strides = array<i32>} : memref<8x256xf32, #tpu.memory_space<vmem>>, vector<1x128xf32>,
    %163 = vector.extract_strided_slice %160 {offsets = [0, 128], sizes = [1, 128], strides = [1, 1]} : vector<1x256xf32> to vector<1x128xf32>
    %c4 = arith.constant 4 : index
    %c128_36 = arith.constant 128 : index
    %164 = vector.load %arg8[%c4, %c128_36] : memref<8x256xf32, #tpu.memory_space<vmem>>, vector<1x128xf32>
    tpu.vector_store %arg8[%c4, %c128_36], %163 {strides = array<i32>} : memref<8x256xf32, #tpu.memory_space<vmem>>, vector<1x128xf32>,
    %165 = vector.extract_strided_slice %6 {offsets = [4, 0], sizes = [1, 1024], strides = [1, 1]} : vector<8x1024xf32> to vector<1x1024xf32>
    %166 = vector.extract_strided_slice %6 {offsets = [3, 0], sizes = [1, 1024], strides = [1, 1]} : vector<8x1024xf32> to vector<1x1024xf32>
    %167 = arith.select %25, %165, %166 : vector<1x1024xi1>, vector<1x1024xf32>
    %cst_37 = arith.constant dense<0.000000e+00> : vector<1x1024xf32>
    %168 = tpu.matmul %160, %26, %cst_37 {dimension_numbers = #tpu.dot_dimension_numbers<[1], [0], [0], [1], [0, 0, 1, 1], [], []>} : vector<1x256xf32>, vector<256x1024xf32>, vector<1x1024xf32> -> vector<1x1024xf32>
    %169 = arith.addf %167, %168 : vector<1x1024xf32>
    %170 = vector.extract_strided_slice %169 {offsets = [0, 0], sizes = [1, 256], strides = [1, 1]} : vector<1x1024xf32> to vector<1x256xf32>
    %171 = arith.negf %170 : vector<1x256xf32>
    %172 = math.exp %171 : vector<1x256xf32>
    %cst_38 = arith.constant 1.000000e+00 : f32
    %173 = vector.broadcast %cst_38 : f32 to vector<1x256xf32>
    %174 = arith.addf %173, %172 : vector<1x256xf32>
    %175 = arith.divf %173, %174 : vector<1x256xf32>
    %176 = vector.extract_strided_slice %169 {offsets = [0, 256], sizes = [1, 256], strides = [1, 1]} : vector<1x1024xf32> to vector<1x256xf32>
    %177 = arith.negf %176 : vector<1x256xf32>
    %178 = math.exp %177 : vector<1x256xf32>
    %cst_39 = arith.constant 1.000000e+00 : f32
    %179 = vector.broadcast %cst_39 : f32 to vector<1x256xf32>
    %180 = arith.addf %179, %178 : vector<1x256xf32>
    %181 = arith.divf %179, %180 : vector<1x256xf32>
    %182 = vector.extract_strided_slice %169 {offsets = [0, 512], sizes = [1, 256], strides = [1, 1]} : vector<1x1024xf32> to vector<1x256xf32>
    %183 = math.tanh %182 : vector<1x256xf32>
    %184 = vector.extract_strided_slice %169 {offsets = [0, 768], sizes = [1, 256], strides = [1, 1]} : vector<1x1024xf32> to vector<1x256xf32>
    %185 = arith.negf %184 : vector<1x256xf32>
    %186 = math.exp %185 : vector<1x256xf32>
    %cst_40 = arith.constant 1.000000e+00 : f32
    %187 = vector.broadcast %cst_40 : f32 to vector<1x256xf32>
    %188 = arith.addf %187, %186 : vector<1x256xf32>
    %189 = arith.divf %187, %188 : vector<1x256xf32>
    %190 = arith.mulf %181, %158 : vector<1x256xf32>
    %191 = arith.mulf %175, %183 : vector<1x256xf32>
    %192 = arith.addf %190, %191 : vector<1x256xf32>
    %193 = math.tanh %192 : vector<1x256xf32>
    %194 = arith.mulf %189, %193 : vector<1x256xf32>
    %195 = vector.extract_strided_slice %194 {offsets = [0, 0], sizes = [1, 128], strides = [1, 1]} : vector<1x256xf32> to vector<1x128xf32>
    %c4_41 = arith.constant 4 : index
    %c0_42 = arith.constant 0 : index
    %196 = vector.load %arg8[%c4_41, %c0_42] : memref<8x256xf32, #tpu.memory_space<vmem>>, vector<1x128xf32>
    tpu.vector_store %arg8[%c4_41, %c0_42], %195 {strides = array<i32>} : memref<8x256xf32, #tpu.memory_space<vmem>>, vector<1x128xf32>,
    %197 = vector.extract_strided_slice %194 {offsets = [0, 128], sizes = [1, 128], strides = [1, 1]} : vector<1x256xf32> to vector<1x128xf32>
    %c3_43 = arith.constant 3 : index
    %c128_44 = arith.constant 128 : index
    %198 = vector.load %arg8[%c3_43, %c128_44] : memref<8x256xf32, #tpu.memory_space<vmem>>, vector<1x128xf32>
    tpu.vector_store %arg8[%c3_43, %c128_44], %197 {strides = array<i32>} : memref<8x256xf32, #tpu.memory_space<vmem>>, vector<1x128xf32>,
    %199 = vector.extract_strided_slice %6 {offsets = [5, 0], sizes = [1, 1024], strides = [1, 1]} : vector<8x1024xf32> to vector<1x1024xf32>
    %200 = vector.extract_strided_slice %6 {offsets = [2, 0], sizes = [1, 1024], strides = [1, 1]} : vector<8x1024xf32> to vector<1x1024xf32>
    %201 = arith.select %25, %199, %200 : vector<1x1024xi1>, vector<1x1024xf32>
    %cst_45 = arith.constant dense<0.000000e+00> : vector<1x1024xf32>
    %202 = tpu.matmul %194, %26, %cst_45 {dimension_numbers = #tpu.dot_dimension_numbers<[1], [0], [0], [1], [0, 0, 1, 1], [], []>} : vector<1x256xf32>, vector<256x1024xf32>, vector<1x1024xf32> -> vector<1x1024xf32>
    %203 = arith.addf %201, %202 : vector<1x1024xf32>
    %204 = vector.extract_strided_slice %203 {offsets = [0, 0], sizes = [1, 256], strides = [1, 1]} : vector<1x1024xf32> to vector<1x256xf32>
    %205 = arith.negf %204 : vector<1x256xf32>
    %206 = math.exp %205 : vector<1x256xf32>
    %cst_46 = arith.constant 1.000000e+00 : f32
    %207 = vector.broadcast %cst_46 : f32 to vector<1x256xf32>
    %208 = arith.addf %207, %206 : vector<1x256xf32>
    %209 = arith.divf %207, %208 : vector<1x256xf32>
    %210 = vector.extract_strided_slice %203 {offsets = [0, 256], sizes = [1, 256], strides = [1, 1]} : vector<1x1024xf32> to vector<1x256xf32>
    %211 = arith.negf %210 : vector<1x256xf32>
    %212 = math.exp %211 : vector<1x256xf32>
    %cst_47 = arith.constant 1.000000e+00 : f32
    %213 = vector.broadcast %cst_47 : f32 to vector<1x256xf32>
    %214 = arith.addf %213, %212 : vector<1x256xf32>
    %215 = arith.divf %213, %214 : vector<1x256xf32>
    %216 = vector.extract_strided_slice %203 {offsets = [0, 512], sizes = [1, 256], strides = [1, 1]} : vector<1x1024xf32> to vector<1x256xf32>
    %217 = math.tanh %216 : vector<1x256xf32>
    %218 = vector.extract_strided_slice %203 {offsets = [0, 768], sizes = [1, 256], strides = [1, 1]} : vector<1x1024xf32> to vector<1x256xf32>
    %219 = arith.negf %218 : vector<1x256xf32>
    %220 = math.exp %219 : vector<1x256xf32>
    %cst_48 = arith.constant 1.000000e+00 : f32
    %221 = vector.broadcast %cst_48 : f32 to vector<1x256xf32>
    %222 = arith.addf %221, %220 : vector<1x256xf32>
    %223 = arith.divf %221, %222 : vector<1x256xf32>
    %224 = arith.mulf %215, %192 : vector<1x256xf32>
    %225 = arith.mulf %209, %217 : vector<1x256xf32>
    %226 = arith.addf %224, %225 : vector<1x256xf32>
    %227 = math.tanh %226 : vector<1x256xf32>
    %228 = arith.mulf %223, %227 : vector<1x256xf32>
    %229 = vector.extract_strided_slice %228 {offsets = [0, 0], sizes = [1, 128], strides = [1, 1]} : vector<1x256xf32> to vector<1x128xf32>
    %c5_49 = arith.constant 5 : index
    %c0_50 = arith.constant 0 : index
    %230 = vector.load %arg8[%c5_49, %c0_50] : memref<8x256xf32, #tpu.memory_space<vmem>>, vector<1x128xf32>
    tpu.vector_store %arg8[%c5_49, %c0_50], %229 {strides = array<i32>} : memref<8x256xf32, #tpu.memory_space<vmem>>, vector<1x128xf32>,
    %231 = vector.extract_strided_slice %228 {offsets = [0, 128], sizes = [1, 128], strides = [1, 1]} : vector<1x256xf32> to vector<1x128xf32>
    %c2_51 = arith.constant 2 : index
    %c128_52 = arith.constant 128 : index
    %232 = vector.load %arg8[%c2_51, %c128_52] : memref<8x256xf32, #tpu.memory_space<vmem>>, vector<1x128xf32>
    tpu.vector_store %arg8[%c2_51, %c128_52], %231 {strides = array<i32>} : memref<8x256xf32, #tpu.memory_space<vmem>>, vector<1x128xf32>,
    %233 = vector.extract_strided_slice %6 {offsets = [6, 0], sizes = [1, 1024], strides = [1, 1]} : vector<8x1024xf32> to vector<1x1024xf32>
    %234 = vector.extract_strided_slice %6 {offsets = [1, 0], sizes = [1, 1024], strides = [1, 1]} : vector<8x1024xf32> to vector<1x1024xf32>
    %235 = arith.select %25, %233, %234 : vector<1x1024xi1>, vector<1x1024xf32>
    %cst_53 = arith.constant dense<0.000000e+00> : vector<1x1024xf32>
    %236 = tpu.matmul %228, %26, %cst_53 {dimension_numbers = #tpu.dot_dimension_numbers<[1], [0], [0], [1], [0, 0, 1, 1], [], []>} : vector<1x256xf32>, vector<256x1024xf32>, vector<1x1024xf32> -> vector<1x1024xf32>
    %237 = arith.addf %235, %236 : vector<1x1024xf32>
    %238 = vector.extract_strided_slice %237 {offsets = [0, 0], sizes = [1, 256], strides = [1, 1]} : vector<1x1024xf32> to vector<1x256xf32>
    %239 = arith.negf %238 : vector<1x256xf32>
    %240 = math.exp %239 : vector<1x256xf32>
    %cst_54 = arith.constant 1.000000e+00 : f32
    %241 = vector.broadcast %cst_54 : f32 to vector<1x256xf32>
    %242 = arith.addf %241, %240 : vector<1x256xf32>
    %243 = arith.divf %241, %242 : vector<1x256xf32>
    %244 = vector.extract_strided_slice %237 {offsets = [0, 256], sizes = [1, 256], strides = [1, 1]} : vector<1x1024xf32> to vector<1x256xf32>
    %245 = arith.negf %244 : vector<1x256xf32>
    %246 = math.exp %245 : vector<1x256xf32>
    %cst_55 = arith.constant 1.000000e+00 : f32
    %247 = vector.broadcast %cst_55 : f32 to vector<1x256xf32>
    %248 = arith.addf %247, %246 : vector<1x256xf32>
    %249 = arith.divf %247, %248 : vector<1x256xf32>
    %250 = vector.extract_strided_slice %237 {offsets = [0, 512], sizes = [1, 256], strides = [1, 1]} : vector<1x1024xf32> to vector<1x256xf32>
    %251 = math.tanh %250 : vector<1x256xf32>
    %252 = vector.extract_strided_slice %237 {offsets = [0, 768], sizes = [1, 256], strides = [1, 1]} : vector<1x1024xf32> to vector<1x256xf32>
    %253 = arith.negf %252 : vector<1x256xf32>
    %254 = math.exp %253 : vector<1x256xf32>
    %cst_56 = arith.constant 1.000000e+00 : f32
    %255 = vector.broadcast %cst_56 : f32 to vector<1x256xf32>
    %256 = arith.addf %255, %254 : vector<1x256xf32>
    %257 = arith.divf %255, %256 : vector<1x256xf32>
    %258 = arith.mulf %249, %226 : vector<1x256xf32>
    %259 = arith.mulf %243, %251 : vector<1x256xf32>
    %260 = arith.addf %258, %259 : vector<1x256xf32>
    %261 = math.tanh %260 : vector<1x256xf32>
    %262 = arith.mulf %257, %261 : vector<1x256xf32>
    %263 = vector.extract_strided_slice %262 {offsets = [0, 0], sizes = [1, 128], strides = [1, 1]} : vector<1x256xf32> to vector<1x128xf32>
    %c6_57 = arith.constant 6 : index
    %c0_58 = arith.constant 0 : index
    %264 = vector.load %arg8[%c6_57, %c0_58] : memref<8x256xf32, #tpu.memory_space<vmem>>, vector<1x128xf32>
    tpu.vector_store %arg8[%c6_57, %c0_58], %263 {strides = array<i32>} : memref<8x256xf32, #tpu.memory_space<vmem>>, vector<1x128xf32>,
    %265 = vector.extract_strided_slice %262 {offsets = [0, 128], sizes = [1, 128], strides = [1, 1]} : vector<1x256xf32> to vector<1x128xf32>
    %c1_59 = arith.constant 1 : index
    %c128_60 = arith.constant 128 : index
    %266 = vector.load %arg8[%c1_59, %c128_60] : memref<8x256xf32, #tpu.memory_space<vmem>>, vector<1x128xf32>
    tpu.vector_store %arg8[%c1_59, %c128_60], %265 {strides = array<i32>} : memref<8x256xf32, #tpu.memory_space<vmem>>, vector<1x128xf32>,
    %267 = vector.extract_strided_slice %6 {offsets = [7, 0], sizes = [1, 1024], strides = [1, 1]} : vector<8x1024xf32> to vector<1x1024xf32>
    %268 = vector.extract_strided_slice %6 {offsets = [0, 0], sizes = [1, 1024], strides = [1, 1]} : vector<8x1024xf32> to vector<1x1024xf32>
    %269 = arith.select %25, %267, %268 : vector<1x1024xi1>, vector<1x1024xf32>
    %cst_61 = arith.constant dense<0.000000e+00> : vector<1x1024xf32>
    %270 = tpu.matmul %262, %26, %cst_61 {dimension_numbers = #tpu.dot_dimension_numbers<[1], [0], [0], [1], [0, 0, 1, 1], [], []>} : vector<1x256xf32>, vector<256x1024xf32>, vector<1x1024xf32> -> vector<1x1024xf32>
    %271 = arith.addf %269, %270 : vector<1x1024xf32>
    %272 = vector.extract_strided_slice %271 {offsets = [0, 0], sizes = [1, 256], strides = [1, 1]} : vector<1x1024xf32> to vector<1x256xf32>
    %273 = arith.negf %272 : vector<1x256xf32>
    %274 = math.exp %273 : vector<1x256xf32>
    %cst_62 = arith.constant 1.000000e+00 : f32
    %275 = vector.broadcast %cst_62 : f32 to vector<1x256xf32>
    %276 = arith.addf %275, %274 : vector<1x256xf32>
    %277 = arith.divf %275, %276 : vector<1x256xf32>
    %278 = vector.extract_strided_slice %271 {offsets = [0, 256], sizes = [1, 256], strides = [1, 1]} : vector<1x1024xf32> to vector<1x256xf32>
    %279 = arith.negf %278 : vector<1x256xf32>
    %280 = math.exp %279 : vector<1x256xf32>
    %cst_63 = arith.constant 1.000000e+00 : f32
    %281 = vector.broadcast %cst_63 : f32 to vector<1x256xf32>
    %282 = arith.addf %281, %280 : vector<1x256xf32>
    %283 = arith.divf %281, %282 : vector<1x256xf32>
    %284 = vector.extract_strided_slice %271 {offsets = [0, 512], sizes = [1, 256], strides = [1, 1]} : vector<1x1024xf32> to vector<1x256xf32>
    %285 = math.tanh %284 : vector<1x256xf32>
    %286 = vector.extract_strided_slice %271 {offsets = [0, 768], sizes = [1, 256], strides = [1, 1]} : vector<1x1024xf32> to vector<1x256xf32>
    %287 = arith.negf %286 : vector<1x256xf32>
    %288 = math.exp %287 : vector<1x256xf32>
    %cst_64 = arith.constant 1.000000e+00 : f32
    %289 = vector.broadcast %cst_64 : f32 to vector<1x256xf32>
    %290 = arith.addf %289, %288 : vector<1x256xf32>
    %291 = arith.divf %289, %290 : vector<1x256xf32>
    %292 = arith.mulf %283, %260 : vector<1x256xf32>
    %293 = arith.mulf %277, %285 : vector<1x256xf32>
    %294 = arith.addf %292, %293 : vector<1x256xf32>
    %295 = math.tanh %294 : vector<1x256xf32>
    %296 = arith.mulf %291, %295 : vector<1x256xf32>
    %297 = vector.extract_strided_slice %296 {offsets = [0, 0], sizes = [1, 128], strides = [1, 1]} : vector<1x256xf32> to vector<1x128xf32>
    %c7_65 = arith.constant 7 : index
    %c0_66 = arith.constant 0 : index
    %298 = vector.load %arg8[%c7_65, %c0_66] : memref<8x256xf32, #tpu.memory_space<vmem>>, vector<1x128xf32>
    tpu.vector_store %arg8[%c7_65, %c0_66], %297 {strides = array<i32>} : memref<8x256xf32, #tpu.memory_space<vmem>>, vector<1x128xf32>,
    %299 = vector.extract_strided_slice %296 {offsets = [0, 128], sizes = [1, 128], strides = [1, 1]} : vector<1x256xf32> to vector<1x128xf32>
    %c0_67 = arith.constant 0 : index
    %c128_68 = arith.constant 128 : index
    %300 = vector.load %arg8[%c0_67, %c128_68] : memref<8x256xf32, #tpu.memory_space<vmem>>, vector<1x128xf32>
    tpu.vector_store %arg8[%c0_67, %c128_68], %299 {strides = array<i32>} : memref<8x256xf32, #tpu.memory_space<vmem>>, vector<1x128xf32>,
    %c0_69 = arith.constant 0 : index
    %c0_70 = arith.constant 0 : index
    %301 = vector.load %arg8[%c0_69, %c0_70] : memref<8x256xf32, #tpu.memory_space<vmem>>, vector<8x256xf32>
    %c0_71 = arith.constant 0 : index
    %c0_72 = arith.constant 0 : index
    %302 = vector.load %arg5[%c0_71, %c0_72] : memref<256x128xf32, #tpu.memory_space<vmem>>, vector<256x128xf32>
    %cst_73 = arith.constant dense<0.000000e+00> : vector<8x128xf32>
    %303 = tpu.matmul %301, %302, %cst_73 {dimension_numbers = #tpu.dot_dimension_numbers<[1], [0], [0], [1], [0, 0, 1, 1], [], []>} : vector<8x256xf32>, vector<256x128xf32>, vector<8x128xf32> -> vector<8x128xf32>
    %c0_74 = arith.constant 0 : index
    %c0_75 = arith.constant 0 : index
    %304 = vector.load %arg6[%c0_74, %c0_75] : memref<1x128xf32, #tpu.memory_space<vmem>>, vector<1x128xf32>
    %305 = vector.broadcast %304 : vector<1x128xf32> to vector<8x128xf32>
    %306 = arith.addf %303, %305 : vector<8x128xf32>
    %cst_76 = arith.constant 0.000000e+00 : f32
    %307 = vector.broadcast %cst_76 : f32 to vector<8x128xf32>
    %308 = arith.maximumf %306, %307 : vector<8x128xf32>
    %c0_77 = arith.constant 0 : index
    %c0_78 = arith.constant 0 : index
    %c0_79 = arith.constant 0 : index
    %309 = vector.load %arg7[%c0_77, %c0_78, %c0_79] : memref<1x8x128xf32, #tpu.memory_space<vmem>>, vector<1x8x128xf32>
    %310 = vector.shape_cast %309 : vector<1x8x128xf32> to vector<8x128xf32>
    %311 = vector.shape_cast %308 : vector<8x128xf32> to vector<1x8x128xf32>
    tpu.vector_store %arg7[%c0_77, %c0_78, %c0_79], %311 {strides = array<i32>} : memref<1x8x128xf32, #tpu.memory_space<vmem>>, vector<1x8x128xf32>,
    return
  }
  func.func @transform_0(%arg0: i32) -> (i32, i32, i32) {
    %c0_i32 = arith.constant 0 : i32
    %c0_i32_0 = arith.constant 0 : i32
    %c0_i32_1 = arith.constant 0 : i32
    return %arg0, %c0_i32, %c0_i32_0 : i32, i32, i32
  }
  func.func @transform_1(%arg0: i32) -> (i32, i32) {
    %c0_i32 = arith.constant 0 : i32
    %c0_i32_0 = arith.constant 0 : i32
    %c0_i32_1 = arith.constant 0 : i32
    return %c0_i32, %c0_i32_0 : i32, i32
  }
  func.func @transform_2(%arg0: i32) -> (i32, i32) {
    %c0_i32 = arith.constant 0 : i32
    %c0_i32_0 = arith.constant 0 : i32
    %c0_i32_1 = arith.constant 0 : i32
    return %c0_i32, %c0_i32_0 : i32, i32
  }
  func.func @transform_3(%arg0: i32) -> (i32, i32) {
    %c0_i32 = arith.constant 0 : i32
    %c0_i32_0 = arith.constant 0 : i32
    %c0_i32_1 = arith.constant 0 : i32
    return %c0_i32, %c0_i32_0 : i32, i32
  }
  func.func @transform_4(%arg0: i32) -> (i32, i32) {
    %c0_i32 = arith.constant 0 : i32
    %c0_i32_0 = arith.constant 0 : i32
    %c0_i32_1 = arith.constant 0 : i32
    return %c0_i32, %c0_i32_0 : i32, i32
  }
  func.func @transform_5(%arg0: i32) -> (i32, i32) {
    %c0_i32 = arith.constant 0 : i32
    %c0_i32_0 = arith.constant 0 : i32
    %c0_i32_1 = arith.constant 0 : i32
    return %c0_i32, %c0_i32_0 : i32, i32
  }
  func.func @transform_6(%arg0: i32) -> (i32, i32, i32) {
    %c0_i32 = arith.constant 0 : i32
    %c0_i32_0 = arith.constant 0 : i32
    %c0_i32_1 = arith.constant 0 : i32
    return %arg0, %c0_i32, %c0_i32_0 : i32, i32, i32
  }
}

</mosaic_0001>

<bundles_post_ra>
// kernel: tpu_custom_call.1
= control target key start
LH: loop header
LB: loop body
LE: loop exit
PB: predicated region body
PF: predicated region fallthrough
CT: control target
= control target key end

     0   :  { %s11422_s0 = inlined_call_operand.vmem [shape: f32[2,8,4], index: 0, kind: input, shape index: {}]   ;;  %s11423_s1 = inlined_call_operand.hbm [shape: f32[4,1024], index: 1, kind: input, shape index: {}]   ;;  %s11424_s2 = inlined_call_operand.hbm [shape: f32[256,1024], index: 2, kind: input, shape index: {}]   ;;  %s11425_s3 = inlined_call_operand.vmem [shape: f32[1,1024], index: 3, kind: input, shape index: {}]   ;;  %s11426_s4 = inlined_call_operand.hbm [shape: f32[256,128], index: 4, kind: input, shape index: {}]   ;;  %s11427_s5 = inlined_call_operand.vmem [shape: f32[1,128], index: 5, kind: input, shape index: {}]   ;;  %s11428_s6 = inlined_call_operand.hbm [shape: f32[2,8,128], index: 6, kind: output, shape index: {}]  }
   0x1   :  { %12139 = sst [smem:[#allocation178_spill]] %s11423_s1 }
   0x2   :  { %11 = vsyncpa [#allocation4], 0 }
   0x3   :  { %12 = vsyncpa [#allocation7], 0 }
   0x4   :  { %13 = vsyncpa [#allocation5], 0 }
   0x5   :  { %15 = vsyncpa [#allocation5 + $0x1], 0  ;;  %s6563_s21 = smov 0   ;;  %s6565_s22 = smov 0  }
   0x6   :  { %s6567_s23 = smov 0   ;;  %s6569_s24 = smov 0  }
   0x7 LB: > { %s6584_s25 = sadd.s32 4294967295, %s6518_s24   ;;  %s5077_s26 = sadd.s32 4294967294, %s6518_s24   ;;  %s6518_s24 = sphi %s6569_s24, %s13618_s24   ;;  %s6514_s23 = sphi %s6567_s23, %s13617_s23   ;;  %s6510_s22 = sphi %s6565_s22, %s13616_s22   ;;  %s6506_s21 = sphi %s6563_s21, %s13615_s21  }
   0x8   : > { %s6588_s27 = sadd.s32 1, %s6518_s24   ;;  %s159_s28 = sadd.s32 1, %s6514_s23 }
   0x9   : > { %s156_s29 = ssub.s32 %s6518_s24, %s6588_s27  ;;  %p169_p0 = scmp.ne.s32.totalorder %s6514_s23, %s6510_s22 }
   0xa   : > { %p157_p1 = scmp.eq.s32.totalorder %s156_s29, 0  ;;  %p170_p2 = scmp.eq.s32.totalorder %s6584_s25, 1 }
   0xb   : > { %p175_p3 = scmp.ne.s32.totalorder %s6510_s22, %s6506_s21  ;;  %p176_p4 = scmp.eq.s32.totalorder %s5077_s26, 1 }
   0xc   : > { %s6599_s30 = scalar_select %p157_p1, %s6514_s23, %s159_s28  }
   0xd   : > { %p6601_p5 = por %p170_p2, %p169_p0  ;;  %p6605_p6 = por %p176_p4, %p175_p3 }
   0xe   : > { %p5078_p7 = scmp.ge.s32.totalorder %s6518_s24, 1  ;;  %p183_p8 = scmp.lt.s32.totalorder %s6518_s24, 3 }
   0xf   : > { %p5185_p9 = scmp.eq.s32.totalorder %s6584_s25, 0  ;;  %s206_s12 = sshll.u32 %s11424_s2, 4  ;;  %s207_s12 = int_to_ptr.hbm [resolvable:$true] %s206_s12 }
  0x10   : > { %p6612_p10 = pnand %p5078_p7, %p183_p8  ;;  %s6520_s13 = smov [#allocation6]  }
  0x11   : > { %s208_s14 = sshll.u32 %s6520_s13, 4  ;;  %s12144_s1 = sld [smem:[#allocation178_spill]]  ;;  %s209_s14 = int_to_ptr.vmem [resolvable:$true] %s208_s14 }
  0x12   : > { %p5171_p11 = pneg %p6612_p10  ;;  %s6521_s19 = smov 1024  }
  0x13   : > { %s6522_s20 = smov 64   ;;  %s6523_s26 = smov [#allocation3]  }
  0x14   : > { %p6623_p12 = pnand %p5185_p9, %p5171_p11  ;;  %s197_s28 = sshll.u32 %s6523_s26, 4  ;;  %s198_s28 = int_to_ptr.vmem [resolvable:$true] %s197_s28 }
  0x15   : > { %s223_s11 = sshll.u32 %s11426_s4, 4  ;;  %s6524_s13 = smov [#allocation8]   ;;  %s224_s11 = int_to_ptr.hbm [resolvable:$true] %s223_s11 }
  0x16   : > { %5177 = dma.hbm_to_vmem [thread:$0]  (!%p6623_p12), %s207_s12, 32768, %s209_s14, [#allocation7], %s6521_s19, %s6521_s19, %s6522_s20  }
  0x17   : > { %s195_s18 = sshll.u32 %s12144_s1, 4  ;;  %s225_s16 = sshll.u32 %s6524_s13, 4  ;;  %s196_s18 = int_to_ptr.hbm [resolvable:$true] %s195_s18  ;;  %s226_s16 = int_to_ptr.vmem [resolvable:$true] %s225_s16 }
  0x18   : > { %5174 = dma.hbm_to_vmem [thread:$0]  (!%p6623_p12), %s196_s18, 512, %s198_s28, [#allocation4]  }
  0x19   : > { %s6525_s17 = smov 128   ;;  %s6526_s1 = smov 8  }
  0x1a   : > { %5180 = dma.hbm_to_vmem [thread:$0]  (!%p6623_p12), %s224_s11, 4096, %s226_s16, [#allocation7], %s6525_s17, %s6525_s17, %s6526_s1  }
  0x1b   : > { %251 = sbr.rel (%p6612_p10) target bundleno = 2191 (0x88f), region = 44 }
  0x20   : > { %6493 = dma.done.wait (%p5185_p9), [#allocation4], 512  }
  0x21   : > { %6495 = vsyncadd (%p5185_p9), [#allocation4], 4294966784 }
  0x22   : > { %6497 = dma.done.wait (%p5185_p9), [#allocation7], 36864  }
  0x23   : > { %6499 = vsyncadd (%p5185_p9), [#allocation7], 4294930432  ;;  %p291_p13 = scmp.lt.s32.totalorder %s6584_s25, 1  ;;  %v751_v0 = vld [vmem:[#allocation6 + $0x3c0] sm:$0xff]  ;;  %v297_v11 = vld [vmem:[#allocation3 + $0x8] sm:$0xff]  ;;  %vm341_vm0 = vcmask 1043456  }
  0x24   : > { %v879_v1 = vld [vmem:[#allocation6 + $0x7c0] sm:$0xff]  ;;  %919 = vmatpush.msra.mxu0 %v751_v0  ;;  %324 = vst [vmem:[#allocation1 + $0x10] ss:$2 sm:$0xff] %v297_v11  ;;  %vm337_vm1 = vcmask 31744   ;;  %v298_v15 = vld [vmem:[#allocation3 + $0x10] sm:$0xff]  ;;  %v299_v16 = vld [vmem:[#allocation3 + $0x18] sm:$0xff] }
  0x25   : > { %s292_s12 = scalar_select %p291_p13, %s6584_s25, 1  ;;  %v743_v2 = vld [vmem:[#allocation6 + $0x380] sm:$0xff]  ;;  %939 = vmatpush.msra.mxu1 %v879_v1  ;;  %326 = vst [vmem:[#allocation1 + $0x20] ss:$2 sm:$0xff] %v298_v15  ;;  %v6672_v39 = vld [vmem:[#allocation6 + $0x3c8] sm:$0xff]  ;;  %v6716_v53 = vld [vmem:[#allocation6 + $0x3d0] sm:$0xff] }
  0x26   : > { %v871_v3 = vld [vmem:[#allocation6 + $0x780] sm:$0xff]  ;;  %920 = vmatpush.msra.mxu0 %v743_v2  ;;  %328 = vst [vmem:[#allocation1 + $0x30] ss:$2 sm:$0xff] %v299_v16  ;;  %v6674_v40 = vld [vmem:[#allocation6 + $0x7c8] sm:$0xff]  ;;  %v6718_v54 = vld [vmem:[#allocation6 + $0x7d0] sm:$0xff]  ;;  %v11429_v55 = vmov 0.0  }
  0x27   : > { %v735_v4 = vld [vmem:[#allocation6 + $0x340] sm:$0xff]  ;;  %s5088_s1 = sshll.u32 %s292_s12, 3  ;;  %940 = vmatpush.msra.mxu1 %v871_v3  ;;  %v6684_v43 = vld [vmem:[#allocation6 + $0x388] sm:$0xff]  ;;  %v6728_v58 = vld [vmem:[#allocation6 + $0x390] sm:$0xff]  ;;  %s288_s20 = sand.u32 1, %s6510_s22  }
  0x28   : > { %v863_v5 = vld [vmem:[#allocation6 + $0x740] sm:$0xff]  ;;  %921 = vmatpush.msra.mxu0 %v735_v4  ;;  %s294_s15 = scalar_lea.vmem %s11422_s0, %s5088_s1  ;;  %v6686_v44 = vld [vmem:[#allocation6 + $0x788] sm:$0xff]  ;;  %v6730_v59 = vld [vmem:[#allocation6 + $0x790] sm:$0xff]  ;;  %s5087_s26 = sshll.u32 %s288_s20, 3 }
  0x29   : > { %v296_v6 = vld [vmem:[#allocation3] sm:$0xff]  ;;  %941 = vmatpush.msra.mxu1 %v863_v5  ;;  %v6654_v12 = vld [vmem:[%s294_s15] sm:$0xff]  ;;  %v6740_v62 = vld [vmem:[#allocation6 + $0x350] sm:$0xff]  ;;  %s5154_s28 = sshll.u32 %s6584_s25, 3  ;;  %s290_s17 = scalar_lea.vmem [#allocation9], %s5087_s26 }
  0x2a   : > { %322 = vst [vmem:[#allocation1] ss:$2 sm:$0xff] %v296_v6  ;;  %v727_v7 = vld [vmem:[#allocation6 + $0x300] sm:$0xff]  ;;  %v6696_v47 = vld [vmem:[#allocation6 + $0x348] sm:$0xff]  ;;  %v6742_v63 = vld [vmem:[#allocation6 + $0x750] sm:$0xff]  ;;  %s4982_s16 = scalar_lea.hbm %s11428_s6, %s5154_s28  ;;  %s4984_s12 = sshll.u32 %s290_s17, 4  ;;  %s4985_s12 = int_to_ptr.vmem [resolvable:$true] %s4984_s12 }
  0x2b   : > { %v855_v8 = vld [vmem:[#allocation6 + $0x700] sm:$0xff]  ;;  %922 = vmatpush.msra.mxu0 %v727_v7  ;;  %v331_v23 = vld.sshfl [vmem:[#allocation1 + $0x10] sm:$0xff pattern:$0x75316420]  ;;  %v6698_v48 = vld [vmem:[#allocation6 + $0x748] sm:$0xff]  ;;  %s4986_s1 = sshll.u32 %s4982_s16, 4  ;;  %s4987_s1 = int_to_ptr.hbm [resolvable:$true] %s4986_s1 }
  0x2c   : > { %v719_v9 = vld [vmem:[#allocation6 + $0x2c0] sm:$0xff]  ;;  %942 = vmatpush.msra.mxu1 %v855_v8  ;;  %v333_v29 = vld.sshfl [vmem:[#allocation1 + $0x20] sm:$0xff pattern:$0x75316420]  ;;  %v6752_v2 = vld [vmem:[#allocation6 + $0x310] sm:$0xff]  ;;  %s4972_s25 = scalar_lea.sflag [#allocation5], %s288_s20 }
  0x2d   : > { %v847_v10 = vld [vmem:[#allocation6 + $0x6c0] sm:$0xff]  ;;  %923 = vmatpush.msra.mxu0 %v719_v9  ;;  %v334_v30 = vld.sshfl [vmem:[#allocation1 + $0x28] sm:$0xff pattern:$0x75316420]  ;;  %v6710_v51 = vld [vmem:[#allocation6 + $0x308] sm:$0xff]  ;;  %s6462_s9 = sshra.s32 %s4987_s1, 4  ;;  %s6463_s9 = int_to_ptr.hbm [resolvable:$true] %s6462_s9 }
  0x2e   : > { %v711_v13 = vld [vmem:[#allocation6 + $0x280] sm:$0xff]  ;;  %943 = vmatpush.msra.mxu1 %v847_v10  ;;  %v335_v33 = vld.sshfl [vmem:[#allocation1 + $0x30] sm:$0xff pattern:$0x75316420]  ;;  %v6712_v52 = vld [vmem:[#allocation6 + $0x708] sm:$0xff]  ;;  %s6464_s14 = scalar_lea.hbm %s6463_s9, 8  ;;  %p6469_p3 = scmp.lt.s32.totalorder %s6463_s9, %s11428_s6 }
  0x2f   : > { %v839_v14 = vld [vmem:[#allocation6 + $0x680] sm:$0xff]  ;;  %924 = vmatpush.msra.mxu0 %v711_v13  ;;  %v6722_v56 = vld [vmem:[#allocation6 + $0x2c8] sm:$0xff]  ;;  %v6754_v3 = vld [vmem:[#allocation6 + $0x710] sm:$0xff]  ;;  %p6465_p0 = scmp.ne.s32.totalorder %s6463_s9, %s6464_s14  ;;  %s6468_s19 = scalar_lea.hbm %s11428_s6, 16 }
  0x30   : > { %v703_v19 = vld [vmem:[#allocation6 + $0x240] sm:$0xff]  ;;  %944 = vmatpush.msra.mxu1 %v839_v14  ;;  %v6724_v57 = vld [vmem:[#allocation6 + $0x6c8] sm:$0xff]  ;;  %v6764_v6 = vld [vmem:[#allocation6 + $0x2d0] sm:$0xff]  ;;  %p6470_p4 = scmp.lt.s32.totalorder %s6468_s19, %s6464_s14 }
  0x31   : > { %v329_v17 = vld.sshfl [vmem:[#allocation1] sm:$0xff pattern:$0x75316420]  ;;  %v330_v18 = vld.sshfl [vmem:[#allocation1 + $0x8] sm:$0xff pattern:$0x75316420]  ;;  %925 = vmatpush.msra.mxu0 %v703_v19  ;;  %p6466_p1 = pnand %p6465_p0, %p6601_p5 }
  0x32   : > { %5089 = vmatpush.msk.msra.mxu2 %vm341_vm0, %v329_v17  ;;  %5091 = vmatpush.msk.msra.mxu3 %vm341_vm0, %v330_v18  ;;  %v831_v20 = vld [vmem:[#allocation6 + $0x640] sm:$0xff]  ;;  %v6734_v60 = vld [vmem:[#allocation6 + $0x288] sm:$0xff]  ;;  %v6766_v7 = vld [vmem:[#allocation6 + $0x6d0] sm:$0xff]  ;;  %p6471_p7 = por %p6470_p4, %p6469_p3 }
  0x33   : > { %5090 = vmatmul.msk.f32.vlgmr.msra.gmra.mxu2 %vm337_vm1, %v6654_v12  ;;  %5092 = vmatmul.msk.f32.vlgmr.msra.gmra.mxu3 %vm337_vm1, %v6654_v12  ;;  %v695_v21 = vld [vmem:[#allocation6 + $0x200] sm:$0xff]  ;;  %v6736_v61 = vld [vmem:[#allocation6 + $0x688] sm:$0xff]  ;;  %v6776_v10 = vld [vmem:[#allocation6 + $0x290] sm:$0xff]  ;;  %p6467_p2 = pneg %p6466_p1 }
  0x34   : > { %v823_v22 = vld [vmem:[#allocation6 + $0x600] sm:$0xff]  ;;  %945 = vmatpush.msra.mxu1 %v831_v20  ;;  %5093 = vmatpush.msk.msrb.mxu2 %vm341_vm0, %v331_v23  ;;  %v6746_v0 = vld [vmem:[#allocation6 + $0x248] sm:$0xff]  ;;  %v6778_v11 = vld [vmem:[#allocation6 + $0x690] sm:$0xff] }
  0x35   : > { %v332_v24 = vld.sshfl [vmem:[#allocation1 + $0x18] sm:$0xff pattern:$0x75316420]  ;;  %926 = vmatpush.msra.mxu0 %v695_v21  ;;  %v6748_v1 = vld [vmem:[#allocation6 + $0x648] sm:$0xff]  ;;  %v6788_v15 = vld [vmem:[#allocation6 + $0x250] sm:$0xff]  ;;  %p6472_p8 = pnand %p6471_p7, %p6467_p2 }
  0x36   : > { %5095 = vmatpush.msk.msrb.mxu3 %vm341_vm0, %v332_v24  ;;  %v687_v25 = vld [vmem:[#allocation6 + $0x1c0] sm:$0xff]  ;;  %946 = vmatpush.msra.mxu1 %v823_v22  ;;  %v6758_v4 = vld [vmem:[#allocation6 + $0x208] sm:$0xff]  ;;  %v6790_v16 = vld [vmem:[#allocation6 + $0x650] sm:$0xff] }
  0x37   : > { %v815_v26 = vld [vmem:[#allocation6 + $0x5c0] sm:$0xff]  ;;  %927 = vmatpush.msra.mxu0 %v687_v25  ;;  %5097 = vmatpush.msk.msra.mxu2 %vm341_vm0, %v333_v29  ;;  %v6760_v5 = vld [vmem:[#allocation6 + $0x608] sm:$0xff]  ;;  %v6800_v19 = vld [vmem:[#allocation6 + $0x210] sm:$0xff] }
  0x38   : > { %v679_v27 = vld [vmem:[#allocation6 + $0x180] sm:$0xff]  ;;  %947 = vmatpush.msra.mxu1 %v815_v26  ;;  %5099 = vmatpush.msk.msra.mxu3 %vm341_vm0, %v334_v30  ;;  %v6770_v8 = vld [vmem:[#allocation6 + $0x1c8] sm:$0xff]  ;;  %v6802_v20 = vld [vmem:[#allocation6 + $0x610] sm:$0xff] }
  0x39   : > { %v807_v28 = vld [vmem:[#allocation6 + $0x580] sm:$0xff]  ;;  %928 = vmatpush.msra.mxu0 %v679_v27  ;;  %v6772_v9 = vld [vmem:[#allocation6 + $0x5c8] sm:$0xff]  ;;  %v6812_v23 = vld [vmem:[#allocation6 + $0x1d0] sm:$0xff] }
  0x3a   : > { %v671_v31 = vld [vmem:[#allocation6 + $0x140] sm:$0xff]  ;;  %948 = vmatpush.msra.mxu1 %v807_v28  ;;  %v6782_v13 = vld [vmem:[#allocation6 + $0x188] sm:$0xff]  ;;  %v6814_v24 = vld [vmem:[#allocation6 + $0x5d0] sm:$0xff] }
  0x3b   : > { %5094 = vmatmul.msk.f32.vlgmr.msrb.gmra.mxu2 %vm337_vm1, %v6654_v12  ;;  %5096 = vmatmul.msk.f32.vlgmr.msrb.gmra.mxu3 %vm337_vm1, %v6654_v12  ;;  %v799_v32 = vld [vmem:[#allocation6 + $0x540] sm:$0xff]  ;;  %v6784_v14 = vld [vmem:[#allocation6 + $0x588] sm:$0xff]  ;;  %12145 = vst [vmem:[#allocation13_spill] sm:$0xff] %v6814_v24  ;;  %v6826_v27 = vld [vmem:[#allocation6 + $0x190] sm:$0xff] }
  0x3c   : > { %v336_v34 = vld.sshfl [vmem:[#allocation1 + $0x38] sm:$0xff pattern:$0x75316420]  ;;  %929 = vmatpush.msra.mxu0 %v671_v31  ;;  %949 = vmatpush.msra.mxu1 %v799_v32  ;;  %v6794_v17 = vld [vmem:[#allocation6 + $0x148] sm:$0xff]  ;;  %v6828_v28 = vld [vmem:[#allocation6 + $0x590] sm:$0xff] }
  0x3d   : > { %v663_v35 = vld [vmem:[#allocation6 + $0x100] sm:$0xff]  ;;  %5101 = vmatpush.msk.msrb.mxu2 %vm341_vm0, %v335_v33  ;;  %5103 = vmatpush.msk.msrb.mxu3 %vm341_vm0, %v336_v34  ;;  %v6796_v18 = vld [vmem:[#allocation6 + $0x548] sm:$0xff]  ;;  %12147 = vst [vmem:[#allocation15_spill] sm:$0xff] %v6828_v28  ;;  %v6840_v31 = vld [vmem:[#allocation6 + $0x150] sm:$0xff] }
  0x3e   : > { %v791_v36 = vld [vmem:[#allocation6 + $0x500] sm:$0xff]  ;;  %930 = vmatpush.msra.mxu0 %v663_v35  ;;  %v6806_v21 = vld [vmem:[#allocation6 + $0x108] sm:$0xff]  ;;  %12150 = vst [vmem:[#allocation18_spill] sm:$0xff] %v6840_v31  ;;  %v6842_v32 = vld [vmem:[#allocation6 + $0x550] sm:$0xff] }
  0x3f   : > { %v655_v37 = vld [vmem:[#allocation6 + $0xc0] sm:$0xff]  ;;  %950 = vmatpush.msra.mxu1 %v791_v36  ;;  %v6808_v22 = vld [vmem:[#allocation6 + $0x508] sm:$0xff]  ;;  %12151 = vst [vmem:[#allocation19_spill] sm:$0xff] %v6842_v32  ;;  %v6854_v35 = vld [vmem:[#allocation6 + $0x510] sm:$0xff] }
  0x40   : > { %v783_v38 = vld [vmem:[#allocation6 + $0x4c0] sm:$0xff]  ;;  %931 = vmatpush.msra.mxu0 %v655_v37  ;;  %v6820_v25 = vld [vmem:[#allocation6 + $0xc8] sm:$0xff]  ;;  %12155 = vst [vmem:[#allocation23_spill] sm:$0xff] %v6854_v35 }
  0x41   : > { %951 = vmatpush.msra.mxu1 %v783_v38  ;;  %v6676_v41 = vld [vmem:[#allocation6 + $0x80] sm:$0xff]  ;;  %v6822_v26 = vld [vmem:[#allocation6 + $0x4c8] sm:$0xff]  ;;  %v6864_v38 = vld [vmem:[#allocation6 + $0xd0] sm:$0xff] }
  0x42   : > { %v6678_v42 = vld [vmem:[#allocation6 + $0x480] sm:$0xff]  ;;  %932 = vmatpush.msra.mxu0 %v6676_v41  ;;  %12146 = vst [vmem:[#allocation14_spill] sm:$0xff] %v6822_v26  ;;  %v6834_v29 = vld [vmem:[#allocation6 + $0x88] sm:$0xff] }
  0x43   : > { %5098 = vmatmul.msk.f32.vlgmr.msra.gmra.mxu2 %vm337_vm1, %v6654_v12  ;;  %5100 = vmatmul.msk.f32.vlgmr.msra.gmra.mxu3 %vm337_vm1, %v6654_v12  ;;  %v6690_v45 = vld [vmem:[#allocation6 + $0x40] sm:$0xff]  ;;  %12148 = vst [vmem:[#allocation16_spill] sm:$0xff] %v6834_v29  ;;  %v6836_v30 = vld [vmem:[#allocation6 + $0x488] sm:$0xff] }
  0x44   : > { %959 = vmatpush.msra.mxu2 %v6672_v39  ;;  %979 = vmatpush.msra.mxu3 %v6674_v40  ;;  %v6692_v46 = vld [vmem:[#allocation6 + $0x440] sm:$0xff]  ;;  %12149 = vst [vmem:[#allocation17_spill] sm:$0xff] %v6836_v30  ;;  %v6846_v33 = vld [vmem:[#allocation6 + $0x48] sm:$0xff] }
  0x45   : > { %952 = vmatpush.msra.mxu1 %v6678_v42  ;;  %v6702_v49 = vld [vmem:[#allocation6] sm:$0xff]  ;;  %933 = vmatpush.msra.mxu0 %v6690_v45  ;;  %12152 = vst [vmem:[#allocation20_spill] sm:$0xff] %v6846_v33  ;;  %v6848_v34 = vld [vmem:[#allocation6 + $0x448] sm:$0xff] }
  0x46   : > { %960 = vmatpush.msra.mxu2 %v6684_v43  ;;  %980 = vmatpush.msra.mxu3 %v6686_v44  ;;  %v6704_v50 = vld [vmem:[#allocation6 + $0x400] sm:$0xff]  ;;  %12153 = vst [vmem:[#allocation21_spill] sm:$0xff] %v6848_v34  ;;  %v6858_v36 = vld [vmem:[#allocation6 + $0x8] sm:$0xff] }
  0x47   : > { %953 = vmatpush.msra.mxu1 %v6692_v46  ;;  %934 = vmatpush.msra.mxu0 %v6702_v49  ;;  %12156 = vst [vmem:[#allocation24_spill] sm:$0xff] %v6858_v36  ;;  %v6860_v37 = vld [vmem:[#allocation6 + $0x408] sm:$0xff] }
  0x48   : > { %961 = vmatpush.msra.mxu2 %v6696_v47  ;;  %981 = vmatpush.msra.mxu3 %v6698_v48  ;;  %12157 = vst [vmem:[#allocation25_spill] sm:$0xff] %v6860_v37 }
  0x49   : > { %954 = vmatpush.msra.mxu1 %v6704_v50  ;;  %935 = vmatmul.f32.vlgmr.msra.gmra.mxu0 %v11429_v55  ;;  %12158 = vst [vmem:[#allocation26_spill] sm:$0xff] %v6864_v38 }
  0x4a   : > { %955 = vmatmul.f32.vlgmr.msra.gmra.mxu1 %v11429_v55  ;;  %962 = vmatpush.msra.mxu2 %v6710_v51  ;;  %v6866_v55 = vld [vmem:[#allocation6 + $0x4d0] sm:$0xff] }
  0x4b   : > { %982 = vmatpush.msra.mxu3 %v6712_v52  ;;  %999 = vmatpush.msrb.mxu0 %v6716_v53  ;;  %12159 = vst [vmem:[#allocation27_spill] sm:$0xff] %v6866_v55 }
  0x4c   : > { %1019 = vmatpush.msrb.mxu1 %v6718_v54  ;;  %963 = vmatpush.msra.mxu2 %v6722_v56 }
  0x4d   : > { %983 = vmatpush.msra.mxu3 %v6724_v57  ;;  %1000 = vmatpush.msrb.mxu0 %v6728_v58 }
  0x4e   : > { %1020 = vmatpush.msrb.mxu1 %v6730_v59  ;;  %964 = vmatpush.msra.mxu2 %v6734_v60 }
  0x4f   : > { %984 = vmatpush.msra.mxu3 %v6736_v61  ;;  %1001 = vmatpush.msrb.mxu0 %v6740_v62 }
  0x50   : > { %1021 = vmatpush.msrb.mxu1 %v6742_v63  ;;  %965 = vmatpush.msra.mxu2 %v6746_v0 }
  0x51   : > { %985 = vmatpush.msra.mxu3 %v6748_v1  ;;  %1002 = vmatpush.msrb.mxu0 %v6752_v2 }
  0x52   : > { %1022 = vmatpush.msrb.mxu1 %v6754_v3  ;;  %966 = vmatpush.msra.mxu2 %v6758_v4 }
  0x53   : > { %986 = vmatpush.msra.mxu3 %v6760_v5  ;;  %1003 = vmatpush.msrb.mxu0 %v6764_v6 }
  0x54   : > { %1023 = vmatpush.msrb.mxu1 %v6766_v7  ;;  %967 = vmatpush.msra.mxu2 %v6770_v8 }
  0x55   : > { %987 = vmatpush.msra.mxu3 %v6772_v9  ;;  %1004 = vmatpush.msrb.mxu0 %v6776_v10 }
  0x56   : > { %1024 = vmatpush.msrb.mxu1 %v6778_v11  ;;  %968 = vmatpush.msra.mxu2 %v6782_v13 }
  0x57   : > { %988 = vmatpush.msra.mxu3 %v6784_v14  ;;  %1005 = vmatpush.msrb.mxu0 %v6788_v15 }
  0x58   : > { %1025 = vmatpush.msrb.mxu1 %v6790_v16  ;;  %969 = vmatpush.msra.mxu2 %v6794_v17 }
  0x59   : > { %989 = vmatpush.msra.mxu3 %v6796_v18  ;;  %1006 = vmatpush.msrb.mxu0 %v6800_v19 }
  0x5a   : > { %1026 = vmatpush.msrb.mxu1 %v6802_v20  ;;  %970 = vmatpush.msra.mxu2 %v6806_v21 }
  0x5b   : > { %990 = vmatpush.msra.mxu3 %v6808_v22  ;;  %1007 = vmatpush.msrb.mxu0 %v6812_v23 }
  0x5c   : > { %1027 = vmatpush.msrb.mxu1 %v6814_v24  ;;  %5102 = vmatmul.msk.f32.vlgmr.msrb.gmra.mxu2 %vm337_vm1, %v6654_v12  ;;  %v867_v24 = vld [vmem:[#allocation6 + $0x760] sm:$0xff] }
  0x5d   : > { %5104 = vmatmul.msk.f32.vlgmr.msrb.gmra.mxu3 %vm337_vm1, %v6654_v12  ;;  %971 = vmatpush.msra.mxu2 %v6820_v25  ;;  %v6852_v12 = vld [vmem:[#allocation6 + $0x110] sm:$0xff] }
  0x5e   : > { %991 = vmatpush.msra.mxu3 %v6822_v26  ;;  %1008 = vmatpush.msrb.mxu0 %v6826_v27  ;;  %12154 = vst [vmem:[#allocation22_spill] sm:$0xff] %v6852_v12  ;;  %v836_v26 = vld [vmem:[#allocation6 + $0x668] sm:$0xff] }
  0x5f   : > { %1028 = vmatpush.msrb.mxu1 %v6828_v28  ;;  %972 = vmatpush.msra.mxu2 %v6834_v29  ;;  %v6874_v28 = vld [vmem:[#allocation6 + $0x7d8] sm:$0xff] }
  0x60   : > { %992 = vmatpush.msra.mxu3 %v6836_v30  ;;  %1009 = vmatpush.msrb.mxu0 %v6840_v31  ;;  %12161 = vst [vmem:[#allocation29_spill] sm:$0xff] %v6874_v28  ;;  %v12164_v30 = vmov 0.0   ;;  %v6902_v31 = vld [vmem:[#allocation6 + $0x10] sm:$0xff]  ;;  %v6930_v29 = vld [vmem:[#allocation6 + $0x258] sm:$0xff] }
  0x61   : > { %1029 = vmatpush.msrb.mxu1 %v6842_v32  ;;  %973 = vmatpush.msra.mxu2 %v6846_v33  ;;  %v6872_v32 = vld [vmem:[#allocation6 + $0x3d8] sm:$0xff]  ;;  %v6880_v33 = vld [vmem:[#allocation6 + $0x490] sm:$0xff]  ;;  %12171 = vst [vmem:[#allocation38_spill] sm:$0xff] %v6902_v31 }
  0x62   : > { %993 = vmatpush.msra.mxu3 %v6848_v34  ;;  %1010 = vmatpush.msrb.mxu0 %v6852_v12  ;;  %12160 = vst [vmem:[#allocation28_spill] sm:$0xff] %v6872_v32  ;;  %v6878_v34 = vld [vmem:[#allocation6 + $0x90] sm:$0xff]  ;;  %v6898_v12 = vld [vmem:[#allocation6 + $0x758] sm:$0xff] }
  0x63   : > { %1030 = vmatpush.msrb.mxu1 %v6854_v35  ;;  %974 = vmatpush.msra.mxu2 %v6858_v36  ;;  %12162 = vst [vmem:[#allocation30_spill] sm:$0xff] %v6878_v34  ;;  %v6884_v35 = vld [vmem:[#allocation6 + $0x398] sm:$0xff] }
  0x64   : > { %994 = vmatpush.msra.mxu3 %v6860_v37  ;;  %1011 = vmatpush.msrb.mxu0 %v6864_v38  ;;  %12163 = vst [vmem:[#allocation31_spill] sm:$0xff] %v6880_v33  ;;  %v6886_v36 = vld [vmem:[#allocation6 + $0x798] sm:$0xff]  ;;  %v6890_v37 = vld [vmem:[#allocation6 + $0x50] sm:$0xff] }
  0x65   : > { %1031 = vmatpush.msrb.mxu1 %v6866_v55  ;;  %975 = vmatmul.f32.vlgmr.msra.gmra.mxu2 %v12164_v30  ;;  %12165 = vst [vmem:[#allocation32_spill] sm:$0xff] %v6884_v35  ;;  %v6892_v38 = vld [vmem:[#allocation6 + $0x450] sm:$0xff]  ;;  %v6896_v55 = vld [vmem:[#allocation6 + $0x358] sm:$0xff] }
  0x66   : > { %995 = vmatmul.f32.vlgmr.msra.gmra.mxu3 %v12164_v30  ;;  %12166 = vst [vmem:[#allocation33_spill] sm:$0xff] %v6886_v36  ;;  %1039 = vmatpush.msrb.mxu2 %v6872_v32  ;;  %v6904_v32 = vld [vmem:[#allocation6 + $0x410] sm:$0xff] }
  0x67   : > { %1059 = vmatpush.msrb.mxu3 %v6874_v28  ;;  %12167 = vst [vmem:[#allocation34_spill] sm:$0xff] %v6890_v37  ;;  %1012 = vmatpush.msrb.mxu0 %v6878_v34  ;;  %v6912_v28 = vld [vmem:[#allocation6 + $0x718] sm:$0xff]  ;;  %v883_v34 = vld [vmem:[#allocation6 + $0x7e0] sm:$0xff] }
  0x68   : > { %12168 = vst [vmem:[#allocation35_spill] sm:$0xff] %v6892_v38  ;;  %1032 = vmatpush.msrb.mxu1 %v6880_v33  ;;  %1040 = vmatpush.msrb.mxu2 %v6884_v35  ;;  %v6910_v33 = vld [vmem:[#allocation6 + $0x318] sm:$0xff]  ;;  %v739_v35 = vld [vmem:[#allocation6 + $0x360] sm:$0xff] }
  0x69   : > { %12169 = vst [vmem:[#allocation36_spill] sm:$0xff] %v6896_v55  ;;  %1060 = vmatpush.msrb.mxu3 %v6886_v36  ;;  %1013 = vmatpush.msrb.mxu0 %v6890_v37  ;;  %v755_v36 = vld [vmem:[#allocation6 + $0x3e0] sm:$0xff]  ;;  %v6918_v37 = vld [vmem:[#allocation6 + $0x2d8] sm:$0xff] }
  0x6a   : > { %12170 = vst [vmem:[#allocation37_spill] sm:$0xff] %v6898_v12  ;;  %1033 = vmatpush.msrb.mxu1 %v6892_v38  ;;  %1041 = vmatpush.msrb.mxu2 %v6896_v55  ;;  %v6920_v38 = vld [vmem:[#allocation6 + $0x6d8] sm:$0xff]  ;;  %v875_v55 = vld [vmem:[#allocation6 + $0x7a0] sm:$0xff] }
  0x6b   : > { %12172 = vst [vmem:[#allocation39_spill] sm:$0xff] %v6904_v32  ;;  %1061 = vmatpush.msrb.mxu3 %v6898_v12  ;;  %1014 = vmatpush.msrb.mxu0 %v6902_v31  ;;  %v747_v12 = vld [vmem:[#allocation6 + $0x3a0] sm:$0xff]  ;;  %v6924_v31 = vld [vmem:[#allocation6 + $0x298] sm:$0xff] }
  0x6c   : > { %12173 = vst [vmem:[#allocation40_spill] sm:$0xff] %v6910_v33  ;;  %1034 = vmatpush.msrb.mxu1 %v6904_v32  ;;  %1015 = vmatmul.f32.vlgmr.msrb.gmra.mxu0 %v12164_v30  ;;  %v6926_v32 = vld [vmem:[#allocation6 + $0x698] sm:$0xff] }
  0x6d   : > { %12174 = vst [vmem:[#allocation41_spill] sm:$0xff] %v6912_v28  ;;  %1035 = vmatmul.f32.vlgmr.msrb.gmra.mxu1 %v12164_v30  ;;  %1042 = vmatpush.msrb.mxu2 %v6910_v33  ;;  %v6932_v33 = vld [vmem:[#allocation6 + $0x658] sm:$0xff] }
  0x6e   : > { %12175 = vst [vmem:[#allocation42_spill] sm:$0xff] %v6918_v37  ;;  %1062 = vmatpush.msrb.mxu3 %v6912_v28  ;;  %1079 = vmatpush.msra.mxu0 %v755_v36  ;;  %v859_v36 = vld [vmem:[#allocation6 + $0x720] sm:$0xff]  ;;  %v6936_v28 = vld [vmem:[#allocation6 + $0x218] sm:$0xff] }
  0x6f   : > { %12176 = vst [vmem:[#allocation43_spill] sm:$0xff] %v6920_v38  ;;  %1099 = vmatpush.msra.mxu1 %v883_v34  ;;  %1043 = vmatpush.msrb.mxu2 %v6918_v37  ;;  %v731_v34 = vld [vmem:[#allocation6 + $0x320] sm:$0xff]  ;;  %v6938_v37 = vld [vmem:[#allocation6 + $0x618] sm:$0xff] }
  0x70   : > { %12177 = vst [vmem:[#allocation44_spill] sm:$0xff] %v6924_v31  ;;  %1063 = vmatpush.msrb.mxu3 %v6920_v38  ;;  %1080 = vmatpush.msra.mxu0 %v747_v12  ;;  %v851_v12 = vld [vmem:[#allocation6 + $0x6e0] sm:$0xff]  ;;  %v6942_v38 = vld [vmem:[#allocation6 + $0x1d8] sm:$0xff] }
  0x71   : > { %12178 = vst [vmem:[#allocation45_spill] sm:$0xff] %v6926_v32  ;;  %1100 = vmatpush.msra.mxu1 %v875_v55  ;;  %1044 = vmatpush.msrb.mxu2 %v6924_v31  ;;  %v723_v55 = vld [vmem:[#allocation6 + $0x2e0] sm:$0xff]  ;;  %v6944_v31 = vld [vmem:[#allocation6 + $0x5d8] sm:$0xff] }
  0x72   : > { %12179 = vst [vmem:[#allocation46_spill] sm:$0xff] %v6930_v29  ;;  %1064 = vmatpush.msrb.mxu3 %v6926_v32  ;;  %1081 = vmatpush.msra.mxu0 %v739_v35  ;;  %v843_v35 = vld [vmem:[#allocation6 + $0x6a0] sm:$0xff]  ;;  %v6948_v32 = vld [vmem:[#allocation6 + $0x198] sm:$0xff] }
  0x73   : > { %12180 = vst [vmem:[#allocation47_spill] sm:$0xff] %v6932_v33  ;;  %1101 = vmatpush.msra.mxu1 %v867_v24  ;;  %1045 = vmatpush.msrb.mxu2 %v6930_v29  ;;  %v715_v24 = vld [vmem:[#allocation6 + $0x2a0] sm:$0xff]  ;;  %v6950_v29 = vld [vmem:[#allocation6 + $0x598] sm:$0xff] }
  0x74   : > { %12181 = vst [vmem:[#allocation48_spill] sm:$0xff] %v6936_v28  ;;  %1065 = vmatpush.msrb.mxu3 %v6932_v33  ;;  %1082 = vmatpush.msra.mxu0 %v731_v34  ;;  %v707_v34 = vld [vmem:[#allocation6 + $0x260] sm:$0xff]  ;;  %v6954_v33 = vld [vmem:[#allocation6 + $0x158] sm:$0xff] }
  0x75   : > { %12182 = vst [vmem:[#allocation49_spill] sm:$0xff] %v6938_v37  ;;  %1102 = vmatpush.msra.mxu1 %v859_v36  ;;  %1046 = vmatpush.msrb.mxu2 %v6936_v28  ;;  %v835_v36 = vld [vmem:[#allocation6 + $0x660] sm:$0xff]  ;;  %v6956_v28 = vld [vmem:[#allocation6 + $0x558] sm:$0xff] }
  0x76   : > { %12183 = vst [vmem:[#allocation50_spill] sm:$0xff] %v6942_v38  ;;  %1066 = vmatpush.msrb.mxu3 %v6938_v37  ;;  %1083 = vmatpush.msra.mxu0 %v723_v55  ;;  %v699_v55 = vld [vmem:[#allocation6 + $0x220] sm:$0xff]  ;;  %v6960_v37 = vld [vmem:[#allocation6 + $0x118] sm:$0xff] }
  0x77   : > { %12184 = vst [vmem:[#allocation51_spill] sm:$0xff] %v6944_v31  ;;  %1103 = vmatpush.msra.mxu1 %v851_v12  ;;  %1047 = vmatpush.msrb.mxu2 %v6942_v38  ;;  %v827_v12 = vld [vmem:[#allocation6 + $0x620] sm:$0xff]  ;;  %v6962_v38 = vld [vmem:[#allocation6 + $0x518] sm:$0xff] }
  0x78   : > { %12185 = vst [vmem:[#allocation52_spill] sm:$0xff] %v6948_v32  ;;  %1067 = vmatpush.msrb.mxu3 %v6944_v31  ;;  %1084 = vmatpush.msra.mxu0 %v715_v24  ;;  %v691_v24 = vld [vmem:[#allocation6 + $0x1e0] sm:$0xff]  ;;  %v6966_v31 = vld [vmem:[#allocation6 + $0xd8] sm:$0xff] }
  0x79   : > { %12186 = vst [vmem:[#allocation53_spill] sm:$0xff] %v6950_v29  ;;  %1104 = vmatpush.msra.mxu1 %v843_v35  ;;  %1048 = vmatpush.msrb.mxu2 %v6948_v32  ;;  %v819_v35 = vld [vmem:[#allocation6 + $0x5e0] sm:$0xff]  ;;  %v6968_v32 = vld [vmem:[#allocation6 + $0x4d8] sm:$0xff] }
  0x7a   : > { %12187 = vst [vmem:[#allocation54_spill] sm:$0xff] %v6954_v33  ;;  %1068 = vmatpush.msrb.mxu3 %v6950_v29  ;;  %1085 = vmatpush.msra.mxu0 %v707_v34  ;;  %v683_v34 = vld [vmem:[#allocation6 + $0x1a0] sm:$0xff]  ;;  %v6972_v29 = vld [vmem:[#allocation6 + $0x98] sm:$0xff] }
  0x7b   : > { %12188 = vst [vmem:[#allocation55_spill] sm:$0xff] %v6956_v28  ;;  %1105 = vmatpush.msra.mxu1 %v835_v36  ;;  %1049 = vmatpush.msrb.mxu2 %v6954_v33  ;;  %v811_v36 = vld [vmem:[#allocation6 + $0x5a0] sm:$0xff]  ;;  %v6974_v33 = vld [vmem:[#allocation6 + $0x498] sm:$0xff] }
  0x7c   : > { %12189 = vst [vmem:[#allocation56_spill] sm:$0xff] %v6960_v37  ;;  %1069 = vmatpush.msrb.mxu3 %v6956_v28  ;;  %1086 = vmatpush.msra.mxu0 %v699_v55  ;;  %v675_v55 = vld [vmem:[#allocation6 + $0x160] sm:$0xff]  ;;  %v6978_v28 = vld [vmem:[#allocation6 + $0x58] sm:$0xff] }
  0x7d   : > { %12190 = vst [vmem:[#allocation57_spill] sm:$0xff] %v6962_v38  ;;  %1106 = vmatpush.msra.mxu1 %v827_v12  ;;  %1050 = vmatpush.msrb.mxu2 %v6960_v37  ;;  %v803_v12 = vld [vmem:[#allocation6 + $0x560] sm:$0xff]  ;;  %v6980_v37 = vld [vmem:[#allocation6 + $0x458] sm:$0xff] }
  0x7e   : > { %12191 = vst [vmem:[#allocation58_spill] sm:$0xff] %v6966_v31  ;;  %1070 = vmatpush.msrb.mxu3 %v6962_v38  ;;  %1087 = vmatpush.msra.mxu0 %v691_v24  ;;  %v667_v24 = vld [vmem:[#allocation6 + $0x120] sm:$0xff]  ;;  %v6984_v38 = vld [vmem:[#allocation6 + $0x18] sm:$0xff] }
  0x7f   : > { %12192 = vst [vmem:[#allocation59_spill] sm:$0xff] %v6968_v32  ;;  %1107 = vmatpush.msra.mxu1 %v819_v35  ;;  %1051 = vmatpush.msrb.mxu2 %v6966_v31  ;;  %v795_v35 = vld [vmem:[#allocation6 + $0x520] sm:$0xff]  ;;  %v6986_v31 = vld [vmem:[#allocation6 + $0x418] sm:$0xff] }
  0x80   : > { %12193 = vst [vmem:[#allocation60_spill] sm:$0xff] %v6972_v29  ;;  %1071 = vmatpush.msrb.mxu3 %v6968_v32  ;;  %1088 = vmatpush.msra.mxu0 %v683_v34  ;;  %v659_v34 = vld [vmem:[#allocation6 + $0xe0] sm:$0xff] }
  0x81   : > { %12194 = vst [vmem:[#allocation61_spill] sm:$0xff] %v6974_v33  ;;  %1108 = vmatpush.msra.mxu1 %v811_v36  ;;  %1052 = vmatpush.msrb.mxu2 %v6972_v29  ;;  %v787_v36 = vld [vmem:[#allocation6 + $0x4e0] sm:$0xff]  ;;  %v7003_v29 = vld [vmem:[#allocation6 + $0x328] sm:$0xff] }
  0x82   : > { %12195 = vst [vmem:[#allocation62_spill] sm:$0xff] %v6978_v28  ;;  %1072 = vmatpush.msrb.mxu3 %v6974_v33  ;;  %1089 = vmatpush.msra.mxu0 %v675_v55  ;;  %v6992_v33 = vld [vmem:[#allocation6 + $0x3e8] sm:$0xff]  ;;  %v779_v32 = vld [vmem:[#allocation6 + $0x4a0] sm:$0xff] }
  0x83   : > { %12196 = vst [vmem:[#allocation63_spill] sm:$0xff] %v6980_v37  ;;  %1109 = vmatpush.msra.mxu1 %v803_v12  ;;  %1053 = vmatpush.msrb.mxu2 %v6978_v28  ;;  %v884_v55 = vld [vmem:[#allocation6 + $0x7e8] sm:$0xff]  ;;  %v651_v12 = vld [vmem:[#allocation6 + $0xa0] sm:$0xff] }
  0x84   : > { %12197 = vst [vmem:[#allocation64_spill] sm:$0xff] %v6984_v38  ;;  %1073 = vmatpush.msrb.mxu3 %v6980_v37  ;;  %1090 = vmatpush.msra.mxu0 %v667_v24  ;;  %v6996_v37 = vld [vmem:[#allocation6 + $0x3a8] sm:$0xff]  ;;  %v643_v24 = vld [vmem:[#allocation6 + $0x60] sm:$0xff] }
  0x85   : > { %12198 = vst [vmem:[#allocation65_spill] sm:$0xff] %v6986_v31  ;;  %1110 = vmatpush.msra.mxu1 %v795_v35  ;;  %1054 = vmatpush.msrb.mxu2 %v6984_v38  ;;  %v876_v28 = vld [vmem:[#allocation6 + $0x7a8] sm:$0xff]  ;;  %v771_v35 = vld [vmem:[#allocation6 + $0x460] sm:$0xff] }
  0x86   : > { %1074 = vmatpush.msrb.mxu3 %v6986_v31  ;;  %12199 = vst [vmem:[#allocation66_spill] sm:$0xff] %v6992_v33  ;;  %1091 = vmatpush.msra.mxu0 %v659_v34  ;;  %v6999_v31 = vld [vmem:[#allocation6 + $0x368] sm:$0xff]  ;;  %v763_v38 = vld [vmem:[#allocation6 + $0x420] sm:$0xff] }
  0x87   : > { %1111 = vmatpush.msra.mxu1 %v787_v36  ;;  %1055 = vmatmul.f32.vlgmr.msrb.gmra.mxu2 %v12164_v30  ;;  %12200 = vst [vmem:[#allocation67_spill] sm:$0xff] %v6996_v37  ;;  %v868_v34 = vld [vmem:[#allocation6 + $0x768] sm:$0xff]  ;;  %v635_v36 = vld [vmem:[#allocation6 + $0x20] sm:$0xff] }
  0x88   : > { %1075 = vmatmul.f32.vlgmr.msrb.gmra.mxu3 %v12164_v30  ;;  %1119 = vmatpush.msra.mxu2 %v6992_v33  ;;  %12201 = vst [vmem:[#allocation68_spill] sm:$0xff] %v6999_v31  ;;  %v7013_v33 = vld [vmem:[#allocation6 + $0x268] sm:$0xff] }
  0x89   : > { %1139 = vmatpush.msra.mxu3 %v884_v55  ;;  %1092 = vmatpush.msra.mxu0 %v651_v12  ;;  %12202 = vst [vmem:[#allocation69_spill] sm:$0xff] %v7003_v29  ;;  %v860_v55 = vld [vmem:[#allocation6 + $0x728] sm:$0xff]  ;;  %v757_v12 = vld [vmem:[#allocation6 + $0x3f0] sm:$0xff] }
  0x8a   : > { %1112 = vmatpush.msra.mxu1 %v779_v32  ;;  %1120 = vmatpush.msra.mxu2 %v6996_v37  ;;  %v885_v32 = vld [vmem:[#allocation6 + $0x7f0] sm:$0xff]  ;;  %v7007_v37 = vld [vmem:[#allocation6 + $0x2e8] sm:$0xff]  ;;  %12205 = vst [vmem:[#allocation72_spill] sm:$0xff] %v7013_v33 }
  0x8b   : > { %1140 = vmatpush.msra.mxu3 %v876_v28  ;;  %1093 = vmatpush.msra.mxu0 %v643_v24  ;;  %12203 = vst [vmem:[#allocation70_spill] sm:$0xff] %v7007_v37  ;;  %v852_v28 = vld [vmem:[#allocation6 + $0x6e8] sm:$0xff]  ;;  %v749_v24 = vld [vmem:[#allocation6 + $0x3b0] sm:$0xff] }
  0x8c   : > { %1113 = vmatpush.msra.mxu1 %v771_v35  ;;  %1121 = vmatpush.msra.mxu2 %v6999_v31  ;;  %v877_v35 = vld [vmem:[#allocation6 + $0x7b0] sm:$0xff] }
  0x8d   : > { %1141 = vmatpush.msra.mxu3 %v868_v34  ;;  %1094 = vmatpush.msra.mxu0 %v635_v36  ;;  %v7010_v34 = vld [vmem:[#allocation6 + $0x2a8] sm:$0xff]  ;;  %v869_v31 = vld [vmem:[#allocation6 + $0x770] sm:$0xff] }
  0x8e   : > { %1114 = vmatpush.msra.mxu1 %v763_v38  ;;  %1095 = vmatmul.f32.vlgmr.msra.gmra.mxu0 %v12164_v30  ;;  %12204 = vst [vmem:[#allocation71_spill] sm:$0xff] %v7010_v34  ;;  %v844_v36 = vld [vmem:[#allocation6 + $0x6a8] sm:$0xff]  ;;  %v741_v38 = vld [vmem:[#allocation6 + $0x370] sm:$0xff] }
  0x8f   : > { %1115 = vmatmul.f32.vlgmr.msra.gmra.mxu1 %v12164_v30  ;;  %1122 = vmatpush.msra.mxu2 %v7003_v29  ;;  %v861_v29 = vld [vmem:[#allocation6 + $0x730] sm:$0xff] }
  0x90   : > { %1142 = vmatpush.msra.mxu3 %v860_v55  ;;  %1159 = vmatpush.msrb.mxu0 %v757_v12  ;;  %v733_v55 = vld [vmem:[#allocation6 + $0x330] sm:$0xff]  ;;  %v7016_v12 = vld [vmem:[#allocation6 + $0x228] sm:$0xff] }
  0x91   : > { %1179 = vmatpush.msrb.mxu1 %v885_v32  ;;  %1123 = vmatpush.msra.mxu2 %v7007_v37  ;;  %12206 = vst [vmem:[#allocation73_spill] sm:$0xff] %v7016_v12  ;;  %v828_v32 = vld [vmem:[#allocation6 + $0x628] sm:$0xff]  ;;  %v853_v37 = vld [vmem:[#allocation6 + $0x6f0] sm:$0xff] }
  0x92   : > { %1143 = vmatpush.msra.mxu3 %v852_v28  ;;  %1160 = vmatpush.msrb.mxu0 %v749_v24  ;;  %v725_v28 = vld [vmem:[#allocation6 + $0x2f0] sm:$0xff]  ;;  %v7019_v24 = vld [vmem:[#allocation6 + $0x1e8] sm:$0xff] }
  0x93   : > { %1180 = vmatpush.msrb.mxu1 %v877_v35  ;;  %1124 = vmatpush.msra.mxu2 %v7010_v34  ;;  %12207 = vst [vmem:[#allocation74_spill] sm:$0xff] %v7019_v24  ;;  %v820_v35 = vld [vmem:[#allocation6 + $0x5e8] sm:$0xff]  ;;  %v845_v34 = vld [vmem:[#allocation6 + $0x6b0] sm:$0xff] }
  0x94   : > { %1144 = vmatpush.msra.mxu3 %v844_v36  ;;  %1161 = vmatpush.msrb.mxu0 %v741_v38  ;;  %v717_v36 = vld [vmem:[#allocation6 + $0x2b0] sm:$0xff]  ;;  %v812_v38 = vld [vmem:[#allocation6 + $0x5a8] sm:$0xff] }
  0x95   : > { %1181 = vmatpush.msrb.mxu1 %v869_v31  ;;  %1125 = vmatpush.msra.mxu2 %v7013_v33  ;;  %v7022_v31 = vld [vmem:[#allocation6 + $0x1a8] sm:$0xff]  ;;  %v837_v33 = vld [vmem:[#allocation6 + $0x670] sm:$0xff] }
  0x96   : > { %1145 = vmatpush.msra.mxu3 %v836_v26  ;;  %1162 = vmatpush.msrb.mxu0 %v733_v55  ;;  %12208 = vst [vmem:[#allocation75_spill] sm:$0xff] %v7022_v31  ;;  %v709_v26 = vld [vmem:[#allocation6 + $0x270] sm:$0xff]  ;;  %v804_v55 = vld [vmem:[#allocation6 + $0x568] sm:$0xff] }
  0x97   : > { %1182 = vmatpush.msrb.mxu1 %v861_v29  ;;  %1126 = vmatpush.msra.mxu2 %v7016_v12  ;;  %v7025_v29 = vld [vmem:[#allocation6 + $0x168] sm:$0xff]  ;;  %v829_v12 = vld [vmem:[#allocation6 + $0x630] sm:$0xff] }
  0x98   : > { %1146 = vmatpush.msra.mxu3 %v828_v32  ;;  %1163 = vmatpush.msrb.mxu0 %v725_v28  ;;  %12209 = vst [vmem:[#allocation76_spill] sm:$0xff] %v7025_v29  ;;  %v701_v32 = vld [vmem:[#allocation6 + $0x230] sm:$0xff]  ;;  %v796_v28 = vld [vmem:[#allocation6 + $0x528] sm:$0xff] }
  0x99   : > { %1183 = vmatpush.msrb.mxu1 %v853_v37  ;;  %1127 = vmatpush.msra.mxu2 %v7019_v24  ;;  %v7028_v37 = vld [vmem:[#allocation6 + $0x128] sm:$0xff]  ;;  %v821_v24 = vld [vmem:[#allocation6 + $0x5f0] sm:$0xff] }
  0x9a   : > { %1147 = vmatpush.msra.mxu3 %v820_v35  ;;  %1164 = vmatpush.msrb.mxu0 %v717_v36  ;;  %v693_v35 = vld [vmem:[#allocation6 + $0x1f0] sm:$0xff]  ;;  %v788_v36 = vld [vmem:[#allocation6 + $0x4e8] sm:$0xff] }
  0x9b   : > { %1184 = vmatpush.msrb.mxu1 %v845_v34  ;;  %1128 = vmatpush.msra.mxu2 %v7022_v31  ;;  %v7031_v34 = vld [vmem:[#allocation6 + $0xe8] sm:$0xff]  ;;  %v813_v31 = vld [vmem:[#allocation6 + $0x5b0] sm:$0xff] }
  0x9c   : > { %1148 = vmatpush.msra.mxu3 %v812_v38  ;;  %1165 = vmatpush.msrb.mxu0 %v709_v26  ;;  %v685_v38 = vld [vmem:[#allocation6 + $0x1b0] sm:$0xff]  ;;  %v780_v26 = vld [vmem:[#allocation6 + $0x4a8] sm:$0xff] }
  0x9d   : > { %1185 = vmatpush.msrb.mxu1 %v837_v33  ;;  %1129 = vmatpush.msra.mxu2 %v7025_v29  ;;  %v7034_v33 = vld [vmem:[#allocation6 + $0xa8] sm:$0xff] }
  0x9e   : > { %1149 = vmatpush.msra.mxu3 %v804_v55  ;;  %1166 = vmatpush.msrb.mxu0 %v701_v32  ;;  %12210 = vst [vmem:[#allocation77_spill] sm:$0xff] %v7034_v33  ;;  %v7037_v55 = vld [vmem:[#allocation6 + $0x170] sm:$0xff]  ;;  %v772_v29 = vld [vmem:[#allocation6 + $0x468] sm:$0xff] }
  0x9f   : > { %1186 = vmatpush.msrb.mxu1 %v829_v12  ;;  %1130 = vmatpush.msra.mxu2 %v7028_v37  ;;  %12211 = vst [vmem:[#allocation78_spill] sm:$0xff] %v7037_v55  ;;  %v805_v32 = vld [vmem:[#allocation6 + $0x570] sm:$0xff]  ;;  %v7039_v12 = vld [vmem:[#allocation6 + $0x68] sm:$0xff] }
  0xa0   : > { %1150 = vmatpush.msra.mxu3 %v796_v28  ;;  %1167 = vmatpush.msrb.mxu0 %v693_v35  ;;  %12212 = vst [vmem:[#allocation79_spill] sm:$0xff] %v7039_v12  ;;  %v7042_v28 = vld [vmem:[#allocation6 + $0x130] sm:$0xff]  ;;  %v7045_v35 = vld [vmem:[#allocation6 + $0x28] sm:$0xff] }
  0xa1   : > { %1187 = vmatpush.msrb.mxu1 %v821_v24  ;;  %1131 = vmatpush.msra.mxu2 %v7031_v34  ;;  %12213 = vst [vmem:[#allocation80_spill] sm:$0xff] %v7042_v28  ;;  %v797_v24 = vld [vmem:[#allocation6 + $0x530] sm:$0xff] }
  0xa2   : > { %1151 = vmatpush.msra.mxu3 %v788_v36  ;;  %1168 = vmatpush.msrb.mxu0 %v685_v38  ;;  %12214 = vst [vmem:[#allocation81_spill] sm:$0xff] %v7045_v35  ;;  %v764_v36 = vld [vmem:[#allocation6 + $0x428] sm:$0xff]  ;;  %v7048_v38 = vld [vmem:[#allocation6 + $0xf0] sm:$0xff] }
  0xa3   : > { %1188 = vmatpush.msrb.mxu1 %v813_v31  ;;  %1132 = vmatpush.msra.mxu2 %v7034_v33  ;;  %12215 = vst [vmem:[#allocation82_spill] sm:$0xff] %v7048_v38  ;;  %v789_v31 = vld [vmem:[#allocation6 + $0x4f0] sm:$0xff]  ;;  %v886_v33 = vld [vmem:[#allocation6 + $0x7f8] sm:$0xff] }
  0xa4   : > { %1152 = vmatpush.msra.mxu3 %v780_v26  ;;  %1169 = vmatpush.msrb.mxu0 %v7037_v55  ;;  %v7052_v26 = vld [vmem:[#allocation6 + $0x3f8] sm:$0xff]  ;;  %v781_v55 = vld [vmem:[#allocation6 + $0x4b0] sm:$0xff] }
  0xa5   : > { %1189 = vmatpush.msrb.mxu1 %v805_v32  ;;  %1133 = vmatpush.msra.mxu2 %v7039_v12  ;;  %v7055_v32 = vld [vmem:[#allocation6 + $0xb0] sm:$0xff] }
  0xa6   : > { %1153 = vmatpush.msra.mxu3 %v772_v29  ;;  %1170 = vmatpush.msrb.mxu0 %v7042_v28  ;;  %12216 = vst [vmem:[#allocation83_spill] sm:$0xff] %v7055_v32  ;;  %v7059_v29 = vld [vmem:[#allocation6 + $0x3b8] sm:$0xff]  ;;  %v765_v12 = vld [vmem:[#allocation6 + $0x430] sm:$0xff] }
  0xa7   : > { %1190 = vmatpush.msrb.mxu1 %v797_v24  ;;  %1134 = vmatpush.msra.mxu2 %v7045_v35  ;;  %v7061_v28 = vld [vmem:[#allocation6 + $0x7b8] sm:$0xff]  ;;  %v7064_v24 = vld [vmem:[#allocation6 + $0x70] sm:$0xff] }
  0xa8   : > { %1154 = vmatpush.msra.mxu3 %v764_v36  ;;  %1171 = vmatpush.msrb.mxu0 %v7048_v38  ;;  %12217 = vst [vmem:[#allocation84_spill] sm:$0xff] %v7061_v28  ;;  %v773_v36 = vld [vmem:[#allocation6 + $0x470] sm:$0xff]  ;;  %v7069_v38 = vld [vmem:[#allocation6 + $0x778] sm:$0xff] }
  0xa9   : > { %1191 = vmatpush.msrb.mxu1 %v789_v31  ;;  %1135 = vmatmul.f32.vlgmr.msra.gmra.mxu2 %v12164_v30  ;;  %12218 = vst [vmem:[#allocation85_spill] sm:$0xff] %v7064_v24  ;;  %v7067_v31 = vld [vmem:[#allocation6 + $0x378] sm:$0xff]  ;;  %v7073_v35 = vld [vmem:[#allocation6 + $0x30] sm:$0xff] }
  0xaa   : > { %1155 = vmatmul.f32.vlgmr.msra.gmra.mxu3 %v12164_v30  ;;  %1199 = vmatpush.msrb.mxu2 %v7052_v26  ;;  %12219 = vst [vmem:[#allocation86_spill] sm:$0xff] %v7067_v31 }
  0xab   : > { %1219 = vmatpush.msrb.mxu3 %v886_v33  ;;  %1172 = vmatpush.msrb.mxu0 %v7055_v32  ;;  %12220 = vst [vmem:[#allocation87_spill] sm:$0xff] %v7069_v38  ;;  %v7078_v33 = vld [vmem:[#allocation6 + $0x338] sm:$0xff] }
  0xac   : > { %1192 = vmatpush.msrb.mxu1 %v781_v55  ;;  %1200 = vmatpush.msrb.mxu2 %v7059_v29  ;;  %12221 = vst [vmem:[#allocation88_spill] sm:$0xff] %v7073_v35  ;;  %v7080_v55 = vld [vmem:[#allocation6 + $0x738] sm:$0xff] }
  0xad   : > { %1220 = vmatpush.msrb.mxu3 %v7061_v28  ;;  %1173 = vmatpush.msrb.mxu0 %v7064_v24  ;;  %12222 = vst [vmem:[#allocation89_spill] sm:$0xff] %v7078_v33  ;;  %v7085_v28 = vld [vmem:[#allocation6 + $0x2f8] sm:$0xff]  ;;  %v7095_v24 = vld [vmem:[#allocation6 + $0x3c0] sm:$0xff] }
  0xae   : > { %1193 = vmatpush.msrb.mxu1 %v773_v36  ;;  %1201 = vmatpush.msrb.mxu2 %v7067_v31  ;;  %12223 = vst [vmem:[#allocation90_spill] sm:$0xff] %v7080_v55  ;;  %v7087_v32 = vld [vmem:[#allocation6 + $0x6f8] sm:$0xff] }
  0xaf   : > { %1221 = vmatpush.msrb.mxu3 %v7069_v38  ;;  %1174 = vmatpush.msrb.mxu0 %v7073_v35  ;;  %12224 = vst [vmem:[#allocation91_spill] sm:$0xff] %v7085_v28  ;;  %v7091_v36 = vld [vmem:[#allocation6 + $0x2b8] sm:$0xff] }
  0xb0   : > { %1194 = vmatpush.msrb.mxu1 %v765_v12  ;;  %1175 = vmatmul.f32.vlgmr.msrb.gmra.mxu0 %v12164_v30  ;;  %12225 = vst [vmem:[#allocation92_spill] sm:$0xff] %v7087_v32  ;;  %v7093_v38 = vld [vmem:[#allocation6 + $0x6b8] sm:$0xff]  ;;  %v5490_v12 = vld [vmem:[#allocation6 + $0x7c0] sm:$0xff] }
  0xb1   : > { %1195 = vmatmul.f32.vlgmr.msrb.gmra.mxu1 %v12164_v30  ;;  %1202 = vmatpush.msrb.mxu2 %v7078_v33  ;;  %12226 = vst [vmem:[#allocation93_spill] sm:$0xff] %v7091_v36  ;;  %v7100_v35 = vld [vmem:[#allocation6 + $0x278] sm:$0xff]  ;;  %v7104_v33 = vld [vmem:[#allocation6 + $0x380] sm:$0xff] }
  0xb2   : > { %1222 = vmatpush.msrb.mxu3 %v7080_v55  ;;  %12227 = vst [vmem:[#allocation94_spill] sm:$0xff] %v7093_v38  ;;  %1399 = vmatpush.msra.mxu0 %v7095_v24  ;;  %v7102_v31 = vld [vmem:[#allocation6 + $0x678] sm:$0xff]  ;;  %v5492_v55 = vld [vmem:[#allocation6 + $0x780] sm:$0xff] }
  0xb3   : > { %12228 = vst [vmem:[#allocation95_spill] sm:$0xff] %v7095_v24  ;;  %1419 = vmatpush.msra.mxu1 %v5490_v12  ;;  %1203 = vmatpush.msrb.mxu2 %v7085_v28  ;;  %v7109_v24 = vld [vmem:[#allocation6 + $0x238] sm:$0xff]  ;;  %v7113_v28 = vld [vmem:[#allocation6 + $0x340] sm:$0xff] }
  0xb4   : > { %1223 = vmatpush.msrb.mxu3 %v7087_v32  ;;  %12229 = vst [vmem:[#allocation96_spill] sm:$0xff] %v7100_v35  ;;  %1400 = vmatpush.msra.mxu0 %v7104_v33  ;;  %v7111_v12 = vld [vmem:[#allocation6 + $0x638] sm:$0xff]  ;;  %v5494_v32 = vld [vmem:[#allocation6 + $0x740] sm:$0xff] }
  0xb5   : > { %12230 = vst [vmem:[#allocation97_spill] sm:$0xff] %v7102_v31  ;;  %1420 = vmatpush.msra.mxu1 %v5492_v55  ;;  %1204 = vmatpush.msrb.mxu2 %v7091_v36  ;;  %v7120_v55 = vld [vmem:[#allocation6 + $0x5f8] sm:$0xff]  ;;  %v7122_v36 = vld [vmem:[#allocation6 + $0x300] sm:$0xff] }
  0xb6   : > { %12231 = vst [vmem:[#allocation98_spill] sm:$0xff] %v7104_v33  ;;  %1224 = vmatpush.msrb.mxu3 %v7093_v38  ;;  %1401 = vmatpush.msra.mxu0 %v7113_v28  ;;  %v7118_v33 = vld [vmem:[#allocation6 + $0x1f8] sm:$0xff]  ;;  %v5496_v38 = vld [vmem:[#allocation6 + $0x700] sm:$0xff] }
  0xb7   : > { %12232 = vst [vmem:[#allocation99_spill] sm:$0xff] %v7109_v24  ;;  %1421 = vmatpush.msra.mxu1 %v5494_v32  ;;  %1205 = vmatpush.msrb.mxu2 %v7100_v35  ;;  %v7129_v32 = vld [vmem:[#allocation6 + $0x5b8] sm:$0xff]  ;;  %v7131_v35 = vld [vmem:[#allocation6 + $0x2c0] sm:$0xff] }
  0xb8   : > { %12233 = vst [vmem:[#allocation100_spill] sm:$0xff] %v7111_v12  ;;  %1225 = vmatpush.msrb.mxu3 %v7102_v31  ;;  %1402 = vmatpush.msra.mxu0 %v7122_v36  ;;  %v5498_v31 = vld [vmem:[#allocation6 + $0x6c0] sm:$0xff] }
  0xb9   : > { %12234 = vst [vmem:[#allocation101_spill] sm:$0xff] %v7113_v28  ;;  %1422 = vmatpush.msra.mxu1 %v5496_v38  ;;  %1206 = vmatpush.msrb.mxu2 %v7109_v24  ;;  %v7127_v28 = vld [vmem:[#allocation6 + $0x1b8] sm:$0xff]  ;;  %v7140_v24 = vld [vmem:[#allocation6 + $0x280] sm:$0xff] }
  0xba   : > { %12235 = vst [vmem:[#allocation102_spill] sm:$0xff] %v7118_v33  ;;  %1226 = vmatpush.msrb.mxu3 %v7111_v12  ;;  %1403 = vmatpush.msra.mxu0 %v7131_v35  ;;  %v7138_v38 = vld [vmem:[#allocation6 + $0x578] sm:$0xff]  ;;  %v5500_v12 = vld [vmem:[#allocation6 + $0x680] sm:$0xff] }
  0xbb   : > { %12236 = vst [vmem:[#allocation103_spill] sm:$0xff] %v7120_v55  ;;  %1423 = vmatpush.msra.mxu1 %v5498_v31  ;;  %1207 = vmatpush.msrb.mxu2 %v7118_v33  ;;  %v7147_v31 = vld [vmem:[#allocation6 + $0x538] sm:$0xff]  ;;  %v7149_v33 = vld [vmem:[#allocation6 + $0x240] sm:$0xff] }
  0xbc   : > { %12237 = vst [vmem:[#allocation104_spill] sm:$0xff] %v7122_v36  ;;  %1227 = vmatpush.msrb.mxu3 %v7120_v55  ;;  %v7136_v36 = vld [vmem:[#allocation6 + $0x178] sm:$0xff]  ;;  %1404 = vmatpush.msra.mxu0 %v7140_v24  ;;  %v5502_v55 = vld [vmem:[#allocation6 + $0x640] sm:$0xff] }
  0xbd   : > { %12238 = vst [vmem:[#allocation105_spill] sm:$0xff] %v7127_v28  ;;  %1424 = vmatpush.msra.mxu1 %v5500_v12  ;;  %1208 = vmatpush.msrb.mxu2 %v7127_v28  ;;  %v7156_v12 = vld [vmem:[#allocation6 + $0x4f8] sm:$0xff]  ;;  %v7158_v28 = vld [vmem:[#allocation6 + $0x200] sm:$0xff] }
  0xbe   : > { %12239 = vst [vmem:[#allocation106_spill] sm:$0xff] %v7129_v32  ;;  %1228 = vmatpush.msrb.mxu3 %v7129_v32  ;;  %1405 = vmatpush.msra.mxu0 %v7149_v33  ;;  %v5504_v32 = vld [vmem:[#allocation6 + $0x600] sm:$0xff] }
  0xbf   : > { %12240 = vst [vmem:[#allocation107_spill] sm:$0xff] %v7131_v35  ;;  %v7145_v35 = vld [vmem:[#allocation6 + $0x138] sm:$0xff]  ;;  %1425 = vmatpush.msra.mxu1 %v5502_v55  ;;  %1209 = vmatpush.msrb.mxu2 %v7136_v36 }
  0xc0   : > { %12241 = vst [vmem:[#allocation108_spill] sm:$0xff] %v7136_v36  ;;  %1229 = vmatpush.msrb.mxu3 %v7138_v38  ;;  %1406 = vmatpush.msra.mxu0 %v7158_v28  ;;  %v7165_v55 = vld [vmem:[#allocation6 + $0x4b8] sm:$0xff]  ;;  %v7167_v36 = vld [vmem:[#allocation6 + $0x1c0] sm:$0xff] }
  0xc1   : > { %12242 = vst [vmem:[#allocation109_spill] sm:$0xff] %v7138_v38  ;;  %1426 = vmatpush.msra.mxu1 %v5504_v32  ;;  %1210 = vmatpush.msrb.mxu2 %v7145_v35  ;;  %v5506_v38 = vld [vmem:[#allocation6 + $0x5c0] sm:$0xff]  ;;  %v7174_v32 = vld [vmem:[#allocation6 + $0x478] sm:$0xff] }
  0xc2   : > { %12243 = vst [vmem:[#allocation110_spill] sm:$0xff] %v7140_v24  ;;  %v7154_v24 = vld [vmem:[#allocation6 + $0xf8] sm:$0xff]  ;;  %1230 = vmatpush.msrb.mxu3 %v7147_v31  ;;  %1407 = vmatpush.msra.mxu0 %v7167_v36 }
  0xc3   : > { %12244 = vst [vmem:[#allocation111_spill] sm:$0xff] %v7145_v35  ;;  %1427 = vmatpush.msra.mxu1 %v5506_v38  ;;  %1211 = vmatpush.msrb.mxu2 %v7154_v24  ;;  %v7176_v35 = vld [vmem:[#allocation6 + $0x180] sm:$0xff]  ;;  %v7183_v38 = vld [vmem:[#allocation6 + $0x438] sm:$0xff] }
  0xc4   : > { %12245 = vst [vmem:[#allocation112_spill] sm:$0xff] %v7147_v31  ;;  %1231 = vmatpush.msrb.mxu3 %v7156_v12  ;;  %1408 = vmatpush.msra.mxu0 %v7176_v35  ;;  %v5508_v31 = vld [vmem:[#allocation6 + $0x580] sm:$0xff] }
  0xc5   : > { %12246 = vst [vmem:[#allocation113_spill] sm:$0xff] %v7149_v33  ;;  %v7163_v33 = vld [vmem:[#allocation6 + $0xb8] sm:$0xff]  ;;  %1428 = vmatpush.msra.mxu1 %v5508_v31  ;;  %v5512_v31 = vld [vmem:[#allocation6 + $0x500] sm:$0xff] }
  0xc6   : > { %12247 = vst [vmem:[#allocation114_spill] sm:$0xff] %v7154_v24  ;;  %1212 = vmatpush.msrb.mxu2 %v7163_v33  ;;  %1232 = vmatpush.msrb.mxu3 %v7165_v55  ;;  %v7185_v24 = vld [vmem:[#allocation6 + $0x140] sm:$0xff] }
  0xc7   : > { %12248 = vst [vmem:[#allocation115_spill] sm:$0xff] %v7156_v12  ;;  %1409 = vmatpush.msra.mxu0 %v7185_v24  ;;  %v5510_v12 = vld [vmem:[#allocation6 + $0x540] sm:$0xff] }
  0xc8   : > { %12249 = vst [vmem:[#allocation116_spill] sm:$0xff] %v7158_v28  ;;  %v7172_v28 = vld [vmem:[#allocation6 + $0x78] sm:$0xff]  ;;  %1429 = vmatpush.msra.mxu1 %v5510_v12  ;;  %1233 = vmatpush.msrb.mxu3 %v7174_v32  ;;  %v7198_v12 = vld [vmem:[#allocation6 + $0xc0] sm:$0xff] }
  0xc9   : > { %12250 = vst [vmem:[#allocation117_spill] sm:$0xff] %v7167_v36  ;;  %v7181_v36 = vld [vmem:[#allocation6 + $0x38] sm:$0xff]  ;;  %1213 = vmatpush.msrb.mxu2 %v7172_v28 }
  0xca   : > { %12251 = vst [vmem:[#allocation118_spill] sm:$0xff] %v7174_v32  ;;  %1430 = vmatpush.msra.mxu1 %v5512_v31  ;;  %1234 = vmatpush.msrb.mxu3 %v7183_v38  ;;  %v5514_v32 = vld [vmem:[#allocation6 + $0x4c0] sm:$0xff]  ;;  %v7297_v31 = vld [vmem:[%s11425_s3] sm:$0xff] }
  0xcb   : > { %12252 = vst [vmem:[#allocation119_spill] sm:$0xff] %v7176_v35  ;;  %v7190_v35 = vld [vmem:[#allocation6 + $0x100] sm:$0xff]  ;;  %1214 = vmatpush.msrb.mxu2 %v7181_v36  ;;  %1235 = vmatmul.f32.vlgmr.msrb.gmra.mxu3 %v12164_v30 }
  0xcc   : > { %1410 = vmatpush.msra.mxu0 %v7190_v35  ;;  %1215 = vmatmul.f32.vlgmr.msrb.gmra.mxu2 %v12164_v30 }
  0xcd   : > { %1439 = vmatpush.msra.mxu2 %v6672_v39  ;;  %1459 = vmatpush.msra.mxu3 %v6674_v40  ;;  %v12253_v39 = vld [vmem:[#allocation14_spill] sm:$0xff]  ;;  %v12254_v40 = vld [vmem:[#allocation16_spill] sm:$0xff] }
  0xce   : > { %1411 = vmatpush.msra.mxu0 %v7198_v12  ;;  %1431 = vmatpush.msra.mxu1 %v5514_v32  ;;  %v12297_v32 = vld [vmem:[#allocation58_spill] sm:$0xff] }
  0xcf   : > { %1440 = vmatpush.msra.mxu2 %v6684_v43  ;;  %1460 = vmatpush.msra.mxu3 %v6686_v44  ;;  %v12257_v43 = vld [vmem:[#allocation17_spill] sm:$0xff]  ;;  %v12258_v44 = vld [vmem:[#allocation20_spill] sm:$0xff] }
  0xd0   : > { %1412 = vmatpush.msra.mxu0 %v6676_v41  ;;  %1432 = vmatpush.msra.mxu1 %v6678_v42  ;;  %v12255_v41 = vld [vmem:[#allocation13_spill] sm:$0xff]  ;;  %v12256_v42 = vld [vmem:[#allocation18_spill] sm:$0xff] }
  0xd1   : > { %1441 = vmatpush.msra.mxu2 %v6696_v47  ;;  %1461 = vmatpush.msra.mxu3 %v6698_v48  ;;  %v12261_v47 = vld [vmem:[#allocation21_spill] sm:$0xff]  ;;  %v12262_v48 = vld [vmem:[#allocation24_spill] sm:$0xff] }
  0xd2   : > { %1413 = vmatpush.msra.mxu0 %v6690_v45  ;;  %1433 = vmatpush.msra.mxu1 %v6692_v46  ;;  %v12259_v45 = vld [vmem:[#allocation15_spill] sm:$0xff]  ;;  %v12260_v46 = vld [vmem:[#allocation22_spill] sm:$0xff] }
  0xd3   : > { %1442 = vmatpush.msra.mxu2 %v6710_v51  ;;  %1462 = vmatpush.msra.mxu3 %v6712_v52  ;;  %v12265_v51 = vld [vmem:[#allocation26_spill] sm:$0xff]  ;;  %v12266_v52 = vld [vmem:[#allocation25_spill] sm:$0xff] }
  0xd4   : > { %1414 = vmatpush.msra.mxu0 %v6702_v49  ;;  %1434 = vmatpush.msra.mxu1 %v6704_v50  ;;  %v12263_v49 = vld [vmem:[#allocation19_spill] sm:$0xff]  ;;  %v12264_v50 = vld [vmem:[#allocation28_spill] sm:$0xff] }
  0xd5   : > { %1443 = vmatpush.msra.mxu2 %v6722_v56  ;;  %1463 = vmatpush.msra.mxu3 %v6724_v57  ;;  %v12269_v56 = vld [vmem:[#allocation30_spill] sm:$0xff]  ;;  %v12270_v57 = vld [vmem:[#allocation29_spill] sm:$0xff] }
  0xd6   : > { %1479 = vmatpush.msrb.mxu0 %v6716_v53  ;;  %1499 = vmatpush.msrb.mxu1 %v6718_v54  ;;  %v12267_v53 = vld [vmem:[#allocation23_spill] sm:$0xff]  ;;  %v12268_v54 = vld [vmem:[#allocation32_spill] sm:$0xff] }
  0xd7   : > { %1444 = vmatpush.msra.mxu2 %v6734_v60  ;;  %1464 = vmatpush.msra.mxu3 %v6736_v61  ;;  %v12273_v60 = vld [vmem:[#allocation34_spill] sm:$0xff]  ;;  %v12274_v61 = vld [vmem:[#allocation33_spill] sm:$0xff] }
  0xd8   : > { %1480 = vmatpush.msrb.mxu0 %v6728_v58  ;;  %1500 = vmatpush.msrb.mxu1 %v6730_v59  ;;  %v12271_v58 = vld [vmem:[#allocation27_spill] sm:$0xff]  ;;  %v12272_v59 = vld [vmem:[#allocation36_spill] sm:$0xff] }
  0xd9   : > { %1445 = vmatpush.msra.mxu2 %v6746_v0  ;;  %1465 = vmatpush.msra.mxu3 %v6748_v1  ;;  %v12277_v0 = vld [vmem:[#allocation38_spill] sm:$0xff]  ;;  %v12278_v1 = vld [vmem:[#allocation37_spill] sm:$0xff] }
  0xda   : > { %1481 = vmatpush.msrb.mxu0 %v6740_v62  ;;  %1501 = vmatpush.msrb.mxu1 %v6742_v63  ;;  %v12275_v62 = vld [vmem:[#allocation31_spill] sm:$0xff]  ;;  %v12276_v63 = vld [vmem:[#allocation40_spill] sm:$0xff] }
  0xdb   : > { %1446 = vmatpush.msra.mxu2 %v6758_v4  ;;  %1466 = vmatpush.msra.mxu3 %v6760_v5  ;;  %v12281_v4 = vld [vmem:[#allocation41_spill] sm:$0xff]  ;;  %v12282_v5 = vld [vmem:[#allocation39_spill] sm:$0xff] }
  0xdc   : > { %1482 = vmatpush.msrb.mxu0 %v6752_v2  ;;  %1502 = vmatpush.msrb.mxu1 %v6754_v3  ;;  %v12279_v2 = vld [vmem:[#allocation35_spill] sm:$0xff]  ;;  %v12280_v3 = vld [vmem:[#allocation42_spill] sm:$0xff] }
  0xdd   : > { %1447 = vmatpush.msra.mxu2 %v6770_v8  ;;  %1467 = vmatpush.msra.mxu3 %v6772_v9  ;;  %v12285_v8 = vld [vmem:[#allocation46_spill] sm:$0xff]  ;;  %v12286_v9 = vld [vmem:[#allocation45_spill] sm:$0xff] }
  0xde   : > { %1483 = vmatpush.msrb.mxu0 %v6764_v6  ;;  %1503 = vmatpush.msrb.mxu1 %v6766_v7  ;;  %v12283_v6 = vld [vmem:[#allocation44_spill] sm:$0xff]  ;;  %v12284_v7 = vld [vmem:[#allocation43_spill] sm:$0xff] }
  0xdf   : > { %1448 = vmatpush.msra.mxu2 %v6782_v13  ;;  %1468 = vmatpush.msra.mxu3 %v6784_v14  ;;  %v12287_v13 = vld [vmem:[#allocation48_spill] sm:$0xff]  ;;  %v12288_v14 = vld [vmem:[#allocation47_spill] sm:$0xff] }
  0xe0   : > { %1484 = vmatpush.msrb.mxu0 %v6776_v10  ;;  %1504 = vmatpush.msrb.mxu1 %v6778_v11  ;;  %v375_v10 = vpop.f32.mrf.mxu2  ;;  %v395_v11 = vpop.f32.mrf.mxu3 }
  0xe1   : > { %1449 = vmatpush.msra.mxu2 %v6794_v17  ;;  %1469 = vmatpush.msra.mxu3 %v6796_v18  ;;  %v12291_v17 = vld [vmem:[#allocation52_spill] sm:$0xff]  ;;  %v12292_v18 = vld [vmem:[#allocation51_spill] sm:$0xff] }
  0xe2   : > { %1485 = vmatpush.msrb.mxu0 %v6788_v15  ;;  %1505 = vmatpush.msrb.mxu1 %v6790_v16  ;;  %v12289_v15 = vld [vmem:[#allocation50_spill] sm:$0xff]  ;;  %v12290_v16 = vld [vmem:[#allocation49_spill] sm:$0xff] }
  0xe3   : > { %1450 = vmatpush.msra.mxu2 %v6806_v21  ;;  %1470 = vmatpush.msra.mxu3 %v6808_v22  ;;  %v12293_v21 = vld [vmem:[#allocation54_spill] sm:$0xff]  ;;  %v12294_v22 = vld [vmem:[#allocation53_spill] sm:$0xff] }
  0xe4   : > { %1486 = vmatpush.msrb.mxu0 %v6800_v19  ;;  %1506 = vmatpush.msrb.mxu1 %v6802_v20  ;;  %v936_v19 = vpop.f32.mrf.mxu0  ;;  %v956_v20 = vpop.f32.mrf.mxu1 }
  0xe5   : > { %1451 = vmatpush.msra.mxu2 %v6820_v25  ;;  %1471 = vmatpush.msra.mxu3 %v12253_v39  ;;  %v12296_v25 = vld [vmem:[#allocation55_spill] sm:$0xff]  ;;  %v12298_v39 = vld [vmem:[#allocation57_spill] sm:$0xff] }
  0xe6   : > { %1487 = vmatpush.msrb.mxu0 %v6812_v23  ;;  %1507 = vmatpush.msrb.mxu1 %v12255_v41  ;;  %v12295_v23 = vld [vmem:[#allocation56_spill] sm:$0xff]  ;;  %v12300_v41 = vld [vmem:[#allocation59_spill] sm:$0xff] }
  0xe7   : > { %1452 = vmatpush.msra.mxu2 %v12254_v40  ;;  %1472 = vmatpush.msra.mxu3 %v12257_v43  ;;  %v12299_v40 = vld [vmem:[#allocation60_spill] sm:$0xff] }
  0xe8   : > { %1488 = vmatpush.msrb.mxu0 %v6826_v27  ;;  %1508 = vmatpush.msrb.mxu1 %v12259_v45  ;;  %v415_v27 = vpop.f32.mrf.mxu2  ;;  %v435_v30 = vpop.f32.mrf.mxu3  ;;  %v12301_v45 = vld [vmem:[#allocation62_spill] sm:$0xff] }
  0xe9   : > { %1453 = vmatpush.msra.mxu2 %v12258_v44  ;;  %1473 = vmatpush.msra.mxu3 %v12261_v47  ;;  %v12302_v47 = vld [vmem:[#allocation61_spill] sm:$0xff] }
  0xea   : > { %1489 = vmatpush.msrb.mxu0 %v12256_v42  ;;  %1509 = vmatpush.msrb.mxu1 %v12263_v49  ;;  %v302_v42 = vperm.slane %v7297_v31, 0  ;;  %v12303_v49 = vld [vmem:[#allocation64_spill] sm:$0xff] }
  0xeb   : > { %1454 = vmatpush.msra.mxu2 %v12262_v48  ;;  %1474 = vmatpush.msra.mxu3 %v12266_v52  ;;  %v957_v48 = vadd.f32 %v956_v20, %v936_v19 }
  0xec   : > { %1490 = vmatpush.msrb.mxu0 %v12260_v46  ;;  %1510 = vmatpush.msrb.mxu1 %v12267_v53  ;;  %v1016_v43 = vpop.f32.mrf.mxu0  ;;  %v1036_v44 = vpop.f32.mrf.mxu1  ;;  %v304_v46 = vperm.slane %v7297_v31, 2  ;;  %v7308_v52 = vadd.f32 %v375_v10, %v302_v42 }
  0xed   : > { %1519 = vmatpush.msrb.mxu2 %v12264_v50  ;;  %1539 = vmatpush.msrb.mxu3 %v12270_v57  ;;  %v1037_v50 = vadd.f32 %v1036_v44, %v1016_v43 }
  0xee   : > { %1491 = vmatpush.msrb.mxu0 %v12265_v51  ;;  %1511 = vmatpush.msrb.mxu1 %v12271_v58  ;;  %v12304_v51 = vld [vmem:[#allocation63_spill] sm:$0xff]  ;;  %12305 = vst [vmem:[#allocation14_spill] sm:$0xff] %v7308_v52  ;;  %v7310_v53 = vadd.f32 %v415_v27, %v304_v46  ;;  %v1239_v58 = vadd.f32 %v957_v48, %v7308_v52  ;;  %v306_v27 = vperm.slane %v7297_v31, 4 }
  0xef   : > { %1520 = vmatpush.msrb.mxu2 %v12268_v54  ;;  %1540 = vmatpush.msrb.mxu3 %v12274_v61  ;;  %v12307_v54 = vld [vmem:[#allocation65_spill] sm:$0xff] }
  0xf0   : > { %1492 = vmatpush.msrb.mxu0 %v12269_v56  ;;  %1512 = vmatpush.msrb.mxu1 %v12275_v62  ;;  %12306 = vst [vmem:[#allocation16_spill] sm:$0xff] %v7310_v53  ;;  %v455_v56 = vpop.f32.mrf.mxu2  ;;  %v7313_v57 = vpop.f32.mrf.mxu3 }
  0xf1   : > { %1521 = vmatpush.msrb.mxu2 %v12272_v59  ;;  %1541 = vmatpush.msrb.mxu3 %v12278_v1  ;;  %v1241_v59 = vadd.f32 %v1037_v50, %v7310_v53  ;;  %v7343_v46 = vadd.f32 %v455_v56, %v306_v27 }
  0xf2   : > { %1493 = vmatpush.msrb.mxu0 %v12273_v60  ;;  %1513 = vmatpush.msrb.mxu1 %v12279_v2  ;;  %v5105_v60 = vmul.f32 -1.442695, %v1239_v58 }
  0xf3   : > { %1522 = vmatpush.msrb.mxu2 %v12276_v63  ;;  %1542 = vmatpush.msrb.mxu3 %v12281_v4  ;;  %v5107_v61 = vmul.f32 -1.442695, %v1241_v59 }
  0xf4   : > { %1494 = vmatpush.msrb.mxu0 %v12277_v0  ;;  %1514 = vmatpush.msrb.mxu1 %v12282_v5  ;;  %5233 = vpow2.f32 %v5105_v60 }
  0xf5   : > { %1523 = vmatpush.msrb.mxu2 %v12280_v3  ;;  %1543 = vmatpush.msrb.mxu3 %v12284_v7  ;;  %5235 = vpow2.f32 %v5107_v61  ;;  %v305_v7 = vperm.slane %v7297_v31, 3 }
  0xf7   : > { %1524 = vmatpush.msrb.mxu2 %v12283_v6  ;;  %1544 = vmatpush.msrb.mxu3 %v12286_v9  ;;  %v303_v6 = vperm.slane %v7297_v31, 1 }
  0xf8   : > { %v495_v62 = vpop.f32.mrf.mxu2  ;;  %v7317_v63 = vpop.f32.mrf.mxu3 }
  0xf9   : > { %1525 = vmatpush.msrb.mxu2 %v12285_v8  ;;  %1545 = vmatpush.msrb.mxu3 %v12288_v14  ;;  %v7327_v8 = vadd.f32 %v395_v11, %v303_v6 }
  0xfa   : > { %v5234_v0 = vpop.eup %5233 }
  0xfb   : > { %1526 = vmatpush.msrb.mxu2 %v12287_v13  ;;  %1546 = vmatpush.msrb.mxu3 %v12290_v16  ;;  %v5236_v1 = vpop.eup %5235  ;;  %v7319_v2 = vadd.f32 1.0, %v5234_v0  ;;  %12308 = vst [vmem:[#allocation13_spill] sm:$0xff] %v7327_v8  ;;  %v7329_v16 = vadd.f32 %v435_v30, %v305_v7  ;;  %v11541_v19 = vrot.slane %v7327_v8, 7 }
  0xfc   : > { %v7321_v5 = vadd.f32 1.0, %v5236_v1 }
  0xfd   : > { %1527 = vmatpush.msrb.mxu2 %v12289_v15  ;;  %1547 = vmatpush.msrb.mxu3 %v12292_v18  ;;  %5237 = vrcp.f32 %v7319_v2  ;;  %12309 = vst [vmem:[#allocation18_spill] sm:$0xff] %v7329_v16  ;;  %vm1260_vm4 = vweird.f32 %v7319_v2  ;;  %v1266_v56 = vand.u32 2147483648, %v7319_v2  ;;  %v1264_v0 = vand.u32 2147483647, %v7319_v2 }
  0xfe   : > { %5239 = vrcp.f32 %v7321_v5  ;;  %v1304_v60 = vand.u32 2147483648, %v7321_v5  ;;  %vm1298_vm5 = vweird.f32 %v7321_v5  ;;  %v1302_v1 = vand.u32 2147483647, %v7321_v5 }
  0xff   : > { %1528 = vmatpush.msrb.mxu2 %v12291_v17  ;;  %1548 = vmatpush.msrb.mxu3 %v12294_v22  ;;  %vm1265_vm8 = vcmp.eq.f32.partialorder %v1264_v0, 8.507059e+37 }
 0x100   : > { %v976_v3 = vpop.f32.mrf.mxu2  ;;  %v996_v4 = vpop.f32.mrf.mxu3  ;;  %vm1303_vm9 = vcmp.eq.f32.partialorder %v1302_v1, 8.507059e+37 }
 0x101   : > { %1529 = vmatpush.msrb.mxu2 %v12293_v21  ;;  %1549 = vmatpush.msrb.mxu3 %v12296_v25  ;;  %v997_v17 = vadd.f32 %v996_v4, %v976_v3  ;;  %v308_v21 = vperm.slane %v7297_v31, 6  ;;  %v11540_v25 = vrot.slane %v7329_v16, 7 }
 0x103   : > { %1530 = vmatpush.msrb.mxu2 %v12295_v23  ;;  %1550 = vmatpush.msrb.mxu3 %v12298_v39  ;;  %v5238_v15 = vpop.eup %5237  ;;  %v1240_v11 = vadd.f32 %v997_v17, %v11541_v19  ;;  %v7584_v19 = vld [vmem:[#allocation6 + $0x5e8] sm:$0xff] }
 0x104   : > { %v5240_v18 = vpop.eup %5239  ;;  %v1256_v22 = vmul.f32 %v5238_v15, %v7319_v2  ;;  %vm1261_vm2 = vweird.f32 %v5238_v15 }
 0x105   : > { %1531 = vmatpush.msrb.mxu2 %v12297_v32  ;;  %1551 = vmatpush.msrb.mxu3 %v12300_v41  ;;  %v1294_v23 = vmul.f32 %v5240_v18, %v7321_v5  ;;  %v5106_v44 = vmul.f32 -1.442695, %v1240_v11  ;;  %vm1299_vm3 = vweird.f32 %v5240_v18  ;;  %vm7351_vm6 = vmor %vm1260_vm4, %vm1261_vm2 }
 0x106   : > { %v1257_v43 = vsub.f32 1.0, %v1256_v22  ;;  %vm1300_vm7 = vmor %vm1298_vm5, %vm1299_vm3 }
 0x107   : > { %1532 = vmatpush.msrb.mxu2 %v12299_v40  ;;  %1552 = vmatpush.msrb.mxu3 %v12302_v47  ;;  %v7341_v40 = vadd.f32 %v495_v62, %v308_v21  ;;  %5241 = vpow2.f32 %v5106_v44 }
 0x109   : > { %1533 = vmatpush.msrb.mxu2 %v12301_v45  ;;  %1553 = vmatpush.msrb.mxu3 %v12304_v51  ;;  %12310 = vst [vmem:[#allocation17_spill] sm:$0xff] %v7341_v40  ;;  %v1295_v45 = vsub.f32 1.0, %v1294_v23 }
 0x10a   : > { %v1056_v13 = vpop.f32.mrf.mxu2 }
 0x10b   : > { %1534 = vmatpush.msrb.mxu2 %v12303_v49  ;;  %1554 = vmatpush.msrb.mxu3 %v12307_v54  ;;  %v1096_v9 = vpop.f32.mrf.mxu0  ;;  %v1076_v14 = vpop.f32.mrf.mxu3  ;;  %v1296_v51 = vmul.f32 %v5240_v18, %v1295_v45  ;;  %v1258_v54 = vmul.f32 %v5238_v15, %v1257_v43  ;;  %v307_v43 = vperm.slane %v7297_v31, 5 }
 0x10c   : > { %v1116_v10 = vpop.f32.mrf.mxu1  ;;  %v1077_v20 = vadd.f32 %v1076_v14, %v1056_v13  ;;  %v1305_v13 = vor.u32 1.1754944e-38, %v1304_v60  ;;  %v1267_v14 = vor.u32 1.1754944e-38, %v1266_v56 }
 0x10d   : > { %v1117_v41 = vadd.f32 %v1116_v10, %v1096_v9  ;;  %v1259_v58 = vadd.f32 %v5238_v15, %v1258_v54  ;;  %v1297_v59 = vadd.f32 %v5240_v18, %v1296_v51  ;;  %v5242_v61 = vpop.eup %5241  ;;  %v7382_v54 = vadd.f32 %v7313_v57, %v307_v43 }
 0x10e   : > { %v1242_v30 = vadd.f32 %v1077_v20, %v11540_v25  ;;  %v7359_v17 = vadd.f32 1.0, %v5242_v61  ;;  %v7581_v25 = vld [vmem:[#allocation6 + $0x5e0] sm:$0xff] }
 0x10f   : > { %v1243_v49 = vadd.f32 %v1117_v41, %v7343_v46  ;;  %v1263_v6 = vsel %vm7351_vm6, %v5238_v15, %v1259_v58  ;;  %v1301_v7 = vsel %vm1300_vm7, %v5240_v18, %v1297_v59 }
 0x110   : > { %v5108_v48 = vmul.f32 -1.442695, %v1242_v30  ;;  %v1268_v2 = vsel %vm1265_vm8, %v1267_v14, %v1263_v6  ;;  %v1306_v5 = vsel %vm1303_vm9, %v1305_v13, %v1301_v7  ;;  %v309_v30 = vperm.slane %v7297_v31, 7  ;;  %v7393_v6 = vld [vmem:[#allocation6 + $0x3e0] sm:$0xff]  ;;  %v12313_v7 = vld [vmem:[#allocation66_spill] sm:$0xff] }
 0x111   : > { %v1363_v22 = vmul.f32 0.0, %v1306_v5  ;;  %v12314_v5 = vld [vmem:[#allocation67_spill] sm:$0xff]  ;;  %vm1275_vm0 = vweird.f32 %v7359_v17  ;;  %v1279_v43 = vand.u32 2147483647, %v7359_v17 }
 0x113   : > { %vm1280_vm4 = vcmp.eq.f32.partialorder %v1279_v43, 8.507059e+37 }
 0x12c   : > { %v1136_v23 = vpop.f32.mrf.mxu2 }
 0x12d   : > { %v1176_v32 = vpop.f32.mrf.mxu0  ;;  %v1156_v27 = vpop.f32.mrf.mxu3 }
 0x12e   : > { %v1196_v39 = vpop.f32.mrf.mxu1  ;;  %v1157_v56 = vadd.f32 %v1156_v27, %v1136_v23  ;;  %v7413_v23 = vld [vmem:[#allocation6 + $0x320] sm:$0xff]  ;;  %v12316_v27 = vld [vmem:[#allocation69_spill] sm:$0xff] }
 0x12f   : > { %v1197_v42 = vadd.f32 %v1196_v39, %v1176_v32 }
 0x131   : > { %v1245_v47 = vadd.f32 %v1197_v42, %v7341_v40 }
 0x133   : > { %v5109_v50 = vmul.f32 -1.442695, %v1245_v47  ;;  %v7375_v47 = vadd.f32 %v7317_v63, %v309_v30 }
 0x135   : > { %5243 = vpow2.f32 %v5109_v50  ;;  %v11539_v62 = vrot.slane %v7375_v47, 7 }
 0x136   : > { %5245 = vpow2.f32 %v5108_v48 }
 0x137   : > { %5247 = vtanh.f32 %v1243_v49 }
 0x13b   : > { %v5244_v3 = vpop.eup %5243 }
 0x13c   : > { %v5246_v4 = vpop.eup %5245  ;;  %v1331_v9 = vadd.f32 1.0, %v5244_v3 }
 0x13d   : > { %v5248_v10 = vpop.eup %5247  ;;  %v7361_v20 = vadd.f32 1.0, %v5246_v4  ;;  %v11538_v4 = vrot.slane %v7382_v54, 7 }
 0x13e   : > { %5249 = vrcp.f32 %v1331_v9  ;;  %v1365_v21 = vmul.f32 %v5248_v10, %v1268_v2  ;;  %v1344_v41 = vand.u32 2147483648, %v1331_v9  ;;  %v1342_v45 = vand.u32 2147483647, %v1331_v9  ;;  %v7401_v2 = vld [vmem:[#allocation6 + $0x3a0] sm:$0xff] }
 0x13f   : > { %5251 = vrcp.f32 %v7359_v17  ;;  %vm1338_vm11 = vweird.f32 %v1331_v9  ;;  %v1319_v30 = vand.u32 2147483648, %v7361_v20  ;;  %vm1313_vm1 = vweird.f32 %v7361_v20 }
 0x140   : > { %5253 = vrcp.f32 %v7361_v20  ;;  %v7365_v18 = vadd.f32 %v1365_v21, %v1363_v22  ;;  %v1345_v51 = vor.u32 1.1754944e-38, %v1344_v41  ;;  %vm1343_vm13 = vcmp.eq.f32.partialorder %v1342_v45, 8.507059e+37  ;;  %v7405_v21 = vld [vmem:[#allocation6 + $0x360] sm:$0xff]  ;;  %v12315_v22 = vld [vmem:[#allocation68_spill] sm:$0xff] }
 0x141   : > { %v7429_v45 = vld [vmem:[#allocation6 + $0x2e0] sm:$0xff] }
 0x142   : > { %5255 = vtanh.f32 %v7365_v18  ;;  %v7472_v41 = vld [vmem:[#allocation6 + $0x120] sm:$0xff] }
 0x144   : > { %v5250_v15 = vpop.eup %5249 }
 0x145   : > { %v1334_v11 = vmul.f32 %v5250_v15, %v1331_v9  ;;  %v7368_v39 = vpop.eup %5251  ;;  %vm1339_vm10 = vweird.f32 %v5250_v15  ;;  %v1244_v9 = vadd.f32 %v1157_v56, %v11538_v4  ;;  %v7449_v56 = vld [vmem:[#allocation6 + $0x260] sm:$0xff]  ;;  %v7574_v4 = vld [vmem:[#allocation6 + $0x628] sm:$0xff] }
 0x146   : > { %v7371_v42 = vpop.eup %5253  ;;  %v1271_v49 = vmul.f32 %v7368_v39, %v7359_v17  ;;  %vm1340_vm12 = vmor %vm1338_vm11, %vm1339_vm10  ;;  %vm1276_vm14 = vweird.f32 %v7368_v39 }
 0x147   : > { %v1335_v32 = vsub.f32 1.0, %v1334_v11  ;;  %v1309_v50 = vmul.f32 %v7371_v42, %v7361_v20  ;;  %vm1314_vm15 = vweird.f32 %v7371_v42  ;;  %vm7423_vm2 = vmor %vm1275_vm0, %vm1276_vm14 }
 0x148   : > { %v5256_v58 = vpop.eup %5255  ;;  %v1272_v1 = vsub.f32 1.0, %v1271_v49  ;;  %vm7435_vm3 = vmor %vm1313_vm1, %vm1314_vm15 }
 0x149   : > { %v1336_v44 = vmul.f32 %v5250_v15, %v1335_v32  ;;  %v1310_v3 = vsub.f32 1.0, %v1309_v50  ;;  %v1281_v32 = vand.u32 2147483648, %v7359_v17 }
 0x14a   : > { %v1273_v14 = vmul.f32 %v7368_v39, %v1272_v1 }
 0x14b   : > { %v1337_v48 = vadd.f32 %v5250_v15, %v1336_v44  ;;  %v1311_v13 = vmul.f32 %v7371_v42, %v1310_v3  ;;  %v1317_v44 = vand.u32 2147483647, %v7361_v20  ;;  %v7453_v3 = vld [vmem:[#allocation6 + $0x220] sm:$0xff] }
 0x14d   : > { %v1341_v31 = vsel %vm1340_vm12, %v5250_v15, %v1337_v48  ;;  %v1274_v15 = vadd.f32 %v7368_v39, %v1273_v14  ;;  %v1312_v11 = vadd.f32 %v7371_v42, %v1311_v13  ;;  %v12319_v48 = vld [vmem:[#allocation70_spill] sm:$0xff]  ;;  %vm1318_vm5 = vcmp.eq.f32.partialorder %v1317_v44, 8.507059e+37 }
 0x14e   : > { %v1346_v59 = vsel %vm1343_vm13, %v1345_v51, %v1341_v31  ;;  %v1236_v63 = vpop.f32.mrf.mxu3  ;;  %v7445_v31 = vld [vmem:[#allocation6 + $0x2a0] sm:$0xff] }
 0x14f   : > { %v1216_v60 = vpop.f32.mrf.mxu2  ;;  %v7384_v61 = vmul.f32 %v5256_v58, %v1346_v59  ;;  %v1278_v51 = vsel %vm7423_vm2, %v7368_v39, %v1274_v15  ;;  %v1316_v17 = vsel %vm7435_vm3, %v7371_v42, %v1312_v11  ;;  %v12322_v58 = vld [vmem:[#allocation71_spill] sm:$0xff]  ;;  %v12323_v39 = vld [vmem:[#allocation72_spill] sm:$0xff] }
 0x150   : > { %v1237_v0 = vadd.f32 %v1236_v63, %v1216_v60  ;;  %v1320_v60 = vor.u32 1.1754944e-38, %v1319_v30  ;;  %v1282_v63 = vor.u32 1.1754944e-38, %v1281_v32  ;;  %v7467_v11 = vld [vmem:[#allocation6 + $0x160] sm:$0xff] }
 0x151   : > { %1373 = vst [vmem:[#allocation2] sm:$0x1] %v7384_v61  ;;  %1415 = vmatmul.f32.vlgmr.msra.gmra.mxu0 %v7384_v61  ;;  %1455 = vmatmul.f32.vlgmr.msra.gmra.mxu2 %v7384_v61 }
 0x152   : > { %v1246_v57 = vadd.f32 %v1237_v0, %v11539_v62  ;;  %1559 = vmatpush.msra.mxu0 %v7393_v6  ;;  %1599 = vmatpush.msra.mxu2 %v12313_v7  ;;  %v1283_v42 = vsel %vm1280_vm4, %v1282_v63, %v1278_v51  ;;  %v1321_v0 = vsel %vm1318_vm5, %v1320_v60, %v1316_v17  ;;  %v7480_v51 = vld [vmem:[#allocation6 + $0xa0] sm:$0xff]  ;;  %v12329_v17 = vld [vmem:[#allocation77_spill] sm:$0xff] }
 0x153   : > { %v1364_v7 = vmul.f32 0.0, %v1321_v0  ;;  %12328 = vst [vmem:[#allocation20_spill] sm:$0xff] %v7480_v51  ;;  %v7484_v60 = vld [vmem:[#allocation6 + $0x60] sm:$0xff]  ;;  %v7502_v0 = vld [vmem:[#allocation6 + $0x7e8] sm:$0xff] }
 0x154   : > { %v5110_v10 = vmul.f32 -1.442695, %v1246_v57  ;;  %1560 = vmatpush.msra.mxu0 %v7401_v2  ;;  %1600 = vmatpush.msra.mxu2 %v12314_v5  ;;  %v12324_v57 = vld [vmem:[#allocation73_spill] sm:$0xff]  ;;  %v7463_v5 = vld [vmem:[#allocation6 + $0x1a0] sm:$0xff]  ;;  %12330 = vst [vmem:[#allocation15_spill] sm:$0xff] %v7484_v60 }
 0x155   : > { %v12331_v63 = vld [vmem:[#allocation79_spill] sm:$0xff] }
 0x156   : > { %5257 = vpow2.f32 %v5110_v10  ;;  %1561 = vmatpush.msra.mxu0 %v7405_v21  ;;  %1601 = vmatpush.msra.mxu2 %v12315_v22  ;;  %v12325_v10 = vld [vmem:[#allocation74_spill] sm:$0xff]  ;;  %v12326_v22 = vld [vmem:[#allocation75_spill] sm:$0xff] }
 0x157   : > { %5259 = vtanh.f32 %v1244_v9  ;;  %v7457_v9 = vld [vmem:[#allocation6 + $0x1e0] sm:$0xff] }
 0x158   : > { %1562 = vmatpush.msra.mxu0 %v7413_v23  ;;  %1602 = vmatpush.msra.mxu2 %v12316_v27  ;;  %v12327_v27 = vld [vmem:[#allocation76_spill] sm:$0xff]  ;;  %v12347_v62 = vld [vmem:[#allocation99_spill] sm:$0xff] }
 0x159   : > { %1495 = vmatmul.f32.vlgmr.msrb.gmra.mxu0 %v7384_v61  ;;  %1535 = vmatmul.f32.vlgmr.msrb.gmra.mxu2 %v7384_v61 }
 0x15a   : > { %1563 = vmatpush.msra.mxu0 %v7429_v45  ;;  %1603 = vmatpush.msra.mxu2 %v12319_v48  ;;  %v7476_v48 = vld [vmem:[#allocation6 + $0xe0] sm:$0xff] }
 0x15c   : > { %v5258_v49 = vpop.eup %5257  ;;  %1564 = vmatpush.msra.mxu0 %v7445_v31  ;;  %1604 = vmatpush.msra.mxu2 %v12322_v58 }
 0x15d   : > { %v1332_v20 = vadd.f32 1.0, %v5258_v49  ;;  %v5260_v59 = vpop.eup %5259 }
 0x15e   : > { %1565 = vmatpush.msra.mxu0 %v7449_v56  ;;  %1605 = vmatpush.msra.mxu2 %v12323_v39  ;;  %v1366_v1 = vmul.f32 %v5260_v59, %v1283_v42  ;;  %v12333_v39 = vld [vmem:[#allocation81_spill] sm:$0xff]  ;;  %v7498_v42 = vld [vmem:[#allocation6 + $0x7e0] sm:$0xff] }
 0x15f   : > { %5261 = vrcp.f32 %v1332_v20  ;;  %v1359_v32 = vand.u32 2147483648, %v1332_v20  ;;  %v1357_v44 = vand.u32 2147483647, %v1332_v20  ;;  %vm1353_vm7 = vweird.f32 %v1332_v20 }
 0x160   : > { %1566 = vmatpush.msra.mxu0 %v7453_v3  ;;  %1606 = vmatpush.msra.mxu2 %v12324_v57  ;;  %v7461_v14 = vadd.f32 %v1366_v1, %v1364_v7  ;;  %v7505_v1 = vld [vmem:[#allocation6 + $0x3f0] sm:$0xff]  ;;  %v7509_v57 = vld [vmem:[#allocation6 + $0x7a0] sm:$0xff]  ;;  %v7512_v7 = vld [vmem:[#allocation6 + $0x7a8] sm:$0xff] }
 0x161   : > { %v1360_v50 = vor.u32 1.1754944e-38, %v1359_v32  ;;  %vm1358_vm9 = vcmp.eq.f32.partialorder %v1357_v44, 8.507059e+37  ;;  %12334 = vst [vmem:[#allocation21_spill] sm:$0xff] %v7505_v1  ;;  %v12339_v32 = vld [vmem:[#allocation89_spill] sm:$0xff]  ;;  %v7544_v44 = vld [vmem:[#allocation6 + $0x6e8] sm:$0xff] }
 0x162   : > { %1567 = vmatpush.msra.mxu0 %v7457_v9  ;;  %1607 = vmatpush.msra.mxu2 %v12325_v10  ;;  %5263 = vtanh.f32 %v7461_v14  ;;  %v7515_v10 = vld [vmem:[#allocation6 + $0x3b0] sm:$0xff] }
 0x163   : > { %12335 = vst [vmem:[#allocation24_spill] sm:$0xff] %v7515_v10 }
 0x164   : > { %1568 = vmatpush.msra.mxu0 %v7463_v5  ;;  %1608 = vmatpush.msra.mxu2 %v12326_v22  ;;  %v7522_v22 = vld [vmem:[#allocation6 + $0x768] sm:$0xff] }
 0x165   : > { %v5262_v13 = vpop.eup %5261 }
 0x166   : > { %v1349_v15 = vmul.f32 %v5262_v13, %v1332_v20  ;;  %1569 = vmatpush.msra.mxu0 %v7467_v11  ;;  %1609 = vmatpush.msra.mxu2 %v12327_v27  ;;  %vm1354_vm6 = vweird.f32 %v5262_v13  ;;  %v7490_v20 = vld [vmem:[#allocation6 + $0x20] sm:$0xff] }
 0x167   : > { %vm1355_vm8 = vmor %vm1353_vm7, %vm1354_vm6  ;;  %12332 = vst [vmem:[#allocation22_spill] sm:$0xff] %v7490_v20  ;;  %v7529_v27 = vld [vmem:[#allocation6 + $0x720] sm:$0xff] }
 0x168   : > { %v1350_v30 = vsub.f32 1.0, %v1349_v15  ;;  %1570 = vmatpush.msra.mxu0 %v7472_v41  ;;  %1610 = vmatpush.msra.mxu2 %v7028_v37  ;;  %v5264_v58 = vpop.eup %5263  ;;  %v12337_v15 = vld [vmem:[#allocation86_spill] sm:$0xff] }
 0x16a   : > { %v1351_v43 = vmul.f32 %v5262_v13, %v1350_v30  ;;  %1571 = vmatpush.msra.mxu0 %v7476_v48  ;;  %1611 = vmatpush.msra.mxu2 %v7031_v34  ;;  %v7532_v30 = vld [vmem:[#allocation6 + $0x728] sm:$0xff] }
 0x16c   : > { %v1352_v49 = vadd.f32 %v5262_v13, %v1351_v43  ;;  %1572 = vmatpush.msra.mxu0 %v7480_v51  ;;  %1612 = vmatpush.msra.mxu2 %v12329_v17  ;;  %v7541_v43 = vld [vmem:[#allocation6 + $0x6e0] sm:$0xff] }
 0x16d   : > { %v7551_v17 = vld [vmem:[#allocation6 + $0x6a0] sm:$0xff] }
 0x16e   : > { %v1356_v37 = vsel %vm1355_vm8, %v5262_v13, %v1352_v49  ;;  %1573 = vmatpush.msra.mxu0 %v7484_v60  ;;  %1613 = vmatpush.msra.mxu2 %v12331_v63  ;;  %v7519_v13 = vld [vmem:[#allocation6 + $0x760] sm:$0xff]  ;;  %v7547_v49 = vld [vmem:[#allocation6 + $0x2f0] sm:$0xff]  ;;  %v7620_v60 = vld [vmem:[#allocation6 + $0x4e8] sm:$0xff] }
 0x16f   : > { %v1361_v59 = vsel %vm1358_vm9, %v1360_v50, %v1356_v37  ;;  %12340 = vst [vmem:[#allocation26_spill] sm:$0xff] %v7547_v49  ;;  %v12341_v50 = vld [vmem:[#allocation91_spill] sm:$0xff]  ;;  %v7554_v37 = vld [vmem:[#allocation6 + $0x6a8] sm:$0xff] }
 0x170   : > { %v7488_v34 = vmul.f32 %v5264_v58, %v1361_v59  ;;  %1574 = vmatpush.msra.mxu0 %v7490_v20  ;;  %1614 = vmatpush.msra.mxu2 %v12333_v39  ;;  %v7557_v58 = vld [vmem:[#allocation6 + $0x2b0] sm:$0xff]  ;;  %v7561_v63 = vld [vmem:[#allocation6 + $0x660] sm:$0xff]  ;;  %v7564_v39 = vld [vmem:[#allocation6 + $0x668] sm:$0xff]  ;;  %12363 = vst [vmem:[#allocation37_spill] sm:$0xff] %v7620_v60 }
 0x171   : > { %1575 = vmatmul.f32.vlgmr.msra.gmra.mxu0 %v7384_v61  ;;  %1615 = vmatmul.f32.vlgmr.msra.gmra.mxu2 %v7384_v61  ;;  %12342 = vst [vmem:[#allocation25_spill] sm:$0xff] %v7557_v58  ;;  %v12343_v59 = vld [vmem:[#allocation93_spill] sm:$0xff]  ;;  %v7617_v20 = vld [vmem:[#allocation6 + $0x4e0] sm:$0xff] }
 0x172   : > { %1374 = vst [vmem:[#allocation2 + $0xf] sm:$0x1] %v7488_v34  ;;  %1435 = vmatmul.f32.vlgmr.msra.gmra.mxu1 %v7488_v34  ;;  %1475 = vmatmul.f32.vlgmr.msra.gmra.mxu3 %v7488_v34 }
 0x173   : > { %1579 = vmatpush.msra.mxu1 %v7498_v42  ;;  %1619 = vmatpush.msra.mxu3 %v7502_v0  ;;  %12362 = vst [vmem:[#allocation38_spill] sm:$0xff] %v7617_v20 }
 0x174   : > { %1639 = vmatpush.msrb.mxu0 %v7505_v1  ;;  %1679 = vmatpush.msrb.mxu2 %v7052_v26  ;;  %v7525_v26 = vld [vmem:[#allocation6 + $0x370] sm:$0xff]  ;;  %v7612_v1 = vld [vmem:[#allocation6 + $0x528] sm:$0xff] }
 0x175   : > { %1580 = vmatpush.msra.mxu1 %v7509_v57  ;;  %1620 = vmatpush.msra.mxu3 %v7512_v7  ;;  %12336 = vst [vmem:[#allocation19_spill] sm:$0xff] %v7525_v26 }
 0x176   : > { %1640 = vmatpush.msrb.mxu0 %v7515_v10  ;;  %1680 = vmatpush.msrb.mxu2 %v7059_v29  ;;  %v7535_v29 = vld [vmem:[#allocation6 + $0x330] sm:$0xff]  ;;  %v7609_v10 = vld [vmem:[#allocation6 + $0x520] sm:$0xff]  ;;  %12359 = vst [vmem:[#allocation40_spill] sm:$0xff] %v7612_v1 }
 0x177   : > { %1581 = vmatpush.msra.mxu1 %v7519_v13  ;;  %1621 = vmatpush.msra.mxu3 %v7522_v22  ;;  %12338 = vst [vmem:[#allocation28_spill] sm:$0xff] %v7535_v29 }
 0x178   : > { %1641 = vmatpush.msrb.mxu0 %v7525_v26  ;;  %1681 = vmatpush.msrb.mxu2 %v12337_v15  ;;  %v7567_v15 = vld [vmem:[#allocation6 + $0x270] sm:$0xff]  ;;  %v12357_v26 = vld [vmem:[#allocation108_spill] sm:$0xff]  ;;  %12358 = vst [vmem:[#allocation31_spill] sm:$0xff] %v7609_v10 }
 0x179   : > { %1582 = vmatpush.msra.mxu1 %v7529_v27  ;;  %1622 = vmatpush.msra.mxu3 %v7532_v30  ;;  %12344 = vst [vmem:[#allocation23_spill] sm:$0xff] %v7567_v15 }
 0x17a   : > { %1642 = vmatpush.msrb.mxu0 %v7535_v29  ;;  %1682 = vmatpush.msrb.mxu2 %v12339_v32  ;;  %v12345_v32 = vld [vmem:[#allocation96_spill] sm:$0xff]  ;;  %v7601_v29 = vld [vmem:[#allocation6 + $0x560] sm:$0xff] }
 0x17b   : > { %1515 = vmatmul.f32.vlgmr.msrb.gmra.mxu1 %v7488_v34  ;;  %1555 = vmatmul.f32.vlgmr.msrb.gmra.mxu3 %v7488_v34  ;;  %12354 = vst [vmem:[#allocation34_spill] sm:$0xff] %v7601_v29 }
 0x17c   : > { %1583 = vmatpush.msra.mxu1 %v7541_v43  ;;  %1623 = vmatpush.msra.mxu3 %v7544_v44 }
 0x17d   : > { %1643 = vmatpush.msrb.mxu0 %v7547_v49  ;;  %1683 = vmatpush.msrb.mxu2 %v12341_v50  ;;  %v7571_v50 = vld [vmem:[#allocation6 + $0x620] sm:$0xff]  ;;  %v12353_v49 = vld [vmem:[#allocation105_spill] sm:$0xff] }
 0x17e   : > { %1584 = vmatpush.msra.mxu1 %v7551_v17  ;;  %1624 = vmatpush.msra.mxu3 %v7554_v37 }
 0x17f   : > { %1644 = vmatpush.msrb.mxu0 %v7557_v58  ;;  %1684 = vmatpush.msrb.mxu2 %v12343_v59  ;;  %v7577_v59 = vld [vmem:[#allocation6 + $0x230] sm:$0xff]  ;;  %v7591_v58 = vld [vmem:[#allocation6 + $0x5a0] sm:$0xff] }
 0x180   : > { %1585 = vmatpush.msra.mxu1 %v7561_v63  ;;  %1625 = vmatpush.msra.mxu3 %v7564_v39  ;;  %12346 = vst [vmem:[#allocation32_spill] sm:$0xff] %v7577_v59 }
 0x181   : > { %1645 = vmatpush.msrb.mxu0 %v7567_v15  ;;  %1685 = vmatpush.msrb.mxu2 %v12345_v32  ;;  %v7587_v32 = vld [vmem:[#allocation6 + $0x1f0] sm:$0xff]  ;;  %v12349_v15 = vld [vmem:[#allocation102_spill] sm:$0xff]  ;;  %12350 = vst [vmem:[#allocation29_spill] sm:$0xff] %v7591_v58 }
 0x182   : > { %1586 = vmatpush.msra.mxu1 %v7571_v50  ;;  %1626 = vmatpush.msra.mxu3 %v7574_v4  ;;  %12348 = vst [vmem:[#allocation30_spill] sm:$0xff] %v7587_v32 }
 0x183   : > { %1646 = vmatpush.msrb.mxu0 %v7577_v59  ;;  %1686 = vmatpush.msrb.mxu2 %v12347_v62  ;;  %v7594_v59 = vld [vmem:[#allocation6 + $0x5a8] sm:$0xff]  ;;  %v7597_v62 = vld [vmem:[#allocation6 + $0x1b0] sm:$0xff] }
 0x184   : > { %1587 = vmatpush.msra.mxu1 %v7581_v25  ;;  %1627 = vmatpush.msra.mxu3 %v7584_v19  ;;  %12351 = vst [vmem:[#allocation27_spill] sm:$0xff] %v7594_v59 }
 0x185   : > { %1647 = vmatpush.msrb.mxu0 %v7587_v32  ;;  %1687 = vmatpush.msrb.mxu2 %v12349_v15  ;;  %12352 = vst [vmem:[#allocation36_spill] sm:$0xff] %v7597_v62  ;;  %v7604_v32 = vld [vmem:[#allocation6 + $0x568] sm:$0xff]  ;;  %v12356_v15 = vld [vmem:[#allocation78_spill] sm:$0xff] }
 0x186   : > { %1588 = vmatpush.msra.mxu1 %v7591_v58  ;;  %1628 = vmatpush.msra.mxu3 %v7594_v59  ;;  %12355 = vst [vmem:[#allocation33_spill] sm:$0xff] %v7604_v32 }
 0x187   : > { %1648 = vmatpush.msrb.mxu0 %v7597_v62  ;;  %1688 = vmatpush.msrb.mxu2 %v12353_v49  ;;  %v12360_v49 = vld [vmem:[#allocation80_spill] sm:$0xff]  ;;  %v12361_v62 = vld [vmem:[#allocation111_spill] sm:$0xff] }
 0x188   : > { %1589 = vmatpush.msra.mxu1 %v7601_v29  ;;  %1629 = vmatpush.msra.mxu3 %v7604_v32  ;;  %v11700_v29 = vrot.slane %v7327_v8, 5 }
 0x189   : > { %1649 = vmatpush.msrb.mxu0 %v12356_v15  ;;  %1689 = vmatpush.msrb.mxu2 %v12357_v26  ;;  %v12364_v26 = vld [vmem:[#allocation82_spill] sm:$0xff] }
 0x18a   : > { %1590 = vmatpush.msra.mxu1 %v7609_v10  ;;  %1630 = vmatpush.msra.mxu3 %v7612_v1  ;;  %v12365_v15 = vld [vmem:[#allocation114_spill] sm:$0xff]  ;;  %v7625_v10 = vld [vmem:[#allocation6 + $0x4a0] sm:$0xff]  ;;  %v7628_v1 = vld [vmem:[#allocation6 + $0x4a8] sm:$0xff] }
 0x18b   : > { %1650 = vmatpush.msrb.mxu0 %v12360_v49  ;;  %1690 = vmatpush.msrb.mxu2 %v12361_v62  ;;  %12366 = vst [vmem:[#allocation35_spill] sm:$0xff] %v7625_v10  ;;  %v12368_v62 = vld [vmem:[#allocation83_spill] sm:$0xff] }
 0x18c   : > { %1591 = vmatpush.msra.mxu1 %v7617_v20  ;;  %1631 = vmatpush.msra.mxu3 %v7620_v60  ;;  %12367 = vst [vmem:[#allocation42_spill] sm:$0xff] %v7628_v1  ;;  %v7633_v49 = vld [vmem:[#allocation6 + $0x460] sm:$0xff]  ;;  %v7636_v60 = vld [vmem:[#allocation6 + $0x468] sm:$0xff] }
 0x18d   : > { %1651 = vmatpush.msrb.mxu0 %v12364_v26  ;;  %1691 = vmatpush.msrb.mxu2 %v12365_v15  ;;  %12369 = vst [vmem:[#allocation41_spill] sm:$0xff] %v7633_v49  ;;  %v12371_v26 = vld [vmem:[#allocation85_spill] sm:$0xff]  ;;  %v7641_v15 = vld [vmem:[#allocation6 + $0x420] sm:$0xff] }
 0x18e   : > { %1592 = vmatpush.msra.mxu1 %v7625_v10  ;;  %1632 = vmatpush.msra.mxu3 %v7628_v1  ;;  %12370 = vst [vmem:[#allocation39_spill] sm:$0xff] %v7636_v60  ;;  %v7644_v1 = vld [vmem:[#allocation6 + $0x428] sm:$0xff] }
 0x18f   : > { %1652 = vmatpush.msrb.mxu0 %v12368_v62  ;;  %1692 = vmatpush.msrb.mxu2 %v7163_v33  ;;  %12372 = vst [vmem:[#allocation44_spill] sm:$0xff] %v7641_v15  ;;  %v12374_v33 = vld [vmem:[#allocation88_spill] sm:$0xff]  ;;  %v7652_v62 = vld [vmem:[#allocation6 + $0x7f0] sm:$0xff] }
 0x190   : > { %1593 = vmatpush.msra.mxu1 %v7633_v49  ;;  %1633 = vmatpush.msra.mxu3 %v7636_v60  ;;  %12373 = vst [vmem:[#allocation43_spill] sm:$0xff] %v7644_v1 }
 0x191   : > { %1653 = vmatpush.msrb.mxu0 %v12371_v26  ;;  %1693 = vmatpush.msrb.mxu2 %v7172_v28  ;;  %12375 = vst [vmem:[#allocation46_spill] sm:$0xff] %v7652_v62  ;;  %v7656_v28 = vld [vmem:[#allocation6 + $0x7f8] sm:$0xff]  ;;  %v7659_v26 = vld [vmem:[#allocation6 + $0x7b0] sm:$0xff] }
 0x192   : > { %1594 = vmatpush.msra.mxu1 %v7641_v15  ;;  %1634 = vmatpush.msra.mxu3 %v7644_v1  ;;  %12376 = vst [vmem:[#allocation45_spill] sm:$0xff] %v7656_v28  ;;  %v7664_v1 = vld [vmem:[#allocation6 + $0x3c8] sm:$0xff]  ;;  %v7667_v15 = vld [vmem:[#allocation6 + $0x770] sm:$0xff] }
 0x193   : > { %1654 = vmatpush.msrb.mxu0 %v12374_v33  ;;  %1694 = vmatpush.msrb.mxu2 %v7181_v36  ;;  %12377 = vst [vmem:[#allocation48_spill] sm:$0xff] %v7659_v26  ;;  %v12378_v36 = vld [vmem:[#allocation95_spill] sm:$0xff]  ;;  %v12379_v33 = vld [vmem:[#allocation84_spill] sm:$0xff] }
 0x194   : > { %1595 = vmatmul.f32.vlgmr.msra.gmra.mxu1 %v7488_v34  ;;  %1635 = vmatmul.f32.vlgmr.msra.gmra.mxu3 %v7488_v34  ;;  %12380 = vst [vmem:[#allocation47_spill] sm:$0xff] %v7664_v1 }
 0x195   : > { %1655 = vmatmul.f32.vlgmr.msrb.gmra.mxu0 %v7384_v61  ;;  %1659 = vmatpush.msrb.mxu1 %v7652_v62  ;;  %12381 = vst [vmem:[#allocation50_spill] sm:$0xff] %v7667_v15  ;;  %v12383_v62 = vld [vmem:[#allocation87_spill] sm:$0xff] }
 0x196   : > { %1695 = vmatmul.f32.vlgmr.msrb.gmra.mxu2 %v7384_v61  ;;  %1699 = vmatpush.msrb.mxu3 %v7656_v28  ;;  %v12382_v61 = vld [vmem:[#allocation98_spill] sm:$0xff]  ;;  %v7672_v28 = vld [vmem:[#allocation6 + $0x388] sm:$0xff] }
 0x197   : > { %1660 = vmatpush.msrb.mxu1 %v7659_v26  ;;  %1915 = vmatpush.msra.mxu0 %v12378_v36  ;;  %12384 = vst [vmem:[#allocation49_spill] sm:$0xff] %v7672_v28  ;;  %v7675_v26 = vld [vmem:[#allocation6 + $0x730] sm:$0xff] }
 0x198   : > { %1700 = vmatpush.msrb.mxu3 %v12379_v33  ;;  %1955 = vmatpush.msra.mxu2 %v7664_v1  ;;  %12385 = vst [vmem:[#allocation52_spill] sm:$0xff] %v7675_v26  ;;  %v12386_v36 = vld [vmem:[#allocation101_spill] sm:$0xff]  ;;  %v12387_v33 = vld [vmem:[#allocation90_spill] sm:$0xff]  ;;  %v7680_v1 = vld [vmem:[#allocation6 + $0x348] sm:$0xff] }
 0x199   : > { %1661 = vmatpush.msrb.mxu1 %v7667_v15  ;;  %1916 = vmatpush.msra.mxu0 %v12382_v61  ;;  %12388 = vst [vmem:[#allocation51_spill] sm:$0xff] %v7680_v1  ;;  %v7683_v15 = vld [vmem:[#allocation6 + $0x6f0] sm:$0xff]  ;;  %v12391_v61 = vld [vmem:[#allocation92_spill] sm:$0xff] }
 0x19a   : > { %1701 = vmatpush.msrb.mxu3 %v12383_v62  ;;  %1956 = vmatpush.msra.mxu2 %v7672_v28  ;;  %12389 = vst [vmem:[#allocation54_spill] sm:$0xff] %v7683_v15  ;;  %v12390_v62 = vld [vmem:[#allocation104_spill] sm:$0xff] }
 0x19b   : > { %1662 = vmatpush.msrb.mxu1 %v7675_v26  ;;  %1917 = vmatpush.msra.mxu0 %v12386_v36  ;;  %v7688_v28 = vld [vmem:[#allocation6 + $0x308] sm:$0xff]  ;;  %v7691_v26 = vld [vmem:[#allocation6 + $0x6b0] sm:$0xff]  ;;  %v12394_v36 = vld [vmem:[#allocation107_spill] sm:$0xff] }
 0x19c   : > { %1702 = vmatpush.msrb.mxu3 %v12387_v33  ;;  %1957 = vmatpush.msra.mxu2 %v7680_v1  ;;  %12392 = vst [vmem:[#allocation53_spill] sm:$0xff] %v7688_v28  ;;  %v12395_v33 = vld [vmem:[#allocation94_spill] sm:$0xff]  ;;  %v7696_v1 = vld [vmem:[#allocation6 + $0x2c8] sm:$0xff] }
 0x19d   : > { %1663 = vmatpush.msrb.mxu1 %v7683_v15  ;;  %1918 = vmatpush.msra.mxu0 %v12390_v62  ;;  %12393 = vst [vmem:[#allocation56_spill] sm:$0xff] %v7691_v26  ;;  %v7699_v15 = vld [vmem:[#allocation6 + $0x670] sm:$0xff]  ;;  %v12398_v62 = vld [vmem:[#allocation110_spill] sm:$0xff] }
 0x19e   : > { %1703 = vmatpush.msrb.mxu3 %v12391_v61  ;;  %1958 = vmatpush.msra.mxu2 %v7688_v28  ;;  %12396 = vst [vmem:[#allocation55_spill] sm:$0xff] %v7696_v1  ;;  %v12399_v61 = vld [vmem:[#allocation97_spill] sm:$0xff]  ;;  %v7704_v28 = vld [vmem:[#allocation6 + $0x288] sm:$0xff] }
 0x19f   : > { %1664 = vmatpush.msrb.mxu1 %v7691_v26  ;;  %1919 = vmatpush.msra.mxu0 %v12394_v36  ;;  %12397 = vst [vmem:[#allocation58_spill] sm:$0xff] %v7699_v15  ;;  %v7707_v26 = vld [vmem:[#allocation6 + $0x630] sm:$0xff] }
 0x1a0   : > { %1704 = vmatpush.msrb.mxu3 %v12395_v33  ;;  %1959 = vmatpush.msra.mxu2 %v7696_v1  ;;  %12400 = vst [vmem:[#allocation57_spill] sm:$0xff] %v7704_v28  ;;  %v12402_v36 = vld [vmem:[#allocation113_spill] sm:$0xff]  ;;  %v12403_v33 = vld [vmem:[#allocation100_spill] sm:$0xff] }
 0x1a1   : > { %1665 = vmatpush.msrb.mxu1 %v7699_v15  ;;  %1920 = vmatpush.msra.mxu0 %v12398_v62  ;;  %12401 = vst [vmem:[#allocation60_spill] sm:$0xff] %v7707_v26  ;;  %v7712_v1 = vld [vmem:[#allocation6 + $0x248] sm:$0xff]  ;;  %v7715_v15 = vld [vmem:[#allocation6 + $0x5f0] sm:$0xff] }
 0x1a2   : > { %1705 = vmatpush.msrb.mxu3 %v12399_v61  ;;  %1960 = vmatpush.msra.mxu2 %v7704_v28  ;;  %12404 = vst [vmem:[#allocation59_spill] sm:$0xff] %v7712_v1  ;;  %v12406_v62 = vld [vmem:[#allocation116_spill] sm:$0xff]  ;;  %v12407_v61 = vld [vmem:[#allocation103_spill] sm:$0xff] }
 0x1a3   : > { %1666 = vmatpush.msrb.mxu1 %v7707_v26  ;;  %1921 = vmatpush.msra.mxu0 %v12402_v36  ;;  %12405 = vst [vmem:[#allocation62_spill] sm:$0xff] %v7715_v15  ;;  %v7720_v28 = vld [vmem:[#allocation6 + $0x208] sm:$0xff]  ;;  %v7723_v26 = vld [vmem:[#allocation6 + $0x5b0] sm:$0xff] }
 0x1a4   : > { %1706 = vmatpush.msrb.mxu3 %v12403_v33  ;;  %1961 = vmatpush.msra.mxu2 %v7712_v1  ;;  %12408 = vst [vmem:[#allocation61_spill] sm:$0xff] %v7720_v28  ;;  %v12410_v36 = vld [vmem:[#allocation117_spill] sm:$0xff]  ;;  %v12411_v33 = vld [vmem:[#allocation106_spill] sm:$0xff]  ;;  %v7728_v1 = vld [vmem:[#allocation6 + $0x1c8] sm:$0xff] }
 0x1a5   : > { %1667 = vmatpush.msrb.mxu1 %v7715_v15  ;;  %1922 = vmatpush.msra.mxu0 %v12406_v62  ;;  %12409 = vst [vmem:[#allocation64_spill] sm:$0xff] %v7723_v26  ;;  %v7731_v15 = vld [vmem:[#allocation6 + $0x570] sm:$0xff]  ;;  %v12414_v62 = vld [vmem:[#allocation119_spill] sm:$0xff] }
 0x1a6   : > { %1707 = vmatpush.msrb.mxu3 %v12407_v61  ;;  %1962 = vmatpush.msra.mxu2 %v7720_v28  ;;  %12412 = vst [vmem:[#allocation63_spill] sm:$0xff] %v7728_v1  ;;  %v12415_v61 = vld [vmem:[#allocation109_spill] sm:$0xff]  ;;  %v7736_v28 = vld [vmem:[#allocation6 + $0x188] sm:$0xff] }
 0x1a7   : > { %1668 = vmatpush.msrb.mxu1 %v7723_v26  ;;  %1923 = vmatpush.msra.mxu0 %v12410_v36  ;;  %12413 = vst [vmem:[#allocation65_spill] sm:$0xff] %v7731_v15  ;;  %v7739_v26 = vld [vmem:[#allocation6 + $0x530] sm:$0xff]  ;;  %v12418_v36 = vld [vmem:[#allocation112_spill] sm:$0xff] }
 0x1a8   : > { %1708 = vmatpush.msrb.mxu3 %v12411_v33  ;;  %1963 = vmatpush.msra.mxu2 %v7728_v1  ;;  %12416 = vst [vmem:[#allocation66_spill] sm:$0xff] %v7736_v28  ;;  %v7744_v33 = vld [vmem:[#allocation6 + $0x148] sm:$0xff]  ;;  %v7747_v1 = vld [vmem:[#allocation6 + $0x4f0] sm:$0xff] }
 0x1a9   : > { %1669 = vmatpush.msrb.mxu1 %v7731_v15  ;;  %1924 = vmatpush.msra.mxu0 %v12414_v62  ;;  %12417 = vst [vmem:[#allocation67_spill] sm:$0xff] %v7739_v26  ;;  %v12421_v62 = vld [vmem:[#allocation115_spill] sm:$0xff] }
 0x1aa   : > { %1709 = vmatpush.msrb.mxu3 %v12415_v61  ;;  %1964 = vmatpush.msra.mxu2 %v7736_v28  ;;  %12419 = vst [vmem:[#allocation68_spill] sm:$0xff] %v7744_v33  ;;  %v7752_v61 = vld [vmem:[#allocation6 + $0x108] sm:$0xff]  ;;  %v7755_v28 = vld [vmem:[#allocation6 + $0x4b0] sm:$0xff] }
 0x1ab   : > { %1670 = vmatpush.msrb.mxu1 %v7739_v26  ;;  %1925 = vmatpush.msra.mxu0 %v7185_v24  ;;  %12420 = vst [vmem:[#allocation69_spill] sm:$0xff] %v7747_v1  ;;  %v7760_v24 = vld [vmem:[#allocation6 + $0xc8] sm:$0xff] }
 0x1ac   : > { %1710 = vmatpush.msrb.mxu3 %v12418_v36  ;;  %1965 = vmatpush.msra.mxu2 %v7744_v33  ;;  %12422 = vst [vmem:[#allocation70_spill] sm:$0xff] %v7752_v61  ;;  %v7763_v36 = vld [vmem:[#allocation6 + $0x470] sm:$0xff]  ;;  %v7803_v33 = vld [vmem:[#allocation6 + $0x740] sm:$0xff] }
 0x1ad   : > { %1671 = vmatpush.msrb.mxu1 %v7747_v1  ;;  %1926 = vmatpush.msra.mxu0 %v7190_v35  ;;  %12423 = vst [vmem:[#allocation71_spill] sm:$0xff] %v7755_v28  ;;  %v7766_v35 = vld [vmem:[#allocation6 + $0x80] sm:$0xff] }
 0x1ae   : > { %1711 = vmatpush.msrb.mxu3 %v12421_v62  ;;  %1966 = vmatpush.msra.mxu2 %v7752_v61  ;;  %12424 = vst [vmem:[#allocation72_spill] sm:$0xff] %v7760_v24  ;;  %v12427_v62 = vld [vmem:[#allocation118_spill] sm:$0xff]  ;;  %v7770_v61 = vld [vmem:[#allocation6 + $0x88] sm:$0xff] }
 0x1af   : > { %1672 = vmatpush.msrb.mxu1 %v7755_v28  ;;  %1927 = vmatpush.msra.mxu0 %v7198_v12  ;;  %12425 = vst [vmem:[#allocation73_spill] sm:$0xff] %v7763_v36  ;;  %v7773_v12 = vld [vmem:[#allocation6 + $0x430] sm:$0xff] }
 0x1b0   : > { %1712 = vmatpush.msrb.mxu3 %v7165_v55  ;;  %1967 = vmatpush.msra.mxu2 %v7760_v24  ;;  %12426 = vst [vmem:[#allocation74_spill] sm:$0xff] %v7766_v35  ;;  %v7776_v55 = vld [vmem:[#allocation6 + $0x40] sm:$0xff] }
 0x1b1   : > { %1673 = vmatpush.msrb.mxu1 %v7763_v36  ;;  %1928 = vmatpush.msra.mxu0 %v7766_v35  ;;  %12428 = vst [vmem:[#allocation75_spill] sm:$0xff] %v7770_v61  ;;  %v7782_v35 = vld [vmem:[#allocation6 + $0x7c0] sm:$0xff] }
 0x1b2   : > { %1713 = vmatpush.msrb.mxu3 %v12427_v62  ;;  %1968 = vmatpush.msra.mxu2 %v7770_v61  ;;  %12429 = vst [vmem:[#allocation76_spill] sm:$0xff] %v7773_v12  ;;  %v7785_v62 = vld [vmem:[#allocation6 + $0x7c8] sm:$0xff]  ;;  %v7791_v24 = vld [vmem:[#allocation6 + $0x780] sm:$0xff] }
 0x1b3   : > { %1674 = vmatpush.msrb.mxu1 %v7773_v12  ;;  %12430 = vst [vmem:[#allocation77_spill] sm:$0xff] %v7776_v55  ;;  %1929 = vmatpush.msra.mxu0 %v7776_v55  ;;  %v7788_v61 = vld [vmem:[#allocation6 + $0x48] sm:$0xff] }
 0x1b4   : > { %1714 = vmatpush.msrb.mxu3 %v7183_v38  ;;  %1675 = vmatmul.f32.vlgmr.msrb.gmra.mxu1 %v7488_v34  ;;  %12431 = vst [vmem:[#allocation79_spill] sm:$0xff] %v7782_v35  ;;  %v7794_v38 = vld [vmem:[#allocation6] sm:$0xff]  ;;  %v7800_v55 = vld [vmem:[#allocation6 + $0x8] sm:$0xff] }
 0x1b5   : > { %1715 = vmatmul.f32.vlgmr.msrb.gmra.mxu3 %v7488_v34  ;;  %1935 = vmatpush.msra.mxu1 %v7782_v35  ;;  %12432 = vst [vmem:[#allocation81_spill] sm:$0xff] %v7785_v62  ;;  %v7797_v34 = vld [vmem:[#allocation6 + $0x788] sm:$0xff] }
 0x1b6   : > { %1975 = vmatpush.msra.mxu3 %v7785_v62  ;;  %12433 = vst [vmem:[#allocation86_spill] sm:$0xff] %v7788_v61  ;;  %1969 = vmatpush.msra.mxu2 %v7788_v61  ;;  %v7806_v61 = vld [vmem:[#allocation6 + $0x3d0] sm:$0xff] }
 0x1b7   : > { %12434 = vst [vmem:[#allocation89_spill] sm:$0xff] %v7791_v24  ;;  %1936 = vmatpush.msra.mxu1 %v7791_v24  ;;  %1930 = vmatpush.msra.mxu0 %v7794_v38  ;;  %v7809_v24 = vld [vmem:[#allocation6 + $0x748] sm:$0xff] }
 0x1b8   : > { %12435 = vst [vmem:[#allocation91_spill] sm:$0xff] %v7794_v38  ;;  %1976 = vmatpush.msra.mxu3 %v7797_v34  ;;  %1970 = vmatpush.msra.mxu2 %v7800_v55  ;;  %v7812_v38 = vld [vmem:[#allocation6 + $0x3d8] sm:$0xff] }
 0x1b9   : > { %12436 = vst [vmem:[#allocation93_spill] sm:$0xff] %v7797_v34  ;;  %1937 = vmatpush.msra.mxu1 %v7803_v33  ;;  %1995 = vmatpush.msrb.mxu0 %v7806_v61  ;;  %v7815_v34 = vld [vmem:[#allocation6 + $0x700] sm:$0xff] }
 0x1ba   : > { %12437 = vst [vmem:[#allocation96_spill] sm:$0xff] %v7800_v55  ;;  %1977 = vmatpush.msra.mxu3 %v7809_v24  ;;  %2035 = vmatpush.msrb.mxu2 %v7812_v38  ;;  %v7818_v55 = vld [vmem:[#allocation6 + $0x390] sm:$0xff] }
 0x1bb   : > { %12438 = vst [vmem:[#allocation99_spill] sm:$0xff] %v7803_v33  ;;  %1938 = vmatpush.msra.mxu1 %v7815_v34  ;;  %1996 = vmatpush.msrb.mxu0 %v7818_v55  ;;  %v7821_v33 = vld [vmem:[#allocation6 + $0x708] sm:$0xff] }
 0x1bc   : > { %12439 = vst [vmem:[#allocation102_spill] sm:$0xff] %v7806_v61  ;;  %1978 = vmatpush.msra.mxu3 %v7821_v33  ;;  %v7824_v61 = vld [vmem:[#allocation6 + $0x398] sm:$0xff] }
 0x1bd   : > { %12440 = vst [vmem:[#allocation105_spill] sm:$0xff] %v7809_v24  ;;  %2036 = vmatpush.msrb.mxu2 %v7824_v61  ;;  %v7827_v24 = vld [vmem:[#allocation6 + $0x6c0] sm:$0xff] }
 0x1be   : > { %12441 = vst [vmem:[#allocation78_spill] sm:$0xff] %v7812_v38  ;;  %1939 = vmatpush.msra.mxu1 %v7827_v24  ;;  %v7830_v38 = vld [vmem:[#allocation6 + $0x350] sm:$0xff] }
 0x1bf   : > { %12442 = vst [vmem:[#allocation108_spill] sm:$0xff] %v7815_v34  ;;  %1997 = vmatpush.msrb.mxu0 %v7830_v38  ;;  %v7833_v34 = vld [vmem:[#allocation6 + $0x6c8] sm:$0xff] }
 0x1c0   : > { %12443 = vst [vmem:[#allocation80_spill] sm:$0xff] %v7818_v55  ;;  %1979 = vmatpush.msra.mxu3 %v7833_v34  ;;  %v7836_v55 = vld [vmem:[#allocation6 + $0x358] sm:$0xff] }
 0x1c1   : > { %12444 = vst [vmem:[#allocation111_spill] sm:$0xff] %v7821_v33  ;;  %2037 = vmatpush.msrb.mxu2 %v7836_v55  ;;  %v7839_v33 = vld [vmem:[#allocation6 + $0x680] sm:$0xff] }
 0x1c2   : > { %12445 = vst [vmem:[#allocation82_spill] sm:$0xff] %v7824_v61  ;;  %1940 = vmatpush.msra.mxu1 %v7839_v33  ;;  %v7842_v61 = vld [vmem:[#allocation6 + $0x310] sm:$0xff] }
 0x1c3   : > { %12446 = vst [vmem:[#allocation114_spill] sm:$0xff] %v7827_v24  ;;  %1998 = vmatpush.msrb.mxu0 %v7842_v61  ;;  %v7845_v24 = vld [vmem:[#allocation6 + $0x688] sm:$0xff] }
 0x1c4   : > { %12447 = vst [vmem:[#allocation83_spill] sm:$0xff] %v7830_v38  ;;  %1980 = vmatpush.msra.mxu3 %v7845_v24  ;;  %v7848_v38 = vld [vmem:[#allocation6 + $0x318] sm:$0xff] }
 0x1c5   : > { %12448 = vst [vmem:[#allocation85_spill] sm:$0xff] %v7833_v34  ;;  %2038 = vmatpush.msrb.mxu2 %v7848_v38  ;;  %v7851_v34 = vld [vmem:[#allocation6 + $0x640] sm:$0xff] }
 0x1c6   : > { %12449 = vst [vmem:[#allocation88_spill] sm:$0xff] %v7836_v55  ;;  %1941 = vmatpush.msra.mxu1 %v7851_v34  ;;  %v7854_v55 = vld [vmem:[#allocation6 + $0x2d0] sm:$0xff] }
 0x1c7   : > { %12450 = vst [vmem:[#allocation95_spill] sm:$0xff] %v7839_v33  ;;  %1999 = vmatpush.msrb.mxu0 %v7854_v55  ;;  %v7857_v33 = vld [vmem:[#allocation6 + $0x648] sm:$0xff] }
 0x1c8   : > { %12451 = vst [vmem:[#allocation84_spill] sm:$0xff] %v7842_v61  ;;  %1981 = vmatpush.msra.mxu3 %v7857_v33  ;;  %v7860_v61 = vld [vmem:[#allocation6 + $0x2d8] sm:$0xff] }
 0x1c9   : > { %12452 = vst [vmem:[#allocation98_spill] sm:$0xff] %v7845_v24  ;;  %2039 = vmatpush.msrb.mxu2 %v7860_v61  ;;  %v7863_v24 = vld [vmem:[#allocation6 + $0x600] sm:$0xff] }
 0x1ca   : > { %12453 = vst [vmem:[#allocation87_spill] sm:$0xff] %v7848_v38  ;;  %1942 = vmatpush.msra.mxu1 %v7863_v24  ;;  %v7866_v38 = vld [vmem:[#allocation6 + $0x290] sm:$0xff] }
 0x1cb   : > { %12454 = vst [vmem:[#allocation101_spill] sm:$0xff] %v7851_v34  ;;  %2000 = vmatpush.msrb.mxu0 %v7866_v38  ;;  %v7869_v34 = vld [vmem:[#allocation6 + $0x608] sm:$0xff] }
 0x1cc   : > { %12455 = vst [vmem:[#allocation90_spill] sm:$0xff] %v7854_v55  ;;  %1982 = vmatpush.msra.mxu3 %v7869_v34  ;;  %v7872_v55 = vld [vmem:[#allocation6 + $0x298] sm:$0xff] }
 0x1cd   : > { %12456 = vst [vmem:[#allocation104_spill] sm:$0xff] %v7857_v33  ;;  %2040 = vmatpush.msrb.mxu2 %v7872_v55  ;;  %v7875_v33 = vld [vmem:[#allocation6 + $0x5c0] sm:$0xff] }
 0x1ce   : > { %12457 = vst [vmem:[#allocation92_spill] sm:$0xff] %v7860_v61  ;;  %1943 = vmatpush.msra.mxu1 %v7875_v33  ;;  %v7878_v61 = vld [vmem:[#allocation6 + $0x250] sm:$0xff]  ;;  %v1416_v62 = vpop.f32.mrf.mxu0 }
 0x1cf   : > { %12458 = vst [vmem:[#allocation107_spill] sm:$0xff] %v7863_v24  ;;  %2001 = vmatpush.msrb.mxu0 %v7878_v61  ;;  %v7881_v24 = vld [vmem:[#allocation6 + $0x5c8] sm:$0xff] }
 0x1d0   : > { %12459 = vst [vmem:[#allocation94_spill] sm:$0xff] %v7866_v38  ;;  %1983 = vmatpush.msra.mxu3 %v7881_v24  ;;  %v7884_v38 = vld [vmem:[#allocation6 + $0x258] sm:$0xff] }
 0x1d1   : > { %12460 = vst [vmem:[#allocation110_spill] sm:$0xff] %v7869_v34  ;;  %2041 = vmatpush.msrb.mxu2 %v7884_v38  ;;  %v7887_v34 = vld [vmem:[#allocation6 + $0x580] sm:$0xff] }
 0x1d2   : > { %12461 = vst [vmem:[#allocation97_spill] sm:$0xff] %v7872_v55  ;;  %1944 = vmatpush.msra.mxu1 %v7887_v34  ;;  %v7890_v55 = vld [vmem:[#allocation6 + $0x210] sm:$0xff] }
 0x1d3   : > { %12462 = vst [vmem:[#allocation113_spill] sm:$0xff] %v7875_v33  ;;  %2002 = vmatpush.msrb.mxu0 %v7890_v55  ;;  %v7893_v33 = vld [vmem:[#allocation6 + $0x588] sm:$0xff] }
 0x1d4   : > { %12463 = vst [vmem:[#allocation100_spill] sm:$0xff] %v7878_v61  ;;  %1984 = vmatpush.msra.mxu3 %v7893_v33  ;;  %v7896_v61 = vld [vmem:[#allocation6 + $0x218] sm:$0xff] }
 0x1d5   : > { %12464 = vst [vmem:[#allocation116_spill] sm:$0xff] %v7881_v24  ;;  %2042 = vmatpush.msrb.mxu2 %v7896_v61  ;;  %v7899_v24 = vld [vmem:[#allocation6 + $0x540] sm:$0xff] }
 0x1d6   : > { %12465 = vst [vmem:[#allocation103_spill] sm:$0xff] %v7884_v38  ;;  %1945 = vmatpush.msra.mxu1 %v7899_v24  ;;  %v7902_v38 = vld [vmem:[#allocation6 + $0x1d0] sm:$0xff]  ;;  %v1496_v28 = vpop.f32.mrf.mxu0 }
 0x1d7   : > { %12466 = vst [vmem:[#allocation117_spill] sm:$0xff] %v7887_v34  ;;  %2003 = vmatpush.msrb.mxu0 %v7902_v38  ;;  %v7905_v34 = vld [vmem:[#allocation6 + $0x548] sm:$0xff] }
 0x1d8   : > { %12467 = vst [vmem:[#allocation106_spill] sm:$0xff] %v7890_v55  ;;  %1985 = vmatpush.msra.mxu3 %v7905_v34  ;;  %v7908_v55 = vld [vmem:[#allocation6 + $0x1d8] sm:$0xff] }
 0x1d9   : > { %12468 = vst [vmem:[#allocation119_spill] sm:$0xff] %v7893_v33  ;;  %2043 = vmatpush.msrb.mxu2 %v7908_v55  ;;  %v7911_v33 = vld [vmem:[#allocation6 + $0x500] sm:$0xff] }
 0x1da   : > { %12469 = vst [vmem:[#allocation109_spill] sm:$0xff] %v7896_v61  ;;  %1946 = vmatpush.msra.mxu1 %v7911_v33  ;;  %v7914_v61 = vld [vmem:[#allocation6 + $0x190] sm:$0xff] }
 0x1db   : > { %12470 = vst [vmem:[#allocation112_spill] sm:$0xff] %v7899_v24  ;;  %2004 = vmatpush.msrb.mxu0 %v7914_v61  ;;  %v7917_v24 = vld [vmem:[#allocation6 + $0x508] sm:$0xff] }
 0x1dc   : > { %12471 = vst [vmem:[#allocation115_spill] sm:$0xff] %v7902_v38  ;;  %1986 = vmatpush.msra.mxu3 %v7917_v24  ;;  %v7920_v38 = vld [vmem:[#allocation6 + $0x198] sm:$0xff] }
 0x1dd   : > { %12472 = vst [vmem:[#allocation118_spill] sm:$0xff] %v7905_v34  ;;  %2044 = vmatpush.msrb.mxu2 %v7920_v38  ;;  %v7923_v34 = vld [vmem:[#allocation6 + $0x4c0] sm:$0xff] }
 0x1de   : > { %12473 = vst [vmem:[#allocation120_spill] sm:$0xff] %v7908_v55  ;;  %1947 = vmatpush.msra.mxu1 %v7923_v34  ;;  %v7926_v55 = vld [vmem:[#allocation6 + $0x150] sm:$0xff] }
 0x1df   : > { %12474 = vst [vmem:[#allocation121_spill] sm:$0xff] %v7911_v33  ;;  %2005 = vmatpush.msrb.mxu0 %v7926_v55  ;;  %v7929_v33 = vld [vmem:[#allocation6 + $0x4c8] sm:$0xff] }
 0x1e0   : > { %12475 = vst [vmem:[#allocation122_spill] sm:$0xff] %v7914_v61  ;;  %1987 = vmatpush.msra.mxu3 %v7929_v33  ;;  %v7932_v61 = vld [vmem:[#allocation6 + $0x158] sm:$0xff] }
 0x1e1   : > { %12476 = vst [vmem:[#allocation123_spill] sm:$0xff] %v7917_v24  ;;  %2045 = vmatpush.msrb.mxu2 %v7932_v61  ;;  %v7935_v24 = vld [vmem:[#allocation6 + $0x480] sm:$0xff] }
 0x1e2   : > { %12477 = vst [vmem:[#allocation124_spill] sm:$0xff] %v7920_v38  ;;  %1948 = vmatpush.msra.mxu1 %v7935_v24  ;;  %v7938_v38 = vld [vmem:[#allocation6 + $0x110] sm:$0xff] }
 0x1e3   : > { %12478 = vst [vmem:[#allocation125_spill] sm:$0xff] %v7923_v34  ;;  %2006 = vmatpush.msrb.mxu0 %v7938_v38  ;;  %v7941_v34 = vld [vmem:[#allocation6 + $0x488] sm:$0xff] }
 0x1e4   : > { %12479 = vst [vmem:[#allocation126_spill] sm:$0xff] %v7926_v55  ;;  %1988 = vmatpush.msra.mxu3 %v7941_v34  ;;  %v7944_v55 = vld [vmem:[#allocation6 + $0x118] sm:$0xff] }
 0x1e5   : > { %12480 = vst [vmem:[#allocation127_spill] sm:$0xff] %v7929_v33  ;;  %2046 = vmatpush.msrb.mxu2 %v7944_v55  ;;  %v7947_v33 = vld [vmem:[#allocation6 + $0x440] sm:$0xff] }
 0x1e6   : > { %12481 = vst [vmem:[#allocation128_spill] sm:$0xff] %v7932_v61  ;;  %1949 = vmatpush.msra.mxu1 %v7947_v33  ;;  %v7950_v61 = vld [vmem:[#allocation6 + $0xd0] sm:$0xff] }
 0x1e7   : > { %12482 = vst [vmem:[#allocation129_spill] sm:$0xff] %v7935_v24  ;;  %2007 = vmatpush.msrb.mxu0 %v7950_v61  ;;  %v7953_v24 = vld [vmem:[#allocation6 + $0x448] sm:$0xff] }
 0x1e8   : > { %12483 = vst [vmem:[#allocation130_spill] sm:$0xff] %v7938_v38  ;;  %1989 = vmatpush.msra.mxu3 %v7953_v24  ;;  %v7956_v38 = vld [vmem:[#allocation6 + $0xd8] sm:$0xff] }
 0x1e9   : > { %12484 = vst [vmem:[#allocation131_spill] sm:$0xff] %v7941_v34  ;;  %2047 = vmatpush.msrb.mxu2 %v7956_v38  ;;  %v7959_v34 = vld [vmem:[#allocation6 + $0x400] sm:$0xff] }
 0x1ea   : > { %12485 = vst [vmem:[#allocation132_spill] sm:$0xff] %v7944_v55  ;;  %1950 = vmatpush.msra.mxu1 %v7959_v34  ;;  %v7962_v55 = vld [vmem:[#allocation6 + $0x90] sm:$0xff] }
 0x1eb   : > { %12486 = vst [vmem:[#allocation133_spill] sm:$0xff] %v7947_v33  ;;  %2008 = vmatpush.msrb.mxu0 %v7962_v55  ;;  %v7965_v33 = vld [vmem:[#allocation6 + $0x408] sm:$0xff] }
 0x1ec   : > { %12487 = vst [vmem:[#allocation134_spill] sm:$0xff] %v7950_v61  ;;  %1990 = vmatpush.msra.mxu3 %v7965_v33  ;;  %v7968_v61 = vld [vmem:[#allocation6 + $0x7d0] sm:$0xff] }
 0x1ed   : > { %12488 = vst [vmem:[#allocation135_spill] sm:$0xff] %v7953_v24  ;;  %2015 = vmatpush.msrb.mxu1 %v7968_v61  ;;  %v7971_v24 = vld [vmem:[#allocation6 + $0x7d8] sm:$0xff] }
 0x1ee   : > { %12489 = vst [vmem:[#allocation136_spill] sm:$0xff] %v7956_v38  ;;  %2055 = vmatpush.msrb.mxu3 %v7971_v24  ;;  %v7974_v38 = vld [vmem:[#allocation6 + $0x98] sm:$0xff] }
 0x1ef   : > { %12490 = vst [vmem:[#allocation137_spill] sm:$0xff] %v7959_v34  ;;  %2048 = vmatpush.msrb.mxu2 %v7974_v38  ;;  %v7977_v34 = vld [vmem:[#allocation6 + $0x790] sm:$0xff] }
 0x1f0   : > { %12491 = vst [vmem:[#allocation138_spill] sm:$0xff] %v7962_v55  ;;  %2016 = vmatpush.msrb.mxu1 %v7977_v34  ;;  %v7980_v55 = vld [vmem:[#allocation6 + $0x50] sm:$0xff] }
 0x1f1   : > { %12492 = vst [vmem:[#allocation139_spill] sm:$0xff] %v7965_v33  ;;  %2009 = vmatpush.msrb.mxu0 %v7980_v55  ;;  %v7983_v33 = vld [vmem:[#allocation6 + $0x798] sm:$0xff] }
 0x1f2   : > { %12493 = vst [vmem:[#allocation140_spill] sm:$0xff] %v7968_v61  ;;  %2056 = vmatpush.msrb.mxu3 %v7983_v33  ;;  %v7986_v61 = vld [vmem:[#allocation6 + $0x58] sm:$0xff] }
 0x1f3   : > { %12494 = vst [vmem:[#allocation141_spill] sm:$0xff] %v7971_v24  ;;  %2049 = vmatpush.msrb.mxu2 %v7986_v61  ;;  %v7989_v24 = vld [vmem:[#allocation6 + $0x750] sm:$0xff] }
 0x1f4   : > { %12495 = vst [vmem:[#allocation142_spill] sm:$0xff] %v7974_v38  ;;  %2017 = vmatpush.msrb.mxu1 %v7989_v24  ;;  %v7992_v38 = vld [vmem:[#allocation6 + $0x10] sm:$0xff] }
 0x1f5   : > { %12496 = vst [vmem:[#allocation143_spill] sm:$0xff] %v7977_v34  ;;  %2010 = vmatpush.msrb.mxu0 %v7992_v38  ;;  %v7995_v34 = vld [vmem:[#allocation6 + $0x758] sm:$0xff]  ;;  %v1476_v35 = vpop.f32.mrf.mxu3 }
 0x1f6   : > { %12497 = vst [vmem:[#allocation144_spill] sm:$0xff] %v7980_v55  ;;  %2057 = vmatpush.msrb.mxu3 %v7995_v34  ;;  %v7998_v55 = vld [vmem:[#allocation6 + $0x18] sm:$0xff] }
 0x1f7   : > { %12498 = vst [vmem:[#allocation145_spill] sm:$0xff] %v7983_v33  ;;  %2050 = vmatpush.msrb.mxu2 %v7998_v55  ;;  %v8001_v33 = vld [vmem:[#allocation6 + $0x710] sm:$0xff] }
 0x1f8   : > { %12499 = vst [vmem:[#allocation146_spill] sm:$0xff] %v7986_v61  ;;  %2018 = vmatpush.msrb.mxu1 %v8001_v33  ;;  %v8004_v61 = vld [vmem:[#allocation6 + $0x718] sm:$0xff] }
 0x1f9   : > { %12500 = vst [vmem:[#allocation147_spill] sm:$0xff] %v7989_v24  ;;  %2058 = vmatpush.msrb.mxu3 %v8004_v61  ;;  %v8007_v24 = vld [vmem:[#allocation6 + $0x6d0] sm:$0xff] }
 0x1fa   : > { %12501 = vst [vmem:[#allocation148_spill] sm:$0xff] %v7992_v38  ;;  %2019 = vmatpush.msrb.mxu1 %v8007_v24  ;;  %v8010_v38 = vld [vmem:[#allocation6 + $0x6d8] sm:$0xff] }
 0x1fb   : > { %12502 = vst [vmem:[#allocation149_spill] sm:$0xff] %v7995_v34  ;;  %2059 = vmatpush.msrb.mxu3 %v8010_v38  ;;  %v8013_v34 = vld [vmem:[#allocation6 + $0x690] sm:$0xff] }
 0x1fc   : > { %12503 = vst [vmem:[#allocation150_spill] sm:$0xff] %v7998_v55  ;;  %2020 = vmatpush.msrb.mxu1 %v8013_v34  ;;  %v8016_v55 = vld [vmem:[#allocation6 + $0x698] sm:$0xff] }
 0x1fd   : > { %12504 = vst [vmem:[#allocation151_spill] sm:$0xff] %v8001_v33  ;;  %2060 = vmatpush.msrb.mxu3 %v8016_v55  ;;  %v8019_v33 = vld [vmem:[#allocation6 + $0x650] sm:$0xff] }
 0x1fe   : > { %12505 = vst [vmem:[#allocation152_spill] sm:$0xff] %v8004_v61  ;;  %2021 = vmatpush.msrb.mxu1 %v8019_v33  ;;  %v8022_v61 = vld [vmem:[#allocation6 + $0x658] sm:$0xff]  ;;  %v1556_v15 = vpop.f32.mrf.mxu3 }
 0x1ff   : > { %12506 = vst [vmem:[#allocation153_spill] sm:$0xff] %v8007_v24  ;;  %2061 = vmatpush.msrb.mxu3 %v8022_v61  ;;  %v8025_v24 = vld [vmem:[#allocation6 + $0x610] sm:$0xff] }
 0x200   : > { %12507 = vst [vmem:[#allocation154_spill] sm:$0xff] %v8010_v38  ;;  %2022 = vmatpush.msrb.mxu1 %v8025_v24  ;;  %v8028_v38 = vld [vmem:[#allocation6 + $0x618] sm:$0xff] }
 0x201   : > { %12508 = vst [vmem:[#allocation155_spill] sm:$0xff] %v8013_v34  ;;  %2062 = vmatpush.msrb.mxu3 %v8028_v38  ;;  %v8031_v34 = vld [vmem:[#allocation6 + $0x5d0] sm:$0xff] }
 0x202   : > { %12509 = vst [vmem:[#allocation156_spill] sm:$0xff] %v8016_v55  ;;  %2023 = vmatpush.msrb.mxu1 %v8031_v34  ;;  %v8034_v55 = vld [vmem:[#allocation6 + $0x5d8] sm:$0xff] }
 0x203   : > { %12510 = vst [vmem:[#allocation157_spill] sm:$0xff] %v8019_v33  ;;  %2063 = vmatpush.msrb.mxu3 %v8034_v55  ;;  %v8037_v33 = vld [vmem:[#allocation6 + $0x590] sm:$0xff] }
 0x204   : > { %12511 = vst [vmem:[#allocation158_spill] sm:$0xff] %v8022_v61  ;;  %2024 = vmatpush.msrb.mxu1 %v8037_v33  ;;  %v8040_v61 = vld [vmem:[#allocation6 + $0x598] sm:$0xff] }
 0x205   : > { %12512 = vst [vmem:[#allocation159_spill] sm:$0xff] %v8025_v24  ;;  %2064 = vmatpush.msrb.mxu3 %v8040_v61  ;;  %v8043_v24 = vld [vmem:[#allocation6 + $0x550] sm:$0xff] }
 0x206   : > { %12513 = vst [vmem:[#allocation160_spill] sm:$0xff] %v8028_v38  ;;  %2025 = vmatpush.msrb.mxu1 %v8043_v24  ;;  %v8046_v38 = vld [vmem:[#allocation6 + $0x558] sm:$0xff] }
 0x207   : > { %12514 = vst [vmem:[#allocation161_spill] sm:$0xff] %v8031_v34  ;;  %2065 = vmatpush.msrb.mxu3 %v8046_v38  ;;  %v8049_v34 = vld [vmem:[#allocation6 + $0x510] sm:$0xff] }
 0x208   : > { %12515 = vst [vmem:[#allocation162_spill] sm:$0xff] %v8034_v55  ;;  %2026 = vmatpush.msrb.mxu1 %v8049_v34  ;;  %v8052_v55 = vld [vmem:[#allocation6 + $0x518] sm:$0xff] }
 0x209   : > { %12516 = vst [vmem:[#allocation163_spill] sm:$0xff] %v8037_v33  ;;  %2066 = vmatpush.msrb.mxu3 %v8052_v55  ;;  %v8055_v33 = vld [vmem:[#allocation6 + $0x4d0] sm:$0xff] }
 0x20a   : > { %12517 = vst [vmem:[#allocation164_spill] sm:$0xff] %v8040_v61  ;;  %2027 = vmatpush.msrb.mxu1 %v8055_v33  ;;  %v8058_v61 = vld [vmem:[#allocation6 + $0x4d8] sm:$0xff] }
 0x20b   : > { %12518 = vst [vmem:[#allocation165_spill] sm:$0xff] %v8043_v24  ;;  %2067 = vmatpush.msrb.mxu3 %v8058_v61  ;;  %v8061_v24 = vld [vmem:[#allocation6 + $0x490] sm:$0xff] }
 0x20c   : > { %12519 = vst [vmem:[#allocation166_spill] sm:$0xff] %v8046_v38  ;;  %2028 = vmatpush.msrb.mxu1 %v8061_v24  ;;  %v8064_v38 = vld [vmem:[#allocation6 + $0x498] sm:$0xff] }
 0x20d   : > { %12520 = vst [vmem:[#allocation167_spill] sm:$0xff] %v8049_v34  ;;  %2068 = vmatpush.msrb.mxu3 %v8064_v38  ;;  %v8067_v34 = vld [vmem:[#allocation6 + $0x450] sm:$0xff] }
 0x20e   : > { %12521 = vst [vmem:[#allocation168_spill] sm:$0xff] %v8052_v55  ;;  %2029 = vmatpush.msrb.mxu1 %v8067_v34  ;;  %v8070_v55 = vld [vmem:[#allocation6 + $0x458] sm:$0xff] }
 0x20f   : > { %12522 = vst [vmem:[#allocation169_spill] sm:$0xff] %v8055_v33  ;;  %2069 = vmatpush.msrb.mxu3 %v8070_v55  ;;  %v8073_v33 = vld [vmem:[#allocation6 + $0x410] sm:$0xff] }
 0x210   : > { %12523 = vst [vmem:[#allocation170_spill] sm:$0xff] %v8058_v61  ;;  %2030 = vmatpush.msrb.mxu1 %v8073_v33  ;;  %v8076_v61 = vld [vmem:[#allocation6 + $0x418] sm:$0xff] }
 0x211   : > { %12524 = vst [vmem:[#allocation171_spill] sm:$0xff] %v8061_v24  ;;  %2070 = vmatpush.msrb.mxu3 %v8076_v61  ;;  %v1436_v24 = vpop.f32.mrf.mxu1 }
 0x212   : > { %12525 = vst [vmem:[#allocation172_spill] sm:$0xff] %v8064_v38  ;;  %v1456_v38 = vpop.f32.mrf.mxu2  ;;  %v1437_v36 = vadd.f32 %v1436_v24, %v1416_v62  ;;  %v11699_v24 = vrot.slane %v7329_v16, 5 }
 0x213   : > { %12526 = vst [vmem:[#allocation173_spill] sm:$0xff] %v8067_v34  ;;  %v1477_v49 = vadd.f32 %v1476_v35, %v1456_v38 }
 0x214   : > { %12527 = vst [vmem:[#allocation174_spill] sm:$0xff] %v8070_v55  ;;  %v1727_v1 = vrot.slane %v1437_v36, 7 }
 0x215   : > { %12528 = vst [vmem:[#allocation175_spill] sm:$0xff] %v8073_v33 }
 0x216   : > { %12529 = vst [vmem:[#allocation176_spill] sm:$0xff] %v8076_v61  ;;  %v1743_v60 = vadd.f32 %v1727_v1, %v7308_v52  ;;  %v1728_v61 = vrot.slane %v1477_v49, 7 }
 0x218   : > { %v5111_v20 = vmul.f32 -1.442695, %v1743_v60 }
 0x219   : > { %v1516_v12 = vpop.f32.mrf.mxu1 }
 0x21a   : > { %v1517_v34 = vadd.f32 %v1516_v12, %v1496_v28  ;;  %v1536_v55 = vpop.f32.mrf.mxu2  ;;  %5265 = vpow2.f32 %v5111_v20  ;;  %v1744_v28 = vadd.f32 %v1728_v61, %v11700_v29 }
 0x21b   : > { %v1557_v33 = vadd.f32 %v1556_v15, %v1536_v55 }
 0x21c   : > { %v1729_v26 = vrot.slane %v1517_v34, 7  ;;  %v5112_v1 = vmul.f32 -1.442695, %v1744_v28  ;;  %v1636_v28 = vpop.f32.mrf.mxu3 }
 0x21d   : > { %v1730_v32 = vrot.slane %v1557_v33, 7  ;;  %v1576_v33 = vpop.f32.mrf.mxu0 }
 0x21e   : > { %v1745_v10 = vadd.f32 %v1729_v26, %v7310_v53 }
 0x21f   : > { %v1746_v36 = vadd.f32 %v1730_v32, %v11699_v24 }
 0x220   : > { %v5113_v51 = vmul.f32 -1.442695, %v1745_v10  ;;  %v5266_v35 = vpop.eup %5265 }
 0x221   : > { %v5114_v15 = vmul.f32 -1.442695, %v1746_v36  ;;  %v8087_v60 = vadd.f32 1.0, %v5266_v35  ;;  %v1596_v61 = vpop.f32.mrf.mxu1 }
 0x222   : > { %5267 = vpow2.f32 %v5113_v51  ;;  %v1616_v38 = vpop.f32.mrf.mxu2  ;;  %v1597_v34 = vadd.f32 %v1596_v61, %v1576_v33 }
 0x223   : > { %5269 = vpow2.f32 %v5112_v1  ;;  %v1637_v8 = vadd.f32 %v1636_v28, %v1616_v38  ;;  %v11714_v38 = vrot.slane %v7375_v47, 5  ;;  %vm1764_vm12 = vweird.f32 %v8087_v60 }
 0x224   : > { %5271 = vpow2.f32 %v5114_v15 }
 0x225   : > { %5273 = vrcp.f32 %v8087_v60  ;;  %v1656_v1 = vpop.f32.mrf.mxu0 }
 0x228   : > { %v5268_v26 = vpop.eup %5267 }
 0x229   : > { %v8089_v49 = vadd.f32 1.0, %v5268_v26  ;;  %v5270_v20 = vpop.eup %5269 }
 0x22a   : > { %v5272_v10 = vpop.eup %5271  ;;  %v8093_v32 = vadd.f32 1.0, %v5270_v20 }
 0x22b   : > { %5275 = vrcp.f32 %v8089_v49  ;;  %v8095_v51 = vadd.f32 1.0, %v5272_v10  ;;  %v8097_v12 = vpop.eup %5273  ;;  %v1731_v10 = vrot.slane %v1597_v34, 7  ;;  %vm1802_vm13 = vweird.f32 %v8089_v49 }
 0x22c   : > { %5277 = vrcp.f32 %v8093_v32  ;;  %v1760_v62 = vmul.f32 %v8097_v12, %v8087_v60  ;;  %vm1765_vm10 = vweird.f32 %v8097_v12  ;;  %vm1779_vm4 = vweird.f32 %v8093_v32 }
 0x22d   : > { %5279 = vrcp.f32 %v8095_v51  ;;  %vm8136_vm14 = vmor %vm1764_vm12, %vm1765_vm10  ;;  %vm1817_vm5 = vweird.f32 %v8095_v51 }
 0x22e   : > { %v1761_v26 = vsub.f32 1.0, %v1760_v62  ;;  %v1747_v62 = vadd.f32 %v1731_v10, %v7343_v46  ;;  %v1808_v10 = vand.u32 2147483648, %v8089_v49 }
 0x230   : > { %v1762_v33 = vmul.f32 %v8097_v12, %v1761_v26 }
 0x231   : > { %v8099_v55 = vpop.eup %5275  ;;  %v1676_v15 = vpop.f32.mrf.mxu1 }
 0x232   : > { %v1798_v36 = vmul.f32 %v8099_v55, %v8089_v49  ;;  %v1677_v35 = vadd.f32 %v1676_v15, %v1656_v1  ;;  %v8107_v20 = vpop.eup %5277  ;;  %v1696_v1 = vpop.f32.mrf.mxu2  ;;  %v1763_v58 = vadd.f32 %v8097_v12, %v1762_v33  ;;  %vm1803_vm11 = vweird.f32 %v8099_v55 }
 0x233   : > { %v8109_v29 = vpop.eup %5279  ;;  %v1775_v61 = vmul.f32 %v8107_v20, %v8093_v32  ;;  %vm8141_vm15 = vmor %vm1802_vm13, %vm1803_vm11  ;;  %vm1780_vm2 = vweird.f32 %v8107_v20 }
 0x234   : > { %v1733_v24 = vrot.slane %v1677_v35, 7  ;;  %v1799_v16 = vsub.f32 1.0, %v1798_v36  ;;  %v1813_v52 = vmul.f32 %v8109_v29, %v8095_v51  ;;  %v1732_v36 = vrot.slane %v1637_v8, 7  ;;  %vm8162_vm6 = vmor %vm1779_vm4, %vm1780_vm2 }
 0x235   : > { %v1776_v26 = vsub.f32 1.0, %v1775_v61  ;;  %v1806_v61 = vand.u32 2147483647, %v8089_v49  ;;  %vm1818_vm3 = vweird.f32 %v8109_v29 }
 0x236   : > { %v1749_v53 = vadd.f32 %v1733_v24, %v7341_v40  ;;  %v1800_v35 = vmul.f32 %v8099_v55, %v1799_v16  ;;  %v11713_v24 = vrot.slane %v7382_v54, 5  ;;  %v1814_v40 = vsub.f32 1.0, %v1813_v52  ;;  %vm8168_vm7 = vmor %vm1817_vm5, %vm1818_vm3 }
 0x237   : > { %vm1807_vm1 = vcmp.eq.f32.partialorder %v1806_v61, 8.507059e+37 }
 0x238   : > { %v5115_v15 = vmul.f32 -1.442695, %v1749_v53  ;;  %v1716_v34 = vpop.f32.mrf.mxu3  ;;  %v1770_v53 = vand.u32 2147483648, %v8087_v60  ;;  %v1801_v16 = vadd.f32 %v8099_v55, %v1800_v35  ;;  %v1748_v52 = vadd.f32 %v1732_v36, %v11713_v24 }
 0x239   : > { %v1717_v59 = vadd.f32 %v1716_v34, %v1696_v1  ;;  %v1767_v34 = vsel %vm8136_vm14, %v8097_v12, %v1763_v58  ;;  %v1777_v35 = vmul.f32 %v8107_v20, %v1776_v26  ;;  %v1869_v24 = vrot.slane %v7365_v18, 7 }
 0x23a   : > { %5281 = vpow2.f32 %v5115_v15  ;;  %v1771_v36 = vor.u32 1.1754944e-38, %v1770_v53  ;;  %v1823_v26 = vand.u32 2147483648, %v8095_v51  ;;  %v1785_v18 = vand.u32 2147483648, %v8093_v32 }
 0x23b   : > { %v1734_v28 = vrot.slane %v1717_v59, 7  ;;  %5283 = vtanh.f32 %v1747_v62  ;;  %v1768_v59 = vand.u32 2147483647, %v8087_v60  ;;  %v1815_v60 = vmul.f32 %v8109_v29, %v1814_v40 }
 0x23c   : > { %v1778_v12 = vadd.f32 %v8107_v20, %v1777_v35 }
 0x23d   : > { %v1750_v8 = vadd.f32 %v1734_v28, %v11714_v38  ;;  %v1805_v28 = vsel %vm8141_vm15, %v8099_v55, %v1801_v16  ;;  %v1809_v38 = vor.u32 1.1754944e-38, %v1808_v10  ;;  %vm1769_vm0 = vcmp.eq.f32.partialorder %v1768_v59, 8.507059e+37 }
 0x23e   : > { %v1772_v40 = vsel %vm1769_vm0, %v1771_v36, %v1767_v34  ;;  %v1816_v55 = vadd.f32 %v8109_v29, %v1815_v60  ;;  %v1783_v10 = vand.u32 2147483647, %v8093_v32  ;;  %v1824_v32 = vor.u32 1.1754944e-38, %v1823_v26 }
 0x23f   : > { %v5116_v62 = vmul.f32 -1.442695, %v1750_v8  ;;  %v1810_v58 = vsel %vm1807_vm1, %v1809_v38, %v1805_v28  ;;  %v1821_v38 = vand.u32 2147483647, %v8095_v51  ;;  %v1786_v51 = vor.u32 1.1754944e-38, %v1785_v18 }
 0x240   : > { %v5282_v1 = vpop.eup %5281  ;;  %v1873_v33 = vmul.f32 %v1869_v24, %v1810_v58  ;;  %vm1784_vm8 = vcmp.eq.f32.partialorder %v1783_v10, 8.507059e+37  ;;  %v1870_v28 = vrot.slane %v7461_v14, 7 }
 0x241   : > { %v1835_v49 = vadd.f32 1.0, %v5282_v1  ;;  %5285 = vpow2.f32 %v5116_v62  ;;  %v5284_v8 = vpop.eup %5283  ;;  %v1782_v62 = vsel %vm8162_vm6, %v8107_v20, %v1778_v12  ;;  %v1820_v1 = vsel %vm8168_vm7, %v8109_v29, %v1816_v55 }
 0x242   : > { %5287 = vtanh.f32 %v1748_v52  ;;  %v1875_v53 = vmul.f32 %v5284_v8, %v1772_v40  ;;  %vm1822_vm9 = vcmp.eq.f32.partialorder %v1821_v38, 8.507059e+37  ;;  %v1787_v24 = vsel %vm1784_vm8, %v1786_v51, %v1782_v62  ;;  %v8191_v51 = vld [vmem:[#allocation6 + $0x3e8] sm:$0xff] }
 0x243   : > { %5289 = vrcp.f32 %v1835_v49  ;;  %v1825_v36 = vsel %vm1822_vm9, %v1824_v32, %v1820_v1  ;;  %v1848_v40 = vand.u32 2147483648, %v1835_v49  ;;  %v1846_v12 = vand.u32 2147483647, %v1835_v49 }
 0x244   : > { %v8178_v34 = vadd.f32 %v1875_v53, %v1873_v33  ;;  %v1874_v29 = vmul.f32 %v1870_v28, %v1825_v36  ;;  %vm1842_vm11 = vweird.f32 %v1835_v49 }
 0x245   : > { %v1849_v18 = vor.u32 1.1754944e-38, %v1848_v40  ;;  %vm1847_vm13 = vcmp.eq.f32.partialorder %v1846_v12, 8.507059e+37  ;;  %v12555_v40 = vld [vmem:[#allocation19_spill] sm:$0xff] }
 0x246   : > { %v12557_v12 = vld [vmem:[#allocation43_spill] sm:$0xff] }
 0x247   : > { %v5286_v59 = vpop.eup %5285 }
 0x248   : > { %v5288_v61 = vpop.eup %5287  ;;  %v1836_v15 = vadd.f32 1.0, %v5286_v59 }
 0x249   : > { %v5290_v60 = vpop.eup %5289  ;;  %v1876_v8 = vmul.f32 %v5288_v61, %v1787_v24 }
 0x24a   : > { %v1838_v35 = vmul.f32 %v5290_v60, %v1835_v49  ;;  %5291 = vrcp.f32 %v1836_v15  ;;  %vm1843_vm10 = vweird.f32 %v5290_v60  ;;  %v1863_v33 = vand.u32 2147483648, %v1836_v15 }
 0x24b   : > { %5293 = vtanh.f32 %v8178_v34  ;;  %v8182_v26 = vadd.f32 %v1876_v8, %v1874_v29  ;;  %vm1844_vm12 = vmor %vm1842_vm11, %vm1843_vm10  ;;  %v1861_v62 = vand.u32 2147483647, %v1836_v15  ;;  %vm1857_vm15 = vweird.f32 %v1836_v15  ;;  %v8201_v8 = vld [vmem:[#allocation6 + $0x368] sm:$0xff]  ;;  %v8304_v29 = vld [vmem:[#allocation6 + $0x378] sm:$0xff] }
 0x24c   : > { %v1839_v20 = vsub.f32 1.0, %v1838_v35  ;;  %v1864_v49 = vor.u32 1.1754944e-38, %v1863_v33  ;;  %v12564_v33 = vld [vmem:[#allocation50_spill] sm:$0xff] }
 0x24d   : > { %5295 = vtanh.f32 %v8182_v26  ;;  %vm1862_vm1 = vcmp.eq.f32.partialorder %v1861_v62, 8.507059e+37  ;;  %v8330_v62 = vld [vmem:[#allocation6 + $0x778] sm:$0xff] }
 0x24e   : > { %v1840_v58 = vmul.f32 %v5290_v60, %v1839_v20  ;;  %v12554_v20 = vld [vmem:[#allocation39_spill] sm:$0xff] }
 0x250   : > { %v5292_v55 = vpop.eup %5291  ;;  %v1841_v53 = vadd.f32 %v5290_v60, %v1840_v58  ;;  %v12556_v58 = vld [vmem:[#allocation44_spill] sm:$0xff] }
 0x251   : > { %v1853_v16 = vmul.f32 %v5292_v55, %v1836_v15  ;;  %v5294_v14 = vpop.eup %5293  ;;  %vm1858_vm14 = vweird.f32 %v5292_v55  ;;  %v8195_v15 = vld [vmem:[#allocation6 + $0x3a8] sm:$0xff] }
 0x252   : > { %v1845_v10 = vsel %vm1844_vm12, %v5290_v60, %v1841_v53  ;;  %vm1859_vm0 = vmor %vm1857_vm15, %vm1858_vm14  ;;  %v12559_v53 = vld [vmem:[#allocation46_spill] sm:$0xff] }
 0x253   : > { %v1850_v38 = vsel %vm1847_vm13, %v1849_v18, %v1845_v10  ;;  %v1854_v59 = vsub.f32 1.0, %v1853_v16  ;;  %v5296_v35 = vpop.eup %5295  ;;  %v8313_v18 = vld [vmem:[#allocation6 + $0x338] sm:$0xff]  ;;  %v12560_v16 = vld [vmem:[#allocation45_spill] sm:$0xff] }
 0x254   : > { %v1881_v52 = vmul.f32 %v5294_v14, %v1850_v38  ;;  %v12561_v10 = vld [vmem:[#allocation26_spill] sm:$0xff]  ;;  %v12562_v14 = vld [vmem:[#allocation48_spill] sm:$0xff] }
 0x255   : > { %v1855_v61 = vmul.f32 %v5292_v55, %v1854_v59  ;;  %v8319_v38 = vld [vmem:[#allocation6 + $0x2f8] sm:$0xff] }
 0x256   : > { %v8185_v1 = vrot.slane %v1881_v52, 1  ;;  %v8322_v59 = vld [vmem:[#allocation6 + $0x7b8] sm:$0xff]  ;;  %v12563_v52 = vld [vmem:[#allocation25_spill] sm:$0xff] }
 0x257   : > { %v1856_v32 = vadd.f32 %v5292_v55, %v1855_v61  ;;  %v8327_v61 = vld [vmem:[#allocation6 + $0x2b8] sm:$0xff] }
 0x258   : > { %1886 = vst [vmem:[#allocation2 + $0x1] sm:$0x1] %v8185_v1  ;;  %1931 = vmatmul.f32.vlgmr.msra.gmra.mxu0 %v8185_v1  ;;  %1971 = vmatmul.f32.vlgmr.msra.gmra.mxu2 %v8185_v1 }
 0x259   : > { %v1860_v60 = vsel %vm1859_vm0, %v5292_v55, %v1856_v32  ;;  %2075 = vmatpush.msra.mxu0 %v7393_v6  ;;  %2115 = vmatpush.msra.mxu2 %v8191_v51  ;;  %v8209_v6 = vld [vmem:[#allocation6 + $0x328] sm:$0xff]  ;;  %v12565_v32 = vld [vmem:[#allocation23_spill] sm:$0xff] }
 0x25a   : > { %v1865_v24 = vsel %vm1862_vm1, %v1864_v49, %v1860_v60  ;;  %v12558_v55 = vld [vmem:[#allocation28_spill] sm:$0xff]  ;;  %v8335_v60 = vld [vmem:[#allocation6 + $0x278] sm:$0xff] }
 0x25b   : > { %v1882_v36 = vmul.f32 %v5296_v35, %v1865_v24  ;;  %2076 = vmatpush.msra.mxu0 %v7401_v2  ;;  %2116 = vmatpush.msra.mxu2 %v8195_v15  ;;  %v8217_v2 = vld [vmem:[#allocation6 + $0x2e8] sm:$0xff]  ;;  %v8338_v35 = vld [vmem:[#allocation6 + $0x738] sm:$0xff] }
 0x25c   : > { %v12566_v49 = vld [vmem:[#allocation52_spill] sm:$0xff] }
 0x25d   : > { %v8198_v28 = vrot.slane %v1882_v36, 1  ;;  %2077 = vmatpush.msra.mxu0 %v7405_v21  ;;  %2117 = vmatpush.msra.mxu2 %v8201_v8  ;;  %v8223_v21 = vld [vmem:[#allocation6 + $0x2a8] sm:$0xff]  ;;  %v12568_v36 = vld [vmem:[#allocation54_spill] sm:$0xff] }
 0x25e   : > { %v12567_v24 = vld [vmem:[#allocation32_spill] sm:$0xff] }
 0x25f   : > { %1890 = vst [vmem:[#allocation2 + $0xe] sm:$0x1] %v8198_v28  ;;  %1951 = vmatmul.f32.vlgmr.msra.gmra.mxu1 %v8198_v28  ;;  %1991 = vmatmul.f32.vlgmr.msra.gmra.mxu3 %v8198_v28 }
 0x260   : > { %2078 = vmatpush.msra.mxu0 %v7413_v23  ;;  %2095 = vmatpush.msra.mxu1 %v7498_v42  ;;  %v8229_v23 = vld [vmem:[#allocation6 + $0x268] sm:$0xff]  ;;  %v12539_v42 = vld [vmem:[#allocation27_spill] sm:$0xff] }
 0x261   : > { %2118 = vmatpush.msra.mxu2 %v8209_v6  ;;  %2135 = vmatpush.msra.mxu3 %v7502_v0  ;;  %v12542_v0 = vld [vmem:[#allocation33_spill] sm:$0xff] }
 0x262   : > { %2011 = vmatmul.f32.vlgmr.msrb.gmra.mxu0 %v8185_v1  ;;  %2051 = vmatmul.f32.vlgmr.msrb.gmra.mxu2 %v8185_v1 }
 0x263   : > { %2079 = vmatpush.msra.mxu0 %v7429_v45  ;;  %2096 = vmatpush.msra.mxu1 %v7509_v57  ;;  %v8237_v45 = vld [vmem:[#allocation6 + $0x228] sm:$0xff] }
 0x264   : > { %2119 = vmatpush.msra.mxu2 %v8217_v2  ;;  %2136 = vmatpush.msra.mxu3 %v7512_v7  ;;  %v8279_v57 = vld [vmem:[#allocation6 + $0x68] sm:$0xff] }
 0x265   : > { %2080 = vmatpush.msra.mxu0 %v7445_v31  ;;  %2097 = vmatpush.msra.mxu1 %v7519_v13  ;;  %v8243_v31 = vld [vmem:[#allocation6 + $0x1e8] sm:$0xff]  ;;  %v12546_v13 = vld [vmem:[#allocation22_spill] sm:$0xff] }
 0x266   : > { %2120 = vmatpush.msra.mxu2 %v8223_v21  ;;  %2137 = vmatpush.msra.mxu3 %v7522_v22  ;;  %v12545_v7 = vld [vmem:[#allocation40_spill] sm:$0xff]  ;;  %v12547_v22 = vld [vmem:[#allocation38_spill] sm:$0xff] }
 0x267   : > { %2081 = vmatpush.msra.mxu0 %v7449_v56  ;;  %2098 = vmatpush.msra.mxu1 %v7529_v27  ;;  %v8249_v56 = vld [vmem:[#allocation6 + $0x1a8] sm:$0xff] }
 0x268   : > { %2121 = vmatpush.msra.mxu2 %v8229_v23  ;;  %2138 = vmatpush.msra.mxu3 %v7532_v30  ;;  %v8285_v27 = vld [vmem:[#allocation6 + $0x28] sm:$0xff]  ;;  %v12548_v30 = vld [vmem:[#allocation37_spill] sm:$0xff] }
 0x269   : > { %2031 = vmatmul.f32.vlgmr.msrb.gmra.mxu1 %v8198_v28  ;;  %2071 = vmatmul.f32.vlgmr.msrb.gmra.mxu3 %v8198_v28 }
 0x26a   : > { %2082 = vmatpush.msra.mxu0 %v7453_v3  ;;  %2099 = vmatpush.msra.mxu1 %v7541_v43  ;;  %v8255_v3 = vld [vmem:[#allocation6 + $0x168] sm:$0xff]  ;;  %v12549_v43 = vld [vmem:[#allocation21_spill] sm:$0xff] }
 0x26b   : > { %2122 = vmatpush.msra.mxu2 %v8237_v45  ;;  %2139 = vmatpush.msra.mxu3 %v7544_v44  ;;  %v8292_v44 = vld [vmem:[#allocation6 + $0x3f8] sm:$0xff] }
 0x26c   : > { %2083 = vmatpush.msra.mxu0 %v7457_v9  ;;  %2100 = vmatpush.msra.mxu1 %v7551_v17  ;;  %v8261_v9 = vld [vmem:[#allocation6 + $0x128] sm:$0xff]  ;;  %v12550_v17 = vld [vmem:[#allocation35_spill] sm:$0xff] }
 0x26d   : > { %2123 = vmatpush.msra.mxu2 %v8243_v31  ;;  %2140 = vmatpush.msra.mxu3 %v7554_v37  ;;  %v12551_v37 = vld [vmem:[#allocation42_spill] sm:$0xff] }
 0x26e   : > { %2084 = vmatpush.msra.mxu0 %v7463_v5  ;;  %2101 = vmatpush.msra.mxu1 %v7561_v63  ;;  %v12538_v5 = vld [vmem:[#allocation29_spill] sm:$0xff]  ;;  %v12552_v63 = vld [vmem:[#allocation24_spill] sm:$0xff] }
 0x26f   : > { %2124 = vmatpush.msra.mxu2 %v8249_v56  ;;  %2141 = vmatpush.msra.mxu3 %v7564_v39  ;;  %v8298_v39 = vld [vmem:[#allocation6 + $0x3b8] sm:$0xff] }
 0x270   : > { %2085 = vmatpush.msra.mxu0 %v7467_v11  ;;  %2102 = vmatpush.msra.mxu1 %v7571_v50  ;;  %v8267_v11 = vld [vmem:[#allocation6 + $0xe8] sm:$0xff]  ;;  %v12553_v50 = vld [vmem:[#allocation41_spill] sm:$0xff] }
 0x271   : > { %2125 = vmatpush.msra.mxu2 %v8255_v3  ;;  %2142 = vmatpush.msra.mxu3 %v7574_v4  ;;  %v12540_v4 = vld [vmem:[#allocation20_spill] sm:$0xff] }
 0x272   : > { %2086 = vmatpush.msra.mxu0 %v7472_v41  ;;  %2103 = vmatpush.msra.mxu1 %v7581_v25  ;;  %v12541_v41 = vld [vmem:[#allocation34_spill] sm:$0xff]  ;;  %v8273_v25 = vld [vmem:[#allocation6 + $0xa8] sm:$0xff] }
 0x273   : > { %2126 = vmatpush.msra.mxu2 %v8261_v9  ;;  %2143 = vmatpush.msra.mxu3 %v7584_v19  ;;  %v12543_v19 = vld [vmem:[#allocation15_spill] sm:$0xff] }
 0x274   : > { %2087 = vmatpush.msra.mxu0 %v7476_v48  ;;  %2104 = vmatpush.msra.mxu1 %v12538_v5  ;;  %v12544_v48 = vld [vmem:[#allocation31_spill] sm:$0xff]  ;;  %v8343_v5 = vld [vmem:[#allocation6 + $0x238] sm:$0xff] }
 0x275   : > { %2127 = vmatpush.msra.mxu2 %v8267_v11  ;;  %2144 = vmatpush.msra.mxu3 %v12539_v42  ;;  %v8346_v42 = vld [vmem:[#allocation6 + $0x6f8] sm:$0xff] }
 0x276   : > { %2088 = vmatpush.msra.mxu0 %v12540_v4  ;;  %2105 = vmatpush.msra.mxu1 %v12541_v41  ;;  %v12569_v4 = vld [vmem:[#allocation30_spill] sm:$0xff]  ;;  %v12570_v41 = vld [vmem:[#allocation56_spill] sm:$0xff] }
 0x277   : > { %2128 = vmatpush.msra.mxu2 %v8273_v25  ;;  %2145 = vmatpush.msra.mxu3 %v12542_v0  ;;  %v8351_v0 = vld [vmem:[#allocation6 + $0x1f8] sm:$0xff] }
 0x278   : > { %2089 = vmatpush.msra.mxu0 %v12543_v19  ;;  %2106 = vmatpush.msra.mxu1 %v12544_v48  ;;  %v8354_v19 = vld [vmem:[#allocation6 + $0x6b8] sm:$0xff]  ;;  %v12571_v48 = vld [vmem:[#allocation36_spill] sm:$0xff] }
 0x279   : > { %2129 = vmatpush.msra.mxu2 %v8279_v57  ;;  %2146 = vmatpush.msra.mxu3 %v12545_v7  ;;  %v12572_v7 = vld [vmem:[#allocation58_spill] sm:$0xff] }
 0x27a   : > { %2090 = vmatpush.msra.mxu0 %v12546_v13  ;;  %2107 = vmatpush.msra.mxu1 %v12547_v22  ;;  %v8359_v13 = vld [vmem:[#allocation6 + $0x1b8] sm:$0xff] }
 0x27b   : > { %2130 = vmatpush.msra.mxu2 %v8285_v27  ;;  %2147 = vmatpush.msra.mxu3 %v12548_v30  ;;  %12573 = vst [vmem:[#allocation29_spill] sm:$0xff] %v8359_v13  ;;  %v8362_v22 = vld [vmem:[#allocation6 + $0x678] sm:$0xff]  ;;  %v8365_v30 = vld [vmem:[#allocation6 + $0x170] sm:$0xff] }
 0x27c   : > { %2091 = vmatmul.f32.vlgmr.msra.gmra.mxu0 %v8185_v1  ;;  %2131 = vmatmul.f32.vlgmr.msra.gmra.mxu2 %v8185_v1  ;;  %12574 = vst [vmem:[#allocation27_spill] sm:$0xff] %v8362_v22 }
 0x27d   : > { %2155 = vmatpush.msrb.mxu0 %v12549_v43  ;;  %2195 = vmatpush.msrb.mxu2 %v8292_v44  ;;  %12575 = vst [vmem:[#allocation20_spill] sm:$0xff] %v8365_v30  ;;  %v12576_v43 = vld [vmem:[#allocation60_spill] sm:$0xff] }
 0x27e   : > { %2108 = vmatpush.msra.mxu1 %v12550_v17  ;;  %2148 = vmatpush.msra.mxu3 %v12551_v37  ;;  %v8369_v17 = vld [vmem:[#allocation6 + $0x178] sm:$0xff] }
 0x27f   : > { %2156 = vmatpush.msrb.mxu0 %v12552_v63  ;;  %2196 = vmatpush.msrb.mxu2 %v8298_v39  ;;  %12577 = vst [vmem:[#allocation34_spill] sm:$0xff] %v8369_v17  ;;  %v8372_v37 = vld [vmem:[#allocation6 + $0x638] sm:$0xff]  ;;  %v8375_v63 = vld [vmem:[#allocation6 + $0x130] sm:$0xff] }
 0x280   : > { %2109 = vmatpush.msra.mxu1 %v12553_v50  ;;  %2149 = vmatpush.msra.mxu3 %v12554_v20  ;;  %12578 = vst [vmem:[#allocation33_spill] sm:$0xff] %v8372_v37  ;;  %v12580_v50 = vld [vmem:[#allocation62_spill] sm:$0xff] }
 0x281   : > { %2157 = vmatpush.msrb.mxu0 %v12555_v40  ;;  %2197 = vmatpush.msrb.mxu2 %v8304_v29  ;;  %12579 = vst [vmem:[#allocation15_spill] sm:$0xff] %v8375_v63  ;;  %v8379_v20 = vld [vmem:[#allocation6 + $0x138] sm:$0xff] }
 0x282   : > { %2110 = vmatpush.msra.mxu1 %v12556_v58  ;;  %2150 = vmatpush.msra.mxu3 %v12557_v12  ;;  %12581 = vst [vmem:[#allocation31_spill] sm:$0xff] %v8379_v20  ;;  %v8382_v40 = vld [vmem:[#allocation6 + $0x5f8] sm:$0xff]  ;;  %v8385_v58 = vld [vmem:[#allocation6 + $0xf0] sm:$0xff]  ;;  %v12584_v12 = vld [vmem:[#allocation64_spill] sm:$0xff] }
 0x283   : > { %2111 = vmatmul.f32.vlgmr.msra.gmra.mxu1 %v8198_v28  ;;  %2151 = vmatmul.f32.vlgmr.msra.gmra.mxu3 %v8198_v28  ;;  %12582 = vst [vmem:[#allocation40_spill] sm:$0xff] %v8382_v40 }
 0x284   : > { %2158 = vmatpush.msrb.mxu0 %v12558_v55  ;;  %2175 = vmatpush.msrb.mxu1 %v12559_v53  ;;  %12583 = vst [vmem:[#allocation22_spill] sm:$0xff] %v8385_v58  ;;  %v8389_v55 = vld [vmem:[#allocation6 + $0xf8] sm:$0xff] }
 0x285   : > { %2198 = vmatpush.msrb.mxu2 %v8313_v18  ;;  %2215 = vmatpush.msrb.mxu3 %v12560_v16  ;;  %12585 = vst [vmem:[#allocation38_spill] sm:$0xff] %v8389_v55  ;;  %v8392_v53 = vld [vmem:[#allocation6 + $0x5b8] sm:$0xff]  ;;  %v8395_v16 = vld [vmem:[#allocation6 + $0xb0] sm:$0xff] }
 0x286   : > { %2159 = vmatpush.msrb.mxu0 %v12561_v10  ;;  %2176 = vmatpush.msrb.mxu1 %v12562_v14  ;;  %12586 = vst [vmem:[#allocation37_spill] sm:$0xff] %v8392_v53  ;;  %v12588_v10 = vld [vmem:[#allocation65_spill] sm:$0xff]  ;;  %v8399_v14 = vld [vmem:[#allocation6 + $0xb8] sm:$0xff] }
 0x287   : > { %2199 = vmatpush.msrb.mxu2 %v8319_v38  ;;  %2216 = vmatpush.msrb.mxu3 %v8322_v59  ;;  %12587 = vst [vmem:[#allocation21_spill] sm:$0xff] %v8395_v16 }
 0x288   : > { %2160 = vmatpush.msrb.mxu0 %v12563_v52  ;;  %2177 = vmatpush.msrb.mxu1 %v12564_v33  ;;  %12589 = vst [vmem:[#allocation35_spill] sm:$0xff] %v8399_v14  ;;  %v8402_v52 = vld [vmem:[#allocation6 + $0x578] sm:$0xff]  ;;  %v8405_v33 = vld [vmem:[#allocation6 + $0x70] sm:$0xff] }
 0x289   : > { %2200 = vmatpush.msrb.mxu2 %v8327_v61  ;;  %2217 = vmatpush.msrb.mxu3 %v8330_v62  ;;  %12590 = vst [vmem:[#allocation42_spill] sm:$0xff] %v8402_v52 }
 0x28a   : > { %2161 = vmatpush.msrb.mxu0 %v12565_v32  ;;  %2178 = vmatpush.msrb.mxu1 %v12566_v49  ;;  %12591 = vst [vmem:[#allocation24_spill] sm:$0xff] %v8405_v33  ;;  %v12592_v32 = vld [vmem:[#allocation67_spill] sm:$0xff]  ;;  %v8409_v49 = vld [vmem:[#allocation6 + $0x78] sm:$0xff] }
 0x28b   : > { %2201 = vmatpush.msrb.mxu2 %v8335_v60  ;;  %2218 = vmatpush.msrb.mxu3 %v8338_v35  ;;  %12593 = vst [vmem:[#allocation41_spill] sm:$0xff] %v8409_v49 }
 0x28c   : > { %2162 = vmatpush.msrb.mxu0 %v12567_v24  ;;  %2179 = vmatpush.msrb.mxu1 %v12568_v36  ;;  %v8412_v24 = vld [vmem:[#allocation6 + $0x538] sm:$0xff]  ;;  %v8415_v36 = vld [vmem:[#allocation6 + $0x30] sm:$0xff] }
 0x28d   : > { %2202 = vmatpush.msrb.mxu2 %v8343_v5  ;;  %2219 = vmatpush.msrb.mxu3 %v8346_v42  ;;  %12594 = vst [vmem:[#allocation39_spill] sm:$0xff] %v8412_v24 }
 0x28e   : > { %2163 = vmatpush.msrb.mxu0 %v12569_v4  ;;  %2180 = vmatpush.msrb.mxu1 %v12570_v41  ;;  %12595 = vst [vmem:[#allocation19_spill] sm:$0xff] %v8415_v36  ;;  %v12596_v4 = vld [vmem:[#allocation69_spill] sm:$0xff]  ;;  %v8419_v41 = vld [vmem:[#allocation6 + $0x38] sm:$0xff] }
 0x28f   : > { %2203 = vmatpush.msrb.mxu2 %v8351_v0  ;;  %2220 = vmatpush.msrb.mxu3 %v8354_v19  ;;  %12597 = vst [vmem:[#allocation44_spill] sm:$0xff] %v8419_v41 }
 0x290   : > { %2164 = vmatpush.msrb.mxu0 %v12571_v48  ;;  %2181 = vmatpush.msrb.mxu1 %v12572_v7  ;;  %v8422_v48 = vld [vmem:[#allocation6 + $0x4f8] sm:$0xff]  ;;  %v12599_v7 = vld [vmem:[#allocation71_spill] sm:$0xff] }
 0x291   : > { %2204 = vmatpush.msrb.mxu2 %v8359_v13  ;;  %2221 = vmatpush.msrb.mxu3 %v8362_v22  ;;  %12598 = vst [vmem:[#allocation43_spill] sm:$0xff] %v8422_v48  ;;  %v11755_v13 = vrot.slane %v7382_v54, 3 }
 0x292   : > { %2165 = vmatpush.msrb.mxu0 %v8365_v30  ;;  %2182 = vmatpush.msrb.mxu1 %v12576_v43  ;;  %v8428_v43 = vld [vmem:[#allocation6 + $0x4b8] sm:$0xff] }
 0x293   : > { %2205 = vmatpush.msrb.mxu2 %v8369_v17  ;;  %2222 = vmatpush.msrb.mxu3 %v8372_v37  ;;  %12600 = vst [vmem:[#allocation28_spill] sm:$0xff] %v8428_v43  ;;  %v12736_v37 = vld [vmem:[#allocation18_spill] sm:$0xff] }
 0x294   : > { %2166 = vmatpush.msrb.mxu0 %v8375_v63  ;;  %2183 = vmatpush.msrb.mxu1 %v12580_v50  ;;  %v8431_v50 = vld [vmem:[#allocation6 + $0x3c0] sm:$0xff] }
 0x295   : > { %2206 = vmatpush.msrb.mxu2 %v8379_v20  ;;  %2223 = vmatpush.msrb.mxu3 %v8382_v40  ;;  %12601 = vst [vmem:[#allocation46_spill] sm:$0xff] %v8431_v50  ;;  %v12735_v40 = vld [vmem:[#allocation13_spill] sm:$0xff] }
 0x296   : > { %2167 = vmatpush.msrb.mxu0 %v8385_v58  ;;  %2184 = vmatpush.msrb.mxu1 %v12584_v12  ;;  %v12602_v12 = vld [vmem:[#allocation47_spill] sm:$0xff]  ;;  %v11748_v20 = vrot.slane %v12735_v40, 3 }
 0x297   : > { %2207 = vmatpush.msrb.mxu2 %v8389_v55  ;;  %2224 = vmatpush.msrb.mxu3 %v8392_v53  ;;  %v12734_v53 = vld [vmem:[#allocation16_spill] sm:$0xff] }
 0x298   : > { %2168 = vmatpush.msrb.mxu0 %v8395_v16  ;;  %2185 = vmatpush.msrb.mxu1 %v12588_v10  ;;  %v12603_v10 = vld [vmem:[#allocation73_spill] sm:$0xff]  ;;  %v12733_v16 = vld [vmem:[#allocation14_spill] sm:$0xff] }
 0x299   : > { %2208 = vmatpush.msrb.mxu2 %v8399_v14  ;;  %2225 = vmatpush.msrb.mxu3 %v8402_v52 }
 0x29a   : > { %2169 = vmatpush.msrb.mxu0 %v8405_v33  ;;  %2186 = vmatpush.msrb.mxu1 %v12592_v32  ;;  %v8436_v32 = vld [vmem:[#allocation6 + $0x478] sm:$0xff] }
 0x29b   : > { %2209 = vmatpush.msrb.mxu2 %v8409_v49  ;;  %2226 = vmatpush.msrb.mxu3 %v8412_v24  ;;  %12604 = vst [vmem:[#allocation45_spill] sm:$0xff] %v8436_v32 }
 0x29c   : > { %2170 = vmatpush.msrb.mxu0 %v8415_v36  ;;  %2187 = vmatpush.msrb.mxu1 %v12596_v4  ;;  %v8439_v4 = vld [vmem:[#allocation6 + $0x380] sm:$0xff] }
 0x29d   : > { %2210 = vmatpush.msrb.mxu2 %v8419_v41  ;;  %2227 = vmatpush.msrb.mxu3 %v8422_v48  ;;  %12605 = vst [vmem:[#allocation26_spill] sm:$0xff] %v8439_v4  ;;  %v12654_v48 = vld [vmem:[#allocation75_spill] sm:$0xff]  ;;  %v12659_v41 = vld [vmem:[#allocation125_spill] sm:$0xff] }
 0x29e   : > { %2171 = vmatmul.f32.vlgmr.msrb.gmra.mxu0 %v8185_v1  ;;  %2211 = vmatmul.f32.vlgmr.msrb.gmra.mxu2 %v8185_v1  ;;  %v12606_v1 = vld [vmem:[#allocation49_spill] sm:$0xff] }
 0x29f   : > { %2188 = vmatpush.msrb.mxu1 %v12599_v7  ;;  %2228 = vmatpush.msrb.mxu3 %v8428_v43  ;;  %v12607_v7 = vld [vmem:[#allocation76_spill] sm:$0xff]  ;;  %v8444_v43 = vld [vmem:[#allocation6 + $0x438] sm:$0xff] }
 0x2a0   : > { %2431 = vmatpush.msra.mxu0 %v8431_v50  ;;  %2471 = vmatpush.msra.mxu2 %v12602_v12  ;;  %12608 = vst [vmem:[#allocation48_spill] sm:$0xff] %v8444_v43  ;;  %v8449_v12 = vld [vmem:[#allocation6 + $0x340] sm:$0xff]  ;;  %v12616_v50 = vld [vmem:[#allocation93_spill] sm:$0xff] }
 0x2a1   : > { %2189 = vmatpush.msrb.mxu1 %v12603_v10  ;;  %2229 = vmatpush.msrb.mxu3 %v8436_v32  ;;  %12609 = vst [vmem:[#allocation25_spill] sm:$0xff] %v8449_v12  ;;  %v12610_v10 = vld [vmem:[#allocation51_spill] sm:$0xff] }
 0x2a2   : > { %2432 = vmatpush.msra.mxu0 %v8439_v4  ;;  %2472 = vmatpush.msra.mxu2 %v12606_v1  ;;  %v12611_v32 = vld [vmem:[#allocation79_spill] sm:$0xff]  ;;  %v12612_v4 = vld [vmem:[#allocation81_spill] sm:$0xff] }
 0x2a3   : > { %2190 = vmatpush.msrb.mxu1 %v12607_v7  ;;  %2230 = vmatpush.msrb.mxu3 %v8444_v43  ;;  %v8455_v1 = vld [vmem:[#allocation6 + $0x300] sm:$0xff]  ;;  %v12614_v7 = vld [vmem:[#allocation53_spill] sm:$0xff] }
 0x2a4   : > { %2191 = vmatmul.f32.vlgmr.msrb.gmra.mxu1 %v8198_v28  ;;  %2231 = vmatmul.f32.vlgmr.msrb.gmra.mxu3 %v8198_v28  ;;  %12613 = vst [vmem:[#allocation50_spill] sm:$0xff] %v8455_v1  ;;  %v12615_v43 = vld [vmem:[#allocation89_spill] sm:$0xff]  ;;  %v8461_v28 = vld [vmem:[#allocation6 + $0x2c0] sm:$0xff] }
 0x2a5   : > { %2433 = vmatpush.msra.mxu0 %v8449_v12  ;;  %2473 = vmatpush.msra.mxu2 %v12610_v10  ;;  %12617 = vst [vmem:[#allocation23_spill] sm:$0xff] %v8461_v28  ;;  %v12618_v12 = vld [vmem:[#allocation55_spill] sm:$0xff] }
 0x2a6   : > { %2451 = vmatpush.msra.mxu1 %v12611_v32  ;;  %2491 = vmatpush.msra.mxu3 %v12612_v4  ;;  %v12619_v10 = vld [vmem:[#allocation99_spill] sm:$0xff]  ;;  %v12620_v32 = vld [vmem:[#allocation105_spill] sm:$0xff] }
 0x2a7   : > { %2434 = vmatpush.msra.mxu0 %v8455_v1  ;;  %2474 = vmatpush.msra.mxu2 %v12614_v7  ;;  %v8467_v4 = vld [vmem:[#allocation6 + $0x280] sm:$0xff]  ;;  %v12622_v1 = vld [vmem:[#allocation57_spill] sm:$0xff]  ;;  %v12623_v7 = vld [vmem:[#allocation108_spill] sm:$0xff] }
 0x2a8   : > { %2452 = vmatpush.msra.mxu1 %v12615_v43  ;;  %2492 = vmatpush.msra.mxu3 %v12616_v50  ;;  %12621 = vst [vmem:[#allocation52_spill] sm:$0xff] %v8467_v4  ;;  %v12624_v43 = vld [vmem:[#allocation111_spill] sm:$0xff] }
 0x2a9   : > { %2435 = vmatpush.msra.mxu0 %v8461_v28  ;;  %2475 = vmatpush.msra.mxu2 %v12618_v12  ;;  %v8473_v50 = vld [vmem:[#allocation6 + $0x240] sm:$0xff]  ;;  %v12627_v12 = vld [vmem:[#allocation114_spill] sm:$0xff] }
 0x2aa   : > { %2453 = vmatpush.msra.mxu1 %v12619_v10  ;;  %2493 = vmatpush.msra.mxu3 %v12620_v32  ;;  %12625 = vst [vmem:[#allocation32_spill] sm:$0xff] %v8473_v50  ;;  %v12626_v28 = vld [vmem:[#allocation59_spill] sm:$0xff]  ;;  %v12628_v10 = vld [vmem:[#allocation85_spill] sm:$0xff] }
 0x2ab   : > { %2436 = vmatpush.msra.mxu0 %v8467_v4  ;;  %2476 = vmatpush.msra.mxu2 %v12622_v1  ;;  %v8479_v32 = vld [vmem:[#allocation6 + $0x200] sm:$0xff]  ;;  %v12630_v4 = vld [vmem:[#allocation61_spill] sm:$0xff] }
 0x2ac   : > { %2454 = vmatpush.msra.mxu1 %v12623_v7  ;;  %2494 = vmatpush.msra.mxu3 %v12624_v43  ;;  %12629 = vst [vmem:[#allocation54_spill] sm:$0xff] %v8479_v32  ;;  %v12631_v1 = vld [vmem:[#allocation95_spill] sm:$0xff]  ;;  %v12632_v7 = vld [vmem:[#allocation98_spill] sm:$0xff] }
 0x2ad   : > { %2437 = vmatpush.msra.mxu0 %v8473_v50  ;;  %2477 = vmatpush.msra.mxu2 %v12626_v28  ;;  %v8485_v43 = vld [vmem:[#allocation6 + $0x1c0] sm:$0xff]  ;;  %v12635_v28 = vld [vmem:[#allocation101_spill] sm:$0xff] }
 0x2ae   : > { %2455 = vmatpush.msra.mxu1 %v12627_v12  ;;  %2495 = vmatpush.msra.mxu3 %v12628_v10  ;;  %12633 = vst [vmem:[#allocation30_spill] sm:$0xff] %v8485_v43  ;;  %v12634_v50 = vld [vmem:[#allocation63_spill] sm:$0xff]  ;;  %v12636_v12 = vld [vmem:[#allocation104_spill] sm:$0xff] }
 0x2af   : > { %2438 = vmatpush.msra.mxu0 %v8479_v32  ;;  %2478 = vmatpush.msra.mxu2 %v12630_v4  ;;  %v8491_v10 = vld [vmem:[#allocation6 + $0x180] sm:$0xff]  ;;  %v12638_v32 = vld [vmem:[#allocation66_spill] sm:$0xff] }
 0x2b0   : > { %2456 = vmatpush.msra.mxu1 %v12631_v1  ;;  %2496 = vmatpush.msra.mxu3 %v12632_v7  ;;  %12637 = vst [vmem:[#allocation56_spill] sm:$0xff] %v8491_v10  ;;  %v12639_v4 = vld [vmem:[#allocation107_spill] sm:$0xff]  ;;  %v12640_v1 = vld [vmem:[#allocation110_spill] sm:$0xff] }
 0x2b1   : > { %2439 = vmatpush.msra.mxu0 %v8485_v43  ;;  %2479 = vmatpush.msra.mxu2 %v12634_v50  ;;  %v8497_v7 = vld [vmem:[#allocation6 + $0x140] sm:$0xff]  ;;  %v12642_v43 = vld [vmem:[#allocation68_spill] sm:$0xff]  ;;  %v12643_v50 = vld [vmem:[#allocation113_spill] sm:$0xff] }
 0x2b2   : > { %2457 = vmatpush.msra.mxu1 %v12635_v28  ;;  %2497 = vmatpush.msra.mxu3 %v12636_v12  ;;  %12641 = vst [vmem:[#allocation36_spill] sm:$0xff] %v8497_v7  ;;  %v12644_v28 = vld [vmem:[#allocation116_spill] sm:$0xff]  ;;  %v8503_v12 = vld [vmem:[#allocation6 + $0x100] sm:$0xff] }
 0x2b3   : > { %2440 = vmatpush.msra.mxu0 %v8491_v10  ;;  %2480 = vmatpush.msra.mxu2 %v12638_v32  ;;  %12645 = vst [vmem:[#allocation58_spill] sm:$0xff] %v8503_v12  ;;  %v12646_v10 = vld [vmem:[#allocation70_spill] sm:$0xff]  ;;  %v12647_v32 = vld [vmem:[#allocation117_spill] sm:$0xff] }
 0x2b4   : > { %2458 = vmatpush.msra.mxu1 %v12639_v4  ;;  %2498 = vmatpush.msra.mxu3 %v12640_v1  ;;  %v12648_v4 = vld [vmem:[#allocation119_spill] sm:$0xff] }
 0x2b5   : > { %2441 = vmatpush.msra.mxu0 %v8497_v7  ;;  %2481 = vmatpush.msra.mxu2 %v12642_v43  ;;  %v8509_v1 = vld [vmem:[#allocation6 + $0xc0] sm:$0xff]  ;;  %v12650_v7 = vld [vmem:[#allocation72_spill] sm:$0xff] }
 0x2b6   : > { %2459 = vmatpush.msra.mxu1 %v12643_v50  ;;  %2499 = vmatpush.msra.mxu3 %v12644_v28  ;;  %12649 = vst [vmem:[#allocation60_spill] sm:$0xff] %v8509_v1  ;;  %v12651_v43 = vld [vmem:[#allocation112_spill] sm:$0xff]  ;;  %v12652_v50 = vld [vmem:[#allocation118_spill] sm:$0xff] }
 0x2b7   : > { %2442 = vmatpush.msra.mxu0 %v8503_v12  ;;  %2482 = vmatpush.msra.mxu2 %v12646_v10  ;;  %v12653_v28 = vld [vmem:[#allocation74_spill] sm:$0xff]  ;;  %v12655_v12 = vld [vmem:[#allocation121_spill] sm:$0xff]  ;;  %v12656_v10 = vld [vmem:[#allocation123_spill] sm:$0xff] }
 0x2b8   : > { %2460 = vmatpush.msra.mxu1 %v12647_v32  ;;  %2500 = vmatpush.msra.mxu3 %v12648_v4  ;;  %v12657_v32 = vld [vmem:[#allocation77_spill] sm:$0xff]  ;;  %v12658_v4 = vld [vmem:[#allocation86_spill] sm:$0xff] }
 0x2b9   : > { %2443 = vmatpush.msra.mxu0 %v8509_v1  ;;  %2483 = vmatpush.msra.mxu2 %v12650_v7  ;;  %v12660_v1 = vld [vmem:[#allocation127_spill] sm:$0xff] }
 0x2ba   : > { %2461 = vmatpush.msra.mxu1 %v12651_v43  ;;  %2501 = vmatpush.msra.mxu3 %v12652_v50  ;;  %v12661_v7 = vld [vmem:[#allocation91_spill] sm:$0xff]  ;;  %v12662_v43 = vld [vmem:[#allocation96_spill] sm:$0xff]  ;;  %v12663_v50 = vld [vmem:[#allocation102_spill] sm:$0xff] }
 0x2bb   : > { %2444 = vmatpush.msra.mxu0 %v12653_v28  ;;  %2484 = vmatpush.msra.mxu2 %v12654_v48  ;;  %v12664_v28 = vld [vmem:[#allocation78_spill] sm:$0xff]  ;;  %v12665_v48 = vld [vmem:[#allocation129_spill] sm:$0xff] }
 0x2bc   : > { %2462 = vmatpush.msra.mxu1 %v12655_v12  ;;  %2502 = vmatpush.msra.mxu3 %v12656_v10  ;;  %v12666_v12 = vld [vmem:[#allocation131_spill] sm:$0xff]  ;;  %v12667_v10 = vld [vmem:[#allocation80_spill] sm:$0xff] }
 0x2bd   : > { %2445 = vmatpush.msra.mxu0 %v12657_v32  ;;  %2485 = vmatpush.msra.mxu2 %v12658_v4  ;;  %v12668_v32 = vld [vmem:[#allocation82_spill] sm:$0xff]  ;;  %v12669_v4 = vld [vmem:[#allocation133_spill] sm:$0xff] }
 0x2be   : > { %2463 = vmatpush.msra.mxu1 %v12659_v41  ;;  %2503 = vmatpush.msra.mxu3 %v12660_v1  ;;  %v12670_v41 = vld [vmem:[#allocation135_spill] sm:$0xff] }
 0x2bf   : > { %2446 = vmatpush.msra.mxu0 %v12661_v7  ;;  %2486 = vmatpush.msra.mxu2 %v12662_v43  ;;  %v12671_v1 = vld [vmem:[#allocation83_spill] sm:$0xff]  ;;  %v12672_v7 = vld [vmem:[#allocation88_spill] sm:$0xff]  ;;  %v12673_v43 = vld [vmem:[#allocation137_spill] sm:$0xff] }
 0x2c0   : > { %2464 = vmatpush.msra.mxu1 %v12665_v48  ;;  %2504 = vmatpush.msra.mxu3 %v12666_v12  ;;  %v12676_v48 = vld [vmem:[#allocation140_spill] sm:$0xff]  ;;  %v12677_v12 = vld [vmem:[#allocation87_spill] sm:$0xff] }
 0x2c1   : > { %2511 = vmatpush.msrb.mxu0 %v12663_v50  ;;  %2551 = vmatpush.msrb.mxu2 %v12664_v28  ;;  %v12674_v50 = vld [vmem:[#allocation139_spill] sm:$0xff]  ;;  %v12675_v28 = vld [vmem:[#allocation84_spill] sm:$0xff] }
 0x2c2   : > { %2465 = vmatpush.msra.mxu1 %v12669_v4  ;;  %2505 = vmatpush.msra.mxu3 %v12670_v41  ;;  %v12680_v4 = vld [vmem:[#allocation143_spill] sm:$0xff]  ;;  %v12681_v41 = vld [vmem:[#allocation92_spill] sm:$0xff] }
 0x2c3   : > { %2512 = vmatpush.msrb.mxu0 %v12667_v10  ;;  %2552 = vmatpush.msrb.mxu2 %v12668_v32  ;;  %v12678_v10 = vld [vmem:[#allocation141_spill] sm:$0xff]  ;;  %v12679_v32 = vld [vmem:[#allocation90_spill] sm:$0xff] }
 0x2c4   : > { %2466 = vmatpush.msra.mxu1 %v12673_v43  ;;  %2506 = vmatpush.msra.mxu3 %v12674_v50  ;;  %v12684_v43 = vld [vmem:[#allocation147_spill] sm:$0xff]  ;;  %v12685_v50 = vld [vmem:[#allocation97_spill] sm:$0xff] }
 0x2c5   : > { %2513 = vmatpush.msrb.mxu0 %v12671_v1  ;;  %2553 = vmatpush.msrb.mxu2 %v12672_v7  ;;  %v12682_v1 = vld [vmem:[#allocation145_spill] sm:$0xff]  ;;  %v12683_v7 = vld [vmem:[#allocation94_spill] sm:$0xff] }
 0x2c6   : > { %2531 = vmatpush.msrb.mxu1 %v12676_v48  ;;  %2571 = vmatpush.msrb.mxu3 %v12678_v10  ;;  %v12687_v48 = vld [vmem:[#allocation100_spill] sm:$0xff]  ;;  %v12689_v10 = vld [vmem:[#allocation103_spill] sm:$0xff] }
 0x2c7   : > { %2514 = vmatpush.msrb.mxu0 %v12675_v28  ;;  %2554 = vmatpush.msrb.mxu2 %v12677_v12  ;;  %v12686_v28 = vld [vmem:[#allocation149_spill] sm:$0xff]  ;;  %v12688_v12 = vld [vmem:[#allocation151_spill] sm:$0xff] }
 0x2c8   : > { %2532 = vmatpush.msrb.mxu1 %v12680_v4  ;;  %2572 = vmatpush.msrb.mxu3 %v12682_v1  ;;  %v12691_v4 = vld [vmem:[#allocation106_spill] sm:$0xff]  ;;  %v12693_v1 = vld [vmem:[#allocation109_spill] sm:$0xff] }
 0x2c9   : > { %2515 = vmatpush.msrb.mxu0 %v12679_v32  ;;  %2555 = vmatpush.msrb.mxu2 %v12681_v41  ;;  %v12690_v32 = vld [vmem:[#allocation152_spill] sm:$0xff]  ;;  %v12692_v41 = vld [vmem:[#allocation153_spill] sm:$0xff] }
 0x2ca   : > { %2533 = vmatpush.msrb.mxu1 %v12684_v43  ;;  %2573 = vmatpush.msrb.mxu3 %v12686_v28  ;;  %v12695_v43 = vld [vmem:[#allocation115_spill] sm:$0xff]  ;;  %v12697_v28 = vld [vmem:[#allocation120_spill] sm:$0xff] }
 0x2cb   : > { %2516 = vmatpush.msrb.mxu0 %v12683_v7  ;;  %2556 = vmatpush.msrb.mxu2 %v12685_v50  ;;  %v12694_v7 = vld [vmem:[#allocation154_spill] sm:$0xff]  ;;  %v12696_v50 = vld [vmem:[#allocation155_spill] sm:$0xff] }
 0x2cc   : > { %2534 = vmatpush.msrb.mxu1 %v12688_v12  ;;  %2574 = vmatpush.msrb.mxu3 %v12690_v32  ;;  %v12699_v12 = vld [vmem:[#allocation122_spill] sm:$0xff]  ;;  %v12701_v32 = vld [vmem:[#allocation124_spill] sm:$0xff] }
 0x2cd   : > { %2517 = vmatpush.msrb.mxu0 %v12687_v48  ;;  %2557 = vmatpush.msrb.mxu2 %v12689_v10  ;;  %v12698_v48 = vld [vmem:[#allocation156_spill] sm:$0xff]  ;;  %v12700_v10 = vld [vmem:[#allocation157_spill] sm:$0xff] }
 0x2ce   : > { %2535 = vmatpush.msrb.mxu1 %v12692_v41  ;;  %2575 = vmatpush.msrb.mxu3 %v12694_v7  ;;  %v12703_v41 = vld [vmem:[#allocation126_spill] sm:$0xff]  ;;  %v12705_v7 = vld [vmem:[#allocation128_spill] sm:$0xff] }
 0x2cf   : > { %2518 = vmatpush.msrb.mxu0 %v12691_v4  ;;  %2558 = vmatpush.msrb.mxu2 %v12693_v1  ;;  %v12702_v4 = vld [vmem:[#allocation158_spill] sm:$0xff]  ;;  %v12704_v1 = vld [vmem:[#allocation159_spill] sm:$0xff] }
 0x2d0   : > { %2536 = vmatpush.msrb.mxu1 %v12696_v50  ;;  %2576 = vmatpush.msrb.mxu3 %v12698_v48  ;;  %v12707_v50 = vld [vmem:[#allocation130_spill] sm:$0xff]  ;;  %v12709_v48 = vld [vmem:[#allocation132_spill] sm:$0xff] }
 0x2d1   : > { %2519 = vmatpush.msrb.mxu0 %v12695_v43  ;;  %2559 = vmatpush.msrb.mxu2 %v12697_v28  ;;  %v12706_v43 = vld [vmem:[#allocation160_spill] sm:$0xff]  ;;  %v12708_v28 = vld [vmem:[#allocation161_spill] sm:$0xff] }
 0x2d2   : > { %2537 = vmatpush.msrb.mxu1 %v12700_v10  ;;  %2577 = vmatpush.msrb.mxu3 %v12702_v4  ;;  %v12711_v10 = vld [vmem:[#allocation134_spill] sm:$0xff]  ;;  %v12713_v4 = vld [vmem:[#allocation136_spill] sm:$0xff] }
 0x2d3   : > { %2520 = vmatpush.msrb.mxu0 %v12699_v12  ;;  %2560 = vmatpush.msrb.mxu2 %v12701_v32  ;;  %v12710_v12 = vld [vmem:[#allocation162_spill] sm:$0xff]  ;;  %v12712_v32 = vld [vmem:[#allocation163_spill] sm:$0xff] }
 0x2d4   : > { %2538 = vmatpush.msrb.mxu1 %v12704_v1  ;;  %2578 = vmatpush.msrb.mxu3 %v12706_v43  ;;  %v12715_v1 = vld [vmem:[#allocation138_spill] sm:$0xff] }
 0x2d5   : > { %2521 = vmatpush.msrb.mxu0 %v12703_v41  ;;  %2561 = vmatpush.msrb.mxu2 %v12705_v7  ;;  %v12714_v41 = vld [vmem:[#allocation164_spill] sm:$0xff]  ;;  %v12716_v7 = vld [vmem:[#allocation165_spill] sm:$0xff]  ;;  %v12717_v43 = vld [vmem:[#allocation142_spill] sm:$0xff] }
 0x2d6   : > { %2539 = vmatpush.msrb.mxu1 %v12708_v28  ;;  %2579 = vmatpush.msrb.mxu3 %v12710_v12  ;;  %v12719_v28 = vld [vmem:[#allocation144_spill] sm:$0xff]  ;;  %v12721_v12 = vld [vmem:[#allocation146_spill] sm:$0xff] }
 0x2d7   : > { %2522 = vmatpush.msrb.mxu0 %v12707_v50  ;;  %2562 = vmatpush.msrb.mxu2 %v12709_v48  ;;  %v12718_v50 = vld [vmem:[#allocation166_spill] sm:$0xff]  ;;  %v12720_v48 = vld [vmem:[#allocation167_spill] sm:$0xff] }
 0x2d8   : > { %2540 = vmatpush.msrb.mxu1 %v12712_v32  ;;  %2580 = vmatpush.msrb.mxu3 %v12714_v41  ;;  %v12723_v32 = vld [vmem:[#allocation148_spill] sm:$0xff]  ;;  %v12725_v41 = vld [vmem:[#allocation150_spill] sm:$0xff] }
 0x2d9   : > { %2523 = vmatpush.msrb.mxu0 %v12711_v10  ;;  %2563 = vmatpush.msrb.mxu2 %v12713_v4  ;;  %v12722_v10 = vld [vmem:[#allocation168_spill] sm:$0xff]  ;;  %v12724_v4 = vld [vmem:[#allocation169_spill] sm:$0xff] }
 0x2da   : > { %2541 = vmatpush.msrb.mxu1 %v12716_v7  ;;  %2581 = vmatpush.msrb.mxu3 %v12718_v50  ;;  %v12727_v7 = vld [vmem:[#allocation171_spill] sm:$0xff]  ;;  %v12729_v50 = vld [vmem:[#allocation173_spill] sm:$0xff] }
 0x2db   : > { %2524 = vmatpush.msrb.mxu0 %v12715_v1  ;;  %2564 = vmatpush.msrb.mxu2 %v12717_v43  ;;  %v12726_v1 = vld [vmem:[#allocation170_spill] sm:$0xff]  ;;  %v12728_v43 = vld [vmem:[#allocation172_spill] sm:$0xff] }
 0x2dc   : > { %2542 = vmatpush.msrb.mxu1 %v12720_v48  ;;  %2582 = vmatpush.msrb.mxu3 %v12722_v10  ;;  %v12731_v48 = vld [vmem:[#allocation175_spill] sm:$0xff]  ;;  %v1952_v10 = vpop.f32.mrf.mxu1 }
 0x2dd   : > { %2525 = vmatpush.msrb.mxu0 %v12719_v28  ;;  %2565 = vmatpush.msrb.mxu2 %v12721_v12  ;;  %v12730_v28 = vld [vmem:[#allocation174_spill] sm:$0xff]  ;;  %v12732_v12 = vld [vmem:[#allocation176_spill] sm:$0xff] }
 0x2de   : > { %2543 = vmatpush.msrb.mxu1 %v12724_v4  ;;  %2583 = vmatpush.msrb.mxu3 %v12726_v1  ;;  %v1972_v4 = vpop.f32.mrf.mxu2 }
 0x2df   : > { %2526 = vmatpush.msrb.mxu0 %v12723_v32  ;;  %2566 = vmatpush.msrb.mxu2 %v12725_v41  ;;  %v1932_v32 = vpop.f32.mrf.mxu0 }
 0x2e0   : > { %2544 = vmatpush.msrb.mxu1 %v12727_v7  ;;  %2584 = vmatpush.msrb.mxu3 %v12728_v43  ;;  %v1953_v41 = vadd.f32 %v1952_v10, %v1932_v32  ;;  %v11747_v10 = vrot.slane %v12736_v37, 3 }
 0x2e2   : > { %2545 = vmatpush.msrb.mxu1 %v12729_v50  ;;  %2585 = vmatpush.msrb.mxu3 %v12730_v28  ;;  %v1992_v36 = vpop.f32.mrf.mxu3  ;;  %v2243_v33 = vrot.slane %v1953_v41, 6 }
 0x2e3   : > { %v1993_v43 = vadd.f32 %v1992_v36, %v1972_v4 }
 0x2e4   : > { %2546 = vmatpush.msrb.mxu1 %v12731_v48  ;;  %2586 = vmatpush.msrb.mxu3 %v12732_v12  ;;  %v2259_v28 = vadd.f32 %v2243_v33, %v12733_v16 }
 0x2e5   : > { %v2244_v55 = vrot.slane %v1993_v43, 6 }
 0x2e6   : > { %v2032_v24 = vpop.f32.mrf.mxu1  ;;  %v2052_v14 = vpop.f32.mrf.mxu2  ;;  %v5117_v58 = vmul.f32 -1.442695, %v2259_v28 }
 0x2e7   : > { %v2012_v49 = vpop.f32.mrf.mxu0 }
 0x2e8   : > { %v2033_v1 = vadd.f32 %v2032_v24, %v2012_v49  ;;  %v2260_v49 = vadd.f32 %v2244_v55, %v11748_v20  ;;  %5297 = vpow2.f32 %v5117_v58 }
 0x2ea   : > { %v2245_v52 = vrot.slane %v2033_v1, 6 }
 0x2ec   : > { %v2072_v7 = vpop.f32.mrf.mxu3  ;;  %v2261_v48 = vadd.f32 %v2245_v52, %v12734_v53  ;;  %v12737_v53 = vld [vmem:[#allocation17_spill] sm:$0xff] }
 0x2ed   : > { %v2073_v50 = vadd.f32 %v2072_v7, %v2052_v14  ;;  %v5118_v14 = vmul.f32 -1.442695, %v2260_v49 }
 0x2ee   : > { %v5119_v63 = vmul.f32 -1.442695, %v2261_v48  ;;  %v5298_v36 = vpop.eup %5297 }
 0x2ef   : > { %v2246_v12 = vrot.slane %v2073_v50, 6  ;;  %v8603_v32 = vadd.f32 1.0, %v5298_v36 }
 0x2f0   : > { %5299 = vpow2.f32 %v5119_v63 }
 0x2f1   : > { %v2262_v24 = vadd.f32 %v2246_v12, %v11747_v10  ;;  %5301 = vpow2.f32 %v5118_v14  ;;  %vm2280_vm4 = vweird.f32 %v8603_v32 }
 0x2f3   : > { %v5120_v33 = vmul.f32 -1.442695, %v2262_v24 }
 0x2f5   : > { %5303 = vpow2.f32 %v5120_v33 }
 0x2f6   : > { %v5300_v52 = vpop.eup %5299  ;;  %5305 = vrcp.f32 %v8603_v32 }
 0x2f7   : > { %v8605_v4 = vadd.f32 1.0, %v5300_v52  ;;  %v5302_v41 = vpop.eup %5301 }
 0x2f8   : > { %v8609_v55 = vadd.f32 1.0, %v5302_v41 }
 0x2f9   : > { %5307 = vrcp.f32 %v8605_v4  ;;  %v2092_v58 = vpop.f32.mrf.mxu0  ;;  %vm2318_vm5 = vweird.f32 %v8605_v4 }
 0x2fa   : > { %5309 = vrcp.f32 %v8609_v55  ;;  %vm2295_vm9 = vweird.f32 %v8609_v55 }
 0x2fb   : > { %v5304_v1 = vpop.eup %5303 }
 0x2fc   : > { %v8611_v7 = vadd.f32 1.0, %v5304_v1  ;;  %v8613_v43 = vpop.eup %5305 }
 0x2fd   : > { %v2276_v49 = vmul.f32 %v8613_v43, %v8603_v32  ;;  %vm2281_vm2 = vweird.f32 %v8613_v43 }
 0x2fe   : > { %5311 = vrcp.f32 %v8611_v7  ;;  %vm8652_vm6 = vmor %vm2280_vm4, %vm2281_vm2  ;;  %vm2333_vm13 = vweird.f32 %v8611_v7 }
 0x2ff   : > { %v8616_v50 = vpop.eup %5307  ;;  %v2132_v28 = vpop.f32.mrf.mxu2  ;;  %v2277_v20 = vsub.f32 1.0, %v2276_v49 }
 0x300   : > { %v2112_v63 = vpop.f32.mrf.mxu1  ;;  %v2314_v24 = vmul.f32 %v8616_v50, %v8605_v4  ;;  %v8623_v52 = vpop.eup %5309  ;;  %vm2319_vm3 = vweird.f32 %v8616_v50 }
 0x301   : > { %v2113_v12 = vadd.f32 %v2112_v63, %v2092_v58  ;;  %v2291_v63 = vmul.f32 %v8623_v52, %v8609_v55  ;;  %v2278_v49 = vmul.f32 %v8613_v43, %v2277_v20  ;;  %v2322_v20 = vand.u32 2147483647, %v8605_v4  ;;  %vm8658_vm7 = vmor %vm2318_vm5, %vm2319_vm3 }
 0x302   : > { %v2315_v37 = vsub.f32 1.0, %v2314_v24  ;;  %vm2296_vm11 = vweird.f32 %v8623_v52 }
 0x303   : > { %v2247_v1 = vrot.slane %v2113_v12, 6  ;;  %vm2323_vm10 = vcmp.eq.f32.partialorder %v2322_v20, 8.507059e+37  ;;  %vm8684_vm14 = vmor %vm2295_vm9, %vm2296_vm11  ;;  %v2299_v20 = vand.u32 2147483647, %v8609_v55 }
 0x304   : > { %v8625_v41 = vpop.eup %5311  ;;  %v2316_v12 = vmul.f32 %v8616_v50, %v2315_v37  ;;  %v2324_v37 = vand.u32 2147483648, %v8605_v4 }
 0x305   : > { %v2329_v16 = vmul.f32 %v8625_v41, %v8611_v7  ;;  %vm2334_vm12 = vweird.f32 %v8625_v41  ;;  %vm2300_vm0 = vcmp.eq.f32.partialorder %v2299_v20, 8.507059e+37 }
 0x306   : > { %v2152_v48 = vpop.f32.mrf.mxu3  ;;  %vm2335_vm15 = vmor %vm2333_vm13, %vm2334_vm12 }
 0x307   : > { %v2153_v40 = vadd.f32 %v2152_v48, %v2132_v28  ;;  %v2292_v48 = vsub.f32 1.0, %v2291_v63 }
 0x309   : > { %v2248_v24 = vrot.slane %v2153_v40, 6 }
 0x30b   : > { %v2264_v40 = vadd.f32 %v2248_v24, %v11755_v13  ;;  %v8844_v13 = vld [vmem:[#allocation6 + $0x528] sm:$0xff] }
 0x30c   : > { %12754 = vst [vmem:[#allocation49_spill] sm:$0xff] %v8844_v13 }
 0x31b   : > { %v2172_v14 = vpop.f32.mrf.mxu0 }
 0x321   : > { %v2192_v33 = vpop.f32.mrf.mxu1  ;;  %v2212_v17 = vpop.f32.mrf.mxu2 }
 0x322   : > { %v2193_v36 = vadd.f32 %v2192_v33, %v2172_v14  ;;  %v2263_v14 = vadd.f32 %v2247_v1, %v7343_v46  ;;  %v2286_v1 = vand.u32 2147483648, %v8603_v32 }
 0x324   : > { %v2249_v10 = vrot.slane %v2193_v36, 6  ;;  %v2330_v36 = vsub.f32 1.0, %v2329_v16  ;;  %v2287_v4 = vor.u32 1.1754944e-38, %v2286_v1 }
 0x326   : > { %v2265_v58 = vadd.f32 %v2249_v10, %v12737_v53  ;;  %v11756_v10 = vrot.slane %v7375_v47, 3  ;;  %v2284_v53 = vand.u32 2147483647, %v8603_v32  ;;  %v2293_v32 = vmul.f32 %v8623_v52, %v2292_v48 }
 0x327   : > { %v2232_v30 = vpop.f32.mrf.mxu3 }
 0x328   : > { %v5121_v33 = vmul.f32 -1.442695, %v2265_v58  ;;  %v2233_v22 = vadd.f32 %v2232_v30, %v2212_v17  ;;  %v2279_v17 = vadd.f32 %v8613_v43, %v2278_v49  ;;  %v2331_v58 = vmul.f32 %v8625_v41, %v2330_v36 }
 0x329   : > { %vm8662_vm8 = vcmp.eq.f32.partialorder %v2284_v53, 8.507059e+37  ;;  %v2325_v36 = vor.u32 1.1754944e-38, %v2324_v37  ;;  %v2294_v53 = vadd.f32 %v8623_v52, %v2293_v32 }
 0x32a   : > { %5313 = vpow2.f32 %v5121_v33  ;;  %v2250_v28 = vrot.slane %v2233_v22, 6  ;;  %v2317_v22 = vadd.f32 %v8616_v50, %v2316_v12  ;;  %v2385_v33 = vrot.slane %v8178_v34, 7 }
 0x32b   : > { %5315 = vtanh.f32 %v2263_v14  ;;  %v2283_v24 = vsel %vm8652_vm6, %v8613_v43, %v2279_v17  ;;  %v2332_v1 = vadd.f32 %v8625_v41, %v2331_v58  ;;  %v2339_v43 = vand.u32 2147483648, %v8611_v7 }
 0x32c   : > { %v2266_v30 = vadd.f32 %v2250_v28, %v11756_v10  ;;  %v2321_v28 = vsel %vm8658_vm7, %v8616_v50, %v2317_v22  ;;  %v2288_v50 = vsel %vm8662_vm8, %v2287_v4, %v2283_v24  ;;  %v2301_v17 = vand.u32 2147483648, %v8609_v55  ;;  %v8847_v10 = vld [vmem:[#allocation6 + $0x20] sm:$0xff] }
 0x32d   : > { %v2298_v63 = vsel %vm8684_vm14, %v8623_v52, %v2294_v53  ;;  %v2336_v32 = vsel %vm2335_vm15, %v8625_v41, %v2332_v1  ;;  %v2340_v49 = vor.u32 1.1754944e-38, %v2339_v43  ;;  %12755 = vst [vmem:[#allocation76_spill] sm:$0xff] %v8847_v10 }
 0x32e   : > { %v5122_v16 = vmul.f32 -1.442695, %v2266_v30  ;;  %v2326_v30 = vsel %vm2323_vm10, %v2325_v36, %v2321_v28  ;;  %v2302_v4 = vor.u32 1.1754944e-38, %v2301_v17 }
 0x32f   : > { %v2389_v58 = vmul.f32 %v2385_v33, %v2326_v30  ;;  %v2386_v33 = vrot.slane %v8182_v26, 7 }
 0x330   : > { %v5314_v14 = vpop.eup %5313  ;;  %5317 = vpow2.f32 %v5122_v16  ;;  %v2303_v55 = vsel %vm2300_vm0, %v2302_v4, %v2298_v63 }
 0x331   : > { %v2351_v34 = vadd.f32 1.0, %v5314_v14  ;;  %v5316_v48 = vpop.eup %5315  ;;  %5319 = vtanh.f32 %v2264_v40  ;;  %v2337_v40 = vand.u32 2147483647, %v8611_v7 }
 0x332   : > { %v2391_v22 = vmul.f32 %v5316_v48, %v2288_v50 }
 0x333   : > { %5321 = vrcp.f32 %v2351_v34  ;;  %vm2338_vm1 = vcmp.eq.f32.partialorder %v2337_v40, 8.507059e+37  ;;  %v2364_v41 = vand.u32 2147483648, %v2351_v34  ;;  %v2362_v1 = vand.u32 2147483647, %v2351_v34 }
 0x334   : > { %v8694_v28 = vadd.f32 %v2391_v22, %v2389_v58  ;;  %v2341_v7 = vsel %vm2338_vm1, %v2340_v49, %v2336_v32  ;;  %vm2358_vm3 = vweird.f32 %v2351_v34 }
 0x335   : > { %v2390_v52 = vmul.f32 %v2386_v33, %v2341_v7  ;;  %v2365_v37 = vor.u32 1.1754944e-38, %v2364_v41  ;;  %vm2363_vm5 = vcmp.eq.f32.partialorder %v2362_v1, 8.507059e+37  ;;  %v8738_v41 = vld [vmem:[#allocation6 + $0x7a0] sm:$0xff] }
 0x336   : > { %v5318_v16 = vpop.eup %5317  ;;  %v8748_v1 = vld [vmem:[#allocation6 + $0x760] sm:$0xff] }
 0x337   : > { %v2352_v14 = vadd.f32 1.0, %v5318_v16  ;;  %v5320_v12 = vpop.eup %5319 }
 0x338   : > { %v2392_v36 = vmul.f32 %v5320_v12, %v2303_v55 }
 0x339   : > { %v5322_v24 = vpop.eup %5321  ;;  %5323 = vrcp.f32 %v2352_v14  ;;  %v2379_v58 = vand.u32 2147483648, %v2352_v14  ;;  %v2377_v12 = vand.u32 2147483647, %v2352_v14  ;;  %vm2373_vm7 = vweird.f32 %v2352_v14 }
 0x33a   : > { %v2354_v48 = vmul.f32 %v5322_v24, %v2351_v34  ;;  %5325 = vtanh.f32 %v8694_v28  ;;  %vm2359_vm2 = vweird.f32 %v5322_v24  ;;  %v8698_v30 = vadd.f32 %v2392_v36, %v2390_v52  ;;  %v8726_v52 = vld [vmem:[#allocation6 + $0x7e0] sm:$0xff] }
 0x33b   : > { %vm2360_vm4 = vmor %vm2358_vm3, %vm2359_vm2  ;;  %v2380_v34 = vor.u32 1.1754944e-38, %v2379_v58  ;;  %vm2378_vm9 = vcmp.eq.f32.partialorder %v2377_v12, 8.507059e+37  ;;  %v8794_v58 = vld [vmem:[#allocation6 + $0x668] sm:$0xff]  ;;  %v8807_v12 = vld [vmem:[#allocation6 + $0x120] sm:$0xff] }
 0x33c   : > { %v2355_v50 = vsub.f32 1.0, %v2354_v48  ;;  %5327 = vtanh.f32 %v8698_v30  ;;  %v8706_v48 = vld [vmem:[#allocation6 + $0x3e0] sm:$0xff] }
 0x33e   : > { %v2356_v53 = vmul.f32 %v5322_v24, %v2355_v50  ;;  %v8716_v50 = vld [vmem:[#allocation6 + $0x360] sm:$0xff] }
 0x33f   : > { %v5324_v43 = vpop.eup %5323 }
 0x340   : > { %v2357_v17 = vadd.f32 %v5322_v24, %v2356_v53  ;;  %v2369_v22 = vmul.f32 %v5324_v43, %v2352_v14  ;;  %v5326_v40 = vpop.eup %5325  ;;  %vm2374_vm6 = vweird.f32 %v5324_v43  ;;  %v8710_v14 = vld [vmem:[#allocation6 + $0x3a0] sm:$0xff]  ;;  %v8742_v53 = vld [vmem:[#allocation6 + $0x7a8] sm:$0xff] }
 0x341   : > { %vm2375_vm8 = vmor %vm2373_vm7, %vm2374_vm6 }
 0x342   : > { %v2361_v20 = vsel %vm2360_vm4, %v5322_v24, %v2357_v17  ;;  %v2370_v26 = vsub.f32 1.0, %v2369_v22  ;;  %v5328_v55 = vpop.eup %5327  ;;  %v8755_v17 = vld [vmem:[#allocation6 + $0x260] sm:$0xff]  ;;  %v8762_v22 = vld [vmem:[#allocation6 + $0x728] sm:$0xff] }
 0x343   : > { %v2366_v16 = vsel %vm2363_vm5, %v2365_v37, %v2361_v20  ;;  %v8770_v37 = vld [vmem:[#allocation6 + $0x6e0] sm:$0xff]  ;;  %v8774_v20 = vld [vmem:[#allocation6 + $0x6e8] sm:$0xff] }
 0x344   : > { %v2397_v63 = vmul.f32 %v5326_v40, %v2366_v16  ;;  %v2371_v32 = vmul.f32 %v5324_v43, %v2370_v26  ;;  %v8780_v26 = vld [vmem:[#allocation6 + $0x6a0] sm:$0xff]  ;;  %v8784_v40 = vld [vmem:[#allocation6 + $0x6a8] sm:$0xff] }
 0x345   : > { %v8787_v16 = vld [vmem:[#allocation6 + $0x1a0] sm:$0xff] }
 0x346   : > { %v8701_v49 = vrot.slane %v2397_v63, 2  ;;  %v2372_v4 = vadd.f32 %v5324_v43, %v2371_v32  ;;  %v8797_v63 = vld [vmem:[#allocation6 + $0x160] sm:$0xff]  ;;  %v8804_v32 = vld [vmem:[#allocation6 + $0x628] sm:$0xff] }
 0x348   : > { %2402 = vst [vmem:[#allocation2 + $0x2] sm:$0x1] %v8701_v49  ;;  %v2376_v24 = vsel %vm2375_vm8, %v5324_v43, %v2372_v4  ;;  %2447 = vmatmul.f32.vlgmr.msra.gmra.mxu0 %v8701_v49  ;;  %2487 = vmatmul.f32.vlgmr.msra.gmra.mxu2 %v8701_v49  ;;  %v8752_v43 = vld [vmem:[#allocation6 + $0x768] sm:$0xff] }
 0x349   : > { %v2381_v7 = vsel %vm2378_vm9, %v2380_v34, %v2376_v24  ;;  %2591 = vmatpush.msra.mxu0 %v8706_v48  ;;  %2631 = vmatpush.msra.mxu2 %v8191_v51  ;;  %v8723_v51 = vld [vmem:[#allocation6 + $0x320] sm:$0xff]  ;;  %v8814_v4 = vld [vmem:[#allocation6 + $0x5e8] sm:$0xff] }
 0x34a   : > { %v2398_v33 = vmul.f32 %v5328_v55, %v2381_v7  ;;  %v8817_v34 = vld [vmem:[#allocation6 + $0xe0] sm:$0xff]  ;;  %v8824_v24 = vld [vmem:[#allocation6 + $0x5a8] sm:$0xff] }
 0x34b   : > { %2592 = vmatpush.msra.mxu0 %v8710_v14  ;;  %2632 = vmatpush.msra.mxu2 %v8195_v15  ;;  %v8730_v15 = vld [vmem:[#allocation6 + $0x7e8] sm:$0xff]  ;;  %12746 = vst [vmem:[#allocation62_spill] sm:$0xff] %v8817_v34  ;;  %v8827_v55 = vld [vmem:[#allocation6 + $0xa0] sm:$0xff] }
 0x34c   : > { %v8714_v36 = vrot.slane %v2398_v33, 2  ;;  %12748 = vst [vmem:[#allocation65_spill] sm:$0xff] %v8824_v24  ;;  %v8834_v7 = vld [vmem:[#allocation6 + $0x568] sm:$0xff]  ;;  %v8837_v33 = vld [vmem:[#allocation6 + $0x60] sm:$0xff] }
 0x34d   : > { %2593 = vmatpush.msra.mxu0 %v8716_v50  ;;  %2633 = vmatpush.msra.mxu2 %v8201_v8  ;;  %v8735_v8 = vld [vmem:[#allocation6 + $0x2e0] sm:$0xff]  ;;  %12749 = vst [vmem:[#allocation67_spill] sm:$0xff] %v8827_v55 }
 0x34e   : > { %2406 = vst [vmem:[#allocation2 + $0xd] sm:$0x1] %v8714_v36  ;;  %2467 = vmatmul.f32.vlgmr.msra.gmra.mxu1 %v8714_v36  ;;  %2507 = vmatmul.f32.vlgmr.msra.gmra.mxu3 %v8714_v36 }
 0x34f   : > { %2594 = vmatpush.msra.mxu0 %v8723_v51  ;;  %2611 = vmatpush.msra.mxu1 %v8726_v52  ;;  %12751 = vst [vmem:[#allocation71_spill] sm:$0xff] %v8834_v7 }
 0x350   : > { %2634 = vmatpush.msra.mxu2 %v8209_v6  ;;  %2651 = vmatpush.msra.mxu3 %v8730_v15  ;;  %v8745_v6 = vld [vmem:[#allocation6 + $0x2a0] sm:$0xff]  ;;  %12752 = vst [vmem:[#allocation47_spill] sm:$0xff] %v8837_v33 }
 0x351   : > { %2527 = vmatmul.f32.vlgmr.msrb.gmra.mxu0 %v8701_v49  ;;  %2567 = vmatmul.f32.vlgmr.msrb.gmra.mxu2 %v8701_v49 }
 0x352   : > { %2595 = vmatpush.msra.mxu0 %v8735_v8  ;;  %2612 = vmatpush.msra.mxu1 %v8738_v41 }
 0x353   : > { %2635 = vmatpush.msra.mxu2 %v8217_v2  ;;  %2652 = vmatpush.msra.mxu3 %v8742_v53  ;;  %v8758_v2 = vld [vmem:[#allocation6 + $0x720] sm:$0xff] }
 0x354   : > { %2596 = vmatpush.msra.mxu0 %v8745_v6  ;;  %2613 = vmatpush.msra.mxu1 %v8748_v1 }
 0x355   : > { %2636 = vmatpush.msra.mxu2 %v8223_v21  ;;  %2653 = vmatpush.msra.mxu3 %v8752_v43  ;;  %v8767_v21 = vld [vmem:[#allocation6 + $0x220] sm:$0xff] }
 0x356   : > { %2597 = vmatpush.msra.mxu0 %v8755_v17  ;;  %2614 = vmatpush.msra.mxu1 %v8758_v2 }
 0x357   : > { %2637 = vmatpush.msra.mxu2 %v8229_v23  ;;  %2654 = vmatpush.msra.mxu3 %v8762_v22  ;;  %v8777_v23 = vld [vmem:[#allocation6 + $0x1e0] sm:$0xff] }
 0x358   : > { %2547 = vmatmul.f32.vlgmr.msrb.gmra.mxu1 %v8714_v36  ;;  %2587 = vmatmul.f32.vlgmr.msrb.gmra.mxu3 %v8714_v36 }
 0x359   : > { %2598 = vmatpush.msra.mxu0 %v8767_v21  ;;  %2615 = vmatpush.msra.mxu1 %v8770_v37 }
 0x35a   : > { %2638 = vmatpush.msra.mxu2 %v8237_v45  ;;  %2655 = vmatpush.msra.mxu3 %v8774_v20  ;;  %v8790_v45 = vld [vmem:[#allocation6 + $0x660] sm:$0xff] }
 0x35b   : > { %2599 = vmatpush.msra.mxu0 %v8777_v23  ;;  %2616 = vmatpush.msra.mxu1 %v8780_v26 }
 0x35c   : > { %2639 = vmatpush.msra.mxu2 %v8243_v31  ;;  %2656 = vmatpush.msra.mxu3 %v8784_v40  ;;  %v8800_v31 = vld [vmem:[#allocation6 + $0x620] sm:$0xff] }
 0x35d   : > { %2600 = vmatpush.msra.mxu0 %v8787_v16  ;;  %2617 = vmatpush.msra.mxu1 %v8790_v45 }
 0x35e   : > { %2640 = vmatpush.msra.mxu2 %v8249_v56  ;;  %2657 = vmatpush.msra.mxu3 %v8794_v58  ;;  %v8810_v56 = vld [vmem:[#allocation6 + $0x5e0] sm:$0xff] }
 0x35f   : > { %2601 = vmatpush.msra.mxu0 %v8797_v63  ;;  %2618 = vmatpush.msra.mxu1 %v8800_v31 }
 0x360   : > { %2641 = vmatpush.msra.mxu2 %v8255_v3  ;;  %2658 = vmatpush.msra.mxu3 %v8804_v32  ;;  %v8820_v3 = vld [vmem:[#allocation6 + $0x5a0] sm:$0xff] }
 0x361   : > { %2602 = vmatpush.msra.mxu0 %v8807_v12  ;;  %2619 = vmatpush.msra.mxu1 %v8810_v56  ;;  %12747 = vst [vmem:[#allocation64_spill] sm:$0xff] %v8820_v3 }
 0x362   : > { %2642 = vmatpush.msra.mxu2 %v8261_v9  ;;  %2659 = vmatpush.msra.mxu3 %v8814_v4  ;;  %v8830_v9 = vld [vmem:[#allocation6 + $0x560] sm:$0xff] }
 0x363   : > { %2603 = vmatpush.msra.mxu0 %v8817_v34  ;;  %2620 = vmatpush.msra.mxu1 %v8820_v3  ;;  %12750 = vst [vmem:[#allocation69_spill] sm:$0xff] %v8830_v9  ;;  %v11921_v34 = vrot.slane %v7382_v54, 1 }
 0x364   : > { %2643 = vmatpush.msra.mxu2 %v8267_v11  ;;  %2660 = vmatpush.msra.mxu3 %v8824_v24  ;;  %v8840_v11 = vld [vmem:[#allocation6 + $0x520] sm:$0xff] }
 0x365   : > { %2604 = vmatpush.msra.mxu0 %v8827_v55  ;;  %2621 = vmatpush.msra.mxu1 %v8830_v9  ;;  %12753 = vst [vmem:[#allocation73_spill] sm:$0xff] %v8840_v11  ;;  %v12945_v9 = vld [vmem:[#allocation18_spill] sm:$0xff] }
 0x366   : > { %2644 = vmatpush.msra.mxu2 %v8273_v25  ;;  %2661 = vmatpush.msra.mxu3 %v8834_v7  ;;  %v8850_v25 = vld [vmem:[#allocation6 + $0x4e0] sm:$0xff] }
 0x367   : > { %2605 = vmatpush.msra.mxu0 %v8837_v33  ;;  %2622 = vmatpush.msra.mxu1 %v8840_v11  ;;  %12756 = vst [vmem:[#allocation51_spill] sm:$0xff] %v8850_v25  ;;  %v8854_v33 = vld [vmem:[#allocation6 + $0x4e8] sm:$0xff] }
 0x368   : > { %2645 = vmatpush.msra.mxu2 %v8279_v57  ;;  %2662 = vmatpush.msra.mxu3 %v8844_v13  ;;  %12757 = vst [vmem:[#allocation79_spill] sm:$0xff] %v8854_v33  ;;  %v8859_v57 = vld [vmem:[#allocation6 + $0x3f0] sm:$0xff] }
 0x369   : > { %2606 = vmatpush.msra.mxu0 %v8847_v10  ;;  %2623 = vmatpush.msra.mxu1 %v8850_v25  ;;  %12758 = vst [vmem:[#allocation81_spill] sm:$0xff] %v8859_v57  ;;  %v8863_v10 = vld [vmem:[#allocation6 + $0x4a0] sm:$0xff]  ;;  %v8866_v25 = vld [vmem:[#allocation6 + $0x4a8] sm:$0xff]  ;;  %v12944_v13 = vld [vmem:[#allocation13_spill] sm:$0xff] }
 0x36a   : > { %2646 = vmatpush.msra.mxu2 %v8285_v27  ;;  %2663 = vmatpush.msra.mxu3 %v8854_v33  ;;  %12759 = vst [vmem:[#allocation53_spill] sm:$0xff] %v8863_v10  ;;  %v8869_v27 = vld [vmem:[#allocation6 + $0x3b0] sm:$0xff]  ;;  %v8873_v33 = vld [vmem:[#allocation6 + $0x460] sm:$0xff]  ;;  %v11914_v11 = vrot.slane %v12944_v13, 1 }
 0x36b   : > { %2607 = vmatmul.f32.vlgmr.msra.gmra.mxu0 %v8701_v49  ;;  %2647 = vmatmul.f32.vlgmr.msra.gmra.mxu2 %v8701_v49  ;;  %12760 = vst [vmem:[#allocation89_spill] sm:$0xff] %v8866_v25 }
 0x36c   : > { %2671 = vmatpush.msrb.mxu0 %v8859_v57  ;;  %2711 = vmatpush.msrb.mxu2 %v8292_v44  ;;  %12761 = vst [vmem:[#allocation93_spill] sm:$0xff] %v8869_v27  ;;  %v8876_v57 = vld [vmem:[#allocation6 + $0x468] sm:$0xff]  ;;  %v8879_v44 = vld [vmem:[#allocation6 + $0x370] sm:$0xff] }
 0x36d   : > { %2624 = vmatpush.msra.mxu1 %v8863_v10  ;;  %2664 = vmatpush.msra.mxu3 %v8866_v25  ;;  %12762 = vst [vmem:[#allocation55_spill] sm:$0xff] %v8873_v33  ;;  %v8883_v25 = vld [vmem:[#allocation6 + $0x420] sm:$0xff] }
 0x36e   : > { %2672 = vmatpush.msrb.mxu0 %v8869_v27  ;;  %2712 = vmatpush.msrb.mxu2 %v8298_v39  ;;  %12763 = vst [vmem:[#allocation99_spill] sm:$0xff] %v8876_v57  ;;  %v8886_v27 = vld [vmem:[#allocation6 + $0x428] sm:$0xff]  ;;  %v8891_v39 = vld [vmem:[#allocation6 + $0x330] sm:$0xff] }
 0x36f   : > { %2625 = vmatpush.msra.mxu1 %v8873_v33  ;;  %2665 = vmatpush.msra.mxu3 %v8876_v57  ;;  %12764 = vst [vmem:[#allocation105_spill] sm:$0xff] %v8879_v44  ;;  %v8894_v57 = vld [vmem:[#allocation6 + $0x7f0] sm:$0xff] }
 0x370   : > { %2673 = vmatpush.msrb.mxu0 %v8879_v44  ;;  %2713 = vmatpush.msrb.mxu2 %v8304_v29  ;;  %12765 = vst [vmem:[#allocation57_spill] sm:$0xff] %v8883_v25  ;;  %v8898_v29 = vld [vmem:[#allocation6 + $0x7f8] sm:$0xff] }
 0x371   : > { %2626 = vmatpush.msra.mxu1 %v8883_v25  ;;  %12766 = vst [vmem:[#allocation108_spill] sm:$0xff] %v8886_v27  ;;  %2666 = vmatpush.msra.mxu3 %v8886_v27  ;;  %v8901_v25 = vld [vmem:[#allocation6 + $0x2f0] sm:$0xff] }
 0x372   : > { %2627 = vmatmul.f32.vlgmr.msra.gmra.mxu1 %v8714_v36  ;;  %2667 = vmatmul.f32.vlgmr.msra.gmra.mxu3 %v8714_v36  ;;  %12767 = vst [vmem:[#allocation111_spill] sm:$0xff] %v8891_v39  ;;  %v8904_v27 = vld [vmem:[#allocation6 + $0x7b0] sm:$0xff] }
 0x373   : > { %2674 = vmatpush.msrb.mxu0 %v8891_v39  ;;  %12768 = vst [vmem:[#allocation59_spill] sm:$0xff] %v8894_v57  ;;  %2691 = vmatpush.msrb.mxu1 %v8894_v57  ;;  %v8909_v39 = vld [vmem:[#allocation6 + $0x2b0] sm:$0xff]  ;;  %v12943_v57 = vld [vmem:[#allocation16_spill] sm:$0xff] }
 0x374   : > { %2714 = vmatpush.msrb.mxu2 %v8313_v18  ;;  %12769 = vst [vmem:[#allocation114_spill] sm:$0xff] %v8898_v29  ;;  %2731 = vmatpush.msrb.mxu3 %v8898_v29  ;;  %v8912_v18 = vld [vmem:[#allocation6 + $0x770] sm:$0xff]  ;;  %v12942_v29 = vld [vmem:[#allocation14_spill] sm:$0xff] }
 0x375   : > { %12770 = vst [vmem:[#allocation85_spill] sm:$0xff] %v8901_v25  ;;  %2675 = vmatpush.msrb.mxu0 %v8901_v25  ;;  %2692 = vmatpush.msrb.mxu1 %v8904_v27  ;;  %v8917_v25 = vld [vmem:[#allocation6 + $0x270] sm:$0xff] }
 0x376   : > { %12771 = vst [vmem:[#allocation61_spill] sm:$0xff] %v8904_v27  ;;  %2715 = vmatpush.msrb.mxu2 %v8319_v38  ;;  %2732 = vmatpush.msrb.mxu3 %v8322_v59  ;;  %v8920_v27 = vld [vmem:[#allocation6 + $0x730] sm:$0xff] }
 0x377   : > { %12772 = vst [vmem:[#allocation95_spill] sm:$0xff] %v8909_v39  ;;  %2676 = vmatpush.msrb.mxu0 %v8909_v39  ;;  %2693 = vmatpush.msrb.mxu1 %v8912_v18  ;;  %v8925_v38 = vld [vmem:[#allocation6 + $0x230] sm:$0xff] }
 0x378   : > { %12773 = vst [vmem:[#allocation98_spill] sm:$0xff] %v8912_v18  ;;  %2716 = vmatpush.msrb.mxu2 %v8327_v61  ;;  %2733 = vmatpush.msrb.mxu3 %v8330_v62  ;;  %v8928_v59 = vld [vmem:[#allocation6 + $0x6f0] sm:$0xff] }
 0x379   : > { %12774 = vst [vmem:[#allocation63_spill] sm:$0xff] %v8917_v25  ;;  %2677 = vmatpush.msrb.mxu0 %v8917_v25  ;;  %2694 = vmatpush.msrb.mxu1 %v8920_v27  ;;  %v8933_v61 = vld [vmem:[#allocation6 + $0x1f0] sm:$0xff] }
 0x37a   : > { %12775 = vst [vmem:[#allocation101_spill] sm:$0xff] %v8920_v27  ;;  %2717 = vmatpush.msrb.mxu2 %v8335_v60  ;;  %2734 = vmatpush.msrb.mxu3 %v8338_v35  ;;  %v8936_v62 = vld [vmem:[#allocation6 + $0x6b0] sm:$0xff] }
 0x37b   : > { %12776 = vst [vmem:[#allocation104_spill] sm:$0xff] %v8925_v38  ;;  %2678 = vmatpush.msrb.mxu0 %v8925_v38  ;;  %2695 = vmatpush.msrb.mxu1 %v8928_v59  ;;  %v8941_v60 = vld [vmem:[#allocation6 + $0x1b0] sm:$0xff] }
 0x37c   : > { %12777 = vst [vmem:[#allocation66_spill] sm:$0xff] %v8928_v59  ;;  %2718 = vmatpush.msrb.mxu2 %v8343_v5  ;;  %2735 = vmatpush.msrb.mxu3 %v8346_v42  ;;  %v8944_v35 = vld [vmem:[#allocation6 + $0x670] sm:$0xff]  ;;  %v12783_v42 = vld [vmem:[#allocation27_spill] sm:$0xff] }
 0x37d   : > { %12778 = vst [vmem:[#allocation107_spill] sm:$0xff] %v8933_v61  ;;  %2679 = vmatpush.msrb.mxu0 %v8933_v61  ;;  %2696 = vmatpush.msrb.mxu1 %v8936_v62  ;;  %v12782_v5 = vld [vmem:[#allocation29_spill] sm:$0xff]  ;;  %v12784_v61 = vld [vmem:[#allocation20_spill] sm:$0xff] }
 0x37e   : > { %12779 = vst [vmem:[#allocation110_spill] sm:$0xff] %v8936_v62  ;;  %2719 = vmatpush.msrb.mxu2 %v8351_v0  ;;  %2736 = vmatpush.msrb.mxu3 %v8354_v19  ;;  %v8950_v59 = vld [vmem:[#allocation6 + $0x630] sm:$0xff]  ;;  %v12786_v0 = vld [vmem:[#allocation34_spill] sm:$0xff]  ;;  %v12788_v62 = vld [vmem:[#allocation15_spill] sm:$0xff] }
 0x37f   : > { %12780 = vst [vmem:[#allocation68_spill] sm:$0xff] %v8941_v60  ;;  %2680 = vmatpush.msrb.mxu0 %v8941_v60  ;;  %2697 = vmatpush.msrb.mxu1 %v8944_v35  ;;  %v12787_v19 = vld [vmem:[#allocation33_spill] sm:$0xff] }
 0x380   : > { %12781 = vst [vmem:[#allocation113_spill] sm:$0xff] %v8944_v35  ;;  %2720 = vmatpush.msrb.mxu2 %v12782_v5  ;;  %2737 = vmatpush.msrb.mxu3 %v12783_v42  ;;  %v8956_v60 = vld [vmem:[#allocation6 + $0x5f0] sm:$0xff]  ;;  %v12790_v35 = vld [vmem:[#allocation31_spill] sm:$0xff]  ;;  %v12791_v5 = vld [vmem:[#allocation40_spill] sm:$0xff] }
 0x381   : > { %2681 = vmatpush.msrb.mxu0 %v12784_v61  ;;  %12785 = vst [vmem:[#allocation116_spill] sm:$0xff] %v8950_v59  ;;  %2698 = vmatpush.msrb.mxu1 %v8950_v59  ;;  %v12792_v42 = vld [vmem:[#allocation22_spill] sm:$0xff]  ;;  %v8962_v61 = vld [vmem:[#allocation6 + $0x5b0] sm:$0xff] }
 0x382   : > { %2721 = vmatpush.msrb.mxu2 %v12786_v0  ;;  %2738 = vmatpush.msrb.mxu3 %v12787_v19  ;;  %12789 = vst [vmem:[#allocation70_spill] sm:$0xff] %v8956_v60  ;;  %v12794_v59 = vld [vmem:[#allocation38_spill] sm:$0xff]  ;;  %v12795_v0 = vld [vmem:[#allocation37_spill] sm:$0xff] }
 0x383   : > { %2682 = vmatpush.msrb.mxu0 %v12788_v62  ;;  %2699 = vmatpush.msrb.mxu1 %v8956_v60  ;;  %12793 = vst [vmem:[#allocation117_spill] sm:$0xff] %v8962_v61  ;;  %v12796_v19 = vld [vmem:[#allocation21_spill] sm:$0xff]  ;;  %v12798_v60 = vld [vmem:[#allocation35_spill] sm:$0xff] }
 0x384   : > { %2722 = vmatpush.msrb.mxu2 %v12790_v35  ;;  %2739 = vmatpush.msrb.mxu3 %v12791_v5  ;;  %v8968_v62 = vld [vmem:[#allocation6 + $0x570] sm:$0xff]  ;;  %v12799_v35 = vld [vmem:[#allocation42_spill] sm:$0xff]  ;;  %v12800_v5 = vld [vmem:[#allocation24_spill] sm:$0xff] }
 0x385   : > { %2683 = vmatpush.msrb.mxu0 %v12792_v42  ;;  %2700 = vmatpush.msrb.mxu1 %v8962_v61  ;;  %12797 = vst [vmem:[#allocation119_spill] sm:$0xff] %v8968_v62  ;;  %v8974_v42 = vld [vmem:[#allocation6 + $0x530] sm:$0xff] }
 0x386   : > { %2723 = vmatpush.msrb.mxu2 %v12794_v59  ;;  %2740 = vmatpush.msrb.mxu3 %v12795_v0  ;;  %12801 = vst [vmem:[#allocation72_spill] sm:$0xff] %v8974_v42  ;;  %v12802_v61 = vld [vmem:[#allocation41_spill] sm:$0xff]  ;;  %v12803_v59 = vld [vmem:[#allocation39_spill] sm:$0xff] }
 0x387   : > { %2684 = vmatpush.msrb.mxu0 %v12796_v19  ;;  %2701 = vmatpush.msrb.mxu1 %v8968_v62  ;;  %v12804_v0 = vld [vmem:[#allocation19_spill] sm:$0xff]  ;;  %v8980_v19 = vld [vmem:[#allocation6 + $0x4f0] sm:$0xff]  ;;  %v12806_v62 = vld [vmem:[#allocation44_spill] sm:$0xff] }
 0x388   : > { %2724 = vmatpush.msrb.mxu2 %v12798_v60  ;;  %2741 = vmatpush.msrb.mxu3 %v12799_v35  ;;  %12805 = vst [vmem:[#allocation112_spill] sm:$0xff] %v8980_v19  ;;  %v12807_v60 = vld [vmem:[#allocation43_spill] sm:$0xff]  ;;  %v8987_v35 = vld [vmem:[#allocation6 + $0x4b0] sm:$0xff] }
 0x389   : > { %2685 = vmatpush.msrb.mxu0 %v12800_v5  ;;  %2702 = vmatpush.msrb.mxu1 %v8974_v42  ;;  %12808 = vst [vmem:[#allocation118_spill] sm:$0xff] %v8987_v35  ;;  %v12810_v5 = vld [vmem:[#allocation46_spill] sm:$0xff] }
 0x38a   : > { %2725 = vmatpush.msrb.mxu2 %v12802_v61  ;;  %2742 = vmatpush.msrb.mxu3 %v12803_v59  ;;  %v12809_v61 = vld [vmem:[#allocation28_spill] sm:$0xff] }
 0x38b   : > { %2686 = vmatpush.msrb.mxu0 %v12804_v0  ;;  %2703 = vmatpush.msrb.mxu1 %v8980_v19  ;;  %v8992_v59 = vld [vmem:[#allocation6 + $0x3c8] sm:$0xff]  ;;  %v8995_v0 = vld [vmem:[#allocation6 + $0x470] sm:$0xff] }
 0x38c   : > { %2726 = vmatpush.msrb.mxu2 %v12806_v62  ;;  %2743 = vmatpush.msrb.mxu3 %v12807_v60  ;;  %12811 = vst [vmem:[#allocation74_spill] sm:$0xff] %v8992_v59  ;;  %v12813_v62 = vld [vmem:[#allocation45_spill] sm:$0xff]  ;;  %v12814_v60 = vld [vmem:[#allocation26_spill] sm:$0xff] }
 0x38d   : > { %2687 = vmatmul.f32.vlgmr.msrb.gmra.mxu0 %v8701_v49  ;;  %2727 = vmatmul.f32.vlgmr.msrb.gmra.mxu2 %v8701_v49  ;;  %12812 = vst [vmem:[#allocation75_spill] sm:$0xff] %v8995_v0  ;;  %v9000_v49 = vld [vmem:[#allocation6 + $0x388] sm:$0xff] }
 0x38e   : > { %2704 = vmatpush.msrb.mxu1 %v8987_v35  ;;  %2744 = vmatpush.msrb.mxu3 %v12809_v61  ;;  %12815 = vst [vmem:[#allocation121_spill] sm:$0xff] %v9000_v49  ;;  %v9003_v35 = vld [vmem:[#allocation6 + $0x430] sm:$0xff]  ;;  %v12817_v61 = vld [vmem:[#allocation48_spill] sm:$0xff] }
 0x38f   : > { %2923 = vmatpush.msra.mxu0 %v12810_v5  ;;  %2963 = vmatpush.msra.mxu2 %v8992_v59  ;;  %12816 = vst [vmem:[#allocation123_spill] sm:$0xff] %v9003_v35  ;;  %v12818_v5 = vld [vmem:[#allocation25_spill] sm:$0xff] }
 0x390   : > { %2705 = vmatpush.msrb.mxu1 %v8995_v0  ;;  %2745 = vmatpush.msrb.mxu3 %v12813_v62  ;;  %v9010_v0 = vld [vmem:[#allocation6 + $0x348] sm:$0xff]  ;;  %v9013_v62 = vld [vmem:[#allocation6 + $0x7c0] sm:$0xff] }
 0x391   : > { %2924 = vmatpush.msra.mxu0 %v12814_v60  ;;  %2964 = vmatpush.msra.mxu2 %v9000_v49  ;;  %12819 = vst [vmem:[#allocation77_spill] sm:$0xff] %v9010_v0  ;;  %v9016_v60 = vld [vmem:[#allocation6 + $0x7c8] sm:$0xff] }
 0x392   : > { %2706 = vmatpush.msrb.mxu1 %v9003_v35  ;;  %2746 = vmatpush.msrb.mxu3 %v12817_v61  ;;  %12820 = vst [vmem:[#allocation86_spill] sm:$0xff] %v9013_v62  ;;  %v12822_v35 = vld [vmem:[#allocation50_spill] sm:$0xff]  ;;  %v9020_v61 = vld [vmem:[#allocation6 + $0x308] sm:$0xff] }
 0x393   : > { %2707 = vmatmul.f32.vlgmr.msrb.gmra.mxu1 %v8714_v36  ;;  %2747 = vmatmul.f32.vlgmr.msrb.gmra.mxu3 %v8714_v36  ;;  %12821 = vst [vmem:[#allocation125_spill] sm:$0xff] %v9016_v60  ;;  %v9023_v36 = vld [vmem:[#allocation6 + $0x780] sm:$0xff] }
 0x394   : > { %2925 = vmatpush.msra.mxu0 %v12818_v5  ;;  %2965 = vmatpush.msra.mxu2 %v9010_v0  ;;  %12823 = vst [vmem:[#allocation127_spill] sm:$0xff] %v9020_v61  ;;  %v9026_v5 = vld [vmem:[#allocation6 + $0x788] sm:$0xff]  ;;  %v12826_v0 = vld [vmem:[#allocation23_spill] sm:$0xff] }
 0x395   : > { %2943 = vmatpush.msra.mxu1 %v9013_v62  ;;  %2983 = vmatpush.msra.mxu3 %v9016_v60  ;;  %12824 = vst [vmem:[#allocation91_spill] sm:$0xff] %v9023_v36  ;;  %v9030_v62 = vld [vmem:[#allocation6 + $0x2c8] sm:$0xff]  ;;  %v9033_v60 = vld [vmem:[#allocation6 + $0x740] sm:$0xff] }
 0x396   : > { %2926 = vmatpush.msra.mxu0 %v12822_v35  ;;  %2966 = vmatpush.msra.mxu2 %v9020_v61  ;;  %12825 = vst [vmem:[#allocation96_spill] sm:$0xff] %v9026_v5  ;;  %v9036_v35 = vld [vmem:[#allocation6 + $0x748] sm:$0xff] }
 0x397   : > { %2944 = vmatpush.msra.mxu1 %v9023_v36  ;;  %2984 = vmatpush.msra.mxu3 %v9026_v5  ;;  %12827 = vst [vmem:[#allocation102_spill] sm:$0xff] %v9030_v62  ;;  %v12830_v61 = vld [vmem:[#allocation52_spill] sm:$0xff]  ;;  %v9043_v5 = vld [vmem:[#allocation6 + $0x700] sm:$0xff] }
 0x398   : > { %2927 = vmatpush.msra.mxu0 %v12826_v0  ;;  %2967 = vmatpush.msra.mxu2 %v9030_v62  ;;  %12828 = vst [vmem:[#allocation78_spill] sm:$0xff] %v9033_v60  ;;  %v9040_v36 = vld [vmem:[#allocation6 + $0x288] sm:$0xff] }
 0x399   : > { %2945 = vmatpush.msra.mxu1 %v9033_v60  ;;  %12829 = vst [vmem:[#allocation129_spill] sm:$0xff] %v9036_v35  ;;  %2985 = vmatpush.msra.mxu3 %v9036_v35  ;;  %v9046_v0 = vld [vmem:[#allocation6 + $0x708] sm:$0xff]  ;;  %v9053_v35 = vld [vmem:[#allocation6 + $0x6c0] sm:$0xff] }
 0x39a   : > { %2928 = vmatpush.msra.mxu0 %v12830_v61  ;;  %12831 = vst [vmem:[#allocation131_spill] sm:$0xff] %v9040_v36  ;;  %2968 = vmatpush.msra.mxu2 %v9040_v36  ;;  %v12834_v62 = vld [vmem:[#allocation32_spill] sm:$0xff]  ;;  %v12838_v36 = vld [vmem:[#allocation54_spill] sm:$0xff] }
 0x39b   : > { %12832 = vst [vmem:[#allocation80_spill] sm:$0xff] %v9043_v5  ;;  %2946 = vmatpush.msra.mxu1 %v9043_v5  ;;  %2986 = vmatpush.msra.mxu3 %v9046_v0  ;;  %v9050_v60 = vld [vmem:[#allocation6 + $0x248] sm:$0xff] }
 0x39c   : > { %12833 = vst [vmem:[#allocation82_spill] sm:$0xff] %v9046_v0  ;;  %2929 = vmatpush.msra.mxu0 %v12834_v62  ;;  %2969 = vmatpush.msra.mxu2 %v9050_v60  ;;  %v9056_v61 = vld [vmem:[#allocation6 + $0x6c8] sm:$0xff]  ;;  %v9063_v0 = vld [vmem:[#allocation6 + $0x680] sm:$0xff] }
 0x39d   : > { %12835 = vst [vmem:[#allocation133_spill] sm:$0xff] %v9050_v60  ;;  %2947 = vmatpush.msra.mxu1 %v9053_v35  ;;  %2987 = vmatpush.msra.mxu3 %v9056_v61  ;;  %v9060_v5 = vld [vmem:[#allocation6 + $0x208] sm:$0xff]  ;;  %v12842_v60 = vld [vmem:[#allocation30_spill] sm:$0xff] }
 0x39e   : > { %12836 = vst [vmem:[#allocation135_spill] sm:$0xff] %v9053_v35  ;;  %2930 = vmatpush.msra.mxu0 %v12838_v36  ;;  %2970 = vmatpush.msra.mxu2 %v9060_v5  ;;  %v9066_v62 = vld [vmem:[#allocation6 + $0x688] sm:$0xff] }
 0x39f   : > { %12837 = vst [vmem:[#allocation83_spill] sm:$0xff] %v9056_v61  ;;  %2948 = vmatpush.msra.mxu1 %v9063_v0  ;;  %2988 = vmatpush.msra.mxu3 %v9066_v62  ;;  %v9070_v35 = vld [vmem:[#allocation6 + $0x1c8] sm:$0xff]  ;;  %v9073_v61 = vld [vmem:[#allocation6 + $0x640] sm:$0xff] }
 0x3a0   : > { %12839 = vst [vmem:[#allocation88_spill] sm:$0xff] %v9060_v5  ;;  %2931 = vmatpush.msra.mxu0 %v12842_v60  ;;  %2971 = vmatpush.msra.mxu2 %v9070_v35  ;;  %v9076_v36 = vld [vmem:[#allocation6 + $0x648] sm:$0xff] }
 0x3a1   : > { %12840 = vst [vmem:[#allocation137_spill] sm:$0xff] %v9063_v0  ;;  %2949 = vmatpush.msra.mxu1 %v9073_v61  ;;  %2989 = vmatpush.msra.mxu3 %v9076_v36  ;;  %v12846_v5 = vld [vmem:[#allocation56_spill] sm:$0xff] }
 0x3a2   : > { %12841 = vst [vmem:[#allocation139_spill] sm:$0xff] %v9066_v62  ;;  %2932 = vmatpush.msra.mxu0 %v12846_v5  ;;  %v9080_v0 = vld [vmem:[#allocation6 + $0x188] sm:$0xff]  ;;  %v9083_v62 = vld [vmem:[#allocation6 + $0x600] sm:$0xff] }
 0x3a3   : > { %12843 = vst [vmem:[#allocation84_spill] sm:$0xff] %v9070_v35  ;;  %2972 = vmatpush.msra.mxu2 %v9080_v0  ;;  %2950 = vmatpush.msra.mxu1 %v9083_v62  ;;  %v9086_v60 = vld [vmem:[#allocation6 + $0x608] sm:$0xff] }
 0x3a4   : > { %12844 = vst [vmem:[#allocation140_spill] sm:$0xff] %v9073_v61  ;;  %2990 = vmatpush.msra.mxu3 %v9086_v60  ;;  %v12850_v35 = vld [vmem:[#allocation36_spill] sm:$0xff] }
 0x3a5   : > { %12845 = vst [vmem:[#allocation87_spill] sm:$0xff] %v9076_v36  ;;  %2933 = vmatpush.msra.mxu0 %v12850_v35  ;;  %v9090_v61 = vld [vmem:[#allocation6 + $0x148] sm:$0xff]  ;;  %v9093_v36 = vld [vmem:[#allocation6 + $0x5c0] sm:$0xff] }
 0x3a6   : > { %12847 = vst [vmem:[#allocation141_spill] sm:$0xff] %v9080_v0  ;;  %2973 = vmatpush.msra.mxu2 %v9090_v61  ;;  %2951 = vmatpush.msra.mxu1 %v9093_v36  ;;  %v9096_v5 = vld [vmem:[#allocation6 + $0x5c8] sm:$0xff]  ;;  %v12854_v0 = vld [vmem:[#allocation58_spill] sm:$0xff] }
 0x3a7   : > { %12848 = vst [vmem:[#allocation90_spill] sm:$0xff] %v9083_v62  ;;  %2991 = vmatpush.msra.mxu3 %v9096_v5  ;;  %2934 = vmatpush.msra.mxu0 %v12854_v0  ;;  %v9100_v62 = vld [vmem:[#allocation6 + $0x108] sm:$0xff] }
 0x3a8   : > { %12849 = vst [vmem:[#allocation143_spill] sm:$0xff] %v9086_v60  ;;  %2974 = vmatpush.msra.mxu2 %v9100_v62  ;;  %v9103_v60 = vld [vmem:[#allocation6 + $0x580] sm:$0xff]  ;;  %v9106_v35 = vld [vmem:[#allocation6 + $0x588] sm:$0xff] }
 0x3a9   : > { %12851 = vst [vmem:[#allocation92_spill] sm:$0xff] %v9090_v61  ;;  %2952 = vmatpush.msra.mxu1 %v9103_v60  ;;  %2992 = vmatpush.msra.mxu3 %v9106_v35  ;;  %v12858_v61 = vld [vmem:[#allocation60_spill] sm:$0xff] }
 0x3aa   : > { %12852 = vst [vmem:[#allocation145_spill] sm:$0xff] %v9093_v36  ;;  %2935 = vmatpush.msra.mxu0 %v12858_v61  ;;  %v9110_v36 = vld [vmem:[#allocation6 + $0xc8] sm:$0xff]  ;;  %v9125_v61 = vld [vmem:[#allocation6 + $0x500] sm:$0xff] }
 0x3ab   : > { %12853 = vst [vmem:[#allocation94_spill] sm:$0xff] %v9096_v5  ;;  %2975 = vmatpush.msra.mxu2 %v9110_v36  ;;  %v9113_v5 = vld [vmem:[#allocation6 + $0x540] sm:$0xff]  ;;  %v9116_v0 = vld [vmem:[#allocation6 + $0x548] sm:$0xff] }
 0x3ac   : > { %12855 = vst [vmem:[#allocation147_spill] sm:$0xff] %v9100_v62  ;;  %2953 = vmatpush.msra.mxu1 %v9113_v5  ;;  %2993 = vmatpush.msra.mxu3 %v9116_v0  ;;  %v9119_v62 = vld [vmem:[#allocation6 + $0x80] sm:$0xff] }
 0x3ad   : > { %12856 = vst [vmem:[#allocation97_spill] sm:$0xff] %v9103_v60  ;;  %2936 = vmatpush.msra.mxu0 %v9119_v62  ;;  %v9122_v60 = vld [vmem:[#allocation6 + $0x88] sm:$0xff] }
 0x3ae   : > { %12857 = vst [vmem:[#allocation149_spill] sm:$0xff] %v9106_v35  ;;  %2976 = vmatpush.msra.mxu2 %v9122_v60  ;;  %2954 = vmatpush.msra.mxu1 %v9125_v61 }
 0x3af   : > { %12859 = vst [vmem:[#allocation100_spill] sm:$0xff] %v9110_v36  ;;  %v9128_v36 = vld [vmem:[#allocation6 + $0x508] sm:$0xff] }
 0x3b0   : > { %12860 = vst [vmem:[#allocation151_spill] sm:$0xff] %v9113_v5  ;;  %2994 = vmatpush.msra.mxu3 %v9128_v36  ;;  %v9131_v5 = vld [vmem:[#allocation6 + $0x40] sm:$0xff] }
 0x3b1   : > { %12861 = vst [vmem:[#allocation103_spill] sm:$0xff] %v9116_v0  ;;  %2937 = vmatpush.msra.mxu0 %v9131_v5  ;;  %v9134_v0 = vld [vmem:[#allocation6 + $0x48] sm:$0xff] }
 0x3b2   : > { %12862 = vst [vmem:[#allocation152_spill] sm:$0xff] %v9119_v62  ;;  %2977 = vmatpush.msra.mxu2 %v9134_v0  ;;  %v9137_v62 = vld [vmem:[#allocation6 + $0x4c0] sm:$0xff] }
 0x3b3   : > { %12863 = vst [vmem:[#allocation106_spill] sm:$0xff] %v9122_v60  ;;  %2955 = vmatpush.msra.mxu1 %v9137_v62  ;;  %v9140_v60 = vld [vmem:[#allocation6 + $0x4c8] sm:$0xff] }
 0x3b4   : > { %12864 = vst [vmem:[#allocation153_spill] sm:$0xff] %v9125_v61  ;;  %2995 = vmatpush.msra.mxu3 %v9140_v60  ;;  %v9143_v61 = vld [vmem:[#allocation6] sm:$0xff] }
 0x3b5   : > { %12865 = vst [vmem:[#allocation109_spill] sm:$0xff] %v9128_v36  ;;  %2938 = vmatpush.msra.mxu0 %v9143_v61  ;;  %v9146_v36 = vld [vmem:[#allocation6 + $0x8] sm:$0xff] }
 0x3b6   : > { %12866 = vst [vmem:[#allocation154_spill] sm:$0xff] %v9131_v5  ;;  %2978 = vmatpush.msra.mxu2 %v9146_v36  ;;  %v9149_v5 = vld [vmem:[#allocation6 + $0x3d0] sm:$0xff] }
 0x3b7   : > { %12867 = vst [vmem:[#allocation115_spill] sm:$0xff] %v9134_v0  ;;  %3003 = vmatpush.msrb.mxu0 %v9149_v5  ;;  %v9152_v0 = vld [vmem:[#allocation6 + $0x3d8] sm:$0xff] }
 0x3b8   : > { %12868 = vst [vmem:[#allocation155_spill] sm:$0xff] %v9137_v62  ;;  %3043 = vmatpush.msrb.mxu2 %v9152_v0  ;;  %v9155_v62 = vld [vmem:[#allocation6 + $0x480] sm:$0xff] }
 0x3b9   : > { %12869 = vst [vmem:[#allocation120_spill] sm:$0xff] %v9140_v60  ;;  %2956 = vmatpush.msra.mxu1 %v9155_v62  ;;  %v9158_v60 = vld [vmem:[#allocation6 + $0x488] sm:$0xff] }
 0x3ba   : > { %12870 = vst [vmem:[#allocation156_spill] sm:$0xff] %v9143_v61  ;;  %2996 = vmatpush.msra.mxu3 %v9158_v60  ;;  %v9161_v61 = vld [vmem:[#allocation6 + $0x390] sm:$0xff] }
 0x3bb   : > { %12871 = vst [vmem:[#allocation122_spill] sm:$0xff] %v9146_v36  ;;  %3004 = vmatpush.msrb.mxu0 %v9161_v61  ;;  %v9164_v36 = vld [vmem:[#allocation6 + $0x398] sm:$0xff] }
 0x3bc   : > { %12872 = vst [vmem:[#allocation157_spill] sm:$0xff] %v9149_v5  ;;  %3044 = vmatpush.msrb.mxu2 %v9164_v36  ;;  %v9167_v5 = vld [vmem:[#allocation6 + $0x440] sm:$0xff] }
 0x3bd   : > { %12873 = vst [vmem:[#allocation124_spill] sm:$0xff] %v9152_v0  ;;  %2957 = vmatpush.msra.mxu1 %v9167_v5  ;;  %v9170_v0 = vld [vmem:[#allocation6 + $0x448] sm:$0xff] }
 0x3be   : > { %12874 = vst [vmem:[#allocation158_spill] sm:$0xff] %v9155_v62  ;;  %2997 = vmatpush.msra.mxu3 %v9170_v0  ;;  %v9173_v62 = vld [vmem:[#allocation6 + $0x350] sm:$0xff] }
 0x3bf   : > { %12875 = vst [vmem:[#allocation126_spill] sm:$0xff] %v9158_v60  ;;  %3005 = vmatpush.msrb.mxu0 %v9173_v62  ;;  %v9176_v60 = vld [vmem:[#allocation6 + $0x358] sm:$0xff] }
 0x3c0   : > { %12876 = vst [vmem:[#allocation159_spill] sm:$0xff] %v9161_v61  ;;  %3045 = vmatpush.msrb.mxu2 %v9176_v60  ;;  %v9179_v61 = vld [vmem:[#allocation6 + $0x400] sm:$0xff] }
 0x3c1   : > { %12877 = vst [vmem:[#allocation128_spill] sm:$0xff] %v9164_v36  ;;  %2958 = vmatpush.msra.mxu1 %v9179_v61  ;;  %v9182_v36 = vld [vmem:[#allocation6 + $0x408] sm:$0xff] }
 0x3c2   : > { %12878 = vst [vmem:[#allocation160_spill] sm:$0xff] %v9167_v5  ;;  %2998 = vmatpush.msra.mxu3 %v9182_v36  ;;  %v9185_v5 = vld [vmem:[#allocation6 + $0x310] sm:$0xff] }
 0x3c3   : > { %12879 = vst [vmem:[#allocation130_spill] sm:$0xff] %v9170_v0  ;;  %3006 = vmatpush.msrb.mxu0 %v9185_v5  ;;  %v9188_v0 = vld [vmem:[#allocation6 + $0x7d0] sm:$0xff] }
 0x3c4   : > { %12880 = vst [vmem:[#allocation161_spill] sm:$0xff] %v9173_v62  ;;  %3023 = vmatpush.msrb.mxu1 %v9188_v0  ;;  %v9191_v62 = vld [vmem:[#allocation6 + $0x318] sm:$0xff] }
 0x3c5   : > { %12881 = vst [vmem:[#allocation132_spill] sm:$0xff] %v9176_v60  ;;  %3046 = vmatpush.msrb.mxu2 %v9191_v62  ;;  %v9194_v60 = vld [vmem:[#allocation6 + $0x7d8] sm:$0xff]  ;;  %v2448_v35 = vpop.f32.mrf.mxu0 }
 0x3c6   : > { %12882 = vst [vmem:[#allocation162_spill] sm:$0xff] %v9179_v61  ;;  %3063 = vmatpush.msrb.mxu3 %v9194_v60  ;;  %v9197_v61 = vld [vmem:[#allocation6 + $0x2d0] sm:$0xff] }
 0x3c7   : > { %12883 = vst [vmem:[#allocation134_spill] sm:$0xff] %v9182_v36  ;;  %3007 = vmatpush.msrb.mxu0 %v9197_v61  ;;  %v9200_v36 = vld [vmem:[#allocation6 + $0x790] sm:$0xff] }
 0x3c8   : > { %12884 = vst [vmem:[#allocation163_spill] sm:$0xff] %v9185_v5  ;;  %3024 = vmatpush.msrb.mxu1 %v9200_v36  ;;  %v9203_v5 = vld [vmem:[#allocation6 + $0x2d8] sm:$0xff] }
 0x3c9   : > { %12885 = vst [vmem:[#allocation136_spill] sm:$0xff] %v9188_v0  ;;  %3047 = vmatpush.msrb.mxu2 %v9203_v5  ;;  %v9206_v0 = vld [vmem:[#allocation6 + $0x798] sm:$0xff] }
 0x3ca   : > { %12886 = vst [vmem:[#allocation164_spill] sm:$0xff] %v9191_v62  ;;  %3064 = vmatpush.msrb.mxu3 %v9206_v0  ;;  %v9209_v62 = vld [vmem:[#allocation6 + $0x290] sm:$0xff] }
 0x3cb   : > { %12887 = vst [vmem:[#allocation138_spill] sm:$0xff] %v9194_v60  ;;  %3008 = vmatpush.msrb.mxu0 %v9209_v62  ;;  %v9212_v60 = vld [vmem:[#allocation6 + $0x750] sm:$0xff] }
 0x3cc   : > { %12888 = vst [vmem:[#allocation165_spill] sm:$0xff] %v9197_v61  ;;  %3025 = vmatpush.msrb.mxu1 %v9212_v60  ;;  %v9215_v61 = vld [vmem:[#allocation6 + $0x298] sm:$0xff] }
 0x3cd   : > { %12889 = vst [vmem:[#allocation142_spill] sm:$0xff] %v9200_v36  ;;  %3048 = vmatpush.msrb.mxu2 %v9215_v61  ;;  %v9218_v36 = vld [vmem:[#allocation6 + $0x758] sm:$0xff] }
 0x3ce   : > { %12890 = vst [vmem:[#allocation166_spill] sm:$0xff] %v9203_v5  ;;  %3065 = vmatpush.msrb.mxu3 %v9218_v36  ;;  %v9221_v5 = vld [vmem:[#allocation6 + $0x250] sm:$0xff]  ;;  %v2528_v42 = vpop.f32.mrf.mxu0 }
 0x3cf   : > { %12891 = vst [vmem:[#allocation144_spill] sm:$0xff] %v9206_v0  ;;  %3009 = vmatpush.msrb.mxu0 %v9221_v5  ;;  %v9224_v0 = vld [vmem:[#allocation6 + $0x710] sm:$0xff] }
 0x3d0   : > { %12892 = vst [vmem:[#allocation167_spill] sm:$0xff] %v9209_v62  ;;  %3026 = vmatpush.msrb.mxu1 %v9224_v0  ;;  %v9227_v62 = vld [vmem:[#allocation6 + $0x258] sm:$0xff] }
 0x3d1   : > { %12893 = vst [vmem:[#allocation146_spill] sm:$0xff] %v9212_v60  ;;  %3049 = vmatpush.msrb.mxu2 %v9227_v62  ;;  %v9230_v60 = vld [vmem:[#allocation6 + $0x718] sm:$0xff]  ;;  %v2508_v49 = vpop.f32.mrf.mxu3 }
 0x3d2   : > { %12894 = vst [vmem:[#allocation168_spill] sm:$0xff] %v9215_v61  ;;  %3066 = vmatpush.msrb.mxu3 %v9230_v60  ;;  %v9233_v61 = vld [vmem:[#allocation6 + $0x210] sm:$0xff] }
 0x3d3   : > { %12895 = vst [vmem:[#allocation148_spill] sm:$0xff] %v9218_v36  ;;  %3010 = vmatpush.msrb.mxu0 %v9233_v61  ;;  %v9236_v36 = vld [vmem:[#allocation6 + $0x6d0] sm:$0xff] }
 0x3d4   : > { %12896 = vst [vmem:[#allocation169_spill] sm:$0xff] %v9221_v5  ;;  %3027 = vmatpush.msrb.mxu1 %v9236_v36  ;;  %v9239_v5 = vld [vmem:[#allocation6 + $0x218] sm:$0xff] }
 0x3d5   : > { %12897 = vst [vmem:[#allocation150_spill] sm:$0xff] %v9224_v0  ;;  %3050 = vmatpush.msrb.mxu2 %v9239_v5  ;;  %v9242_v0 = vld [vmem:[#allocation6 + $0x6d8] sm:$0xff] }
 0x3d6   : > { %12898 = vst [vmem:[#allocation170_spill] sm:$0xff] %v9227_v62  ;;  %3067 = vmatpush.msrb.mxu3 %v9242_v0  ;;  %v9245_v62 = vld [vmem:[#allocation6 + $0x1d0] sm:$0xff] }
 0x3d7   : > { %12899 = vst [vmem:[#allocation171_spill] sm:$0xff] %v9230_v60  ;;  %3011 = vmatpush.msrb.mxu0 %v9245_v62  ;;  %v9248_v60 = vld [vmem:[#allocation6 + $0x690] sm:$0xff] }
 0x3d8   : > { %12900 = vst [vmem:[#allocation172_spill] sm:$0xff] %v9233_v61  ;;  %3028 = vmatpush.msrb.mxu1 %v9248_v60  ;;  %v9251_v61 = vld [vmem:[#allocation6 + $0x1d8] sm:$0xff] }
 0x3d9   : > { %12901 = vst [vmem:[#allocation173_spill] sm:$0xff] %v9236_v36  ;;  %3051 = vmatpush.msrb.mxu2 %v9251_v61  ;;  %v9254_v36 = vld [vmem:[#allocation6 + $0x698] sm:$0xff] }
 0x3da   : > { %12902 = vst [vmem:[#allocation174_spill] sm:$0xff] %v9239_v5  ;;  %3068 = vmatpush.msrb.mxu3 %v9254_v36  ;;  %v9257_v5 = vld [vmem:[#allocation6 + $0x190] sm:$0xff] }
 0x3db   : > { %12903 = vst [vmem:[#allocation175_spill] sm:$0xff] %v9242_v0  ;;  %3012 = vmatpush.msrb.mxu0 %v9257_v5  ;;  %v9260_v0 = vld [vmem:[#allocation6 + $0x650] sm:$0xff]  ;;  %v2588_v27 = vpop.f32.mrf.mxu3 }
 0x3dc   : > { %12904 = vst [vmem:[#allocation176_spill] sm:$0xff] %v9245_v62  ;;  %3029 = vmatpush.msrb.mxu1 %v9260_v0  ;;  %v9263_v62 = vld [vmem:[#allocation6 + $0x198] sm:$0xff] }
 0x3dd   : > { %12905 = vst [vmem:[#allocation29_spill] sm:$0xff] %v9248_v60  ;;  %3052 = vmatpush.msrb.mxu2 %v9263_v62  ;;  %v9266_v60 = vld [vmem:[#allocation6 + $0x658] sm:$0xff] }
 0x3de   : > { %12906 = vst [vmem:[#allocation27_spill] sm:$0xff] %v9251_v61  ;;  %3069 = vmatpush.msrb.mxu3 %v9266_v60  ;;  %v9269_v61 = vld [vmem:[#allocation6 + $0x150] sm:$0xff] }
 0x3df   : > { %12907 = vst [vmem:[#allocation20_spill] sm:$0xff] %v9254_v36  ;;  %3013 = vmatpush.msrb.mxu0 %v9269_v61  ;;  %v9272_v36 = vld [vmem:[#allocation6 + $0x610] sm:$0xff] }
 0x3e0   : > { %12908 = vst [vmem:[#allocation34_spill] sm:$0xff] %v9257_v5  ;;  %3030 = vmatpush.msrb.mxu1 %v9272_v36  ;;  %v9275_v5 = vld [vmem:[#allocation6 + $0x158] sm:$0xff] }
 0x3e1   : > { %12909 = vst [vmem:[#allocation33_spill] sm:$0xff] %v9260_v0  ;;  %3053 = vmatpush.msrb.mxu2 %v9275_v5  ;;  %v9278_v0 = vld [vmem:[#allocation6 + $0x618] sm:$0xff] }
 0x3e2   : > { %12910 = vst [vmem:[#allocation15_spill] sm:$0xff] %v9263_v62  ;;  %3070 = vmatpush.msrb.mxu3 %v9278_v0  ;;  %v9281_v62 = vld [vmem:[#allocation6 + $0x110] sm:$0xff] }
 0x3e3   : > { %12911 = vst [vmem:[#allocation31_spill] sm:$0xff] %v9266_v60  ;;  %3014 = vmatpush.msrb.mxu0 %v9281_v62  ;;  %v9284_v60 = vld [vmem:[#allocation6 + $0x5d0] sm:$0xff] }
 0x3e4   : > { %12912 = vst [vmem:[#allocation40_spill] sm:$0xff] %v9269_v61  ;;  %3031 = vmatpush.msrb.mxu1 %v9284_v60  ;;  %v9287_v61 = vld [vmem:[#allocation6 + $0x118] sm:$0xff] }
 0x3e5   : > { %12913 = vst [vmem:[#allocation22_spill] sm:$0xff] %v9272_v36  ;;  %3054 = vmatpush.msrb.mxu2 %v9287_v61  ;;  %v9290_v36 = vld [vmem:[#allocation6 + $0x5d8] sm:$0xff] }
 0x3e6   : > { %12914 = vst [vmem:[#allocation38_spill] sm:$0xff] %v9275_v5  ;;  %3071 = vmatpush.msrb.mxu3 %v9290_v36  ;;  %v9293_v5 = vld [vmem:[#allocation6 + $0xd0] sm:$0xff] }
 0x3e7   : > { %12915 = vst [vmem:[#allocation37_spill] sm:$0xff] %v9278_v0  ;;  %3015 = vmatpush.msrb.mxu0 %v9293_v5  ;;  %v9296_v0 = vld [vmem:[#allocation6 + $0x590] sm:$0xff] }
 0x3e8   : > { %12916 = vst [vmem:[#allocation21_spill] sm:$0xff] %v9281_v62  ;;  %3032 = vmatpush.msrb.mxu1 %v9296_v0  ;;  %v9299_v62 = vld [vmem:[#allocation6 + $0xd8] sm:$0xff] }
 0x3e9   : > { %12917 = vst [vmem:[#allocation35_spill] sm:$0xff] %v9284_v60  ;;  %3055 = vmatpush.msrb.mxu2 %v9299_v62  ;;  %v9302_v60 = vld [vmem:[#allocation6 + $0x598] sm:$0xff] }
 0x3ea   : > { %12918 = vst [vmem:[#allocation42_spill] sm:$0xff] %v9287_v61  ;;  %3072 = vmatpush.msrb.mxu3 %v9302_v60  ;;  %v9305_v61 = vld [vmem:[#allocation6 + $0x90] sm:$0xff] }
 0x3eb   : > { %12919 = vst [vmem:[#allocation24_spill] sm:$0xff] %v9290_v36  ;;  %3016 = vmatpush.msrb.mxu0 %v9305_v61  ;;  %v9308_v36 = vld [vmem:[#allocation6 + $0x550] sm:$0xff] }
 0x3ec   : > { %12920 = vst [vmem:[#allocation41_spill] sm:$0xff] %v9293_v5  ;;  %3033 = vmatpush.msrb.mxu1 %v9308_v36  ;;  %v9311_v5 = vld [vmem:[#allocation6 + $0x98] sm:$0xff] }
 0x3ed   : > { %12921 = vst [vmem:[#allocation39_spill] sm:$0xff] %v9296_v0  ;;  %3056 = vmatpush.msrb.mxu2 %v9311_v5  ;;  %v9314_v0 = vld [vmem:[#allocation6 + $0x558] sm:$0xff] }
 0x3ee   : > { %12922 = vst [vmem:[#allocation19_spill] sm:$0xff] %v9299_v62  ;;  %3073 = vmatpush.msrb.mxu3 %v9314_v0  ;;  %v9317_v62 = vld [vmem:[#allocation6 + $0x50] sm:$0xff] }
 0x3ef   : > { %12923 = vst [vmem:[#allocation44_spill] sm:$0xff] %v9302_v60  ;;  %3017 = vmatpush.msrb.mxu0 %v9317_v62  ;;  %v9320_v60 = vld [vmem:[#allocation6 + $0x510] sm:$0xff] }
 0x3f0   : > { %12924 = vst [vmem:[#allocation43_spill] sm:$0xff] %v9305_v61  ;;  %3034 = vmatpush.msrb.mxu1 %v9320_v60  ;;  %v9323_v61 = vld [vmem:[#allocation6 + $0x58] sm:$0xff] }
 0x3f1   : > { %12925 = vst [vmem:[#allocation28_spill] sm:$0xff] %v9308_v36  ;;  %3057 = vmatpush.msrb.mxu2 %v9323_v61  ;;  %v9326_v36 = vld [vmem:[#allocation6 + $0x518] sm:$0xff] }
 0x3f2   : > { %12926 = vst [vmem:[#allocation46_spill] sm:$0xff] %v9311_v5  ;;  %3074 = vmatpush.msrb.mxu3 %v9326_v36  ;;  %v9329_v5 = vld [vmem:[#allocation6 + $0x10] sm:$0xff] }
 0x3f3   : > { %12927 = vst [vmem:[#allocation45_spill] sm:$0xff] %v9314_v0  ;;  %3018 = vmatpush.msrb.mxu0 %v9329_v5  ;;  %v9332_v0 = vld [vmem:[#allocation6 + $0x4d0] sm:$0xff] }
 0x3f4   : > { %12928 = vst [vmem:[#allocation26_spill] sm:$0xff] %v9317_v62  ;;  %3035 = vmatpush.msrb.mxu1 %v9332_v0  ;;  %v9335_v62 = vld [vmem:[#allocation6 + $0x18] sm:$0xff] }
 0x3f5   : > { %12929 = vst [vmem:[#allocation48_spill] sm:$0xff] %v9320_v60  ;;  %3058 = vmatpush.msrb.mxu2 %v9335_v62  ;;  %v9338_v60 = vld [vmem:[#allocation6 + $0x4d8] sm:$0xff] }
 0x3f6   : > { %12930 = vst [vmem:[#allocation25_spill] sm:$0xff] %v9323_v61  ;;  %3075 = vmatpush.msrb.mxu3 %v9338_v60  ;;  %v9341_v61 = vld [vmem:[#allocation6 + $0x490] sm:$0xff] }
 0x3f7   : > { %12931 = vst [vmem:[#allocation50_spill] sm:$0xff] %v9326_v36  ;;  %3036 = vmatpush.msrb.mxu1 %v9341_v61  ;;  %v9344_v36 = vld [vmem:[#allocation6 + $0x498] sm:$0xff] }
 0x3f8   : > { %12932 = vst [vmem:[#allocation23_spill] sm:$0xff] %v9329_v5  ;;  %3076 = vmatpush.msrb.mxu3 %v9344_v36  ;;  %v9347_v5 = vld [vmem:[#allocation6 + $0x450] sm:$0xff] }
 0x3f9   : > { %12933 = vst [vmem:[#allocation52_spill] sm:$0xff] %v9332_v0  ;;  %3037 = vmatpush.msrb.mxu1 %v9347_v5  ;;  %v9350_v0 = vld [vmem:[#allocation6 + $0x458] sm:$0xff] }
 0x3fa   : > { %12934 = vst [vmem:[#allocation32_spill] sm:$0xff] %v9335_v62  ;;  %3077 = vmatpush.msrb.mxu3 %v9350_v0  ;;  %v9353_v62 = vld [vmem:[#allocation6 + $0x410] sm:$0xff] }
 0x3fb   : > { %12935 = vst [vmem:[#allocation54_spill] sm:$0xff] %v9338_v60  ;;  %3038 = vmatpush.msrb.mxu1 %v9353_v62  ;;  %v9356_v60 = vld [vmem:[#allocation6 + $0x418] sm:$0xff] }
 0x3fc   : > { %12936 = vst [vmem:[#allocation30_spill] sm:$0xff] %v9341_v61  ;;  %3078 = vmatpush.msrb.mxu3 %v9356_v60  ;;  %v2468_v61 = vpop.f32.mrf.mxu1 }
 0x3fd   : > { %12937 = vst [vmem:[#allocation56_spill] sm:$0xff] %v9344_v36  ;;  %v2488_v36 = vpop.f32.mrf.mxu2  ;;  %v2469_v19 = vadd.f32 %v2468_v61, %v2448_v35  ;;  %v11913_v35 = vrot.slane %v12945_v9, 1 }
 0x3fe   : > { %12938 = vst [vmem:[#allocation36_spill] sm:$0xff] %v9347_v5 }
 0x3ff   : > { %12939 = vst [vmem:[#allocation58_spill] sm:$0xff] %v9350_v0  ;;  %v2759_v38 = vrot.slane %v2469_v19, 5  ;;  %v2509_v0 = vadd.f32 %v2508_v49, %v2488_v36 }
 0x400   : > { %12940 = vst [vmem:[#allocation60_spill] sm:$0xff] %v9353_v62 }
 0x401   : > { %12941 = vst [vmem:[#allocation177_spill] sm:$0xff] %v9356_v60  ;;  %v2775_v62 = vadd.f32 %v2759_v38, %v12942_v29  ;;  %v2760_v33 = vrot.slane %v2509_v0, 5  ;;  %v2668_v0 = vpop.f32.mrf.mxu3 }
 0x403   : > { %v5123_v10 = vmul.f32 -1.442695, %v2775_v62 }
 0x404   : > { %v2548_v59 = vpop.f32.mrf.mxu1 }
 0x405   : > { %v2549_v5 = vadd.f32 %v2548_v59, %v2528_v42  ;;  %v2568_v18 = vpop.f32.mrf.mxu2  ;;  %v2776_v42 = vadd.f32 %v2760_v33, %v11914_v11  ;;  %5329 = vpow2.f32 %v5123_v10  ;;  %v2608_v10 = vpop.f32.mrf.mxu0 }
 0x406   : > { %v2589_v39 = vadd.f32 %v2588_v27, %v2568_v18 }
 0x407   : > { %v2761_v25 = vrot.slane %v2549_v5, 5  ;;  %v5124_v27 = vmul.f32 -1.442695, %v2776_v42 }
 0x408   : > { %v2762_v60 = vrot.slane %v2589_v39, 5 }
 0x409   : > { %v2777_v44 = vadd.f32 %v2761_v25, %v12943_v57  ;;  %v12946_v57 = vld [vmem:[#allocation17_spill] sm:$0xff] }
 0x40a   : > { %v2778_v19 = vadd.f32 %v2762_v60, %v11913_v35 }
 0x40b   : > { %v5125_v7 = vmul.f32 -1.442695, %v2777_v44  ;;  %v5330_v38 = vpop.eup %5329 }
 0x40c   : > { %v5126_v18 = vmul.f32 -1.442695, %v2778_v19  ;;  %v9367_v39 = vadd.f32 1.0, %v5330_v38 }
 0x40d   : > { %5331 = vpow2.f32 %v5125_v7  ;;  %v2628_v7 = vpop.f32.mrf.mxu1  ;;  %v2648_v5 = vpop.f32.mrf.mxu2 }
 0x40e   : > { %5333 = vpow2.f32 %v5124_v27  ;;  %v2629_v61 = vadd.f32 %v2628_v7, %v2608_v10  ;;  %v2688_v27 = vpop.f32.mrf.mxu0  ;;  %v2669_v13 = vadd.f32 %v2668_v0, %v2648_v5  ;;  %vm2796_vm12 = vweird.f32 %v9367_v39 }
 0x40f   : > { %5335 = vpow2.f32 %v5126_v18 }
 0x410   : > { %5337 = vrcp.f32 %v9367_v39 }
 0x413   : > { %v5332_v25 = vpop.eup %5331 }
 0x414   : > { %v9369_v59 = vadd.f32 1.0, %v5332_v25  ;;  %v5334_v44 = vpop.eup %5333 }
 0x415   : > { %v5336_v49 = vpop.eup %5335  ;;  %v9373_v33 = vadd.f32 1.0, %v5334_v44  ;;  %v2708_v18 = vpop.f32.mrf.mxu1 }
 0x416   : > { %5339 = vrcp.f32 %v9369_v59  ;;  %v9375_v62 = vadd.f32 1.0, %v5336_v49  ;;  %v9377_v36 = vpop.eup %5337  ;;  %v2709_v38 = vadd.f32 %v2708_v18, %v2688_v27  ;;  %v2763_v49 = vrot.slane %v2629_v61, 5  ;;  %v2728_v55 = vpop.f32.mrf.mxu2 }
 0x417   : > { %5341 = vrcp.f32 %v9373_v33  ;;  %v2792_v42 = vmul.f32 %v9377_v36, %v9367_v39  ;;  %v2748_v24 = vpop.f32.mrf.mxu3  ;;  %vm2797_vm10 = vweird.f32 %v9377_v36  ;;  %vm2834_vm13 = vweird.f32 %v9369_v59 }
 0x418   : > { %5343 = vrcp.f32 %v9375_v62  ;;  %v2765_v35 = vrot.slane %v2709_v38, 5  ;;  %v2779_v27 = vadd.f32 %v2763_v49, %v7343_v46  ;;  %v2749_v3 = vadd.f32 %v2748_v24, %v2728_v55  ;;  %vm9416_vm14 = vmor %vm2796_vm12, %vm2797_vm10 }
 0x419   : > { %v2793_v11 = vsub.f32 1.0, %v2792_v42  ;;  %v2802_v49 = vand.u32 2147483648, %v9367_v39  ;;  %v2840_v55 = vand.u32 2147483648, %v9369_v59  ;;  %vm2811_vm1 = vweird.f32 %v9373_v33 }
 0x41a   : > { %v2781_v10 = vadd.f32 %v2765_v35, %v12946_v57  ;;  %v11922_v35 = vrot.slane %v7375_v47, 1  ;;  %v2766_v5 = vrot.slane %v2749_v3, 5  ;;  %v2800_v57 = vand.u32 2147483647, %v9367_v39 }
 0x41b   : > { %v2794_v42 = vmul.f32 %v9377_v36, %v2793_v11  ;;  %vm2849_vm5 = vweird.f32 %v9375_v62 }
 0x41c   : > { %v9380_v60 = vpop.eup %5339  ;;  %v5127_v18 = vmul.f32 -1.442695, %v2781_v10  ;;  %v2782_v24 = vadd.f32 %v2766_v5, %v11922_v35  ;;  %vm9426_vm0 = vcmp.eq.f32.partialorder %v2800_v57, 8.507059e+37  ;;  %v9719_v35 = vld [vmem:[#allocation6 + $0x380] sm:$0xff] }
 0x41d   : > { %v2830_v19 = vmul.f32 %v9380_v60, %v9369_v59  ;;  %v9387_v25 = vpop.eup %5341  ;;  %vm2835_vm11 = vweird.f32 %v9380_v60 }
 0x41e   : > { %v9389_v44 = vpop.eup %5343  ;;  %v2807_v7 = vmul.f32 %v9387_v25, %v9373_v33  ;;  %5345 = vpow2.f32 %v5127_v18  ;;  %v2901_v18 = vrot.slane %v8694_v28, 7  ;;  %vm9422_vm15 = vmor %vm2834_vm13, %vm2835_vm11  ;;  %vm2812_vm3 = vweird.f32 %v9387_v25 }
 0x41f   : > { %v2831_v9 = vsub.f32 1.0, %v2830_v19  ;;  %v2845_v29 = vmul.f32 %v9389_v44, %v9375_v62  ;;  %v2764_v19 = vrot.slane %v2669_v13, 5  ;;  %5347 = vtanh.f32 %v2779_v27  ;;  %vm9448_vm6 = vmor %vm2811_vm1, %vm2812_vm3 }
 0x420   : > { %v2808_v0 = vsub.f32 1.0, %v2807_v7  ;;  %v2795_v13 = vadd.f32 %v9377_v36, %v2794_v42  ;;  %vm2850_vm4 = vweird.f32 %v9389_v44 }
 0x421   : > { %v2832_v61 = vmul.f32 %v9380_v60, %v2831_v9  ;;  %v2846_v38 = vsub.f32 1.0, %v2845_v29  ;;  %v2838_v9 = vand.u32 2147483647, %v9369_v59  ;;  %v2780_v11 = vadd.f32 %v2764_v19, %v11921_v34  ;;  %vm2851_vm7 = vmor %vm2849_vm5, %vm2850_vm4  ;;  %v9716_v34 = vld [vmem:[#allocation6 + $0x478] sm:$0xff] }
 0x422   : > { %v5128_v29 = vmul.f32 -1.442695, %v2782_v24  ;;  %v2809_v39 = vmul.f32 %v9387_v25, %v2808_v0  ;;  %v2803_v59 = vor.u32 1.1754944e-38, %v2802_v49  ;;  %v2799_v19 = vsel %vm9416_vm14, %v9377_v36, %v2795_v13 }
 0x423   : > { %v2833_v3 = vadd.f32 %v9380_v60, %v2832_v61  ;;  %v2847_v10 = vmul.f32 %v9389_v44, %v2846_v38  ;;  %v2841_v38 = vor.u32 1.1754944e-38, %v2840_v55  ;;  %vm2839_vm2 = vcmp.eq.f32.partialorder %v2838_v9, 8.507059e+37 }
 0x424   : > { %v5346_v27 = vpop.eup %5345  ;;  %5349 = vpow2.f32 %v5128_v29  ;;  %v2810_v57 = vadd.f32 %v9387_v25, %v2809_v39  ;;  %v2855_v36 = vand.u32 2147483648, %v9375_v62  ;;  %v2817_v13 = vand.u32 2147483648, %v9373_v33 }
 0x425   : > { %v2837_v5 = vsel %vm9422_vm15, %v9380_v60, %v2833_v3  ;;  %v2867_v28 = vadd.f32 1.0, %v5346_v27  ;;  %v5348_v0 = vpop.eup %5347  ;;  %5351 = vtanh.f32 %v2780_v11  ;;  %v2848_v49 = vadd.f32 %v9389_v44, %v2847_v10 }
 0x426   : > { %v2804_v60 = vsel %vm9426_vm0, %v2803_v59, %v2799_v19  ;;  %v2842_v24 = vsel %vm2839_vm2, %v2841_v38, %v2837_v5  ;;  %v2815_v9 = vand.u32 2147483647, %v9373_v33  ;;  %v2853_v11 = vand.u32 2147483647, %v9375_v62 }
 0x427   : > { %5353 = vrcp.f32 %v2867_v28  ;;  %v2907_v3 = vmul.f32 %v5348_v0, %v2804_v60  ;;  %v2905_v10 = vmul.f32 %v2901_v18, %v2842_v24  ;;  %v2814_v7 = vsel %vm9448_vm6, %v9387_v25, %v2810_v57 }
 0x428   : > { %v2852_v39 = vsel %vm2851_vm7, %v9389_v44, %v2848_v49  ;;  %v2856_v42 = vor.u32 1.1754944e-38, %v2855_v36  ;;  %v2818_v59 = vor.u32 1.1754944e-38, %v2817_v13  ;;  %vm2816_vm8 = vcmp.eq.f32.partialorder %v2815_v9, 8.507059e+37 }
 0x429   : > { %v9458_v5 = vadd.f32 %v2907_v3, %v2905_v10  ;;  %vm2854_vm9 = vcmp.eq.f32.partialorder %v2853_v11, 8.507059e+37  ;;  %v2902_v18 = vrot.slane %v8698_v30, 7  ;;  %v2880_v44 = vand.u32 2147483648, %v2867_v28 }
 0x42a   : > { %v5350_v29 = vpop.eup %5349  ;;  %v2819_v33 = vsel %vm2816_vm8, %v2818_v59, %v2814_v7  ;;  %v2857_v62 = vsel %vm2854_vm9, %v2856_v42, %v2852_v39  ;;  %v2878_v49 = vand.u32 2147483647, %v2867_v28  ;;  %vm2874_vm11 = vweird.f32 %v2867_v28 }
 0x42b   : > { %v2868_v27 = vadd.f32 1.0, %v5350_v29  ;;  %v5352_v61 = vpop.eup %5351  ;;  %v2906_v25 = vmul.f32 %v2902_v18, %v2857_v62  ;;  %v2881_v55 = vor.u32 1.1754944e-38, %v2880_v44  ;;  %v12971_v44 = vld [vmem:[#allocation55_spill] sm:$0xff] }
 0x42c   : > { %v2908_v38 = vmul.f32 %v5352_v61, %v2819_v33  ;;  %vm2879_vm13 = vcmp.eq.f32.partialorder %v2878_v49, 8.507059e+37  ;;  %v12973_v49 = vld [vmem:[#allocation105_spill] sm:$0xff] }
 0x42d   : > { %v5354_v19 = vpop.eup %5353  ;;  %5355 = vrcp.f32 %v2868_v27  ;;  %v2895_v10 = vand.u32 2147483648, %v2868_v27  ;;  %v2893_v61 = vand.u32 2147483647, %v2868_v27  ;;  %vm2889_vm15 = vweird.f32 %v2868_v27 }
 0x42e   : > { %v2870_v0 = vmul.f32 %v5354_v19, %v2867_v28  ;;  %5357 = vtanh.f32 %v9458_v5  ;;  %vm2875_vm10 = vweird.f32 %v5354_v19  ;;  %v9462_v24 = vadd.f32 %v2908_v38, %v2906_v25  ;;  %v9578_v25 = vld [vmem:[#allocation6 + $0x3b8] sm:$0xff] }
 0x42f   : > { %vm2876_vm12 = vmor %vm2874_vm11, %vm2875_vm10  ;;  %v2896_v28 = vor.u32 1.1754944e-38, %v2895_v10  ;;  %vm2894_vm1 = vcmp.eq.f32.partialorder %v2893_v61, 8.507059e+37  ;;  %v12980_v10 = vld [vmem:[#allocation61_spill] sm:$0xff]  ;;  %v12981_v61 = vld [vmem:[#allocation95_spill] sm:$0xff] }
 0x430   : > { %v2871_v60 = vsub.f32 1.0, %v2870_v0  ;;  %5359 = vtanh.f32 %v9462_v24  ;;  %v9471_v0 = vld [vmem:[#allocation6 + $0x3e8] sm:$0xff] }
 0x432   : > { %v2872_v57 = vmul.f32 %v5354_v19, %v2871_v60  ;;  %v9481_v60 = vld [vmem:[#allocation6 + $0x368] sm:$0xff] }
 0x433   : > { %v5356_v36 = vpop.eup %5355 }
 0x434   : > { %v2873_v13 = vadd.f32 %v5354_v19, %v2872_v57  ;;  %v2885_v3 = vmul.f32 %v5356_v36, %v2868_v27  ;;  %v5358_v11 = vpop.eup %5357  ;;  %vm2890_vm14 = vweird.f32 %v5356_v36  ;;  %v9475_v27 = vld [vmem:[#allocation6 + $0x3a8] sm:$0xff]  ;;  %v12972_v57 = vld [vmem:[#allocation99_spill] sm:$0xff] }
 0x435   : > { %vm2891_vm0 = vmor %vm2889_vm15, %vm2890_vm14 }
 0x436   : > { %v2877_v9 = vsel %vm2876_vm12, %v5354_v19, %v2873_v13  ;;  %v2886_v30 = vsub.f32 1.0, %v2885_v3  ;;  %v5360_v33 = vpop.eup %5359  ;;  %v12974_v13 = vld [vmem:[#allocation57_spill] sm:$0xff]  ;;  %v12975_v3 = vld [vmem:[#allocation108_spill] sm:$0xff] }
 0x437   : > { %v2882_v29 = vsel %vm2879_vm13, %v2881_v55, %v2877_v9  ;;  %v12976_v55 = vld [vmem:[#allocation111_spill] sm:$0xff] }
 0x438   : > { %v2913_v7 = vmul.f32 %v5358_v11, %v2882_v29  ;;  %v2887_v39 = vmul.f32 %v5356_v36, %v2886_v30  ;;  %v12977_v9 = vld [vmem:[#allocation59_spill] sm:$0xff]  ;;  %v9593_v30 = vld [vmem:[#allocation6 + $0x338] sm:$0xff]  ;;  %v12979_v29 = vld [vmem:[#allocation85_spill] sm:$0xff]  ;;  %13021 = vst [vmem:[#allocation111_spill] sm:$0xff] %v9716_v34 }
 0x439   : > { %v12978_v11 = vld [vmem:[#allocation114_spill] sm:$0xff]  ;;  %13022 = vst [vmem:[#allocation59_spill] sm:$0xff] %v9719_v35 }
 0x43a   : > { %v9465_v42 = vrot.slane %v2913_v7, 3  ;;  %v2888_v59 = vadd.f32 %v5356_v36, %v2887_v39  ;;  %v9599_v7 = vld [vmem:[#allocation6 + $0x2f8] sm:$0xff] }
 0x43b   : > { %v9602_v39 = vld [vmem:[#allocation6 + $0x7b8] sm:$0xff] }
 0x43c   : > { %2918 = vst [vmem:[#allocation2 + $0x3] sm:$0x1] %v9465_v42  ;;  %v2892_v19 = vsel %vm2891_vm0, %v5356_v36, %v2888_v59  ;;  %2939 = vmatmul.f32.vlgmr.msra.gmra.mxu0 %v9465_v42  ;;  %2979 = vmatmul.f32.vlgmr.msra.gmra.mxu2 %v9465_v42  ;;  %v9584_v36 = vld [vmem:[#allocation6 + $0x378] sm:$0xff] }
 0x43d   : > { %v2897_v62 = vsel %vm2894_vm1, %v2896_v28, %v2892_v19  ;;  %3083 = vmatpush.msra.mxu0 %v8706_v48  ;;  %3123 = vmatpush.msra.mxu2 %v9471_v0  ;;  %v9489_v48 = vld [vmem:[#allocation6 + $0x328] sm:$0xff]  ;;  %v12982_v59 = vld [vmem:[#allocation98_spill] sm:$0xff] }
 0x43e   : > { %v2914_v18 = vmul.f32 %v5360_v33, %v2897_v62  ;;  %v9607_v28 = vld [vmem:[#allocation6 + $0x2b8] sm:$0xff]  ;;  %v12983_v33 = vld [vmem:[#allocation63_spill] sm:$0xff]  ;;  %v12984_v62 = vld [vmem:[#allocation101_spill] sm:$0xff] }
 0x43f   : > { %3084 = vmatpush.msra.mxu0 %v8710_v14  ;;  %3124 = vmatpush.msra.mxu2 %v9475_v27  ;;  %v9497_v14 = vld [vmem:[#allocation6 + $0x2e8] sm:$0xff]  ;;  %v9610_v19 = vld [vmem:[#allocation6 + $0x778] sm:$0xff] }
 0x440   : > { %v9478_v38 = vrot.slane %v2914_v18, 3  ;;  %v9615_v18 = vld [vmem:[#allocation6 + $0x278] sm:$0xff] }
 0x441   : > { %3085 = vmatpush.msra.mxu0 %v8716_v50  ;;  %3125 = vmatpush.msra.mxu2 %v9481_v60  ;;  %v9503_v50 = vld [vmem:[#allocation6 + $0x2a8] sm:$0xff] }
 0x442   : > { %2922 = vst [vmem:[#allocation2 + $0xc] sm:$0x1] %v9478_v38  ;;  %2959 = vmatmul.f32.vlgmr.msra.gmra.mxu1 %v9478_v38  ;;  %2999 = vmatmul.f32.vlgmr.msra.gmra.mxu3 %v9478_v38 }
 0x443   : > { %3086 = vmatpush.msra.mxu0 %v8723_v51  ;;  %3103 = vmatpush.msra.mxu1 %v8726_v52  ;;  %v9509_v51 = vld [vmem:[#allocation6 + $0x268] sm:$0xff] }
 0x444   : > { %3126 = vmatpush.msra.mxu2 %v9489_v48  ;;  %3143 = vmatpush.msra.mxu3 %v8730_v15  ;;  %v9517_v52 = vld [vmem:[#allocation6 + $0x228] sm:$0xff] }
 0x445   : > { %3019 = vmatmul.f32.vlgmr.msrb.gmra.mxu0 %v9465_v42  ;;  %3059 = vmatmul.f32.vlgmr.msrb.gmra.mxu2 %v9465_v42  ;;  %v9523_v15 = vld [vmem:[#allocation6 + $0x1e8] sm:$0xff] }
 0x446   : > { %3087 = vmatpush.msra.mxu0 %v8735_v8  ;;  %3104 = vmatpush.msra.mxu1 %v8738_v41  ;;  %v9529_v8 = vld [vmem:[#allocation6 + $0x1a8] sm:$0xff] }
 0x447   : > { %3127 = vmatpush.msra.mxu2 %v9497_v14  ;;  %3144 = vmatpush.msra.mxu3 %v8742_v53  ;;  %v9535_v41 = vld [vmem:[#allocation6 + $0x168] sm:$0xff] }
 0x448   : > { %3088 = vmatpush.msra.mxu0 %v8745_v6  ;;  %3105 = vmatpush.msra.mxu1 %v8748_v1  ;;  %v9541_v53 = vld [vmem:[#allocation6 + $0x128] sm:$0xff]  ;;  %v12955_v6 = vld [vmem:[#allocation62_spill] sm:$0xff] }
 0x449   : > { %3128 = vmatpush.msra.mxu2 %v9503_v50  ;;  %3145 = vmatpush.msra.mxu3 %v8752_v43  ;;  %v12956_v1 = vld [vmem:[#allocation64_spill] sm:$0xff] }
 0x44a   : > { %3089 = vmatpush.msra.mxu0 %v8755_v17  ;;  %3106 = vmatpush.msra.mxu1 %v8758_v2  ;;  %v9547_v43 = vld [vmem:[#allocation6 + $0xe8] sm:$0xff]  ;;  %v12957_v17 = vld [vmem:[#allocation65_spill] sm:$0xff]  ;;  %v12958_v2 = vld [vmem:[#allocation67_spill] sm:$0xff] }
 0x44b   : > { %3129 = vmatpush.msra.mxu2 %v9509_v51  ;;  %3146 = vmatpush.msra.mxu3 %v8762_v22  ;;  %v12959_v22 = vld [vmem:[#allocation69_spill] sm:$0xff] }
 0x44c   : > { %3039 = vmatmul.f32.vlgmr.msrb.gmra.mxu1 %v9478_v38  ;;  %3079 = vmatmul.f32.vlgmr.msrb.gmra.mxu3 %v9478_v38 }
 0x44d   : > { %3090 = vmatpush.msra.mxu0 %v8767_v21  ;;  %3107 = vmatpush.msra.mxu1 %v8770_v37  ;;  %v9553_v21 = vld [vmem:[#allocation6 + $0xa8] sm:$0xff]  ;;  %v12960_v37 = vld [vmem:[#allocation71_spill] sm:$0xff] }
 0x44e   : > { %3130 = vmatpush.msra.mxu2 %v9517_v52  ;;  %3147 = vmatpush.msra.mxu3 %v8774_v20  ;;  %v12961_v20 = vld [vmem:[#allocation47_spill] sm:$0xff] }
 0x44f   : > { %3091 = vmatpush.msra.mxu0 %v8777_v23  ;;  %3108 = vmatpush.msra.mxu1 %v8780_v26  ;;  %v12962_v23 = vld [vmem:[#allocation73_spill] sm:$0xff]  ;;  %v9559_v26 = vld [vmem:[#allocation6 + $0x68] sm:$0xff] }
 0x450   : > { %3131 = vmatpush.msra.mxu2 %v9523_v15  ;;  %3148 = vmatpush.msra.mxu3 %v8784_v40  ;;  %v12963_v40 = vld [vmem:[#allocation49_spill] sm:$0xff] }
 0x451   : > { %3092 = vmatpush.msra.mxu0 %v8787_v16  ;;  %3109 = vmatpush.msra.mxu1 %v8790_v45  ;;  %v12964_v16 = vld [vmem:[#allocation76_spill] sm:$0xff]  ;;  %v12965_v45 = vld [vmem:[#allocation51_spill] sm:$0xff] }
 0x452   : > { %3132 = vmatpush.msra.mxu2 %v9529_v8  ;;  %3149 = vmatpush.msra.mxu3 %v8794_v58  ;;  %v9565_v58 = vld [vmem:[#allocation6 + $0x28] sm:$0xff] }
 0x453   : > { %3093 = vmatpush.msra.mxu0 %v8797_v63  ;;  %3110 = vmatpush.msra.mxu1 %v8800_v31  ;;  %v12966_v63 = vld [vmem:[#allocation79_spill] sm:$0xff]  ;;  %v12967_v31 = vld [vmem:[#allocation81_spill] sm:$0xff] }
 0x454   : > { %3133 = vmatpush.msra.mxu2 %v9535_v41  ;;  %3150 = vmatpush.msra.mxu3 %v8804_v32  ;;  %v9572_v32 = vld [vmem:[#allocation6 + $0x3f8] sm:$0xff] }
 0x455   : > { %3094 = vmatpush.msra.mxu0 %v8807_v12  ;;  %3111 = vmatpush.msra.mxu1 %v8810_v56  ;;  %v12968_v12 = vld [vmem:[#allocation53_spill] sm:$0xff] }
 0x456   : > { %3134 = vmatpush.msra.mxu2 %v9541_v53  ;;  %3151 = vmatpush.msra.mxu3 %v8814_v4  ;;  %v12969_v56 = vld [vmem:[#allocation89_spill] sm:$0xff] }
 0x457   : > { %3095 = vmatpush.msra.mxu0 %v12955_v6  ;;  %3112 = vmatpush.msra.mxu1 %v12956_v1  ;;  %v12970_v4 = vld [vmem:[#allocation93_spill] sm:$0xff]  ;;  %v9618_v6 = vld [vmem:[#allocation6 + $0x738] sm:$0xff]  ;;  %v12985_v1 = vld [vmem:[#allocation104_spill] sm:$0xff] }
 0x458   : > { %3135 = vmatpush.msra.mxu2 %v9547_v43  ;;  %3152 = vmatpush.msra.mxu3 %v12957_v17  ;;  %v12986_v17 = vld [vmem:[#allocation66_spill] sm:$0xff] }
 0x459   : > { %3096 = vmatpush.msra.mxu0 %v12958_v2  ;;  %3113 = vmatpush.msra.mxu1 %v12959_v22  ;;  %v9623_v2 = vld [vmem:[#allocation6 + $0x238] sm:$0xff] }
 0x45a   : > { %3136 = vmatpush.msra.mxu2 %v9553_v21  ;;  %3153 = vmatpush.msra.mxu3 %v12960_v37  ;;  %v9626_v22 = vld [vmem:[#allocation6 + $0x6f8] sm:$0xff]  ;;  %v12987_v37 = vld [vmem:[#allocation107_spill] sm:$0xff] }
 0x45b   : > { %3097 = vmatpush.msra.mxu0 %v12961_v20  ;;  %3114 = vmatpush.msra.mxu1 %v12962_v23  ;;  %v12988_v20 = vld [vmem:[#allocation110_spill] sm:$0xff] }
 0x45c   : > { %3137 = vmatpush.msra.mxu2 %v9559_v26  ;;  %3154 = vmatpush.msra.mxu3 %v12963_v40  ;;  %v9631_v23 = vld [vmem:[#allocation6 + $0x1f8] sm:$0xff] }
 0x45d   : > { %3098 = vmatpush.msra.mxu0 %v12964_v16  ;;  %3115 = vmatpush.msra.mxu1 %v12965_v45  ;;  %v9634_v40 = vld [vmem:[#allocation6 + $0x6b8] sm:$0xff]  ;;  %v12989_v16 = vld [vmem:[#allocation68_spill] sm:$0xff]  ;;  %v12990_v45 = vld [vmem:[#allocation113_spill] sm:$0xff] }
 0x45e   : > { %3138 = vmatpush.msra.mxu2 %v9565_v58  ;;  %3155 = vmatpush.msra.mxu3 %v12966_v63  ;;  %v9639_v63 = vld [vmem:[#allocation6 + $0x1b8] sm:$0xff] }
 0x45f   : > { %3099 = vmatmul.f32.vlgmr.msra.gmra.mxu0 %v9465_v42  ;;  %3139 = vmatmul.f32.vlgmr.msra.gmra.mxu2 %v9465_v42 }
 0x460   : > { %3163 = vmatpush.msrb.mxu0 %v12967_v31  ;;  %3203 = vmatpush.msrb.mxu2 %v9572_v32  ;;  %v9642_v31 = vld [vmem:[#allocation6 + $0x678] sm:$0xff] }
 0x461   : > { %3116 = vmatpush.msra.mxu1 %v12968_v12  ;;  %3156 = vmatpush.msra.mxu3 %v12969_v56  ;;  %12991 = vst [vmem:[#allocation62_spill] sm:$0xff] %v9642_v31  ;;  %v9645_v12 = vld [vmem:[#allocation6 + $0x170] sm:$0xff]  ;;  %v12993_v56 = vld [vmem:[#allocation116_spill] sm:$0xff] }
 0x462   : > { %3164 = vmatpush.msrb.mxu0 %v12970_v4  ;;  %3204 = vmatpush.msrb.mxu2 %v9578_v25  ;;  %12992 = vst [vmem:[#allocation64_spill] sm:$0xff] %v9645_v12  ;;  %v9649_v4 = vld [vmem:[#allocation6 + $0x178] sm:$0xff] }
 0x463   : > { %3117 = vmatpush.msra.mxu1 %v12971_v44  ;;  %3157 = vmatpush.msra.mxu3 %v12972_v57  ;;  %12994 = vst [vmem:[#allocation65_spill] sm:$0xff] %v9649_v4  ;;  %v9652_v44 = vld [vmem:[#allocation6 + $0x638] sm:$0xff]  ;;  %v9655_v57 = vld [vmem:[#allocation6 + $0x130] sm:$0xff] }
 0x464   : > { %3165 = vmatpush.msrb.mxu0 %v12973_v49  ;;  %3205 = vmatpush.msrb.mxu2 %v9584_v36  ;;  %12995 = vst [vmem:[#allocation67_spill] sm:$0xff] %v9652_v44  ;;  %v12997_v49 = vld [vmem:[#allocation70_spill] sm:$0xff] }
 0x465   : > { %3118 = vmatpush.msra.mxu1 %v12974_v13  ;;  %3158 = vmatpush.msra.mxu3 %v12975_v3  ;;  %12996 = vst [vmem:[#allocation69_spill] sm:$0xff] %v9655_v57  ;;  %v9659_v13 = vld [vmem:[#allocation6 + $0x138] sm:$0xff] }
 0x466   : > { %3119 = vmatmul.f32.vlgmr.msra.gmra.mxu1 %v9478_v38  ;;  %3159 = vmatmul.f32.vlgmr.msra.gmra.mxu3 %v9478_v38  ;;  %12998 = vst [vmem:[#allocation71_spill] sm:$0xff] %v9659_v13  ;;  %v9662_v3 = vld [vmem:[#allocation6 + $0x5f8] sm:$0xff] }
 0x467   : > { %3166 = vmatpush.msrb.mxu0 %v12976_v55  ;;  %3183 = vmatpush.msrb.mxu1 %v12977_v9  ;;  %12999 = vst [vmem:[#allocation47_spill] sm:$0xff] %v9662_v3  ;;  %v9665_v55 = vld [vmem:[#allocation6 + $0xf0] sm:$0xff] }
 0x468   : > { %3206 = vmatpush.msrb.mxu2 %v9593_v30  ;;  %3223 = vmatpush.msrb.mxu3 %v12978_v11  ;;  %13000 = vst [vmem:[#allocation73_spill] sm:$0xff] %v9665_v55  ;;  %v13001_v9 = vld [vmem:[#allocation117_spill] sm:$0xff]  ;;  %v9669_v11 = vld [vmem:[#allocation6 + $0xf8] sm:$0xff] }
 0x469   : > { %3167 = vmatpush.msrb.mxu0 %v12979_v29  ;;  %3184 = vmatpush.msrb.mxu1 %v12980_v10  ;;  %13002 = vst [vmem:[#allocation49_spill] sm:$0xff] %v9669_v11  ;;  %v9672_v29 = vld [vmem:[#allocation6 + $0x5b8] sm:$0xff]  ;;  %v9675_v10 = vld [vmem:[#allocation6 + $0xb0] sm:$0xff] }
 0x46a   : > { %3207 = vmatpush.msrb.mxu2 %v9599_v7  ;;  %3224 = vmatpush.msrb.mxu3 %v9602_v39  ;;  %13003 = vst [vmem:[#allocation76_spill] sm:$0xff] %v9672_v29 }
 0x46b   : > { %3168 = vmatpush.msrb.mxu0 %v12981_v61  ;;  %3185 = vmatpush.msrb.mxu1 %v12982_v59  ;;  %13004 = vst [vmem:[#allocation51_spill] sm:$0xff] %v9675_v10  ;;  %v13005_v61 = vld [vmem:[#allocation119_spill] sm:$0xff]  ;;  %v9679_v59 = vld [vmem:[#allocation6 + $0xb8] sm:$0xff] }
 0x46c   : > { %3208 = vmatpush.msrb.mxu2 %v9607_v28  ;;  %3225 = vmatpush.msrb.mxu3 %v9610_v19  ;;  %13006 = vst [vmem:[#allocation79_spill] sm:$0xff] %v9679_v59 }
 0x46d   : > { %3169 = vmatpush.msrb.mxu0 %v12983_v33  ;;  %3186 = vmatpush.msrb.mxu1 %v12984_v62  ;;  %v9682_v33 = vld [vmem:[#allocation6 + $0x578] sm:$0xff]  ;;  %v9685_v62 = vld [vmem:[#allocation6 + $0x70] sm:$0xff] }
 0x46e   : > { %3209 = vmatpush.msrb.mxu2 %v9615_v18  ;;  %3226 = vmatpush.msrb.mxu3 %v9618_v6  ;;  %13007 = vst [vmem:[#allocation81_spill] sm:$0xff] %v9682_v33 }
 0x46f   : > { %3170 = vmatpush.msrb.mxu0 %v12985_v1  ;;  %3187 = vmatpush.msrb.mxu1 %v12986_v17  ;;  %13008 = vst [vmem:[#allocation53_spill] sm:$0xff] %v9685_v62  ;;  %v13009_v1 = vld [vmem:[#allocation72_spill] sm:$0xff]  ;;  %v9689_v17 = vld [vmem:[#allocation6 + $0x78] sm:$0xff] }
 0x470   : > { %3210 = vmatpush.msrb.mxu2 %v9623_v2  ;;  %3227 = vmatpush.msrb.mxu3 %v9626_v22  ;;  %13010 = vst [vmem:[#allocation89_spill] sm:$0xff] %v9689_v17 }
 0x471   : > { %3171 = vmatpush.msrb.mxu0 %v12987_v37  ;;  %3188 = vmatpush.msrb.mxu1 %v12988_v20  ;;  %v9692_v37 = vld [vmem:[#allocation6 + $0x538] sm:$0xff]  ;;  %v9695_v20 = vld [vmem:[#allocation6 + $0x30] sm:$0xff] }
 0x472   : > { %3211 = vmatpush.msrb.mxu2 %v9631_v23  ;;  %3228 = vmatpush.msrb.mxu3 %v9634_v40  ;;  %13011 = vst [vmem:[#allocation93_spill] sm:$0xff] %v9692_v37 }
 0x473   : > { %3172 = vmatpush.msrb.mxu0 %v12989_v16  ;;  %3189 = vmatpush.msrb.mxu1 %v12990_v45  ;;  %13012 = vst [vmem:[#allocation55_spill] sm:$0xff] %v9695_v20  ;;  %v13013_v16 = vld [vmem:[#allocation112_spill] sm:$0xff]  ;;  %v9699_v45 = vld [vmem:[#allocation6 + $0x38] sm:$0xff] }
 0x474   : > { %3212 = vmatpush.msrb.mxu2 %v9639_v63  ;;  %3229 = vmatpush.msrb.mxu3 %v9642_v31  ;;  %13014 = vst [vmem:[#allocation99_spill] sm:$0xff] %v9699_v45 }
 0x475   : > { %3173 = vmatpush.msrb.mxu0 %v9645_v12  ;;  %3190 = vmatpush.msrb.mxu1 %v12993_v56  ;;  %v9702_v56 = vld [vmem:[#allocation6 + $0x4f8] sm:$0xff] }
 0x476   : > { %3213 = vmatpush.msrb.mxu2 %v9649_v4  ;;  %3230 = vmatpush.msrb.mxu3 %v9652_v44  ;;  %13015 = vst [vmem:[#allocation105_spill] sm:$0xff] %v9702_v56 }
 0x477   : > { %3174 = vmatpush.msrb.mxu0 %v9655_v57  ;;  %3191 = vmatpush.msrb.mxu1 %v12997_v49  ;;  %v13016_v49 = vld [vmem:[#allocation118_spill] sm:$0xff] }
 0x478   : > { %3214 = vmatpush.msrb.mxu2 %v9659_v13  ;;  %3231 = vmatpush.msrb.mxu3 %v9662_v3  ;;  %v13152_v13 = vld [vmem:[#allocation13_spill] sm:$0xff] }
 0x479   : > { %3175 = vmatpush.msrb.mxu0 %v9665_v55  ;;  %3192 = vmatpush.msrb.mxu1 %v13001_v9  ;;  %v9708_v9 = vld [vmem:[#allocation6 + $0x4b8] sm:$0xff]  ;;  %v13153_v57 = vrot.slane %v13152_v13, 7 }
 0x47a   : > { %3215 = vmatpush.msrb.mxu2 %v9669_v11  ;;  %3232 = vmatpush.msrb.mxu3 %v9672_v29  ;;  %13017 = vst [vmem:[#allocation57_spill] sm:$0xff] %v9708_v9  ;;  %v13151_v29 = vld [vmem:[#allocation16_spill] sm:$0xff] }
 0x47b   : > { %3176 = vmatpush.msrb.mxu0 %v9675_v10  ;;  %3193 = vmatpush.msrb.mxu1 %v13005_v61  ;;  %v9711_v61 = vld [vmem:[#allocation6 + $0x3c0] sm:$0xff]  ;;  %v13150_v10 = vld [vmem:[#allocation14_spill] sm:$0xff] }
 0x47c   : > { %3216 = vmatpush.msrb.mxu2 %v9679_v59  ;;  %3233 = vmatpush.msrb.mxu3 %v9682_v33  ;;  %13018 = vst [vmem:[#allocation108_spill] sm:$0xff] %v9711_v61 }
 0x47d   : > { %3177 = vmatpush.msrb.mxu0 %v9685_v62  ;;  %3194 = vmatpush.msrb.mxu1 %v13009_v1  ;;  %v13019_v1 = vld [vmem:[#allocation74_spill] sm:$0xff] }
 0x47e   : > { %3217 = vmatpush.msrb.mxu2 %v9689_v17  ;;  %3234 = vmatpush.msrb.mxu3 %v9692_v37 }
 0x47f   : > { %3178 = vmatpush.msrb.mxu0 %v9695_v20  ;;  %3195 = vmatpush.msrb.mxu1 %v13013_v16  ;;  %v13020_v16 = vld [vmem:[#allocation75_spill] sm:$0xff] }
 0x480   : > { %3218 = vmatpush.msrb.mxu2 %v9699_v45  ;;  %3235 = vmatpush.msrb.mxu3 %v9702_v56  ;;  %v13071_v56 = vld [vmem:[#allocation106_spill] sm:$0xff]  ;;  %v13076_v45 = vld [vmem:[#allocation155_spill] sm:$0xff] }
 0x481   : > { %3179 = vmatmul.f32.vlgmr.msrb.gmra.mxu0 %v9465_v42  ;;  %3219 = vmatmul.f32.vlgmr.msrb.gmra.mxu2 %v9465_v42  ;;  %v13023_v42 = vld [vmem:[#allocation121_spill] sm:$0xff] }
 0x482   : > { %3196 = vmatpush.msrb.mxu1 %v13016_v49  ;;  %3236 = vmatpush.msrb.mxu3 %v9708_v9  ;;  %v13024_v49 = vld [vmem:[#allocation123_spill] sm:$0xff]  ;;  %v9724_v9 = vld [vmem:[#allocation6 + $0x438] sm:$0xff] }
 0x483   : > { %3415 = vmatpush.msra.mxu0 %v9711_v61  ;;  %3455 = vmatpush.msra.mxu2 %v13019_v1  ;;  %13025 = vst [vmem:[#allocation114_spill] sm:$0xff] %v9724_v9  ;;  %v9729_v1 = vld [vmem:[#allocation6 + $0x340] sm:$0xff]  ;;  %v13033_v61 = vld [vmem:[#allocation96_spill] sm:$0xff] }
 0x484   : > { %3197 = vmatpush.msrb.mxu1 %v13020_v16  ;;  %3237 = vmatpush.msrb.mxu3 %v9716_v34  ;;  %13026 = vst [vmem:[#allocation85_spill] sm:$0xff] %v9729_v1  ;;  %v13027_v16 = vld [vmem:[#allocation77_spill] sm:$0xff]  ;;  %v13028_v34 = vld [vmem:[#allocation86_spill] sm:$0xff] }
 0x485   : > { %3416 = vmatpush.msra.mxu0 %v9719_v35  ;;  %3456 = vmatpush.msra.mxu2 %v13023_v42  ;;  %v13029_v35 = vld [vmem:[#allocation125_spill] sm:$0xff]  ;;  %v9735_v42 = vld [vmem:[#allocation6 + $0x300] sm:$0xff] }
 0x486   : > { %3198 = vmatpush.msrb.mxu1 %v13024_v49  ;;  %3238 = vmatpush.msrb.mxu3 %v9724_v9  ;;  %13030 = vst [vmem:[#allocation61_spill] sm:$0xff] %v9735_v42  ;;  %v13031_v49 = vld [vmem:[#allocation127_spill] sm:$0xff] }
 0x487   : > { %3199 = vmatmul.f32.vlgmr.msrb.gmra.mxu1 %v9478_v38  ;;  %3239 = vmatmul.f32.vlgmr.msrb.gmra.mxu3 %v9478_v38  ;;  %v13032_v9 = vld [vmem:[#allocation91_spill] sm:$0xff] }
 0x488   : > { %3417 = vmatpush.msra.mxu0 %v9729_v1  ;;  %3457 = vmatpush.msra.mxu2 %v13027_v16  ;;  %v9741_v38 = vld [vmem:[#allocation6 + $0x2c0] sm:$0xff]  ;;  %v13035_v1 = vld [vmem:[#allocation102_spill] sm:$0xff] }
 0x489   : > { %3435 = vmatpush.msra.mxu1 %v13028_v34  ;;  %3475 = vmatpush.msra.mxu3 %v13029_v35  ;;  %13034 = vst [vmem:[#allocation95_spill] sm:$0xff] %v9741_v38  ;;  %v13036_v16 = vld [vmem:[#allocation78_spill] sm:$0xff]  ;;  %v13037_v34 = vld [vmem:[#allocation129_spill] sm:$0xff]  ;;  %v9747_v35 = vld [vmem:[#allocation6 + $0x280] sm:$0xff] }
 0x48a   : > { %3418 = vmatpush.msra.mxu0 %v9735_v42  ;;  %3458 = vmatpush.msra.mxu2 %v13031_v49  ;;  %13038 = vst [vmem:[#allocation98_spill] sm:$0xff] %v9747_v35  ;;  %v13039_v42 = vld [vmem:[#allocation131_spill] sm:$0xff]  ;;  %v13040_v49 = vld [vmem:[#allocation80_spill] sm:$0xff] }
 0x48b   : > { %3436 = vmatpush.msra.mxu1 %v13032_v9  ;;  %3476 = vmatpush.msra.mxu3 %v13033_v61  ;;  %v13041_v9 = vld [vmem:[#allocation82_spill] sm:$0xff]  ;;  %v9753_v61 = vld [vmem:[#allocation6 + $0x240] sm:$0xff] }
 0x48c   : > { %3419 = vmatpush.msra.mxu0 %v9741_v38  ;;  %3459 = vmatpush.msra.mxu2 %v13035_v1  ;;  %13042 = vst [vmem:[#allocation63_spill] sm:$0xff] %v9753_v61  ;;  %v13043_v38 = vld [vmem:[#allocation133_spill] sm:$0xff]  ;;  %v13044_v1 = vld [vmem:[#allocation135_spill] sm:$0xff] }
 0x48d   : > { %3437 = vmatpush.msra.mxu1 %v13036_v16  ;;  %3477 = vmatpush.msra.mxu3 %v13037_v34  ;;  %v13045_v16 = vld [vmem:[#allocation83_spill] sm:$0xff] }
 0x48e   : > { %3420 = vmatpush.msra.mxu0 %v9747_v35  ;;  %3460 = vmatpush.msra.mxu2 %v13039_v42  ;;  %v9759_v34 = vld [vmem:[#allocation6 + $0x200] sm:$0xff]  ;;  %v13047_v35 = vld [vmem:[#allocation88_spill] sm:$0xff]  ;;  %v13048_v42 = vld [vmem:[#allocation137_spill] sm:$0xff] }
 0x48f   : > { %3438 = vmatpush.msra.mxu1 %v13040_v49  ;;  %3478 = vmatpush.msra.mxu3 %v13041_v9  ;;  %13046 = vst [vmem:[#allocation101_spill] sm:$0xff] %v9759_v34  ;;  %v13049_v49 = vld [vmem:[#allocation139_spill] sm:$0xff] }
 0x490   : > { %3421 = vmatpush.msra.mxu0 %v9753_v61  ;;  %3461 = vmatpush.msra.mxu2 %v13043_v38  ;;  %v9765_v9 = vld [vmem:[#allocation6 + $0x1c0] sm:$0xff]  ;;  %v13051_v61 = vld [vmem:[#allocation84_spill] sm:$0xff] }
 0x491   : > { %3439 = vmatpush.msra.mxu1 %v13044_v1  ;;  %3479 = vmatpush.msra.mxu3 %v13045_v16  ;;  %13050 = vst [vmem:[#allocation104_spill] sm:$0xff] %v9765_v9  ;;  %v13052_v38 = vld [vmem:[#allocation140_spill] sm:$0xff]  ;;  %v13053_v1 = vld [vmem:[#allocation87_spill] sm:$0xff] }
 0x492   : > { %3422 = vmatpush.msra.mxu0 %v9759_v34  ;;  %3462 = vmatpush.msra.mxu2 %v13047_v35  ;;  %v9771_v16 = vld [vmem:[#allocation6 + $0x180] sm:$0xff]  ;;  %v13055_v34 = vld [vmem:[#allocation141_spill] sm:$0xff]  ;;  %v13056_v35 = vld [vmem:[#allocation90_spill] sm:$0xff] }
 0x493   : > { %3440 = vmatpush.msra.mxu1 %v13048_v42  ;;  %3480 = vmatpush.msra.mxu3 %v13049_v49  ;;  %13054 = vst [vmem:[#allocation66_spill] sm:$0xff] %v9771_v16  ;;  %v13057_v42 = vld [vmem:[#allocation143_spill] sm:$0xff] }
 0x494   : > { %3423 = vmatpush.msra.mxu0 %v9765_v9  ;;  %3463 = vmatpush.msra.mxu2 %v13051_v61  ;;  %v9777_v49 = vld [vmem:[#allocation6 + $0x140] sm:$0xff]  ;;  %v13059_v9 = vld [vmem:[#allocation92_spill] sm:$0xff]  ;;  %v13060_v61 = vld [vmem:[#allocation145_spill] sm:$0xff] }
 0x495   : > { %3441 = vmatpush.msra.mxu1 %v13052_v38  ;;  %3481 = vmatpush.msra.mxu3 %v13053_v1  ;;  %13058 = vst [vmem:[#allocation107_spill] sm:$0xff] %v9777_v49  ;;  %v13061_v38 = vld [vmem:[#allocation94_spill] sm:$0xff]  ;;  %v9783_v1 = vld [vmem:[#allocation6 + $0x100] sm:$0xff] }
 0x496   : > { %3424 = vmatpush.msra.mxu0 %v9771_v16  ;;  %3464 = vmatpush.msra.mxu2 %v13055_v34  ;;  %13062 = vst [vmem:[#allocation110_spill] sm:$0xff] %v9783_v1  ;;  %v13063_v16 = vld [vmem:[#allocation147_spill] sm:$0xff]  ;;  %v13064_v34 = vld [vmem:[#allocation97_spill] sm:$0xff] }
 0x497   : > { %3442 = vmatpush.msra.mxu1 %v13056_v35  ;;  %3482 = vmatpush.msra.mxu3 %v13057_v42  ;;  %v13065_v35 = vld [vmem:[#allocation149_spill] sm:$0xff]  ;;  %v9789_v42 = vld [vmem:[#allocation6 + $0xc0] sm:$0xff] }
 0x498   : > { %3425 = vmatpush.msra.mxu0 %v9777_v49  ;;  %3465 = vmatpush.msra.mxu2 %v13059_v9  ;;  %13066 = vst [vmem:[#allocation68_spill] sm:$0xff] %v9789_v42  ;;  %v13067_v49 = vld [vmem:[#allocation100_spill] sm:$0xff]  ;;  %v13068_v9 = vld [vmem:[#allocation151_spill] sm:$0xff] }
 0x499   : > { %3443 = vmatpush.msra.mxu1 %v13060_v61  ;;  %3483 = vmatpush.msra.mxu3 %v13061_v38  ;;  %v13069_v61 = vld [vmem:[#allocation103_spill] sm:$0xff]  ;;  %v13070_v38 = vld [vmem:[#allocation152_spill] sm:$0xff] }
 0x49a   : > { %3426 = vmatpush.msra.mxu0 %v9783_v1  ;;  %3466 = vmatpush.msra.mxu2 %v13063_v16  ;;  %v13072_v1 = vld [vmem:[#allocation153_spill] sm:$0xff] }
 0x49b   : > { %3444 = vmatpush.msra.mxu1 %v13064_v34  ;;  %3484 = vmatpush.msra.mxu3 %v13065_v35  ;;  %v13073_v16 = vld [vmem:[#allocation109_spill] sm:$0xff]  ;;  %v13074_v34 = vld [vmem:[#allocation154_spill] sm:$0xff]  ;;  %v13075_v35 = vld [vmem:[#allocation115_spill] sm:$0xff] }
 0x49c   : > { %3427 = vmatpush.msra.mxu0 %v9789_v42  ;;  %3467 = vmatpush.msra.mxu2 %v13067_v49  ;;  %v13077_v42 = vld [vmem:[#allocation120_spill] sm:$0xff] }
 0x49d   : > { %3445 = vmatpush.msra.mxu1 %v13068_v9  ;;  %3485 = vmatpush.msra.mxu3 %v13069_v61  ;;  %v13078_v49 = vld [vmem:[#allocation156_spill] sm:$0xff]  ;;  %v13079_v9 = vld [vmem:[#allocation122_spill] sm:$0xff]  ;;  %v13080_v61 = vld [vmem:[#allocation157_spill] sm:$0xff] }
 0x49e   : > { %3428 = vmatpush.msra.mxu0 %v13070_v38  ;;  %3468 = vmatpush.msra.mxu2 %v13071_v56  ;;  %v13081_v38 = vld [vmem:[#allocation124_spill] sm:$0xff]  ;;  %v13082_v56 = vld [vmem:[#allocation158_spill] sm:$0xff] }
 0x49f   : > { %3446 = vmatpush.msra.mxu1 %v13072_v1  ;;  %3486 = vmatpush.msra.mxu3 %v13073_v16  ;;  %v13083_v1 = vld [vmem:[#allocation126_spill] sm:$0xff]  ;;  %v13084_v16 = vld [vmem:[#allocation159_spill] sm:$0xff] }
 0x4a0   : > { %3429 = vmatpush.msra.mxu0 %v13074_v34  ;;  %3469 = vmatpush.msra.mxu2 %v13075_v35  ;;  %v13085_v34 = vld [vmem:[#allocation128_spill] sm:$0xff] }
 0x4a1   : > { %3447 = vmatpush.msra.mxu1 %v13076_v45  ;;  %3487 = vmatpush.msra.mxu3 %v13077_v42  ;;  %v13086_v35 = vld [vmem:[#allocation160_spill] sm:$0xff]  ;;  %v13087_v45 = vld [vmem:[#allocation130_spill] sm:$0xff]  ;;  %v13088_v42 = vld [vmem:[#allocation161_spill] sm:$0xff] }
 0x4a2   : > { %3430 = vmatpush.msra.mxu0 %v13078_v49  ;;  %3470 = vmatpush.msra.mxu2 %v13079_v9  ;;  %v13089_v49 = vld [vmem:[#allocation132_spill] sm:$0xff]  ;;  %v13090_v9 = vld [vmem:[#allocation162_spill] sm:$0xff] }
 0x4a3   : > { %3448 = vmatpush.msra.mxu1 %v13082_v56  ;;  %3488 = vmatpush.msra.mxu3 %v13083_v1  ;;  %v13093_v56 = vld [vmem:[#allocation136_spill] sm:$0xff] }
 0x4a4   : > { %3495 = vmatpush.msrb.mxu0 %v13080_v61  ;;  %3535 = vmatpush.msrb.mxu2 %v13081_v38  ;;  %v13091_v61 = vld [vmem:[#allocation134_spill] sm:$0xff]  ;;  %v13092_v38 = vld [vmem:[#allocation163_spill] sm:$0xff]  ;;  %v13094_v1 = vld [vmem:[#allocation164_spill] sm:$0xff] }
 0x4a5   : > { %3449 = vmatpush.msra.mxu1 %v13086_v35  ;;  %3489 = vmatpush.msra.mxu3 %v13087_v45  ;;  %v13097_v35 = vld [vmem:[#allocation142_spill] sm:$0xff] }
 0x4a6   : > { %3496 = vmatpush.msrb.mxu0 %v13084_v16  ;;  %3536 = vmatpush.msrb.mxu2 %v13085_v34  ;;  %v13095_v16 = vld [vmem:[#allocation138_spill] sm:$0xff]  ;;  %v13096_v34 = vld [vmem:[#allocation165_spill] sm:$0xff] }
 0x4a7   : > { %3450 = vmatpush.msra.mxu1 %v13090_v9  ;;  %3490 = vmatpush.msra.mxu3 %v13091_v61  ;;  %v13098_v45 = vld [vmem:[#allocation166_spill] sm:$0xff]  ;;  %v13102_v61 = vld [vmem:[#allocation168_spill] sm:$0xff] }
 0x4a8   : > { %3497 = vmatpush.msrb.mxu0 %v13088_v42  ;;  %3537 = vmatpush.msrb.mxu2 %v13089_v49  ;;  %v13099_v42 = vld [vmem:[#allocation144_spill] sm:$0xff]  ;;  %v13100_v49 = vld [vmem:[#allocation167_spill] sm:$0xff]  ;;  %v13101_v9 = vld [vmem:[#allocation146_spill] sm:$0xff] }
 0x4a9   : > { %3515 = vmatpush.msrb.mxu1 %v13093_v56  ;;  %3555 = vmatpush.msrb.mxu3 %v13095_v16  ;;  %v13104_v56 = vld [vmem:[#allocation169_spill] sm:$0xff]  ;;  %v13106_v16 = vld [vmem:[#allocation170_spill] sm:$0xff] }
 0x4aa   : > { %3498 = vmatpush.msrb.mxu0 %v13092_v38  ;;  %3538 = vmatpush.msrb.mxu2 %v13094_v1  ;;  %v13103_v38 = vld [vmem:[#allocation148_spill] sm:$0xff]  ;;  %v13105_v1 = vld [vmem:[#allocation150_spill] sm:$0xff] }
 0x4ab   : > { %3516 = vmatpush.msrb.mxu1 %v13097_v35  ;;  %3556 = vmatpush.msrb.mxu3 %v13099_v42  ;;  %v13108_v35 = vld [vmem:[#allocation172_spill] sm:$0xff]  ;;  %v13110_v42 = vld [vmem:[#allocation174_spill] sm:$0xff] }
 0x4ac   : > { %3499 = vmatpush.msrb.mxu0 %v13096_v34  ;;  %3539 = vmatpush.msrb.mxu2 %v13098_v45  ;;  %v13107_v34 = vld [vmem:[#allocation171_spill] sm:$0xff]  ;;  %v13109_v45 = vld [vmem:[#allocation173_spill] sm:$0xff] }
 0x4ad   : > { %3517 = vmatpush.msrb.mxu1 %v13101_v9  ;;  %3557 = vmatpush.msrb.mxu3 %v13103_v38  ;;  %v13112_v9 = vld [vmem:[#allocation176_spill] sm:$0xff]  ;;  %v13114_v38 = vld [vmem:[#allocation27_spill] sm:$0xff] }
 0x4ae   : > { %3500 = vmatpush.msrb.mxu0 %v13100_v49  ;;  %3540 = vmatpush.msrb.mxu2 %v13102_v61  ;;  %v13111_v49 = vld [vmem:[#allocation175_spill] sm:$0xff]  ;;  %v13113_v61 = vld [vmem:[#allocation29_spill] sm:$0xff] }
 0x4af   : > { %3518 = vmatpush.msrb.mxu1 %v13105_v1  ;;  %3558 = vmatpush.msrb.mxu3 %v13107_v34  ;;  %v13116_v1 = vld [vmem:[#allocation34_spill] sm:$0xff]  ;;  %v13118_v34 = vld [vmem:[#allocation15_spill] sm:$0xff] }
 0x4b0   : > { %3501 = vmatpush.msrb.mxu0 %v13104_v56  ;;  %3541 = vmatpush.msrb.mxu2 %v13106_v16  ;;  %v13115_v56 = vld [vmem:[#allocation20_spill] sm:$0xff]  ;;  %v13117_v16 = vld [vmem:[#allocation33_spill] sm:$0xff] }
 0x4b1   : > { %3519 = vmatpush.msrb.mxu1 %v13109_v45  ;;  %3559 = vmatpush.msrb.mxu3 %v13111_v49  ;;  %v13120_v45 = vld [vmem:[#allocation40_spill] sm:$0xff]  ;;  %v13122_v49 = vld [vmem:[#allocation38_spill] sm:$0xff] }
 0x4b2   : > { %3502 = vmatpush.msrb.mxu0 %v13108_v35  ;;  %3542 = vmatpush.msrb.mxu2 %v13110_v42  ;;  %v13119_v35 = vld [vmem:[#allocation31_spill] sm:$0xff]  ;;  %v13121_v42 = vld [vmem:[#allocation22_spill] sm:$0xff] }
 0x4b3   : > { %3520 = vmatpush.msrb.mxu1 %v13113_v61  ;;  %3560 = vmatpush.msrb.mxu3 %v13115_v56  ;;  %v13124_v61 = vld [vmem:[#allocation21_spill] sm:$0xff]  ;;  %v13126_v56 = vld [vmem:[#allocation42_spill] sm:$0xff] }
 0x4b4   : > { %3503 = vmatpush.msrb.mxu0 %v13112_v9  ;;  %3543 = vmatpush.msrb.mxu2 %v13114_v38  ;;  %v13123_v9 = vld [vmem:[#allocation37_spill] sm:$0xff]  ;;  %v13125_v38 = vld [vmem:[#allocation35_spill] sm:$0xff] }
 0x4b5   : > { %3521 = vmatpush.msrb.mxu1 %v13117_v16  ;;  %3561 = vmatpush.msrb.mxu3 %v13119_v35  ;;  %v13128_v16 = vld [vmem:[#allocation41_spill] sm:$0xff]  ;;  %v13130_v35 = vld [vmem:[#allocation19_spill] sm:$0xff] }
 0x4b6   : > { %3504 = vmatpush.msrb.mxu0 %v13116_v1  ;;  %3544 = vmatpush.msrb.mxu2 %v13118_v34  ;;  %v13127_v1 = vld [vmem:[#allocation24_spill] sm:$0xff]  ;;  %v13129_v34 = vld [vmem:[#allocation39_spill] sm:$0xff] }
 0x4b7   : > { %3522 = vmatpush.msrb.mxu1 %v13121_v42  ;;  %3562 = vmatpush.msrb.mxu3 %v13123_v9  ;;  %v13132_v42 = vld [vmem:[#allocation43_spill] sm:$0xff]  ;;  %v13134_v9 = vld [vmem:[#allocation46_spill] sm:$0xff] }
 0x4b8   : > { %3505 = vmatpush.msrb.mxu0 %v13120_v45  ;;  %3545 = vmatpush.msrb.mxu2 %v13122_v49  ;;  %v13131_v45 = vld [vmem:[#allocation44_spill] sm:$0xff] }
 0x4b9   : > { %3523 = vmatpush.msrb.mxu1 %v13125_v38  ;;  %3563 = vmatpush.msrb.mxu3 %v13127_v1  ;;  %v13133_v49 = vld [vmem:[#allocation28_spill] sm:$0xff]  ;;  %v13136_v38 = vld [vmem:[#allocation26_spill] sm:$0xff]  ;;  %v13138_v1 = vld [vmem:[#allocation25_spill] sm:$0xff] }
 0x4ba   : > { %3506 = vmatpush.msrb.mxu0 %v13124_v61  ;;  %3546 = vmatpush.msrb.mxu2 %v13126_v56  ;;  %v13135_v61 = vld [vmem:[#allocation45_spill] sm:$0xff]  ;;  %v13137_v56 = vld [vmem:[#allocation48_spill] sm:$0xff] }
 0x4bb   : > { %3524 = vmatpush.msrb.mxu1 %v13129_v34  ;;  %3564 = vmatpush.msrb.mxu3 %v13131_v45  ;;  %v13140_v34 = vld [vmem:[#allocation23_spill] sm:$0xff]  ;;  %v13142_v45 = vld [vmem:[#allocation32_spill] sm:$0xff] }
 0x4bc   : > { %3507 = vmatpush.msrb.mxu0 %v13128_v16  ;;  %3547 = vmatpush.msrb.mxu2 %v13130_v35  ;;  %v13139_v16 = vld [vmem:[#allocation50_spill] sm:$0xff]  ;;  %v13141_v35 = vld [vmem:[#allocation52_spill] sm:$0xff] }
 0x4bd   : > { %3525 = vmatpush.msrb.mxu1 %v13133_v49  ;;  %3565 = vmatpush.msrb.mxu3 %v13135_v61  ;;  %v13144_v49 = vld [vmem:[#allocation30_spill] sm:$0xff]  ;;  %v13146_v61 = vld [vmem:[#allocation36_spill] sm:$0xff] }
 0x4be   : > { %3508 = vmatpush.msrb.mxu0 %v13132_v42  ;;  %3548 = vmatpush.msrb.mxu2 %v13134_v9  ;;  %v13143_v42 = vld [vmem:[#allocation54_spill] sm:$0xff]  ;;  %v13145_v9 = vld [vmem:[#allocation56_spill] sm:$0xff] }
 0x4bf   : > { %3526 = vmatpush.msrb.mxu1 %v13137_v56  ;;  %3566 = vmatpush.msrb.mxu3 %v13139_v16  ;;  %v13148_v56 = vld [vmem:[#allocation60_spill] sm:$0xff]  ;;  %v2960_v16 = vpop.f32.mrf.mxu1 }
 0x4c0   : > { %3509 = vmatpush.msrb.mxu0 %v13136_v38  ;;  %3549 = vmatpush.msrb.mxu2 %v13138_v1  ;;  %v13147_v38 = vld [vmem:[#allocation58_spill] sm:$0xff]  ;;  %v13149_v1 = vld [vmem:[#allocation177_spill] sm:$0xff] }
 0x4c1   : > { %3527 = vmatpush.msrb.mxu1 %v13141_v35  ;;  %3567 = vmatpush.msrb.mxu3 %v13143_v42  ;;  %v2980_v35 = vpop.f32.mrf.mxu2 }
 0x4c2   : > { %3510 = vmatpush.msrb.mxu0 %v13140_v34  ;;  %3550 = vmatpush.msrb.mxu2 %v13142_v45  ;;  %v2940_v34 = vpop.f32.mrf.mxu0 }
 0x4c3   : > { %3528 = vmatpush.msrb.mxu1 %v13144_v49  ;;  %3568 = vmatpush.msrb.mxu3 %v13145_v9  ;;  %v2961_v45 = vadd.f32 %v2960_v16, %v2940_v34  ;;  %v13154_v16 = vld [vmem:[#allocation18_spill] sm:$0xff] }
 0x4c4   : > { %v13155_v34 = vrot.slane %v13154_v16, 7 }
 0x4c5   : > { %3529 = vmatpush.msrb.mxu1 %v13146_v61  ;;  %3569 = vmatpush.msrb.mxu3 %v13147_v38  ;;  %v3000_v20 = vpop.f32.mrf.mxu3  ;;  %v3251_v62 = vrot.slane %v2961_v45, 4 }
 0x4c6   : > { %v3001_v9 = vadd.f32 %v3000_v20, %v2980_v35 }
 0x4c7   : > { %3530 = vmatpush.msrb.mxu1 %v13148_v56  ;;  %3570 = vmatpush.msrb.mxu3 %v13149_v1  ;;  %v3267_v38 = vadd.f32 %v3251_v62, %v13150_v10 }
 0x4c8   : > { %v3252_v11 = vrot.slane %v3001_v9, 4 }
 0x4c9   : > { %v3040_v37 = vpop.f32.mrf.mxu1  ;;  %v3060_v59 = vpop.f32.mrf.mxu2  ;;  %v5129_v55 = vmul.f32 -1.442695, %v3267_v38 }
 0x4ca   : > { %v3020_v17 = vpop.f32.mrf.mxu0  ;;  %v3268_v44 = vadd.f32 %v3252_v11, %v13153_v57 }
 0x4cb   : > { %v3041_v42 = vadd.f32 %v3040_v37, %v3020_v17  ;;  %5361 = vpow2.f32 %v5129_v55 }
 0x4cc   : > { %v5130_v37 = vmul.f32 -1.442695, %v3268_v44 }
 0x4cd   : > { %v3253_v33 = vrot.slane %v3041_v42, 4 }
 0x4cf   : > { %v3080_v49 = vpop.f32.mrf.mxu3  ;;  %v3269_v56 = vadd.f32 %v3253_v33, %v13151_v29  ;;  %v13156_v29 = vld [vmem:[#allocation17_spill] sm:$0xff] }
 0x4d0   : > { %v3081_v61 = vadd.f32 %v3080_v49, %v3060_v59 }
 0x4d1   : > { %v5131_v3 = vmul.f32 -1.442695, %v3269_v56  ;;  %v5362_v35 = vpop.eup %5361 }
 0x4d2   : > { %v3254_v1 = vrot.slane %v3081_v61, 4  ;;  %v9881_v62 = vadd.f32 1.0, %v5362_v35 }
 0x4d3   : > { %5363 = vpow2.f32 %v5131_v3 }
 0x4d4   : > { %v3270_v17 = vadd.f32 %v3254_v1, %v13155_v34  ;;  %5365 = vpow2.f32 %v5130_v37  ;;  %vm3288_vm4 = vweird.f32 %v9881_v62 }
 0x4d6   : > { %v5132_v20 = vmul.f32 -1.442695, %v3270_v17 }
 0x4d8   : > { %5367 = vpow2.f32 %v5132_v20 }
 0x4d9   : > { %v5364_v59 = vpop.eup %5363  ;;  %5369 = vrcp.f32 %v9881_v62 }
 0x4da   : > { %v9883_v33 = vadd.f32 1.0, %v5364_v59  ;;  %v5366_v45 = vpop.eup %5365 }
 0x4db   : > { %v9887_v57 = vadd.f32 1.0, %v5366_v45 }
 0x4dc   : > { %5371 = vrcp.f32 %v9883_v33  ;;  %v3100_v55 = vpop.f32.mrf.mxu0  ;;  %vm3326_vm5 = vweird.f32 %v9883_v33 }
 0x4dd   : > { %5373 = vrcp.f32 %v9887_v57  ;;  %vm3303_vm9 = vweird.f32 %v9887_v57 }
 0x4de   : > { %v5368_v42 = vpop.eup %5367 }
 0x4df   : > { %v9889_v44 = vadd.f32 1.0, %v5368_v42  ;;  %v9891_v11 = vpop.eup %5369 }
 0x4e0   : > { %v3284_v56 = vmul.f32 %v9891_v11, %v9881_v62  ;;  %vm3289_vm2 = vweird.f32 %v9891_v11 }
 0x4e1   : > { %5375 = vrcp.f32 %v9889_v44  ;;  %vm9928_vm6 = vmor %vm3288_vm4, %vm3289_vm2  ;;  %vm3341_vm13 = vweird.f32 %v9889_v44 }
 0x4e2   : > { %v9894_v49 = vpop.eup %5371  ;;  %v3140_v9 = vpop.f32.mrf.mxu2  ;;  %v3285_v42 = vsub.f32 1.0, %v3284_v56 }
 0x4e3   : > { %v3120_v3 = vpop.f32.mrf.mxu1  ;;  %v3322_v1 = vmul.f32 %v9894_v49, %v9883_v33  ;;  %v9901_v20 = vpop.eup %5373  ;;  %vm3327_vm3 = vweird.f32 %v9894_v49 }
 0x4e4   : > { %v3121_v38 = vadd.f32 %v3120_v3, %v3100_v55  ;;  %v3299_v3 = vmul.f32 %v9901_v20, %v9887_v57  ;;  %v3286_v56 = vmul.f32 %v9891_v11, %v3285_v42  ;;  %vm9934_vm7 = vmor %vm3326_vm5, %vm3327_vm3  ;;  %vm3304_vm11 = vweird.f32 %v9901_v20 }
 0x4e5   : > { %v3323_v16 = vsub.f32 1.0, %v3322_v1  ;;  %vm9960_vm14 = vmor %vm3303_vm9, %vm3304_vm11 }
 0x4e6   : > { %v3255_v59 = vrot.slane %v3121_v38, 4 }
 0x4e7   : > { %v9903_v35 = vpop.eup %5375  ;;  %v3324_v38 = vmul.f32 %v9894_v49, %v3323_v16 }
 0x4e8   : > { %v3337_v10 = vmul.f32 %v9903_v35, %v9889_v44  ;;  %vm3342_vm12 = vweird.f32 %v9903_v35 }
 0x4e9   : > { %v3160_v61 = vpop.f32.mrf.mxu3  ;;  %vm3343_vm15 = vmor %vm3341_vm13, %vm3342_vm12 }
 0x4ea   : > { %v3161_v13 = vadd.f32 %v3160_v61, %v3140_v9  ;;  %v3300_v61 = vsub.f32 1.0, %v3299_v3 }
 0x4ec   : > { %v3256_v1 = vrot.slane %v3161_v13, 4  ;;  %v3330_v13 = vand.u32 2147483647, %v9883_v33 }
 0x4ee   : > { %vm3331_vm10 = vcmp.eq.f32.partialorder %v3330_v13, 8.507059e+37  ;;  %v3307_v13 = vand.u32 2147483647, %v9887_v57 }
 0x4f0   : > { %vm3308_vm0 = vcmp.eq.f32.partialorder %v3307_v13, 8.507059e+37 }
 0x4fe   : > { %v3180_v34 = vpop.f32.mrf.mxu0 }
 0x504   : > { %v3200_v17 = vpop.f32.mrf.mxu1  ;;  %v3220_v4 = vpop.f32.mrf.mxu2 }
 0x505   : > { %v3201_v37 = vadd.f32 %v3200_v17, %v3180_v34  ;;  %v3271_v34 = vadd.f32 %v3255_v59, %v7343_v46  ;;  %v13157_v59 = vrot.slane %v7375_v47, 7 }
 0x507   : > { %v3257_v45 = vrot.slane %v3201_v37, 4  ;;  %v3338_v37 = vsub.f32 1.0, %v3337_v10  ;;  %v13158_v10 = vrot.slane %v7382_v54, 7 }
 0x509   : > { %v3273_v55 = vadd.f32 %v3257_v45, %v13156_v29  ;;  %v3292_v45 = vand.u32 2147483647, %v9881_v62  ;;  %v3294_v29 = vand.u32 2147483648, %v9881_v62  ;;  %v3272_v16 = vadd.f32 %v3256_v1, %v13158_v10 }
 0x50a   : > { %v3240_v12 = vpop.f32.mrf.mxu3  ;;  %v3339_v3 = vmul.f32 %v9903_v35, %v3338_v37  ;;  %v3301_v62 = vmul.f32 %v9901_v20, %v3300_v61  ;;  %v3345_v10 = vand.u32 2147483647, %v9889_v44 }
 0x50b   : > { %v5133_v17 = vmul.f32 -1.442695, %v3273_v55  ;;  %v3241_v31 = vadd.f32 %v3240_v12, %v3220_v4  ;;  %v3287_v12 = vadd.f32 %v9891_v11, %v3286_v56  ;;  %v3332_v4 = vand.u32 2147483648, %v9883_v33 }
 0x50c   : > { %vm9938_vm8 = vcmp.eq.f32.partialorder %v3292_v45, 8.507059e+37  ;;  %v3295_v33 = vor.u32 1.1754944e-38, %v3294_v29  ;;  %v3302_v29 = vadd.f32 %v9901_v20, %v3301_v62  ;;  %v3340_v45 = vadd.f32 %v9903_v35, %v3339_v3 }
 0x50d   : > { %5377 = vpow2.f32 %v5133_v17  ;;  %v3258_v9 = vrot.slane %v3241_v31, 4  ;;  %v3325_v31 = vadd.f32 %v9894_v49, %v3324_v38  ;;  %v3393_v38 = vrot.slane %v9458_v5, 7 }
 0x50e   : > { %5379 = vtanh.f32 %v3271_v34  ;;  %v3306_v3 = vsel %vm9960_vm14, %v9901_v20, %v3302_v29  ;;  %v3344_v34 = vsel %vm3343_vm15, %v9903_v35, %v3340_v45  ;;  %vm3346_vm1 = vcmp.eq.f32.partialorder %v3345_v10, 8.507059e+37 }
 0x50f   : > { %v3274_v55 = vadd.f32 %v3258_v9, %v13157_v59  ;;  %v3291_v9 = vsel %vm9928_vm6, %v9891_v11, %v3287_v12  ;;  %v3329_v61 = vsel %vm9934_vm7, %v9894_v49, %v3325_v31  ;;  %v3333_v59 = vor.u32 1.1754944e-38, %v3332_v4 }
 0x510   : > { %v3347_v11 = vand.u32 2147483648, %v9889_v44  ;;  %v3296_v49 = vsel %vm9938_vm8, %v3295_v33, %v3291_v9  ;;  %v3309_v12 = vand.u32 2147483648, %v9887_v57 }
 0x511   : > { %v5134_v42 = vmul.f32 -1.442695, %v3274_v55  ;;  %v3334_v55 = vsel %vm3331_vm10, %v3333_v59, %v3329_v61 }
 0x512   : > { %v3348_v56 = vor.u32 1.1754944e-38, %v3347_v11  ;;  %v3310_v1 = vor.u32 1.1754944e-38, %v3309_v12 }
 0x513   : > { %v5378_v17 = vpop.eup %5377  ;;  %5381 = vpow2.f32 %v5134_v42  ;;  %v3397_v42 = vmul.f32 %v3393_v38, %v3334_v55  ;;  %v3394_v38 = vrot.slane %v9462_v24, 7 }
 0x514   : > { %v3359_v5 = vadd.f32 1.0, %v5378_v17  ;;  %v5380_v37 = vpop.eup %5379  ;;  %5383 = vtanh.f32 %v3272_v16  ;;  %v3311_v57 = vsel %vm3308_vm0, %v3310_v1, %v3306_v3  ;;  %v3349_v44 = vsel %vm3346_vm1, %v3348_v56, %v3344_v34 }
 0x515   : > { %v3399_v31 = vmul.f32 %v5380_v37, %v3296_v49  ;;  %v3398_v20 = vmul.f32 %v3394_v38, %v3349_v44  ;;  %v9982_v44 = vld [vmem:[#allocation6 + $0x3e0] sm:$0xff] }
 0x516   : > { %5385 = vrcp.f32 %v3359_v5  ;;  %v3372_v35 = vand.u32 2147483648, %v3359_v5  ;;  %v3370_v45 = vand.u32 2147483647, %v3359_v5  ;;  %vm3366_vm3 = vweird.f32 %v3359_v5 }
 0x517   : > { %v9970_v9 = vadd.f32 %v3399_v31, %v3397_v42 }
 0x518   : > { %v3373_v31 = vor.u32 1.1754944e-38, %v3372_v35  ;;  %vm3371_vm5 = vcmp.eq.f32.partialorder %v3370_v45, 8.507059e+37  ;;  %v10018_v35 = vld [vmem:[#allocation6 + $0x7a8] sm:$0xff] }
 0x519   : > { %v5382_v16 = vpop.eup %5381  ;;  %v10028_v45 = vld [vmem:[#allocation6 + $0x768] sm:$0xff] }
 0x51a   : > { %v3360_v62 = vadd.f32 1.0, %v5382_v16  ;;  %v5384_v17 = vpop.eup %5383 }
 0x51b   : > { %v3400_v37 = vmul.f32 %v5384_v17, %v3311_v57 }
 0x51c   : > { %v5386_v33 = vpop.eup %5385  ;;  %5387 = vrcp.f32 %v3360_v62  ;;  %v3387_v16 = vand.u32 2147483648, %v3360_v62  ;;  %v3385_v34 = vand.u32 2147483647, %v3360_v62  ;;  %vm3381_vm7 = vweird.f32 %v3360_v62 }
 0x51d   : > { %v3362_v61 = vmul.f32 %v5386_v33, %v3359_v5  ;;  %5389 = vtanh.f32 %v9970_v9  ;;  %vm3367_vm2 = vweird.f32 %v5386_v33  ;;  %v9974_v49 = vadd.f32 %v3400_v37, %v3398_v20  ;;  %v9992_v37 = vld [vmem:[#allocation6 + $0x360] sm:$0xff] }
 0x51e   : > { %vm3368_vm4 = vmor %vm3366_vm3, %vm3367_vm2  ;;  %v3388_v5 = vor.u32 1.1754944e-38, %v3387_v16  ;;  %vm3386_vm9 = vcmp.eq.f32.partialorder %v3385_v34, 8.507059e+37  ;;  %v10014_v20 = vld [vmem:[#allocation6 + $0x7a0] sm:$0xff]  ;;  %v10090_v34 = vld [vmem:[#allocation6 + $0x5e8] sm:$0xff] }
 0x51f   : > { %v3363_v59 = vsub.f32 1.0, %v3362_v61  ;;  %5391 = vtanh.f32 %v9974_v49  ;;  %v10073_v16 = vld [vmem:[#allocation6 + $0x160] sm:$0xff] }
 0x521   : > { %v3364_v29 = vmul.f32 %v5386_v33, %v3363_v59  ;;  %v10002_v59 = vld [vmem:[#allocation6 + $0x7e0] sm:$0xff] }
 0x522   : > { %v5388_v11 = vpop.eup %5387 }
 0x523   : > { %v3365_v55 = vadd.f32 %v5386_v33, %v3364_v29  ;;  %v3377_v12 = vmul.f32 %v5388_v11, %v3360_v62  ;;  %v5390_v13 = vpop.eup %5389  ;;  %vm3382_vm6 = vweird.f32 %v5388_v11  ;;  %v9986_v62 = vld [vmem:[#allocation6 + $0x3a0] sm:$0xff] }
 0x524   : > { %vm3383_vm8 = vmor %vm3381_vm7, %vm3382_vm6  ;;  %v10024_v29 = vld [vmem:[#allocation6 + $0x760] sm:$0xff] }
 0x525   : > { %v3369_v4 = vsel %vm3368_vm4, %v5386_v33, %v3365_v55  ;;  %v3378_v24 = vsub.f32 1.0, %v3377_v12  ;;  %v5392_v33 = vpop.eup %5391  ;;  %v10038_v55 = vld [vmem:[#allocation6 + $0x728] sm:$0xff]  ;;  %v10046_v12 = vld [vmem:[#allocation6 + $0x6e0] sm:$0xff] }
 0x526   : > { %v3374_v10 = vsel %vm3371_vm5, %v3373_v31, %v3369_v4  ;;  %v10050_v31 = vld [vmem:[#allocation6 + $0x6e8] sm:$0xff]  ;;  %v10056_v4 = vld [vmem:[#allocation6 + $0x6a0] sm:$0xff] }
 0x527   : > { %v3405_v42 = vmul.f32 %v5390_v13, %v3374_v10  ;;  %v3379_v3 = vmul.f32 %v5388_v11, %v3378_v24  ;;  %v10060_v24 = vld [vmem:[#allocation6 + $0x6a8] sm:$0xff]  ;;  %v10063_v13 = vld [vmem:[#allocation6 + $0x1a0] sm:$0xff] }
 0x528   : > { %v10070_v10 = vld [vmem:[#allocation6 + $0x668] sm:$0xff] }
 0x529   : > { %v9977_v17 = vrot.slane %v3405_v42, 4  ;;  %v3380_v56 = vadd.f32 %v5388_v11, %v3379_v3  ;;  %v10080_v42 = vld [vmem:[#allocation6 + $0x628] sm:$0xff]  ;;  %v10083_v3 = vld [vmem:[#allocation6 + $0x120] sm:$0xff] }
 0x52b   : > { %3410 = vst [vmem:[#allocation2 + $0x4] sm:$0x1] %v9977_v17  ;;  %v3384_v1 = vsel %vm3383_vm8, %v5388_v11, %v3380_v56  ;;  %3431 = vmatmul.f32.vlgmr.msra.gmra.mxu0 %v9977_v17  ;;  %3471 = vmatmul.f32.vlgmr.msra.gmra.mxu2 %v9977_v17  ;;  %v10031_v11 = vld [vmem:[#allocation6 + $0x260] sm:$0xff] }
 0x52c   : > { %v3389_v57 = vsel %vm3386_vm9, %v3388_v5, %v3384_v1  ;;  %3575 = vmatpush.msra.mxu0 %v9982_v44  ;;  %3615 = vmatpush.msra.mxu2 %v9471_v0  ;;  %v9999_v0 = vld [vmem:[#allocation6 + $0x320] sm:$0xff]  ;;  %v10100_v5 = vld [vmem:[#allocation6 + $0x5a8] sm:$0xff] }
 0x52d   : > { %v3406_v61 = vmul.f32 %v5392_v33, %v3389_v57  ;;  %v10093_v56 = vld [vmem:[#allocation6 + $0xe0] sm:$0xff]  ;;  %13168 = vst [vmem:[#allocation116_spill] sm:$0xff] %v10100_v5  ;;  %v10110_v33 = vld [vmem:[#allocation6 + $0x568] sm:$0xff] }
 0x52e   : > { %3576 = vmatpush.msra.mxu0 %v9986_v62  ;;  %3616 = vmatpush.msra.mxu2 %v9475_v27  ;;  %v10006_v27 = vld [vmem:[#allocation6 + $0x7e8] sm:$0xff]  ;;  %v10103_v1 = vld [vmem:[#allocation6 + $0xa0] sm:$0xff]  ;;  %13171 = vst [vmem:[#allocation119_spill] sm:$0xff] %v10110_v33 }
 0x52f   : > { %v9990_v38 = vrot.slane %v3406_v61, 4  ;;  %13169 = vst [vmem:[#allocation70_spill] sm:$0xff] %v10103_v1  ;;  %v10113_v57 = vld [vmem:[#allocation6 + $0x60] sm:$0xff]  ;;  %v10120_v61 = vld [vmem:[#allocation6 + $0x528] sm:$0xff] }
 0x530   : > { %3577 = vmatpush.msra.mxu0 %v9992_v37  ;;  %3617 = vmatpush.msra.mxu2 %v9481_v60  ;;  %v10011_v60 = vld [vmem:[#allocation6 + $0x2e0] sm:$0xff]  ;;  %13172 = vst [vmem:[#allocation72_spill] sm:$0xff] %v10113_v57 }
 0x531   : > { %3414 = vst [vmem:[#allocation2 + $0xb] sm:$0x1] %v9990_v38  ;;  %3451 = vmatmul.f32.vlgmr.msra.gmra.mxu1 %v9990_v38  ;;  %3491 = vmatmul.f32.vlgmr.msra.gmra.mxu3 %v9990_v38 }
 0x532   : > { %3578 = vmatpush.msra.mxu0 %v9999_v0  ;;  %3595 = vmatpush.msra.mxu1 %v10002_v59  ;;  %13174 = vst [vmem:[#allocation118_spill] sm:$0xff] %v10120_v61 }
 0x533   : > { %3618 = vmatpush.msra.mxu2 %v9489_v48  ;;  %3635 = vmatpush.msra.mxu3 %v10006_v27  ;;  %v10021_v48 = vld [vmem:[#allocation6 + $0x2a0] sm:$0xff] }
 0x534   : > { %3511 = vmatmul.f32.vlgmr.msrb.gmra.mxu0 %v9977_v17  ;;  %3551 = vmatmul.f32.vlgmr.msrb.gmra.mxu2 %v9977_v17 }
 0x535   : > { %3579 = vmatpush.msra.mxu0 %v10011_v60  ;;  %3596 = vmatpush.msra.mxu1 %v10014_v20 }
 0x536   : > { %3619 = vmatpush.msra.mxu2 %v9497_v14  ;;  %3636 = vmatpush.msra.mxu3 %v10018_v35  ;;  %v10034_v14 = vld [vmem:[#allocation6 + $0x720] sm:$0xff] }
 0x537   : > { %3580 = vmatpush.msra.mxu0 %v10021_v48  ;;  %3597 = vmatpush.msra.mxu1 %v10024_v29 }
 0x538   : > { %3620 = vmatpush.msra.mxu2 %v9503_v50  ;;  %3637 = vmatpush.msra.mxu3 %v10028_v45  ;;  %v10043_v50 = vld [vmem:[#allocation6 + $0x220] sm:$0xff] }
 0x539   : > { %3581 = vmatpush.msra.mxu0 %v10031_v11  ;;  %3598 = vmatpush.msra.mxu1 %v10034_v14 }
 0x53a   : > { %3621 = vmatpush.msra.mxu2 %v9509_v51  ;;  %3638 = vmatpush.msra.mxu3 %v10038_v55  ;;  %v10053_v51 = vld [vmem:[#allocation6 + $0x1e0] sm:$0xff] }
 0x53b   : > { %3531 = vmatmul.f32.vlgmr.msrb.gmra.mxu1 %v9990_v38  ;;  %3571 = vmatmul.f32.vlgmr.msrb.gmra.mxu3 %v9990_v38 }
 0x53c   : > { %3582 = vmatpush.msra.mxu0 %v10043_v50  ;;  %3599 = vmatpush.msra.mxu1 %v10046_v12 }
 0x53d   : > { %3622 = vmatpush.msra.mxu2 %v9517_v52  ;;  %3639 = vmatpush.msra.mxu3 %v10050_v31  ;;  %v10066_v52 = vld [vmem:[#allocation6 + $0x660] sm:$0xff] }
 0x53e   : > { %3583 = vmatpush.msra.mxu0 %v10053_v51  ;;  %3600 = vmatpush.msra.mxu1 %v10056_v4 }
 0x53f   : > { %3623 = vmatpush.msra.mxu2 %v9523_v15  ;;  %3640 = vmatpush.msra.mxu3 %v10060_v24  ;;  %v10076_v15 = vld [vmem:[#allocation6 + $0x620] sm:$0xff] }
 0x540   : > { %3584 = vmatpush.msra.mxu0 %v10063_v13  ;;  %3601 = vmatpush.msra.mxu1 %v10066_v52 }
 0x541   : > { %3624 = vmatpush.msra.mxu2 %v9529_v8  ;;  %3641 = vmatpush.msra.mxu3 %v10070_v10  ;;  %v10086_v8 = vld [vmem:[#allocation6 + $0x5e0] sm:$0xff] }
 0x542   : > { %3585 = vmatpush.msra.mxu0 %v10073_v16  ;;  %3602 = vmatpush.msra.mxu1 %v10076_v15 }
 0x543   : > { %3625 = vmatpush.msra.mxu2 %v9535_v41  ;;  %3642 = vmatpush.msra.mxu3 %v10080_v42  ;;  %v10096_v41 = vld [vmem:[#allocation6 + $0x5a0] sm:$0xff] }
 0x544   : > { %3586 = vmatpush.msra.mxu0 %v10083_v3  ;;  %3603 = vmatpush.msra.mxu1 %v10086_v8  ;;  %13167 = vst [vmem:[#allocation113_spill] sm:$0xff] %v10096_v41 }
 0x545   : > { %3626 = vmatpush.msra.mxu2 %v9541_v53  ;;  %3643 = vmatpush.msra.mxu3 %v10090_v34  ;;  %v10106_v53 = vld [vmem:[#allocation6 + $0x560] sm:$0xff] }
 0x546   : > { %3587 = vmatpush.msra.mxu0 %v10093_v56  ;;  %3604 = vmatpush.msra.mxu1 %v10096_v41  ;;  %13170 = vst [vmem:[#allocation117_spill] sm:$0xff] %v10106_v53 }
 0x547   : > { %3627 = vmatpush.msra.mxu2 %v9547_v43  ;;  %3644 = vmatpush.msra.mxu3 %v10100_v5  ;;  %v10116_v43 = vld [vmem:[#allocation6 + $0x520] sm:$0xff] }
 0x548   : > { %3588 = vmatpush.msra.mxu0 %v10103_v1  ;;  %3605 = vmatpush.msra.mxu1 %v10106_v53  ;;  %13173 = vst [vmem:[#allocation112_spill] sm:$0xff] %v10116_v43  ;;  %v10123_v53 = vld [vmem:[#allocation6 + $0x20] sm:$0xff] }
 0x549   : > { %3628 = vmatpush.msra.mxu2 %v9553_v21  ;;  %3645 = vmatpush.msra.mxu3 %v10110_v33  ;;  %13175 = vst [vmem:[#allocation74_spill] sm:$0xff] %v10123_v53  ;;  %v10126_v21 = vld [vmem:[#allocation6 + $0x4e0] sm:$0xff] }
 0x54a   : > { %3589 = vmatpush.msra.mxu0 %v10113_v57  ;;  %3606 = vmatpush.msra.mxu1 %v10116_v43  ;;  %13176 = vst [vmem:[#allocation75_spill] sm:$0xff] %v10126_v21  ;;  %v10130_v57 = vld [vmem:[#allocation6 + $0x4e8] sm:$0xff] }
 0x54b   : > { %3629 = vmatpush.msra.mxu2 %v9559_v26  ;;  %3646 = vmatpush.msra.mxu3 %v10120_v61  ;;  %13177 = vst [vmem:[#allocation121_spill] sm:$0xff] %v10130_v57  ;;  %v10135_v26 = vld [vmem:[#allocation6 + $0x3f0] sm:$0xff] }
 0x54c   : > { %3590 = vmatpush.msra.mxu0 %v10123_v53  ;;  %3607 = vmatpush.msra.mxu1 %v10126_v21  ;;  %13178 = vst [vmem:[#allocation123_spill] sm:$0xff] %v10135_v26  ;;  %v10139_v53 = vld [vmem:[#allocation6 + $0x4a0] sm:$0xff]  ;;  %v10142_v21 = vld [vmem:[#allocation6 + $0x4a8] sm:$0xff]  ;;  %v13363_v61 = vld [vmem:[#allocation13_spill] sm:$0xff] }
 0x54d   : > { %3630 = vmatpush.msra.mxu2 %v9565_v58  ;;  %3647 = vmatpush.msra.mxu3 %v10130_v57  ;;  %13179 = vst [vmem:[#allocation77_spill] sm:$0xff] %v10139_v53  ;;  %v10145_v58 = vld [vmem:[#allocation6 + $0x3b0] sm:$0xff]  ;;  %v10149_v57 = vld [vmem:[#allocation6 + $0x460] sm:$0xff]  ;;  %v13364_v43 = vrot.slane %v13363_v61, 5 }
 0x54e   : > { %3591 = vmatmul.f32.vlgmr.msra.gmra.mxu0 %v9977_v17  ;;  %3631 = vmatmul.f32.vlgmr.msra.gmra.mxu2 %v9977_v17  ;;  %13180 = vst [vmem:[#allocation86_spill] sm:$0xff] %v10142_v21 }
 0x54f   : > { %3655 = vmatpush.msrb.mxu0 %v10135_v26  ;;  %3695 = vmatpush.msrb.mxu2 %v9572_v32  ;;  %13181 = vst [vmem:[#allocation125_spill] sm:$0xff] %v10145_v58  ;;  %v10152_v26 = vld [vmem:[#allocation6 + $0x468] sm:$0xff]  ;;  %v10155_v32 = vld [vmem:[#allocation6 + $0x370] sm:$0xff] }
 0x550   : > { %3608 = vmatpush.msra.mxu1 %v10139_v53  ;;  %3648 = vmatpush.msra.mxu3 %v10142_v21  ;;  %13182 = vst [vmem:[#allocation127_spill] sm:$0xff] %v10149_v57  ;;  %v10159_v21 = vld [vmem:[#allocation6 + $0x420] sm:$0xff] }
 0x551   : > { %3656 = vmatpush.msrb.mxu0 %v10145_v58  ;;  %3696 = vmatpush.msrb.mxu2 %v9578_v25  ;;  %13183 = vst [vmem:[#allocation91_spill] sm:$0xff] %v10152_v26  ;;  %v10162_v58 = vld [vmem:[#allocation6 + $0x428] sm:$0xff]  ;;  %v10167_v25 = vld [vmem:[#allocation6 + $0x330] sm:$0xff] }
 0x552   : > { %3609 = vmatpush.msra.mxu1 %v10149_v57  ;;  %3649 = vmatpush.msra.mxu3 %v10152_v26  ;;  %13184 = vst [vmem:[#allocation96_spill] sm:$0xff] %v10155_v32  ;;  %v10170_v26 = vld [vmem:[#allocation6 + $0x7f0] sm:$0xff] }
 0x553   : > { %3657 = vmatpush.msrb.mxu0 %v10155_v32  ;;  %3697 = vmatpush.msrb.mxu2 %v9584_v36  ;;  %13185 = vst [vmem:[#allocation102_spill] sm:$0xff] %v10159_v21  ;;  %v10174_v36 = vld [vmem:[#allocation6 + $0x7f8] sm:$0xff] }
 0x554   : > { %3610 = vmatpush.msra.mxu1 %v10159_v21  ;;  %13186 = vst [vmem:[#allocation78_spill] sm:$0xff] %v10162_v58  ;;  %3650 = vmatpush.msra.mxu3 %v10162_v58  ;;  %v10177_v21 = vld [vmem:[#allocation6 + $0x2f0] sm:$0xff] }
 0x555   : > { %3611 = vmatmul.f32.vlgmr.msra.gmra.mxu1 %v9990_v38  ;;  %3651 = vmatmul.f32.vlgmr.msra.gmra.mxu3 %v9990_v38  ;;  %13187 = vst [vmem:[#allocation129_spill] sm:$0xff] %v10167_v25  ;;  %v10180_v58 = vld [vmem:[#allocation6 + $0x7b0] sm:$0xff] }
 0x556   : > { %3658 = vmatpush.msrb.mxu0 %v10167_v25  ;;  %13188 = vst [vmem:[#allocation131_spill] sm:$0xff] %v10170_v26  ;;  %3675 = vmatpush.msrb.mxu1 %v10170_v26  ;;  %v10185_v25 = vld [vmem:[#allocation6 + $0x2b0] sm:$0xff] }
 0x557   : > { %3698 = vmatpush.msrb.mxu2 %v9593_v30  ;;  %13189 = vst [vmem:[#allocation80_spill] sm:$0xff] %v10174_v36  ;;  %3715 = vmatpush.msrb.mxu3 %v10174_v36  ;;  %v10188_v30 = vld [vmem:[#allocation6 + $0x770] sm:$0xff]  ;;  %v13362_v36 = vld [vmem:[#allocation16_spill] sm:$0xff] }
 0x558   : > { %13190 = vst [vmem:[#allocation82_spill] sm:$0xff] %v10177_v21  ;;  %3659 = vmatpush.msrb.mxu0 %v10177_v21  ;;  %3676 = vmatpush.msrb.mxu1 %v10180_v58  ;;  %v10193_v21 = vld [vmem:[#allocation6 + $0x270] sm:$0xff] }
 0x559   : > { %13191 = vst [vmem:[#allocation133_spill] sm:$0xff] %v10180_v58  ;;  %3699 = vmatpush.msrb.mxu2 %v9599_v7  ;;  %3716 = vmatpush.msrb.mxu3 %v9602_v39  ;;  %v10196_v58 = vld [vmem:[#allocation6 + $0x730] sm:$0xff] }
 0x55a   : > { %13192 = vst [vmem:[#allocation135_spill] sm:$0xff] %v10185_v25  ;;  %3660 = vmatpush.msrb.mxu0 %v10185_v25  ;;  %3677 = vmatpush.msrb.mxu1 %v10188_v30  ;;  %v10201_v7 = vld [vmem:[#allocation6 + $0x230] sm:$0xff]  ;;  %v13361_v25 = vld [vmem:[#allocation14_spill] sm:$0xff] }
 0x55b   : > { %13193 = vst [vmem:[#allocation83_spill] sm:$0xff] %v10188_v30  ;;  %3700 = vmatpush.msrb.mxu2 %v9607_v28  ;;  %3717 = vmatpush.msrb.mxu3 %v9610_v19  ;;  %v10204_v39 = vld [vmem:[#allocation6 + $0x6f0] sm:$0xff] }
 0x55c   : > { %13194 = vst [vmem:[#allocation88_spill] sm:$0xff] %v10193_v21  ;;  %3661 = vmatpush.msrb.mxu0 %v10193_v21  ;;  %3678 = vmatpush.msrb.mxu1 %v10196_v58  ;;  %v10209_v28 = vld [vmem:[#allocation6 + $0x1f0] sm:$0xff] }
 0x55d   : > { %13195 = vst [vmem:[#allocation137_spill] sm:$0xff] %v10196_v58  ;;  %3701 = vmatpush.msrb.mxu2 %v9615_v18  ;;  %3718 = vmatpush.msrb.mxu3 %v9618_v6  ;;  %v10212_v19 = vld [vmem:[#allocation6 + $0x6b0] sm:$0xff] }
 0x55e   : > { %13196 = vst [vmem:[#allocation139_spill] sm:$0xff] %v10201_v7  ;;  %3662 = vmatpush.msrb.mxu0 %v10201_v7  ;;  %3679 = vmatpush.msrb.mxu1 %v10204_v39  ;;  %v10217_v18 = vld [vmem:[#allocation6 + $0x1b0] sm:$0xff] }
 0x55f   : > { %13197 = vst [vmem:[#allocation84_spill] sm:$0xff] %v10204_v39  ;;  %3702 = vmatpush.msrb.mxu2 %v9623_v2  ;;  %3719 = vmatpush.msrb.mxu3 %v9626_v22  ;;  %v10220_v6 = vld [vmem:[#allocation6 + $0x670] sm:$0xff]  ;;  %v13202_v2 = vld [vmem:[#allocation62_spill] sm:$0xff]  ;;  %v13203_v22 = vld [vmem:[#allocation64_spill] sm:$0xff] }
 0x560   : > { %13198 = vst [vmem:[#allocation140_spill] sm:$0xff] %v10209_v28  ;;  %3663 = vmatpush.msrb.mxu0 %v10209_v28  ;;  %3680 = vmatpush.msrb.mxu1 %v10212_v19  ;;  %v10226_v28 = vld [vmem:[#allocation6 + $0x630] sm:$0xff] }
 0x561   : > { %13199 = vst [vmem:[#allocation87_spill] sm:$0xff] %v10212_v19  ;;  %3703 = vmatpush.msrb.mxu2 %v9631_v23  ;;  %3720 = vmatpush.msrb.mxu3 %v9634_v40  ;;  %v13205_v23 = vld [vmem:[#allocation65_spill] sm:$0xff]  ;;  %v13206_v40 = vld [vmem:[#allocation67_spill] sm:$0xff] }
 0x562   : > { %13200 = vst [vmem:[#allocation141_spill] sm:$0xff] %v10217_v18  ;;  %3664 = vmatpush.msrb.mxu0 %v10217_v18  ;;  %3681 = vmatpush.msrb.mxu1 %v10220_v6  ;;  %v13207_v19 = vld [vmem:[#allocation69_spill] sm:$0xff] }
 0x563   : > { %13201 = vst [vmem:[#allocation90_spill] sm:$0xff] %v10220_v6  ;;  %3704 = vmatpush.msrb.mxu2 %v9639_v63  ;;  %3721 = vmatpush.msrb.mxu3 %v13202_v2  ;;  %v10232_v18 = vld [vmem:[#allocation6 + $0x5f0] sm:$0xff]  ;;  %v13209_v6 = vld [vmem:[#allocation71_spill] sm:$0xff] }
 0x564   : > { %3665 = vmatpush.msrb.mxu0 %v13203_v22  ;;  %13204 = vst [vmem:[#allocation143_spill] sm:$0xff] %v10226_v28  ;;  %3682 = vmatpush.msrb.mxu1 %v10226_v28  ;;  %v13210_v63 = vld [vmem:[#allocation47_spill] sm:$0xff]  ;;  %v13211_v2 = vld [vmem:[#allocation73_spill] sm:$0xff] }
 0x565   : > { %3705 = vmatpush.msrb.mxu2 %v13205_v23  ;;  %3722 = vmatpush.msrb.mxu3 %v13206_v40  ;;  %13208 = vst [vmem:[#allocation92_spill] sm:$0xff] %v10232_v18  ;;  %v10238_v22 = vld [vmem:[#allocation6 + $0x5b0] sm:$0xff]  ;;  %v13214_v23 = vld [vmem:[#allocation76_spill] sm:$0xff]  ;;  %v13215_v40 = vld [vmem:[#allocation51_spill] sm:$0xff] }
 0x566   : > { %3666 = vmatpush.msrb.mxu0 %v13207_v19  ;;  %3683 = vmatpush.msrb.mxu1 %v10232_v18  ;;  %13212 = vst [vmem:[#allocation145_spill] sm:$0xff] %v10238_v22  ;;  %v13213_v28 = vld [vmem:[#allocation49_spill] sm:$0xff]  ;;  %v13217_v18 = vld [vmem:[#allocation79_spill] sm:$0xff] }
 0x567   : > { %3706 = vmatpush.msrb.mxu2 %v13209_v6  ;;  %3723 = vmatpush.msrb.mxu3 %v13210_v63  ;;  %v10244_v19 = vld [vmem:[#allocation6 + $0x570] sm:$0xff] }
 0x568   : > { %3667 = vmatpush.msrb.mxu0 %v13211_v2  ;;  %3684 = vmatpush.msrb.mxu1 %v10238_v22  ;;  %13216 = vst [vmem:[#allocation94_spill] sm:$0xff] %v10244_v19  ;;  %v13218_v6 = vld [vmem:[#allocation81_spill] sm:$0xff] }
 0x569   : > { %3707 = vmatpush.msrb.mxu2 %v13213_v28  ;;  %3724 = vmatpush.msrb.mxu3 %v13214_v23  ;;  %v13219_v63 = vld [vmem:[#allocation53_spill] sm:$0xff]  ;;  %v13223_v23 = vld [vmem:[#allocation55_spill] sm:$0xff] }
 0x56a   : > { %3668 = vmatpush.msrb.mxu0 %v13215_v40  ;;  %3685 = vmatpush.msrb.mxu1 %v10244_v19  ;;  %v10250_v2 = vld [vmem:[#allocation6 + $0x530] sm:$0xff]  ;;  %v13225_v19 = vld [vmem:[#allocation99_spill] sm:$0xff] }
 0x56b   : > { %3708 = vmatpush.msrb.mxu2 %v13217_v18  ;;  %3725 = vmatpush.msrb.mxu3 %v13218_v6  ;;  %13220 = vst [vmem:[#allocation147_spill] sm:$0xff] %v10250_v2  ;;  %v13221_v22 = vld [vmem:[#allocation89_spill] sm:$0xff] }
 0x56c   : > { %3669 = vmatpush.msrb.mxu0 %v13219_v63  ;;  %3686 = vmatpush.msrb.mxu1 %v10250_v2  ;;  %v13222_v28 = vld [vmem:[#allocation93_spill] sm:$0xff]  ;;  %v13229_v63 = vld [vmem:[#allocation108_spill] sm:$0xff] }
 0x56d   : > { %3709 = vmatpush.msrb.mxu2 %v13221_v22  ;;  %3726 = vmatpush.msrb.mxu3 %v13222_v28  ;;  %v10256_v40 = vld [vmem:[#allocation6 + $0x4f0] sm:$0xff]  ;;  %v10268_v28 = vld [vmem:[#allocation6 + $0x3c8] sm:$0xff] }
 0x56e   : > { %3670 = vmatpush.msrb.mxu0 %v13223_v23  ;;  %13224 = vst [vmem:[#allocation97_spill] sm:$0xff] %v10256_v40  ;;  %3687 = vmatpush.msrb.mxu1 %v10256_v40  ;;  %v13226_v18 = vld [vmem:[#allocation105_spill] sm:$0xff] }
 0x56f   : > { %3710 = vmatpush.msrb.mxu2 %v13225_v19  ;;  %3727 = vmatpush.msrb.mxu3 %v13226_v18  ;;  %v10263_v6 = vld [vmem:[#allocation6 + $0x4b0] sm:$0xff]  ;;  %13230 = vst [vmem:[#allocation100_spill] sm:$0xff] %v10268_v28  ;;  %v13232_v19 = vld [vmem:[#allocation111_spill] sm:$0xff] }
 0x570   : > { %3671 = vmatmul.f32.vlgmr.msrb.gmra.mxu0 %v9977_v17  ;;  %3711 = vmatmul.f32.vlgmr.msrb.gmra.mxu2 %v9977_v17  ;;  %13227 = vst [vmem:[#allocation149_spill] sm:$0xff] %v10263_v6  ;;  %v13228_v22 = vld [vmem:[#allocation57_spill] sm:$0xff]  ;;  %v13233_v18 = vld [vmem:[#allocation59_spill] sm:$0xff]  ;;  %v10276_v17 = vld [vmem:[#allocation6 + $0x388] sm:$0xff] }
 0x571   : > { %3688 = vmatpush.msrb.mxu1 %v10263_v6  ;;  %3728 = vmatpush.msrb.mxu3 %v13228_v22  ;;  %v10271_v23 = vld [vmem:[#allocation6 + $0x470] sm:$0xff]  ;;  %13234 = vst [vmem:[#allocation103_spill] sm:$0xff] %v10276_v17  ;;  %v13236_v22 = vld [vmem:[#allocation114_spill] sm:$0xff] }
 0x572   : > { %3907 = vmatpush.msra.mxu0 %v13229_v63  ;;  %3947 = vmatpush.msra.mxu2 %v10268_v28  ;;  %13231 = vst [vmem:[#allocation151_spill] sm:$0xff] %v10271_v23  ;;  %v10279_v6 = vld [vmem:[#allocation6 + $0x430] sm:$0xff] }
 0x573   : > { %3689 = vmatpush.msrb.mxu1 %v10271_v23  ;;  %3729 = vmatpush.msrb.mxu3 %v13232_v19  ;;  %13235 = vst [vmem:[#allocation152_spill] sm:$0xff] %v10279_v6  ;;  %v13237_v63 = vld [vmem:[#allocation85_spill] sm:$0xff]  ;;  %v10286_v23 = vld [vmem:[#allocation6 + $0x348] sm:$0xff]  ;;  %v10289_v19 = vld [vmem:[#allocation6 + $0x7c0] sm:$0xff] }
 0x574   : > { %3908 = vmatpush.msra.mxu0 %v13233_v18  ;;  %3948 = vmatpush.msra.mxu2 %v10276_v17  ;;  %13238 = vst [vmem:[#allocation106_spill] sm:$0xff] %v10286_v23  ;;  %v10292_v18 = vld [vmem:[#allocation6 + $0x7c8] sm:$0xff] }
 0x575   : > { %3690 = vmatpush.msrb.mxu1 %v10279_v6  ;;  %3730 = vmatpush.msrb.mxu3 %v13236_v22  ;;  %13239 = vst [vmem:[#allocation153_spill] sm:$0xff] %v10289_v19  ;;  %v13241_v6 = vld [vmem:[#allocation61_spill] sm:$0xff]  ;;  %v10296_v22 = vld [vmem:[#allocation6 + $0x308] sm:$0xff] }
 0x576   : > { %3691 = vmatmul.f32.vlgmr.msrb.gmra.mxu1 %v9990_v38  ;;  %3731 = vmatmul.f32.vlgmr.msrb.gmra.mxu3 %v9990_v38  ;;  %13240 = vst [vmem:[#allocation109_spill] sm:$0xff] %v10292_v18  ;;  %v10299_v38 = vld [vmem:[#allocation6 + $0x780] sm:$0xff] }
 0x577   : > { %3909 = vmatpush.msra.mxu0 %v13237_v63  ;;  %3949 = vmatpush.msra.mxu2 %v10286_v23  ;;  %13242 = vst [vmem:[#allocation154_spill] sm:$0xff] %v10296_v22  ;;  %v10302_v63 = vld [vmem:[#allocation6 + $0x788] sm:$0xff]  ;;  %v13245_v23 = vld [vmem:[#allocation95_spill] sm:$0xff] }
 0x578   : > { %3927 = vmatpush.msra.mxu1 %v10289_v19  ;;  %3967 = vmatpush.msra.mxu3 %v10292_v18  ;;  %13243 = vst [vmem:[#allocation115_spill] sm:$0xff] %v10299_v38  ;;  %v10306_v19 = vld [vmem:[#allocation6 + $0x2c8] sm:$0xff]  ;;  %v10309_v18 = vld [vmem:[#allocation6 + $0x740] sm:$0xff] }
 0x579   : > { %3910 = vmatpush.msra.mxu0 %v13241_v6  ;;  %3950 = vmatpush.msra.mxu2 %v10296_v22  ;;  %13244 = vst [vmem:[#allocation155_spill] sm:$0xff] %v10302_v63  ;;  %v10312_v6 = vld [vmem:[#allocation6 + $0x748] sm:$0xff]  ;;  %v13249_v22 = vld [vmem:[#allocation98_spill] sm:$0xff] }
 0x57a   : > { %3928 = vmatpush.msra.mxu1 %v10299_v38  ;;  %3968 = vmatpush.msra.mxu3 %v10302_v63  ;;  %13246 = vst [vmem:[#allocation120_spill] sm:$0xff] %v10306_v19  ;;  %v10316_v38 = vld [vmem:[#allocation6 + $0x288] sm:$0xff]  ;;  %v10319_v63 = vld [vmem:[#allocation6 + $0x700] sm:$0xff] }
 0x57b   : > { %3911 = vmatpush.msra.mxu0 %v13245_v23  ;;  %3951 = vmatpush.msra.mxu2 %v10306_v19  ;;  %13247 = vst [vmem:[#allocation156_spill] sm:$0xff] %v10309_v18  ;;  %v10322_v23 = vld [vmem:[#allocation6 + $0x708] sm:$0xff]  ;;  %v13253_v19 = vld [vmem:[#allocation63_spill] sm:$0xff] }
 0x57c   : > { %3929 = vmatpush.msra.mxu1 %v10309_v18  ;;  %13248 = vst [vmem:[#allocation122_spill] sm:$0xff] %v10312_v6  ;;  %3969 = vmatpush.msra.mxu3 %v10312_v6  ;;  %v10326_v18 = vld [vmem:[#allocation6 + $0x248] sm:$0xff]  ;;  %v10329_v6 = vld [vmem:[#allocation6 + $0x6c0] sm:$0xff] }
 0x57d   : > { %3912 = vmatpush.msra.mxu0 %v13249_v22  ;;  %13250 = vst [vmem:[#allocation157_spill] sm:$0xff] %v10316_v38  ;;  %3952 = vmatpush.msra.mxu2 %v10316_v38  ;;  %v10332_v22 = vld [vmem:[#allocation6 + $0x6c8] sm:$0xff]  ;;  %v13257_v38 = vld [vmem:[#allocation101_spill] sm:$0xff] }
 0x57e   : > { %13251 = vst [vmem:[#allocation124_spill] sm:$0xff] %v10319_v63  ;;  %3930 = vmatpush.msra.mxu1 %v10319_v63  ;;  %3970 = vmatpush.msra.mxu3 %v10322_v23  ;;  %v10336_v63 = vld [vmem:[#allocation6 + $0x208] sm:$0xff] }
 0x57f   : > { %13252 = vst [vmem:[#allocation158_spill] sm:$0xff] %v10322_v23  ;;  %3913 = vmatpush.msra.mxu0 %v13253_v19  ;;  %3953 = vmatpush.msra.mxu2 %v10326_v18  ;;  %v10339_v23 = vld [vmem:[#allocation6 + $0x680] sm:$0xff]  ;;  %v10342_v19 = vld [vmem:[#allocation6 + $0x688] sm:$0xff] }
 0x580   : > { %13254 = vst [vmem:[#allocation126_spill] sm:$0xff] %v10326_v18  ;;  %3931 = vmatpush.msra.mxu1 %v10329_v6  ;;  %3971 = vmatpush.msra.mxu3 %v10332_v22  ;;  %v13261_v18 = vld [vmem:[#allocation104_spill] sm:$0xff] }
 0x581   : > { %13255 = vst [vmem:[#allocation159_spill] sm:$0xff] %v10329_v6  ;;  %3914 = vmatpush.msra.mxu0 %v13257_v38  ;;  %3954 = vmatpush.msra.mxu2 %v10336_v63  ;;  %v10346_v6 = vld [vmem:[#allocation6 + $0x1c8] sm:$0xff] }
 0x582   : > { %13256 = vst [vmem:[#allocation128_spill] sm:$0xff] %v10332_v22  ;;  %3932 = vmatpush.msra.mxu1 %v10339_v23  ;;  %3972 = vmatpush.msra.mxu3 %v10342_v19  ;;  %v10349_v22 = vld [vmem:[#allocation6 + $0x640] sm:$0xff]  ;;  %v10352_v38 = vld [vmem:[#allocation6 + $0x648] sm:$0xff] }
 0x583   : > { %13258 = vst [vmem:[#allocation160_spill] sm:$0xff] %v10336_v63  ;;  %3915 = vmatpush.msra.mxu0 %v13261_v18  ;;  %3955 = vmatpush.msra.mxu2 %v10346_v6  ;;  %v13265_v63 = vld [vmem:[#allocation66_spill] sm:$0xff]  ;;  %v10362_v18 = vld [vmem:[#allocation6 + $0x608] sm:$0xff] }
 0x584   : > { %13259 = vst [vmem:[#allocation130_spill] sm:$0xff] %v10339_v23  ;;  %3933 = vmatpush.msra.mxu1 %v10349_v22  ;;  %3973 = vmatpush.msra.mxu3 %v10352_v38  ;;  %v10356_v23 = vld [vmem:[#allocation6 + $0x188] sm:$0xff] }
 0x585   : > { %13260 = vst [vmem:[#allocation161_spill] sm:$0xff] %v10342_v19  ;;  %3916 = vmatpush.msra.mxu0 %v13265_v63  ;;  %3956 = vmatpush.msra.mxu2 %v10356_v23  ;;  %v10359_v19 = vld [vmem:[#allocation6 + $0x600] sm:$0xff]  ;;  %v10372_v63 = vld [vmem:[#allocation6 + $0x5c8] sm:$0xff] }
 0x586   : > { %13262 = vst [vmem:[#allocation132_spill] sm:$0xff] %v10346_v6  ;;  %3934 = vmatpush.msra.mxu1 %v10359_v19  ;;  %3974 = vmatpush.msra.mxu3 %v10362_v18  ;;  %v13269_v6 = vld [vmem:[#allocation107_spill] sm:$0xff] }
 0x587   : > { %13263 = vst [vmem:[#allocation162_spill] sm:$0xff] %v10349_v22  ;;  %3917 = vmatpush.msra.mxu0 %v13269_v6  ;;  %v10366_v22 = vld [vmem:[#allocation6 + $0x148] sm:$0xff] }
 0x588   : > { %13264 = vst [vmem:[#allocation134_spill] sm:$0xff] %v10352_v38  ;;  %3957 = vmatpush.msra.mxu2 %v10366_v22  ;;  %v10369_v38 = vld [vmem:[#allocation6 + $0x5c0] sm:$0xff]  ;;  %3975 = vmatpush.msra.mxu3 %v10372_v63  ;;  %v10382_v6 = vld [vmem:[#allocation6 + $0x588] sm:$0xff] }
 0x589   : > { %13266 = vst [vmem:[#allocation163_spill] sm:$0xff] %v10356_v23  ;;  %3935 = vmatpush.msra.mxu1 %v10369_v38  ;;  %v13273_v23 = vld [vmem:[#allocation110_spill] sm:$0xff] }
 0x58a   : > { %13267 = vst [vmem:[#allocation136_spill] sm:$0xff] %v10359_v19  ;;  %3918 = vmatpush.msra.mxu0 %v13273_v23  ;;  %v10376_v19 = vld [vmem:[#allocation6 + $0x108] sm:$0xff]  ;;  %3976 = vmatpush.msra.mxu3 %v10382_v6 }
 0x58b   : > { %13268 = vst [vmem:[#allocation164_spill] sm:$0xff] %v10362_v18  ;;  %3958 = vmatpush.msra.mxu2 %v10376_v19  ;;  %v10379_v18 = vld [vmem:[#allocation6 + $0x580] sm:$0xff]  ;;  %v10392_v23 = vld [vmem:[#allocation6 + $0x548] sm:$0xff] }
 0x58c   : > { %13270 = vst [vmem:[#allocation138_spill] sm:$0xff] %v10366_v22  ;;  %3936 = vmatpush.msra.mxu1 %v10379_v18  ;;  %v13277_v22 = vld [vmem:[#allocation68_spill] sm:$0xff]  ;;  %3977 = vmatpush.msra.mxu3 %v10392_v23 }
 0x58d   : > { %13271 = vst [vmem:[#allocation165_spill] sm:$0xff] %v10369_v38  ;;  %3919 = vmatpush.msra.mxu0 %v13277_v22  ;;  %v10386_v38 = vld [vmem:[#allocation6 + $0xc8] sm:$0xff]  ;;  %v10401_v22 = vld [vmem:[#allocation6 + $0x500] sm:$0xff] }
 0x58e   : > { %13272 = vst [vmem:[#allocation142_spill] sm:$0xff] %v10372_v63  ;;  %3959 = vmatpush.msra.mxu2 %v10386_v38  ;;  %v10389_v63 = vld [vmem:[#allocation6 + $0x540] sm:$0xff] }
 0x58f   : > { %13274 = vst [vmem:[#allocation166_spill] sm:$0xff] %v10376_v19  ;;  %3937 = vmatpush.msra.mxu1 %v10389_v63  ;;  %v10395_v19 = vld [vmem:[#allocation6 + $0x80] sm:$0xff] }
 0x590   : > { %13275 = vst [vmem:[#allocation144_spill] sm:$0xff] %v10379_v18  ;;  %3920 = vmatpush.msra.mxu0 %v10395_v19  ;;  %v10398_v18 = vld [vmem:[#allocation6 + $0x88] sm:$0xff] }
 0x591   : > { %13276 = vst [vmem:[#allocation167_spill] sm:$0xff] %v10382_v6  ;;  %3960 = vmatpush.msra.mxu2 %v10398_v18  ;;  %3938 = vmatpush.msra.mxu1 %v10401_v22 }
 0x592   : > { %13278 = vst [vmem:[#allocation146_spill] sm:$0xff] %v10386_v38  ;;  %v10404_v38 = vld [vmem:[#allocation6 + $0x508] sm:$0xff] }
 0x593   : > { %13279 = vst [vmem:[#allocation168_spill] sm:$0xff] %v10389_v63  ;;  %3978 = vmatpush.msra.mxu3 %v10404_v38  ;;  %v10407_v63 = vld [vmem:[#allocation6 + $0x40] sm:$0xff] }
 0x594   : > { %13280 = vst [vmem:[#allocation148_spill] sm:$0xff] %v10392_v23  ;;  %3921 = vmatpush.msra.mxu0 %v10407_v63  ;;  %v10410_v23 = vld [vmem:[#allocation6 + $0x48] sm:$0xff] }
 0x595   : > { %13281 = vst [vmem:[#allocation169_spill] sm:$0xff] %v10395_v19  ;;  %3961 = vmatpush.msra.mxu2 %v10410_v23  ;;  %v10413_v19 = vld [vmem:[#allocation6 + $0x4c0] sm:$0xff] }
 0x596   : > { %13282 = vst [vmem:[#allocation150_spill] sm:$0xff] %v10398_v18  ;;  %3939 = vmatpush.msra.mxu1 %v10413_v19  ;;  %v10416_v18 = vld [vmem:[#allocation6 + $0x4c8] sm:$0xff] }
 0x597   : > { %13283 = vst [vmem:[#allocation170_spill] sm:$0xff] %v10401_v22  ;;  %3979 = vmatpush.msra.mxu3 %v10416_v18  ;;  %v10419_v22 = vld [vmem:[#allocation6] sm:$0xff] }
 0x598   : > { %13284 = vst [vmem:[#allocation171_spill] sm:$0xff] %v10404_v38  ;;  %3922 = vmatpush.msra.mxu0 %v10419_v22  ;;  %v10422_v38 = vld [vmem:[#allocation6 + $0x8] sm:$0xff] }
 0x599   : > { %13285 = vst [vmem:[#allocation172_spill] sm:$0xff] %v10407_v63  ;;  %3962 = vmatpush.msra.mxu2 %v10422_v38  ;;  %v10425_v63 = vld [vmem:[#allocation6 + $0x3d0] sm:$0xff] }
 0x59a   : > { %13286 = vst [vmem:[#allocation173_spill] sm:$0xff] %v10410_v23  ;;  %3987 = vmatpush.msrb.mxu0 %v10425_v63  ;;  %v10428_v23 = vld [vmem:[#allocation6 + $0x3d8] sm:$0xff] }
 0x59b   : > { %13287 = vst [vmem:[#allocation174_spill] sm:$0xff] %v10413_v19  ;;  %4027 = vmatpush.msrb.mxu2 %v10428_v23  ;;  %v10431_v19 = vld [vmem:[#allocation6 + $0x480] sm:$0xff] }
 0x59c   : > { %13288 = vst [vmem:[#allocation175_spill] sm:$0xff] %v10416_v18  ;;  %3940 = vmatpush.msra.mxu1 %v10431_v19  ;;  %v10434_v18 = vld [vmem:[#allocation6 + $0x488] sm:$0xff] }
 0x59d   : > { %13289 = vst [vmem:[#allocation176_spill] sm:$0xff] %v10419_v22  ;;  %3980 = vmatpush.msra.mxu3 %v10434_v18  ;;  %v10437_v22 = vld [vmem:[#allocation6 + $0x390] sm:$0xff] }
 0x59e   : > { %13290 = vst [vmem:[#allocation29_spill] sm:$0xff] %v10422_v38  ;;  %3988 = vmatpush.msrb.mxu0 %v10437_v22  ;;  %v10440_v38 = vld [vmem:[#allocation6 + $0x398] sm:$0xff] }
 0x59f   : > { %13291 = vst [vmem:[#allocation27_spill] sm:$0xff] %v10425_v63  ;;  %4028 = vmatpush.msrb.mxu2 %v10440_v38  ;;  %v10443_v63 = vld [vmem:[#allocation6 + $0x440] sm:$0xff] }
 0x5a0   : > { %13292 = vst [vmem:[#allocation20_spill] sm:$0xff] %v10428_v23  ;;  %3941 = vmatpush.msra.mxu1 %v10443_v63  ;;  %v10446_v23 = vld [vmem:[#allocation6 + $0x448] sm:$0xff] }
 0x5a1   : > { %13293 = vst [vmem:[#allocation34_spill] sm:$0xff] %v10431_v19  ;;  %3981 = vmatpush.msra.mxu3 %v10446_v23  ;;  %v10449_v19 = vld [vmem:[#allocation6 + $0x350] sm:$0xff] }
 0x5a2   : > { %13294 = vst [vmem:[#allocation33_spill] sm:$0xff] %v10434_v18  ;;  %3989 = vmatpush.msrb.mxu0 %v10449_v19  ;;  %v10452_v18 = vld [vmem:[#allocation6 + $0x358] sm:$0xff] }
 0x5a3   : > { %13295 = vst [vmem:[#allocation15_spill] sm:$0xff] %v10437_v22  ;;  %4029 = vmatpush.msrb.mxu2 %v10452_v18  ;;  %v10455_v22 = vld [vmem:[#allocation6 + $0x400] sm:$0xff] }
 0x5a4   : > { %13296 = vst [vmem:[#allocation31_spill] sm:$0xff] %v10440_v38  ;;  %3942 = vmatpush.msra.mxu1 %v10455_v22  ;;  %v10458_v38 = vld [vmem:[#allocation6 + $0x408] sm:$0xff] }
 0x5a5   : > { %13297 = vst [vmem:[#allocation40_spill] sm:$0xff] %v10443_v63  ;;  %3982 = vmatpush.msra.mxu3 %v10458_v38  ;;  %v10461_v63 = vld [vmem:[#allocation6 + $0x310] sm:$0xff] }
 0x5a6   : > { %13298 = vst [vmem:[#allocation22_spill] sm:$0xff] %v10446_v23  ;;  %3990 = vmatpush.msrb.mxu0 %v10461_v63  ;;  %v10464_v23 = vld [vmem:[#allocation6 + $0x7d0] sm:$0xff] }
 0x5a7   : > { %13299 = vst [vmem:[#allocation38_spill] sm:$0xff] %v10449_v19  ;;  %4007 = vmatpush.msrb.mxu1 %v10464_v23  ;;  %v10467_v19 = vld [vmem:[#allocation6 + $0x318] sm:$0xff] }
 0x5a8   : > { %13300 = vst [vmem:[#allocation37_spill] sm:$0xff] %v10452_v18  ;;  %4030 = vmatpush.msrb.mxu2 %v10467_v19  ;;  %v10470_v18 = vld [vmem:[#allocation6 + $0x7d8] sm:$0xff]  ;;  %v3432_v6 = vpop.f32.mrf.mxu0 }
 0x5a9   : > { %13301 = vst [vmem:[#allocation21_spill] sm:$0xff] %v10455_v22  ;;  %4047 = vmatpush.msrb.mxu3 %v10470_v18  ;;  %v10473_v22 = vld [vmem:[#allocation6 + $0x2d0] sm:$0xff] }
 0x5aa   : > { %13302 = vst [vmem:[#allocation35_spill] sm:$0xff] %v10458_v38  ;;  %3991 = vmatpush.msrb.mxu0 %v10473_v22  ;;  %v10476_v38 = vld [vmem:[#allocation6 + $0x790] sm:$0xff] }
 0x5ab   : > { %13303 = vst [vmem:[#allocation42_spill] sm:$0xff] %v10461_v63  ;;  %4008 = vmatpush.msrb.mxu1 %v10476_v38  ;;  %v10479_v63 = vld [vmem:[#allocation6 + $0x2d8] sm:$0xff] }
 0x5ac   : > { %13304 = vst [vmem:[#allocation24_spill] sm:$0xff] %v10464_v23  ;;  %4031 = vmatpush.msrb.mxu2 %v10479_v63  ;;  %v10482_v23 = vld [vmem:[#allocation6 + $0x798] sm:$0xff] }
 0x5ad   : > { %13305 = vst [vmem:[#allocation41_spill] sm:$0xff] %v10467_v19  ;;  %4048 = vmatpush.msrb.mxu3 %v10482_v23  ;;  %v10485_v19 = vld [vmem:[#allocation6 + $0x290] sm:$0xff] }
 0x5ae   : > { %13306 = vst [vmem:[#allocation39_spill] sm:$0xff] %v10470_v18  ;;  %3992 = vmatpush.msrb.mxu0 %v10485_v19  ;;  %v10488_v18 = vld [vmem:[#allocation6 + $0x750] sm:$0xff] }
 0x5af   : > { %13307 = vst [vmem:[#allocation19_spill] sm:$0xff] %v10473_v22  ;;  %4009 = vmatpush.msrb.mxu1 %v10488_v18  ;;  %v10491_v22 = vld [vmem:[#allocation6 + $0x298] sm:$0xff] }
 0x5b0   : > { %13308 = vst [vmem:[#allocation44_spill] sm:$0xff] %v10476_v38  ;;  %4032 = vmatpush.msrb.mxu2 %v10491_v22  ;;  %v10494_v38 = vld [vmem:[#allocation6 + $0x758] sm:$0xff] }
 0x5b1   : > { %13309 = vst [vmem:[#allocation43_spill] sm:$0xff] %v10479_v63  ;;  %4049 = vmatpush.msrb.mxu3 %v10494_v38  ;;  %v10497_v63 = vld [vmem:[#allocation6 + $0x250] sm:$0xff]  ;;  %v3512_v2 = vpop.f32.mrf.mxu0 }
 0x5b2   : > { %13310 = vst [vmem:[#allocation28_spill] sm:$0xff] %v10482_v23  ;;  %3993 = vmatpush.msrb.mxu0 %v10497_v63  ;;  %v10500_v23 = vld [vmem:[#allocation6 + $0x710] sm:$0xff] }
 0x5b3   : > { %13311 = vst [vmem:[#allocation46_spill] sm:$0xff] %v10485_v19  ;;  %4010 = vmatpush.msrb.mxu1 %v10500_v23  ;;  %v10503_v19 = vld [vmem:[#allocation6 + $0x258] sm:$0xff] }
 0x5b4   : > { %13312 = vst [vmem:[#allocation45_spill] sm:$0xff] %v10488_v18  ;;  %4033 = vmatpush.msrb.mxu2 %v10503_v19  ;;  %v10506_v18 = vld [vmem:[#allocation6 + $0x718] sm:$0xff]  ;;  %v3492_v17 = vpop.f32.mrf.mxu3 }
 0x5b5   : > { %13313 = vst [vmem:[#allocation26_spill] sm:$0xff] %v10491_v22  ;;  %4050 = vmatpush.msrb.mxu3 %v10506_v18  ;;  %v10509_v22 = vld [vmem:[#allocation6 + $0x210] sm:$0xff] }
 0x5b6   : > { %13314 = vst [vmem:[#allocation48_spill] sm:$0xff] %v10494_v38  ;;  %3994 = vmatpush.msrb.mxu0 %v10509_v22  ;;  %v10512_v38 = vld [vmem:[#allocation6 + $0x6d0] sm:$0xff] }
 0x5b7   : > { %13315 = vst [vmem:[#allocation25_spill] sm:$0xff] %v10497_v63  ;;  %4011 = vmatpush.msrb.mxu1 %v10512_v38  ;;  %v10515_v63 = vld [vmem:[#allocation6 + $0x218] sm:$0xff] }
 0x5b8   : > { %13316 = vst [vmem:[#allocation50_spill] sm:$0xff] %v10500_v23  ;;  %4034 = vmatpush.msrb.mxu2 %v10515_v63  ;;  %v10518_v23 = vld [vmem:[#allocation6 + $0x6d8] sm:$0xff] }
 0x5b9   : > { %13317 = vst [vmem:[#allocation23_spill] sm:$0xff] %v10503_v19  ;;  %4051 = vmatpush.msrb.mxu3 %v10518_v23  ;;  %v10521_v19 = vld [vmem:[#allocation6 + $0x1d0] sm:$0xff] }
 0x5ba   : > { %13318 = vst [vmem:[#allocation52_spill] sm:$0xff] %v10506_v18  ;;  %3995 = vmatpush.msrb.mxu0 %v10521_v19  ;;  %v10524_v18 = vld [vmem:[#allocation6 + $0x690] sm:$0xff] }
 0x5bb   : > { %13319 = vst [vmem:[#allocation32_spill] sm:$0xff] %v10509_v22  ;;  %4012 = vmatpush.msrb.mxu1 %v10524_v18  ;;  %v10527_v22 = vld [vmem:[#allocation6 + $0x1d8] sm:$0xff] }
 0x5bc   : > { %13320 = vst [vmem:[#allocation54_spill] sm:$0xff] %v10512_v38  ;;  %4035 = vmatpush.msrb.mxu2 %v10527_v22  ;;  %v10530_v38 = vld [vmem:[#allocation6 + $0x698] sm:$0xff] }
 0x5bd   : > { %13321 = vst [vmem:[#allocation30_spill] sm:$0xff] %v10515_v63  ;;  %4052 = vmatpush.msrb.mxu3 %v10530_v38  ;;  %v10533_v63 = vld [vmem:[#allocation6 + $0x190] sm:$0xff] }
 0x5be   : > { %13322 = vst [vmem:[#allocation56_spill] sm:$0xff] %v10518_v23  ;;  %3996 = vmatpush.msrb.mxu0 %v10533_v63  ;;  %v10536_v23 = vld [vmem:[#allocation6 + $0x650] sm:$0xff]  ;;  %v3572_v7 = vpop.f32.mrf.mxu3 }
 0x5bf   : > { %13323 = vst [vmem:[#allocation36_spill] sm:$0xff] %v10521_v19  ;;  %4013 = vmatpush.msrb.mxu1 %v10536_v23  ;;  %v10539_v19 = vld [vmem:[#allocation6 + $0x198] sm:$0xff] }
 0x5c0   : > { %13324 = vst [vmem:[#allocation58_spill] sm:$0xff] %v10524_v18  ;;  %4036 = vmatpush.msrb.mxu2 %v10539_v19  ;;  %v10542_v18 = vld [vmem:[#allocation6 + $0x658] sm:$0xff] }
 0x5c1   : > { %13325 = vst [vmem:[#allocation60_spill] sm:$0xff] %v10527_v22  ;;  %4053 = vmatpush.msrb.mxu3 %v10542_v18  ;;  %v10545_v22 = vld [vmem:[#allocation6 + $0x150] sm:$0xff] }
 0x5c2   : > { %13326 = vst [vmem:[#allocation177_spill] sm:$0xff] %v10530_v38  ;;  %3997 = vmatpush.msrb.mxu0 %v10545_v22  ;;  %v10548_v38 = vld [vmem:[#allocation6 + $0x610] sm:$0xff] }
 0x5c3   : > { %13327 = vst [vmem:[#allocation62_spill] sm:$0xff] %v10533_v63  ;;  %4014 = vmatpush.msrb.mxu1 %v10548_v38  ;;  %v10551_v63 = vld [vmem:[#allocation6 + $0x158] sm:$0xff] }
 0x5c4   : > { %13328 = vst [vmem:[#allocation64_spill] sm:$0xff] %v10536_v23  ;;  %4037 = vmatpush.msrb.mxu2 %v10551_v63  ;;  %v10554_v23 = vld [vmem:[#allocation6 + $0x618] sm:$0xff] }
 0x5c5   : > { %13329 = vst [vmem:[#allocation65_spill] sm:$0xff] %v10539_v19  ;;  %4054 = vmatpush.msrb.mxu3 %v10554_v23  ;;  %v10557_v19 = vld [vmem:[#allocation6 + $0x110] sm:$0xff] }
 0x5c6   : > { %13330 = vst [vmem:[#allocation67_spill] sm:$0xff] %v10542_v18  ;;  %3998 = vmatpush.msrb.mxu0 %v10557_v19  ;;  %v10560_v18 = vld [vmem:[#allocation6 + $0x5d0] sm:$0xff] }
 0x5c7   : > { %13331 = vst [vmem:[#allocation69_spill] sm:$0xff] %v10545_v22  ;;  %4015 = vmatpush.msrb.mxu1 %v10560_v18  ;;  %v10563_v22 = vld [vmem:[#allocation6 + $0x118] sm:$0xff] }
 0x5c8   : > { %13332 = vst [vmem:[#allocation71_spill] sm:$0xff] %v10548_v38  ;;  %4038 = vmatpush.msrb.mxu2 %v10563_v22  ;;  %v10566_v38 = vld [vmem:[#allocation6 + $0x5d8] sm:$0xff] }
 0x5c9   : > { %13333 = vst [vmem:[#allocation47_spill] sm:$0xff] %v10551_v63  ;;  %4055 = vmatpush.msrb.mxu3 %v10566_v38  ;;  %v10569_v63 = vld [vmem:[#allocation6 + $0xd0] sm:$0xff] }
 0x5ca   : > { %13334 = vst [vmem:[#allocation73_spill] sm:$0xff] %v10554_v23  ;;  %3999 = vmatpush.msrb.mxu0 %v10569_v63  ;;  %v10572_v23 = vld [vmem:[#allocation6 + $0x590] sm:$0xff] }
 0x5cb   : > { %13335 = vst [vmem:[#allocation49_spill] sm:$0xff] %v10557_v19  ;;  %4016 = vmatpush.msrb.mxu1 %v10572_v23  ;;  %v10575_v19 = vld [vmem:[#allocation6 + $0xd8] sm:$0xff] }
 0x5cc   : > { %13336 = vst [vmem:[#allocation76_spill] sm:$0xff] %v10560_v18  ;;  %4039 = vmatpush.msrb.mxu2 %v10575_v19  ;;  %v10578_v18 = vld [vmem:[#allocation6 + $0x598] sm:$0xff] }
 0x5cd   : > { %13337 = vst [vmem:[#allocation51_spill] sm:$0xff] %v10563_v22  ;;  %4056 = vmatpush.msrb.mxu3 %v10578_v18  ;;  %v10581_v22 = vld [vmem:[#allocation6 + $0x90] sm:$0xff] }
 0x5ce   : > { %13338 = vst [vmem:[#allocation79_spill] sm:$0xff] %v10566_v38  ;;  %4000 = vmatpush.msrb.mxu0 %v10581_v22  ;;  %v10584_v38 = vld [vmem:[#allocation6 + $0x550] sm:$0xff] }
 0x5cf   : > { %13339 = vst [vmem:[#allocation81_spill] sm:$0xff] %v10569_v63  ;;  %4017 = vmatpush.msrb.mxu1 %v10584_v38  ;;  %v10587_v63 = vld [vmem:[#allocation6 + $0x98] sm:$0xff] }
 0x5d0   : > { %13340 = vst [vmem:[#allocation53_spill] sm:$0xff] %v10572_v23  ;;  %4040 = vmatpush.msrb.mxu2 %v10587_v63  ;;  %v10590_v23 = vld [vmem:[#allocation6 + $0x558] sm:$0xff] }
 0x5d1   : > { %13341 = vst [vmem:[#allocation89_spill] sm:$0xff] %v10575_v19  ;;  %4057 = vmatpush.msrb.mxu3 %v10590_v23  ;;  %v10593_v19 = vld [vmem:[#allocation6 + $0x50] sm:$0xff] }
 0x5d2   : > { %13342 = vst [vmem:[#allocation93_spill] sm:$0xff] %v10578_v18  ;;  %4001 = vmatpush.msrb.mxu0 %v10593_v19  ;;  %v10596_v18 = vld [vmem:[#allocation6 + $0x510] sm:$0xff] }
 0x5d3   : > { %13343 = vst [vmem:[#allocation55_spill] sm:$0xff] %v10581_v22  ;;  %4018 = vmatpush.msrb.mxu1 %v10596_v18  ;;  %v10599_v22 = vld [vmem:[#allocation6 + $0x58] sm:$0xff] }
 0x5d4   : > { %13344 = vst [vmem:[#allocation99_spill] sm:$0xff] %v10584_v38  ;;  %4041 = vmatpush.msrb.mxu2 %v10599_v22  ;;  %v10602_v38 = vld [vmem:[#allocation6 + $0x518] sm:$0xff] }
 0x5d5   : > { %13345 = vst [vmem:[#allocation105_spill] sm:$0xff] %v10587_v63  ;;  %4058 = vmatpush.msrb.mxu3 %v10602_v38  ;;  %v10605_v63 = vld [vmem:[#allocation6 + $0x10] sm:$0xff] }
 0x5d6   : > { %13346 = vst [vmem:[#allocation57_spill] sm:$0xff] %v10590_v23  ;;  %4002 = vmatpush.msrb.mxu0 %v10605_v63  ;;  %v10608_v23 = vld [vmem:[#allocation6 + $0x4d0] sm:$0xff] }
 0x5d7   : > { %13347 = vst [vmem:[#allocation108_spill] sm:$0xff] %v10593_v19  ;;  %4019 = vmatpush.msrb.mxu1 %v10608_v23  ;;  %v10611_v19 = vld [vmem:[#allocation6 + $0x18] sm:$0xff] }
 0x5d8   : > { %13348 = vst [vmem:[#allocation111_spill] sm:$0xff] %v10596_v18  ;;  %4042 = vmatpush.msrb.mxu2 %v10611_v19  ;;  %v10614_v18 = vld [vmem:[#allocation6 + $0x4d8] sm:$0xff] }
 0x5d9   : > { %13349 = vst [vmem:[#allocation59_spill] sm:$0xff] %v10599_v22  ;;  %4059 = vmatpush.msrb.mxu3 %v10614_v18  ;;  %v10617_v22 = vld [vmem:[#allocation6 + $0x490] sm:$0xff] }
 0x5da   : > { %13350 = vst [vmem:[#allocation114_spill] sm:$0xff] %v10602_v38  ;;  %4020 = vmatpush.msrb.mxu1 %v10617_v22  ;;  %v10620_v38 = vld [vmem:[#allocation6 + $0x498] sm:$0xff] }
 0x5db   : > { %13351 = vst [vmem:[#allocation85_spill] sm:$0xff] %v10605_v63  ;;  %4060 = vmatpush.msrb.mxu3 %v10620_v38  ;;  %v10623_v63 = vld [vmem:[#allocation6 + $0x450] sm:$0xff] }
 0x5dc   : > { %13352 = vst [vmem:[#allocation61_spill] sm:$0xff] %v10608_v23  ;;  %4021 = vmatpush.msrb.mxu1 %v10623_v63  ;;  %v10626_v23 = vld [vmem:[#allocation6 + $0x458] sm:$0xff] }
 0x5dd   : > { %13353 = vst [vmem:[#allocation95_spill] sm:$0xff] %v10611_v19  ;;  %4061 = vmatpush.msrb.mxu3 %v10626_v23  ;;  %v10629_v19 = vld [vmem:[#allocation6 + $0x410] sm:$0xff] }
 0x5de   : > { %13354 = vst [vmem:[#allocation98_spill] sm:$0xff] %v10614_v18  ;;  %4022 = vmatpush.msrb.mxu1 %v10629_v19  ;;  %v10632_v18 = vld [vmem:[#allocation6 + $0x418] sm:$0xff] }
 0x5df   : > { %13355 = vst [vmem:[#allocation63_spill] sm:$0xff] %v10617_v22  ;;  %4062 = vmatpush.msrb.mxu3 %v10632_v18  ;;  %v3452_v22 = vpop.f32.mrf.mxu1 }
 0x5e0   : > { %13356 = vst [vmem:[#allocation101_spill] sm:$0xff] %v10620_v38  ;;  %v3472_v38 = vpop.f32.mrf.mxu2  ;;  %v3453_v40 = vadd.f32 %v3452_v22, %v3432_v6  ;;  %v13365_v6 = vld [vmem:[#allocation18_spill] sm:$0xff] }
 0x5e1   : > { %13357 = vst [vmem:[#allocation104_spill] sm:$0xff] %v10623_v63  ;;  %v13366_v22 = vrot.slane %v13365_v6, 5 }
 0x5e2   : > { %13358 = vst [vmem:[#allocation66_spill] sm:$0xff] %v10626_v23  ;;  %v3743_v39 = vrot.slane %v3453_v40, 3  ;;  %v3493_v23 = vadd.f32 %v3492_v17, %v3472_v38  ;;  %v3652_v38 = vpop.f32.mrf.mxu3 }
 0x5e3   : > { %13359 = vst [vmem:[#allocation107_spill] sm:$0xff] %v10629_v19 }
 0x5e4   : > { %13360 = vst [vmem:[#allocation110_spill] sm:$0xff] %v10632_v18  ;;  %v3759_v19 = vadd.f32 %v3743_v39, %v13361_v25  ;;  %v3744_v32 = vrot.slane %v3493_v23, 3 }
 0x5e6   : > { %v5135_v57 = vmul.f32 -1.442695, %v3759_v19  ;;  %v3760_v33 = vadd.f32 %v3744_v32, %v13364_v43 }
 0x5e7   : > { %v3532_v28 = vpop.f32.mrf.mxu1 }
 0x5e8   : > { %v3533_v63 = vadd.f32 %v3532_v28, %v3512_v2  ;;  %v3552_v21 = vpop.f32.mrf.mxu2  ;;  %5393 = vpow2.f32 %v5135_v57  ;;  %v5136_v40 = vmul.f32 -1.442695, %v3760_v33  ;;  %v3592_v57 = vpop.f32.mrf.mxu0 }
 0x5e9   : > { %v3573_v30 = vadd.f32 %v3572_v7, %v3552_v21 }
 0x5ea   : > { %v3745_v58 = vrot.slane %v3533_v63, 3 }
 0x5eb   : > { %v3746_v18 = vrot.slane %v3573_v30, 3 }
 0x5ec   : > { %v3761_v26 = vadd.f32 %v3745_v58, %v13362_v36  ;;  %v13367_v36 = vld [vmem:[#allocation17_spill] sm:$0xff] }
 0x5ed   : > { %v3762_v2 = vadd.f32 %v3746_v18, %v13366_v22 }
 0x5ee   : > { %v5137_v53 = vmul.f32 -1.442695, %v3761_v26  ;;  %v5394_v17 = vpop.eup %5393 }
 0x5ef   : > { %v5138_v28 = vmul.f32 -1.442695, %v3762_v2  ;;  %v10641_v7 = vadd.f32 1.0, %v5394_v17 }
 0x5f0   : > { %5395 = vpow2.f32 %v5137_v53  ;;  %v3612_v53 = vpop.f32.mrf.mxu1  ;;  %v3632_v19 = vpop.f32.mrf.mxu2 }
 0x5f1   : > { %5397 = vpow2.f32 %v5136_v40  ;;  %v3613_v18 = vadd.f32 %v3612_v53, %v3592_v57  ;;  %v3672_v22 = vpop.f32.mrf.mxu0  ;;  %v3653_v61 = vadd.f32 %v3652_v38, %v3632_v19  ;;  %vm3780_vm12 = vweird.f32 %v10641_v7 }
 0x5f2   : > { %5399 = vpow2.f32 %v5138_v28 }
 0x5f3   : > { %5401 = vrcp.f32 %v10641_v7 }
 0x5f6   : > { %v5396_v21 = vpop.eup %5395 }
 0x5f7   : > { %v10643_v58 = vadd.f32 1.0, %v5396_v21  ;;  %v5398_v30 = vpop.eup %5397  ;;  %v3747_v21 = vrot.slane %v3613_v18, 3 }
 0x5f8   : > { %v5400_v26 = vpop.eup %5399  ;;  %v10647_v43 = vadd.f32 1.0, %v5398_v30  ;;  %v3692_v2 = vpop.f32.mrf.mxu1 }
 0x5f9   : > { %5403 = vrcp.f32 %v10643_v58  ;;  %v10649_v33 = vadd.f32 1.0, %v5400_v26  ;;  %v10651_v32 = vpop.eup %5401  ;;  %v3693_v40 = vadd.f32 %v3692_v2, %v3672_v22  ;;  %v3712_v1 = vpop.f32.mrf.mxu2  ;;  %v3763_v22 = vadd.f32 %v3747_v21, %v7343_v46 }
 0x5fa   : > { %5405 = vrcp.f32 %v10647_v43  ;;  %v3776_v63 = vmul.f32 %v10651_v32, %v10641_v7  ;;  %v3732_v5 = vpop.f32.mrf.mxu3  ;;  %vm3781_vm10 = vweird.f32 %v10651_v32  ;;  %v13368_v21 = vrot.slane %v7375_v47, 5 }
 0x5fb   : > { %5407 = vrcp.f32 %v10649_v33  ;;  %v3749_v30 = vrot.slane %v3693_v40, 3  ;;  %v3733_v41 = vadd.f32 %v3732_v5, %v3712_v1  ;;  %v3824_v1 = vand.u32 2147483648, %v10643_v58  ;;  %vm10688_vm14 = vmor %vm3780_vm12, %vm3781_vm10 }
 0x5fc   : > { %v3777_v26 = vsub.f32 1.0, %v3776_v63  ;;  %vm3818_vm13 = vweird.f32 %v10643_v58  ;;  %vm3795_vm1 = vweird.f32 %v10647_v43  ;;  %vm3833_vm5 = vweird.f32 %v10649_v33 }
 0x5fd   : > { %v3765_v57 = vadd.f32 %v3749_v30, %v13367_v36  ;;  %v3750_v19 = vrot.slane %v3733_v41, 3  ;;  %v3784_v30 = vand.u32 2147483647, %v10641_v7  ;;  %v3786_v36 = vand.u32 2147483648, %v10641_v7 }
 0x5fe   : > { %v3778_v63 = vmul.f32 %v10651_v32, %v3777_v26 }
 0x5ff   : > { %v10654_v39 = vpop.eup %5403  ;;  %v5139_v2 = vmul.f32 -1.442695, %v3765_v57  ;;  %v3766_v57 = vadd.f32 %v3750_v19, %v13368_v21  ;;  %vm10698_vm0 = vcmp.eq.f32.partialorder %v3784_v30, 8.507059e+37  ;;  %v3825_v21 = vor.u32 1.1754944e-38, %v3824_v1 }
 0x600   : > { %v3814_v23 = vmul.f32 %v10654_v39, %v10643_v58  ;;  %v10661_v28 = vpop.eup %5405  ;;  %vm3819_vm11 = vweird.f32 %v10654_v39  ;;  %v3779_v5 = vadd.f32 %v10651_v32, %v3778_v63 }
 0x601   : > { %v10663_v17 = vpop.eup %5407  ;;  %v3791_v53 = vmul.f32 %v10661_v28, %v10647_v43  ;;  %5409 = vpow2.f32 %v5139_v2  ;;  %v5140_v26 = vmul.f32 -1.442695, %v3766_v57  ;;  %vm10694_vm15 = vmor %vm3818_vm13, %vm3819_vm11  ;;  %vm3796_vm3 = vweird.f32 %v10661_v28 }
 0x602   : > { %v3815_v6 = vsub.f32 1.0, %v3814_v23  ;;  %v3829_v25 = vmul.f32 %v10663_v17, %v10649_v33  ;;  %v3748_v23 = vrot.slane %v3653_v61, 3  ;;  %5411 = vtanh.f32 %v3763_v22  ;;  %vm10720_vm6 = vmor %vm3795_vm1, %vm3796_vm3 }
 0x603   : > { %v3792_v38 = vsub.f32 1.0, %v3791_v53  ;;  %v3822_v61 = vand.u32 2147483647, %v10643_v58  ;;  %v3787_v58 = vor.u32 1.1754944e-38, %v3786_v36  ;;  %5413 = vpow2.f32 %v5140_v26 }
 0x604   : > { %v3816_v18 = vmul.f32 %v10654_v39, %v3815_v6  ;;  %v3830_v40 = vsub.f32 1.0, %v3829_v25  ;;  %v13369_v25 = vrot.slane %v7382_v54, 5  ;;  %v3783_v19 = vsel %vm10688_vm14, %v10651_v32, %v3779_v5 }
 0x605   : > { %v3793_v7 = vmul.f32 %v10661_v28, %v3792_v38  ;;  %vm3823_vm2 = vcmp.eq.f32.partialorder %v3822_v61, 8.507059e+37  ;;  %vm3834_vm4 = vweird.f32 %v10663_v17  ;;  %v3839_v32 = vand.u32 2147483648, %v10649_v33 }
 0x606   : > { %v3817_v41 = vadd.f32 %v10654_v39, %v3816_v18  ;;  %v3764_v6 = vadd.f32 %v3748_v23, %v13369_v25  ;;  %v3831_v53 = vmul.f32 %v10663_v17, %v3830_v40  ;;  %v3885_v18 = vrot.slane %v9970_v9, 7  ;;  %vm3835_vm7 = vmor %vm3833_vm5, %vm3834_vm4 }
 0x607   : > { %v5410_v2 = vpop.eup %5409  ;;  %v3794_v36 = vadd.f32 %v10661_v28, %v3793_v7  ;;  %v3801_v5 = vand.u32 2147483648, %v10647_v43  ;;  %v3799_v61 = vand.u32 2147483647, %v10647_v43  ;;  %v3837_v25 = vand.u32 2147483647, %v10649_v33 }
 0x608   : > { %v3821_v38 = vsel %vm10694_vm15, %v10654_v39, %v3817_v41  ;;  %v3851_v9 = vadd.f32 1.0, %v5410_v2  ;;  %v5412_v40 = vpop.eup %5411  ;;  %5415 = vtanh.f32 %v3764_v6  ;;  %v3832_v30 = vadd.f32 %v10663_v17, %v3831_v53 }
 0x609   : > { %v3788_v39 = vsel %vm10698_vm0, %v3787_v58, %v3783_v19  ;;  %v3826_v57 = vsel %vm3823_vm2, %v3825_v21, %v3821_v38  ;;  %v5414_v6 = vpop.eup %5413  ;;  %v3798_v53 = vsel %vm10720_vm6, %v10661_v28, %v3794_v36  ;;  %v3840_v63 = vor.u32 1.1754944e-38, %v3839_v32 }
 0x60a   : > { %5417 = vrcp.f32 %v3851_v9  ;;  %v3891_v41 = vmul.f32 %v5412_v40, %v3788_v39  ;;  %v3889_v26 = vmul.f32 %v3885_v18, %v3826_v57  ;;  %v3836_v22 = vsel %vm3835_vm7, %v10663_v17, %v3832_v30 }
 0x60b   : > { %v3852_v7 = vadd.f32 1.0, %v5414_v6  ;;  %v3802_v23 = vor.u32 1.1754944e-38, %v3801_v5  ;;  %vm3800_vm8 = vcmp.eq.f32.partialorder %v3799_v61, 8.507059e+37  ;;  %vm3838_vm9 = vcmp.eq.f32.partialorder %v3837_v25, 8.507059e+37 }
 0x60c   : > { %v10730_v19 = vadd.f32 %v3891_v41, %v3889_v26  ;;  %v3841_v33 = vsel %vm3838_vm9, %v3840_v63, %v3836_v22  ;;  %v3886_v18 = vrot.slane %v9974_v49, 7  ;;  %v3864_v17 = vand.u32 2147483648, %v3851_v9 }
 0x60d   : > { %5419 = vrcp.f32 %v3852_v7  ;;  %v3803_v43 = vsel %vm3800_vm8, %v3802_v23, %v3798_v53  ;;  %v3862_v30 = vand.u32 2147483647, %v3851_v9  ;;  %vm3858_vm11 = vweird.f32 %v3851_v9 }
 0x60e   : > { %v5416_v2 = vpop.eup %5415  ;;  %5421 = vtanh.f32 %v10730_v19  ;;  %v3890_v28 = vmul.f32 %v3886_v18, %v3841_v33  ;;  %v3865_v41 = vor.u32 1.1754944e-38, %v3864_v17  ;;  %v3879_v6 = vand.u32 2147483648, %v3852_v7  ;;  %v10743_v33 = vld [vmem:[#allocation6 + $0x3e8] sm:$0xff]  ;;  %v10856_v17 = vld [vmem:[#allocation6 + $0x378] sm:$0xff] }
 0x60f   : > { %v3892_v40 = vmul.f32 %v5416_v2, %v3803_v43  ;;  %vm3863_vm13 = vcmp.eq.f32.partialorder %v3862_v30, 8.507059e+37  ;;  %v3877_v22 = vand.u32 2147483647, %v3852_v7  ;;  %vm3873_vm15 = vweird.f32 %v3852_v7  ;;  %v13397_v30 = vld [vmem:[#allocation78_spill] sm:$0xff] }
 0x610   : > { %v5418_v58 = vpop.eup %5417 }
 0x611   : > { %v3854_v38 = vmul.f32 %v5418_v58, %v3851_v9  ;;  %vm3859_vm10 = vweird.f32 %v5418_v58  ;;  %v10734_v39 = vadd.f32 %v3892_v40, %v3890_v28  ;;  %v3880_v9 = vor.u32 1.1754944e-38, %v3879_v6  ;;  %v10753_v40 = vld [vmem:[#allocation6 + $0x368] sm:$0xff]  ;;  %v13403_v6 = vld [vmem:[#allocation135_spill] sm:$0xff] }
 0x612   : > { %vm3860_vm12 = vmor %vm3858_vm11, %vm3859_vm10  ;;  %vm3878_vm1 = vcmp.eq.f32.partialorder %v3877_v22, 8.507059e+37  ;;  %v13395_v28 = vld [vmem:[#allocation96_spill] sm:$0xff]  ;;  %v10882_v22 = vld [vmem:[#allocation6 + $0x778] sm:$0xff] }
 0x613   : > { %v3855_v21 = vsub.f32 1.0, %v3854_v38  ;;  %v5420_v32 = vpop.eup %5419  ;;  %5423 = vtanh.f32 %v10734_v39 }
 0x614   : > { %v3869_v5 = vmul.f32 %v5420_v32, %v3852_v7  ;;  %v5422_v61 = vpop.eup %5421  ;;  %vm3874_vm14 = vweird.f32 %v5420_v32  ;;  %v10747_v7 = vld [vmem:[#allocation6 + $0x3a8] sm:$0xff] }
 0x615   : > { %v3856_v36 = vmul.f32 %v5418_v58, %v3855_v21  ;;  %vm3875_vm0 = vmor %vm3873_vm15, %vm3874_vm14  ;;  %v13394_v21 = vld [vmem:[#allocation91_spill] sm:$0xff] }
 0x616   : > { %v3870_v49 = vsub.f32 1.0, %v3869_v5  ;;  %v10865_v5 = vld [vmem:[#allocation6 + $0x338] sm:$0xff] }
 0x617   : > { %v3857_v57 = vadd.f32 %v5418_v58, %v3856_v36  ;;  %v13396_v36 = vld [vmem:[#allocation102_spill] sm:$0xff] }
 0x618   : > { %v3871_v53 = vmul.f32 %v5420_v32, %v3870_v49  ;;  %v13402_v49 = vld [vmem:[#allocation133_spill] sm:$0xff] }
 0x619   : > { %v3861_v1 = vsel %vm3860_vm12, %v5418_v58, %v3857_v57  ;;  %v5424_v58 = vpop.eup %5423  ;;  %v13399_v57 = vld [vmem:[#allocation131_spill] sm:$0xff] }
 0x61a   : > { %v3866_v25 = vsel %vm3863_vm13, %v3865_v41, %v3861_v1  ;;  %v3872_v63 = vadd.f32 %v5420_v32, %v3871_v53  ;;  %v13400_v41 = vld [vmem:[#allocation80_spill] sm:$0xff]  ;;  %v13401_v1 = vld [vmem:[#allocation82_spill] sm:$0xff] }
 0x61b   : > { %v3897_v26 = vmul.f32 %v5422_v61, %v3866_v25  ;;  %v10871_v61 = vld [vmem:[#allocation6 + $0x2f8] sm:$0xff] }
 0x61c   : > { %v3876_v23 = vsel %vm3875_vm0, %v5420_v32, %v3872_v63  ;;  %v13398_v32 = vld [vmem:[#allocation129_spill] sm:$0xff]  ;;  %v10874_v25 = vld [vmem:[#allocation6 + $0x7b8] sm:$0xff]  ;;  %v13405_v63 = vld [vmem:[#allocation88_spill] sm:$0xff] }
 0x61d   : > { %v10737_v2 = vrot.slane %v3897_v26, 5  ;;  %v3881_v43 = vsel %vm3878_vm1, %v3880_v9, %v3876_v23  ;;  %v13404_v26 = vld [vmem:[#allocation83_spill] sm:$0xff]  ;;  %v10879_v53 = vld [vmem:[#allocation6 + $0x2b8] sm:$0xff]  ;;  %v13406_v9 = vld [vmem:[#allocation137_spill] sm:$0xff] }
 0x61e   : > { %v3898_v38 = vmul.f32 %v5424_v58, %v3881_v43  ;;  %v10887_v23 = vld [vmem:[#allocation6 + $0x278] sm:$0xff]  ;;  %v13407_v43 = vld [vmem:[#allocation139_spill] sm:$0xff] }
 0x61f   : > { %3902 = vst [vmem:[#allocation2 + $0x5] sm:$0x1] %v10737_v2  ;;  %3923 = vmatmul.f32.vlgmr.msra.gmra.mxu0 %v10737_v2  ;;  %3963 = vmatmul.f32.vlgmr.msra.gmra.mxu2 %v10737_v2  ;;  %v10890_v58 = vld [vmem:[#allocation6 + $0x738] sm:$0xff] }
 0x620   : > { %4067 = vmatpush.msra.mxu0 %v9982_v44  ;;  %4107 = vmatpush.msra.mxu2 %v10743_v33  ;;  %v10750_v18 = vrot.slane %v3898_v38, 5  ;;  %v10761_v44 = vld [vmem:[#allocation6 + $0x328] sm:$0xff] }
 0x621   : > { %v13408_v38 = vld [vmem:[#allocation84_spill] sm:$0xff] }
 0x622   : > { %4068 = vmatpush.msra.mxu0 %v9986_v62  ;;  %4108 = vmatpush.msra.mxu2 %v10747_v7  ;;  %3906 = vst [vmem:[#allocation2 + $0xa] sm:$0x1] %v10750_v18  ;;  %v10769_v62 = vld [vmem:[#allocation6 + $0x2e8] sm:$0xff] }
 0x623   : > { %3943 = vmatmul.f32.vlgmr.msra.gmra.mxu1 %v10750_v18  ;;  %3983 = vmatmul.f32.vlgmr.msra.gmra.mxu3 %v10750_v18 }
 0x624   : > { %4069 = vmatpush.msra.mxu0 %v9992_v37  ;;  %4109 = vmatpush.msra.mxu2 %v10753_v40  ;;  %v10775_v37 = vld [vmem:[#allocation6 + $0x2a8] sm:$0xff] }
 0x625   : > { %4087 = vmatpush.msra.mxu1 %v10002_v59  ;;  %4127 = vmatpush.msra.mxu3 %v10006_v27  ;;  %v10789_v59 = vld [vmem:[#allocation6 + $0x228] sm:$0xff] }
 0x626   : > { %4070 = vmatpush.msra.mxu0 %v9999_v0  ;;  %4110 = vmatpush.msra.mxu2 %v10761_v44  ;;  %v10781_v0 = vld [vmem:[#allocation6 + $0x268] sm:$0xff] }
 0x627   : > { %4003 = vmatmul.f32.vlgmr.msrb.gmra.mxu0 %v10737_v2  ;;  %4043 = vmatmul.f32.vlgmr.msrb.gmra.mxu2 %v10737_v2  ;;  %v10795_v27 = vld [vmem:[#allocation6 + $0x1e8] sm:$0xff] }
 0x628   : > { %4071 = vmatpush.msra.mxu0 %v10011_v60  ;;  %4088 = vmatpush.msra.mxu1 %v10014_v20  ;;  %v10801_v60 = vld [vmem:[#allocation6 + $0x1a8] sm:$0xff] }
 0x629   : > { %4111 = vmatpush.msra.mxu2 %v10769_v62  ;;  %4128 = vmatpush.msra.mxu3 %v10018_v35  ;;  %v10807_v20 = vld [vmem:[#allocation6 + $0x168] sm:$0xff] }
 0x62a   : > { %4072 = vmatpush.msra.mxu0 %v10021_v48  ;;  %4089 = vmatpush.msra.mxu1 %v10024_v29  ;;  %v10813_v35 = vld [vmem:[#allocation6 + $0x128] sm:$0xff]  ;;  %v13378_v48 = vld [vmem:[#allocation113_spill] sm:$0xff] }
 0x62b   : > { %4112 = vmatpush.msra.mxu2 %v10775_v37  ;;  %4129 = vmatpush.msra.mxu3 %v10028_v45  ;;  %v10819_v29 = vld [vmem:[#allocation6 + $0xe8] sm:$0xff] }
 0x62c   : > { %4073 = vmatpush.msra.mxu0 %v10031_v11  ;;  %4090 = vmatpush.msra.mxu1 %v10034_v14  ;;  %v13379_v45 = vld [vmem:[#allocation116_spill] sm:$0xff]  ;;  %v13380_v11 = vld [vmem:[#allocation70_spill] sm:$0xff]  ;;  %v13381_v14 = vld [vmem:[#allocation117_spill] sm:$0xff] }
 0x62d   : > { %4113 = vmatpush.msra.mxu2 %v10781_v0  ;;  %4130 = vmatpush.msra.mxu3 %v10038_v55  ;;  %v10825_v55 = vld [vmem:[#allocation6 + $0xa8] sm:$0xff] }
 0x62e   : > { %4023 = vmatmul.f32.vlgmr.msrb.gmra.mxu1 %v10750_v18  ;;  %4063 = vmatmul.f32.vlgmr.msrb.gmra.mxu3 %v10750_v18 }
 0x62f   : > { %4074 = vmatpush.msra.mxu0 %v10043_v50  ;;  %4091 = vmatpush.msra.mxu1 %v10046_v12  ;;  %v13382_v50 = vld [vmem:[#allocation119_spill] sm:$0xff]  ;;  %v13383_v12 = vld [vmem:[#allocation72_spill] sm:$0xff] }
 0x630   : > { %4114 = vmatpush.msra.mxu2 %v10789_v59  ;;  %4131 = vmatpush.msra.mxu3 %v10050_v31  ;;  %v13384_v31 = vld [vmem:[#allocation112_spill] sm:$0xff] }
 0x631   : > { %4075 = vmatpush.msra.mxu0 %v10053_v51  ;;  %4092 = vmatpush.msra.mxu1 %v10056_v4  ;;  %v10831_v51 = vld [vmem:[#allocation6 + $0x68] sm:$0xff]  ;;  %v13385_v4 = vld [vmem:[#allocation118_spill] sm:$0xff] }
 0x632   : > { %4115 = vmatpush.msra.mxu2 %v10795_v27  ;;  %4132 = vmatpush.msra.mxu3 %v10060_v24  ;;  %v13386_v24 = vld [vmem:[#allocation74_spill] sm:$0xff] }
 0x633   : > { %4076 = vmatpush.msra.mxu0 %v10063_v13  ;;  %4093 = vmatpush.msra.mxu1 %v10066_v52  ;;  %v13387_v13 = vld [vmem:[#allocation75_spill] sm:$0xff]  ;;  %v10837_v52 = vld [vmem:[#allocation6 + $0x28] sm:$0xff] }
 0x634   : > { %4116 = vmatpush.msra.mxu2 %v10801_v60  ;;  %4133 = vmatpush.msra.mxu3 %v10070_v10  ;;  %v13388_v10 = vld [vmem:[#allocation121_spill] sm:$0xff] }
 0x635   : > { %4077 = vmatpush.msra.mxu0 %v10073_v16  ;;  %4094 = vmatpush.msra.mxu1 %v10076_v15  ;;  %v13389_v16 = vld [vmem:[#allocation123_spill] sm:$0xff]  ;;  %v10844_v15 = vld [vmem:[#allocation6 + $0x3f8] sm:$0xff] }
 0x636   : > { %4117 = vmatpush.msra.mxu2 %v10807_v20  ;;  %4134 = vmatpush.msra.mxu3 %v10080_v42  ;;  %v13390_v42 = vld [vmem:[#allocation77_spill] sm:$0xff] }
 0x637   : > { %4078 = vmatpush.msra.mxu0 %v10083_v3  ;;  %4095 = vmatpush.msra.mxu1 %v10086_v8  ;;  %v13391_v3 = vld [vmem:[#allocation86_spill] sm:$0xff]  ;;  %v13392_v8 = vld [vmem:[#allocation125_spill] sm:$0xff] }
 0x638   : > { %4118 = vmatpush.msra.mxu2 %v10813_v35  ;;  %4135 = vmatpush.msra.mxu3 %v10090_v34  ;;  %v10850_v34 = vld [vmem:[#allocation6 + $0x3b8] sm:$0xff] }
 0x639   : > { %4079 = vmatpush.msra.mxu0 %v10093_v56  ;;  %4096 = vmatpush.msra.mxu1 %v13378_v48  ;;  %v13393_v56 = vld [vmem:[#allocation127_spill] sm:$0xff]  ;;  %v10895_v48 = vld [vmem:[#allocation6 + $0x238] sm:$0xff] }
 0x63a   : > { %4119 = vmatpush.msra.mxu2 %v10819_v29  ;;  %4136 = vmatpush.msra.mxu3 %v13379_v45  ;;  %v10898_v45 = vld [vmem:[#allocation6 + $0x6f8] sm:$0xff] }
 0x63b   : > { %4080 = vmatpush.msra.mxu0 %v13380_v11  ;;  %4097 = vmatpush.msra.mxu1 %v13381_v14  ;;  %v13409_v11 = vld [vmem:[#allocation140_spill] sm:$0xff]  ;;  %v13410_v14 = vld [vmem:[#allocation87_spill] sm:$0xff] }
 0x63c   : > { %4120 = vmatpush.msra.mxu2 %v10825_v55  ;;  %4137 = vmatpush.msra.mxu3 %v13382_v50  ;;  %v10903_v50 = vld [vmem:[#allocation6 + $0x1f8] sm:$0xff] }
 0x63d   : > { %4081 = vmatpush.msra.mxu0 %v13383_v12  ;;  %4098 = vmatpush.msra.mxu1 %v13384_v31  ;;  %v10906_v12 = vld [vmem:[#allocation6 + $0x6b8] sm:$0xff]  ;;  %v13411_v31 = vld [vmem:[#allocation141_spill] sm:$0xff] }
 0x63e   : > { %4121 = vmatpush.msra.mxu2 %v10831_v51  ;;  %4138 = vmatpush.msra.mxu3 %v13385_v4  ;;  %v13412_v4 = vld [vmem:[#allocation90_spill] sm:$0xff] }
 0x63f   : > { %4082 = vmatpush.msra.mxu0 %v13386_v24  ;;  %4099 = vmatpush.msra.mxu1 %v13387_v13  ;;  %v10911_v24 = vld [vmem:[#allocation6 + $0x1b8] sm:$0xff] }
 0x640   : > { %4122 = vmatpush.msra.mxu2 %v10837_v52  ;;  %4139 = vmatpush.msra.mxu3 %v13388_v10  ;;  %v10914_v13 = vld [vmem:[#allocation6 + $0x678] sm:$0xff]  ;;  %v10917_v10 = vld [vmem:[#allocation6 + $0x170] sm:$0xff] }
 0x641   : > { %4083 = vmatmul.f32.vlgmr.msra.gmra.mxu0 %v10737_v2  ;;  %4123 = vmatmul.f32.vlgmr.msra.gmra.mxu2 %v10737_v2  ;;  %13413 = vst [vmem:[#allocation68_spill] sm:$0xff] %v10914_v13 }
 0x642   : > { %4147 = vmatpush.msrb.mxu0 %v13389_v16  ;;  %4187 = vmatpush.msrb.mxu2 %v10844_v15  ;;  %13414 = vst [vmem:[#allocation113_spill] sm:$0xff] %v10917_v10  ;;  %v13415_v16 = vld [vmem:[#allocation143_spill] sm:$0xff] }
 0x643   : > { %4100 = vmatpush.msra.mxu1 %v13390_v42  ;;  %4140 = vmatpush.msra.mxu3 %v13391_v3  ;;  %v10921_v42 = vld [vmem:[#allocation6 + $0x178] sm:$0xff] }
 0x644   : > { %4148 = vmatpush.msrb.mxu0 %v13392_v8  ;;  %4188 = vmatpush.msrb.mxu2 %v10850_v34  ;;  %13416 = vst [vmem:[#allocation116_spill] sm:$0xff] %v10921_v42  ;;  %v10924_v3 = vld [vmem:[#allocation6 + $0x638] sm:$0xff]  ;;  %v10927_v8 = vld [vmem:[#allocation6 + $0x130] sm:$0xff] }
 0x645   : > { %4101 = vmatpush.msra.mxu1 %v13393_v56  ;;  %4141 = vmatpush.msra.mxu3 %v13394_v21  ;;  %13417 = vst [vmem:[#allocation70_spill] sm:$0xff] %v10924_v3  ;;  %v13419_v56 = vld [vmem:[#allocation92_spill] sm:$0xff]  ;;  %v10931_v21 = vld [vmem:[#allocation6 + $0x138] sm:$0xff] }
 0x646   : > { %4149 = vmatpush.msrb.mxu0 %v13395_v28  ;;  %4189 = vmatpush.msrb.mxu2 %v10856_v17  ;;  %13418 = vst [vmem:[#allocation117_spill] sm:$0xff] %v10927_v8  ;;  %v10934_v28 = vld [vmem:[#allocation6 + $0x5f8] sm:$0xff] }
 0x647   : > { %4102 = vmatpush.msra.mxu1 %v13396_v36  ;;  %4142 = vmatpush.msra.mxu3 %v13397_v30  ;;  %13420 = vst [vmem:[#allocation119_spill] sm:$0xff] %v10931_v21  ;;  %v10937_v36 = vld [vmem:[#allocation6 + $0xf0] sm:$0xff] }
 0x648   : > { %4103 = vmatmul.f32.vlgmr.msra.gmra.mxu1 %v10750_v18  ;;  %4143 = vmatmul.f32.vlgmr.msra.gmra.mxu3 %v10750_v18  ;;  %13421 = vst [vmem:[#allocation72_spill] sm:$0xff] %v10934_v28  ;;  %v13423_v30 = vld [vmem:[#allocation145_spill] sm:$0xff] }
 0x649   : > { %4150 = vmatpush.msrb.mxu0 %v13398_v32  ;;  %4167 = vmatpush.msrb.mxu1 %v13399_v57  ;;  %13422 = vst [vmem:[#allocation112_spill] sm:$0xff] %v10937_v36  ;;  %v10941_v32 = vld [vmem:[#allocation6 + $0xf8] sm:$0xff] }
 0x64a   : > { %4190 = vmatpush.msrb.mxu2 %v10865_v5  ;;  %4207 = vmatpush.msrb.mxu3 %v13400_v41  ;;  %13424 = vst [vmem:[#allocation118_spill] sm:$0xff] %v10941_v32  ;;  %v10944_v57 = vld [vmem:[#allocation6 + $0x5b8] sm:$0xff]  ;;  %v10947_v41 = vld [vmem:[#allocation6 + $0xb0] sm:$0xff] }
 0x64b   : > { %4151 = vmatpush.msrb.mxu0 %v13401_v1  ;;  %4168 = vmatpush.msrb.mxu1 %v13402_v49  ;;  %13425 = vst [vmem:[#allocation74_spill] sm:$0xff] %v10944_v57  ;;  %v13427_v1 = vld [vmem:[#allocation94_spill] sm:$0xff] }
 0x64c   : > { %4191 = vmatpush.msrb.mxu2 %v10871_v61  ;;  %4208 = vmatpush.msrb.mxu3 %v10874_v25  ;;  %13426 = vst [vmem:[#allocation75_spill] sm:$0xff] %v10947_v41  ;;  %v10951_v49 = vld [vmem:[#allocation6 + $0xb8] sm:$0xff] }
 0x64d   : > { %4152 = vmatpush.msrb.mxu0 %v13403_v6  ;;  %4169 = vmatpush.msrb.mxu1 %v13404_v26  ;;  %13428 = vst [vmem:[#allocation121_spill] sm:$0xff] %v10951_v49  ;;  %v10954_v6 = vld [vmem:[#allocation6 + $0x578] sm:$0xff]  ;;  %v10957_v26 = vld [vmem:[#allocation6 + $0x70] sm:$0xff] }
 0x64e   : > { %4192 = vmatpush.msrb.mxu2 %v10879_v53  ;;  %4209 = vmatpush.msrb.mxu3 %v10882_v22  ;;  %13429 = vst [vmem:[#allocation123_spill] sm:$0xff] %v10954_v6 }
 0x64f   : > { %4153 = vmatpush.msrb.mxu0 %v13405_v63  ;;  %4170 = vmatpush.msrb.mxu1 %v13406_v9  ;;  %13430 = vst [vmem:[#allocation77_spill] sm:$0xff] %v10957_v26  ;;  %v13431_v63 = vld [vmem:[#allocation147_spill] sm:$0xff]  ;;  %v10961_v9 = vld [vmem:[#allocation6 + $0x78] sm:$0xff] }
 0x650   : > { %4193 = vmatpush.msrb.mxu2 %v10887_v23  ;;  %4210 = vmatpush.msrb.mxu3 %v10890_v58  ;;  %13432 = vst [vmem:[#allocation86_spill] sm:$0xff] %v10961_v9 }
 0x651   : > { %4154 = vmatpush.msrb.mxu0 %v13407_v43  ;;  %4171 = vmatpush.msrb.mxu1 %v13408_v38  ;;  %v10964_v43 = vld [vmem:[#allocation6 + $0x538] sm:$0xff]  ;;  %v10967_v38 = vld [vmem:[#allocation6 + $0x30] sm:$0xff] }
 0x652   : > { %4194 = vmatpush.msrb.mxu2 %v10895_v48  ;;  %4211 = vmatpush.msrb.mxu3 %v10898_v45  ;;  %13433 = vst [vmem:[#allocation125_spill] sm:$0xff] %v10964_v43 }
 0x653   : > { %4155 = vmatpush.msrb.mxu0 %v13409_v11  ;;  %4172 = vmatpush.msrb.mxu1 %v13410_v14  ;;  %13434 = vst [vmem:[#allocation127_spill] sm:$0xff] %v10967_v38  ;;  %v13435_v11 = vld [vmem:[#allocation97_spill] sm:$0xff]  ;;  %v10971_v14 = vld [vmem:[#allocation6 + $0x38] sm:$0xff] }
 0x654   : > { %4195 = vmatpush.msrb.mxu2 %v10903_v50  ;;  %4212 = vmatpush.msrb.mxu3 %v10906_v12  ;;  %13436 = vst [vmem:[#allocation91_spill] sm:$0xff] %v10971_v14 }
 0x655   : > { %4156 = vmatpush.msrb.mxu0 %v13411_v31  ;;  %4173 = vmatpush.msrb.mxu1 %v13412_v4  ;;  %v10974_v31 = vld [vmem:[#allocation6 + $0x4f8] sm:$0xff]  ;;  %v13438_v4 = vld [vmem:[#allocation149_spill] sm:$0xff] }
 0x656   : > { %4196 = vmatpush.msrb.mxu2 %v10911_v24  ;;  %4213 = vmatpush.msrb.mxu3 %v10914_v13  ;;  %13437 = vst [vmem:[#allocation96_spill] sm:$0xff] %v10974_v31 }
 0x657   : > { %4157 = vmatpush.msrb.mxu0 %v10917_v10  ;;  %4174 = vmatpush.msrb.mxu1 %v13415_v16  ;;  %v10980_v16 = vld [vmem:[#allocation6 + $0x4b8] sm:$0xff] }
 0x658   : > { %4197 = vmatpush.msrb.mxu2 %v10921_v42  ;;  %4214 = vmatpush.msrb.mxu3 %v10924_v3  ;;  %13439 = vst [vmem:[#allocation102_spill] sm:$0xff] %v10980_v16 }
 0x659   : > { %4158 = vmatpush.msrb.mxu0 %v10927_v8  ;;  %4175 = vmatpush.msrb.mxu1 %v13419_v56  ;;  %v6268_v56 = vld [vmem:[#allocation6 + $0x3c0] sm:$0xff] }
 0x65a   : > { %4198 = vmatpush.msrb.mxu2 %v10931_v21  ;;  %4215 = vmatpush.msrb.mxu3 %v10934_v28  ;;  %v13561_v21 = vld [vmem:[#allocation13_spill] sm:$0xff] }
 0x65b   : > { %4159 = vmatpush.msrb.mxu0 %v10937_v36  ;;  %4176 = vmatpush.msrb.mxu1 %v13423_v30  ;;  %v13440_v30 = vld [vmem:[#allocation100_spill] sm:$0xff]  ;;  %v13562_v8 = vrot.slane %v13561_v21, 3 }
 0x65c   : > { %4199 = vmatpush.msrb.mxu2 %v10941_v32  ;;  %4216 = vmatpush.msrb.mxu3 %v10944_v57  ;;  %v13560_v57 = vld [vmem:[#allocation16_spill] sm:$0xff] }
 0x65d   : > { %4160 = vmatpush.msrb.mxu0 %v10947_v41  ;;  %4177 = vmatpush.msrb.mxu1 %v13427_v1  ;;  %v13441_v1 = vld [vmem:[#allocation151_spill] sm:$0xff]  ;;  %v13559_v41 = vld [vmem:[#allocation14_spill] sm:$0xff] }
 0x65e   : > { %4200 = vmatpush.msrb.mxu2 %v10951_v49  ;;  %4217 = vmatpush.msrb.mxu3 %v10954_v6 }
 0x65f   : > { %4161 = vmatpush.msrb.mxu0 %v10957_v26  ;;  %4178 = vmatpush.msrb.mxu1 %v13431_v63  ;;  %v10985_v63 = vld [vmem:[#allocation6 + $0x478] sm:$0xff] }
 0x660   : > { %4201 = vmatpush.msrb.mxu2 %v10961_v9  ;;  %4218 = vmatpush.msrb.mxu3 %v10964_v43  ;;  %13442 = vst [vmem:[#allocation78_spill] sm:$0xff] %v10985_v63 }
 0x661   : > { %4162 = vmatpush.msrb.mxu0 %v10967_v38  ;;  %4179 = vmatpush.msrb.mxu1 %v13435_v11  ;;  %v6270_v11 = vld [vmem:[#allocation6 + $0x380] sm:$0xff] }
 0x662   : > { %4202 = vmatpush.msrb.mxu2 %v10971_v14  ;;  %4219 = vmatpush.msrb.mxu3 %v10974_v31  ;;  %v13443_v31 = vld [vmem:[#allocation103_spill] sm:$0xff]  ;;  %v13452_v14 = vld [vmem:[#allocation120_spill] sm:$0xff] }
 0x663   : > { %4163 = vmatmul.f32.vlgmr.msrb.gmra.mxu0 %v10737_v2  ;;  %4203 = vmatmul.f32.vlgmr.msrb.gmra.mxu2 %v10737_v2  ;;  %v13444_v2 = vld [vmem:[#allocation152_spill] sm:$0xff] }
 0x664   : > { %4180 = vmatpush.msrb.mxu1 %v13438_v4  ;;  %4220 = vmatpush.msrb.mxu3 %v10980_v16  ;;  %v10990_v4 = vld [vmem:[#allocation6 + $0x438] sm:$0xff]  ;;  %v13451_v16 = vld [vmem:[#allocation155_spill] sm:$0xff] }
 0x665   : > { %4399 = vmatpush.msra.mxu0 %v6268_v56  ;;  %4439 = vmatpush.msra.mxu2 %v13440_v30  ;;  %13445 = vst [vmem:[#allocation129_spill] sm:$0xff] %v10990_v4  ;;  %v6272_v56 = vld [vmem:[#allocation6 + $0x340] sm:$0xff]  ;;  %v13446_v30 = vld [vmem:[#allocation106_spill] sm:$0xff] }
 0x666   : > { %4181 = vmatpush.msrb.mxu1 %v13441_v1  ;;  %4221 = vmatpush.msrb.mxu3 %v10985_v63  ;;  %v13447_v1 = vld [vmem:[#allocation153_spill] sm:$0xff] }
 0x667   : > { %4400 = vmatpush.msra.mxu0 %v6270_v11  ;;  %4440 = vmatpush.msra.mxu2 %v13443_v31  ;;  %v13448_v63 = vld [vmem:[#allocation109_spill] sm:$0xff]  ;;  %v6273_v11 = vld [vmem:[#allocation6 + $0x300] sm:$0xff]  ;;  %v13449_v31 = vld [vmem:[#allocation154_spill] sm:$0xff] }
 0x668   : > { %4182 = vmatpush.msrb.mxu1 %v13444_v2  ;;  %4222 = vmatpush.msrb.mxu3 %v10990_v4  ;;  %v13450_v2 = vld [vmem:[#allocation115_spill] sm:$0xff] }
 0x669   : > { %4183 = vmatmul.f32.vlgmr.msrb.gmra.mxu1 %v10750_v18  ;;  %4223 = vmatmul.f32.vlgmr.msrb.gmra.mxu3 %v10750_v18  ;;  %v6274_v4 = vld [vmem:[#allocation6 + $0x2c0] sm:$0xff]  ;;  %v13453_v18 = vld [vmem:[#allocation156_spill] sm:$0xff] }
 0x66a   : > { %4401 = vmatpush.msra.mxu0 %v6272_v56  ;;  %4441 = vmatpush.msra.mxu2 %v13446_v30  ;;  %v13454_v56 = vld [vmem:[#allocation122_spill] sm:$0xff]  ;;  %v6275_v30 = vld [vmem:[#allocation6 + $0x280] sm:$0xff] }
 0x66b   : > { %4419 = vmatpush.msra.mxu1 %v13447_v1  ;;  %4459 = vmatpush.msra.mxu3 %v13448_v63  ;;  %v13455_v1 = vld [vmem:[#allocation157_spill] sm:$0xff]  ;;  %v13456_v63 = vld [vmem:[#allocation124_spill] sm:$0xff] }
 0x66c   : > { %4402 = vmatpush.msra.mxu0 %v6273_v11  ;;  %4442 = vmatpush.msra.mxu2 %v13449_v31  ;;  %v13457_v11 = vld [vmem:[#allocation158_spill] sm:$0xff]  ;;  %v6276_v31 = vld [vmem:[#allocation6 + $0x240] sm:$0xff] }
 0x66d   : > { %4420 = vmatpush.msra.mxu1 %v13450_v2  ;;  %4460 = vmatpush.msra.mxu3 %v13451_v16  ;;  %v13458_v2 = vld [vmem:[#allocation126_spill] sm:$0xff]  ;;  %v13459_v16 = vld [vmem:[#allocation159_spill] sm:$0xff] }
 0x66e   : > { %4403 = vmatpush.msra.mxu0 %v6274_v4  ;;  %4443 = vmatpush.msra.mxu2 %v13452_v14  ;;  %v13460_v4 = vld [vmem:[#allocation128_spill] sm:$0xff]  ;;  %v6277_v14 = vld [vmem:[#allocation6 + $0x200] sm:$0xff] }
 0x66f   : > { %4421 = vmatpush.msra.mxu1 %v13453_v18  ;;  %4461 = vmatpush.msra.mxu3 %v13454_v56  ;;  %v13461_v18 = vld [vmem:[#allocation160_spill] sm:$0xff]  ;;  %v13462_v56 = vld [vmem:[#allocation130_spill] sm:$0xff] }
 0x670   : > { %4404 = vmatpush.msra.mxu0 %v6275_v30  ;;  %4444 = vmatpush.msra.mxu2 %v13455_v1  ;;  %v13463_v30 = vld [vmem:[#allocation161_spill] sm:$0xff]  ;;  %v6278_v1 = vld [vmem:[#allocation6 + $0x1c0] sm:$0xff] }
 0x671   : > { %4422 = vmatpush.msra.mxu1 %v13456_v63  ;;  %4462 = vmatpush.msra.mxu3 %v13457_v11  ;;  %v13464_v63 = vld [vmem:[#allocation132_spill] sm:$0xff]  ;;  %v13465_v11 = vld [vmem:[#allocation162_spill] sm:$0xff] }
 0x672   : > { %4405 = vmatpush.msra.mxu0 %v6276_v31  ;;  %4445 = vmatpush.msra.mxu2 %v13458_v2  ;;  %v13466_v31 = vld [vmem:[#allocation134_spill] sm:$0xff]  ;;  %v6279_v2 = vld [vmem:[#allocation6 + $0x180] sm:$0xff] }
 0x673   : > { %4423 = vmatpush.msra.mxu1 %v13459_v16  ;;  %4463 = vmatpush.msra.mxu3 %v13460_v4  ;;  %v13467_v16 = vld [vmem:[#allocation163_spill] sm:$0xff]  ;;  %v13468_v4 = vld [vmem:[#allocation136_spill] sm:$0xff] }
 0x674   : > { %4406 = vmatpush.msra.mxu0 %v6277_v14  ;;  %4446 = vmatpush.msra.mxu2 %v13461_v18  ;;  %v13469_v14 = vld [vmem:[#allocation164_spill] sm:$0xff]  ;;  %v6280_v18 = vld [vmem:[#allocation6 + $0x140] sm:$0xff] }
 0x675   : > { %4424 = vmatpush.msra.mxu1 %v13462_v56  ;;  %4464 = vmatpush.msra.mxu3 %v13463_v30  ;;  %v13470_v56 = vld [vmem:[#allocation138_spill] sm:$0xff]  ;;  %v13471_v30 = vld [vmem:[#allocation165_spill] sm:$0xff] }
 0x676   : > { %4407 = vmatpush.msra.mxu0 %v6278_v1  ;;  %4447 = vmatpush.msra.mxu2 %v13464_v63  ;;  %v13472_v1 = vld [vmem:[#allocation142_spill] sm:$0xff]  ;;  %v6281_v63 = vld [vmem:[#allocation6 + $0x100] sm:$0xff] }
 0x677   : > { %4425 = vmatpush.msra.mxu1 %v13465_v11  ;;  %4465 = vmatpush.msra.mxu3 %v13466_v31  ;;  %v13473_v11 = vld [vmem:[#allocation166_spill] sm:$0xff]  ;;  %v13474_v31 = vld [vmem:[#allocation144_spill] sm:$0xff] }
 0x678   : > { %4408 = vmatpush.msra.mxu0 %v6279_v2  ;;  %4448 = vmatpush.msra.mxu2 %v13467_v16  ;;  %v13475_v2 = vld [vmem:[#allocation167_spill] sm:$0xff] }
 0x679   : > { %4426 = vmatpush.msra.mxu1 %v13468_v4  ;;  %4466 = vmatpush.msra.mxu3 %v13469_v14  ;;  %v6282_v16 = vld [vmem:[#allocation6 + $0xc0] sm:$0xff]  ;;  %v13476_v4 = vld [vmem:[#allocation146_spill] sm:$0xff]  ;;  %v13477_v14 = vld [vmem:[#allocation168_spill] sm:$0xff] }
 0x67a   : > { %4409 = vmatpush.msra.mxu0 %v6280_v18  ;;  %4449 = vmatpush.msra.mxu2 %v13470_v56  ;;  %v13478_v18 = vld [vmem:[#allocation148_spill] sm:$0xff]  ;;  %v13479_v56 = vld [vmem:[#allocation169_spill] sm:$0xff] }
 0x67b   : > { %4427 = vmatpush.msra.mxu1 %v13471_v30  ;;  %4467 = vmatpush.msra.mxu3 %v13472_v1  ;;  %v13480_v30 = vld [vmem:[#allocation150_spill] sm:$0xff] }
 0x67c   : > { %4410 = vmatpush.msra.mxu0 %v6281_v63  ;;  %4450 = vmatpush.msra.mxu2 %v13473_v11  ;;  %v13481_v1 = vld [vmem:[#allocation170_spill] sm:$0xff]  ;;  %v13482_v63 = vld [vmem:[#allocation171_spill] sm:$0xff]  ;;  %v13483_v11 = vld [vmem:[#allocation172_spill] sm:$0xff] }
 0x67d   : > { %4428 = vmatpush.msra.mxu1 %v13474_v31  ;;  %4468 = vmatpush.msra.mxu3 %v13475_v2  ;;  %v13484_v31 = vld [vmem:[#allocation173_spill] sm:$0xff]  ;;  %v13485_v2 = vld [vmem:[#allocation174_spill] sm:$0xff] }
 0x67e   : > { %4411 = vmatpush.msra.mxu0 %v6282_v16  ;;  %4451 = vmatpush.msra.mxu2 %v13476_v4  ;;  %v13486_v16 = vld [vmem:[#allocation175_spill] sm:$0xff]  ;;  %v13487_v4 = vld [vmem:[#allocation176_spill] sm:$0xff] }
 0x67f   : > { %4429 = vmatpush.msra.mxu1 %v13477_v14  ;;  %4469 = vmatpush.msra.mxu3 %v13478_v18  ;;  %v13488_v14 = vld [vmem:[#allocation29_spill] sm:$0xff]  ;;  %v13489_v18 = vld [vmem:[#allocation27_spill] sm:$0xff] }
 0x680   : > { %4412 = vmatpush.msra.mxu0 %v13479_v56  ;;  %4452 = vmatpush.msra.mxu2 %v13480_v30  ;;  %v13490_v56 = vld [vmem:[#allocation20_spill] sm:$0xff]  ;;  %v13491_v30 = vld [vmem:[#allocation34_spill] sm:$0xff] }
 0x681   : > { %4430 = vmatpush.msra.mxu1 %v13481_v1  ;;  %4470 = vmatpush.msra.mxu3 %v13482_v63  ;;  %v13492_v1 = vld [vmem:[#allocation33_spill] sm:$0xff]  ;;  %v13493_v63 = vld [vmem:[#allocation15_spill] sm:$0xff] }
 0x682   : > { %4413 = vmatpush.msra.mxu0 %v13483_v11  ;;  %4453 = vmatpush.msra.mxu2 %v13484_v31  ;;  %v13494_v11 = vld [vmem:[#allocation31_spill] sm:$0xff]  ;;  %v13495_v31 = vld [vmem:[#allocation40_spill] sm:$0xff] }
 0x683   : > { %4431 = vmatpush.msra.mxu1 %v13485_v2  ;;  %4471 = vmatpush.msra.mxu3 %v13486_v16  ;;  %v13496_v2 = vld [vmem:[#allocation22_spill] sm:$0xff] }
 0x684   : > { %4414 = vmatpush.msra.mxu0 %v13487_v4  ;;  %4454 = vmatpush.msra.mxu2 %v13488_v14  ;;  %v13497_v16 = vld [vmem:[#allocation38_spill] sm:$0xff]  ;;  %v13498_v4 = vld [vmem:[#allocation37_spill] sm:$0xff] }
 0x685   : > { %4432 = vmatpush.msra.mxu1 %v13491_v30  ;;  %4472 = vmatpush.msra.mxu3 %v13492_v1  ;;  %v13499_v14 = vld [vmem:[#allocation21_spill] sm:$0xff]  ;;  %v13502_v30 = vld [vmem:[#allocation24_spill] sm:$0xff] }
 0x686   : > { %4479 = vmatpush.msrb.mxu0 %v13489_v18  ;;  %4519 = vmatpush.msrb.mxu2 %v13490_v56  ;;  %v13500_v18 = vld [vmem:[#allocation35_spill] sm:$0xff]  ;;  %v13501_v56 = vld [vmem:[#allocation42_spill] sm:$0xff]  ;;  %v13503_v1 = vld [vmem:[#allocation41_spill] sm:$0xff] }
 0x687   : > { %4433 = vmatpush.msra.mxu1 %v13495_v31  ;;  %4473 = vmatpush.msra.mxu3 %v13496_v2  ;;  %v13506_v31 = vld [vmem:[#allocation44_spill] sm:$0xff]  ;;  %v13507_v2 = vld [vmem:[#allocation43_spill] sm:$0xff] }
 0x688   : > { %4480 = vmatpush.msrb.mxu0 %v13493_v63  ;;  %4520 = vmatpush.msrb.mxu2 %v13494_v11  ;;  %v13504_v63 = vld [vmem:[#allocation39_spill] sm:$0xff] }
 0x689   : > { %4434 = vmatpush.msra.mxu1 %v13499_v14  ;;  %4474 = vmatpush.msra.mxu3 %v13500_v18  ;;  %v13505_v11 = vld [vmem:[#allocation19_spill] sm:$0xff]  ;;  %v13510_v14 = vld [vmem:[#allocation45_spill] sm:$0xff]  ;;  %v13511_v18 = vld [vmem:[#allocation26_spill] sm:$0xff] }
 0x68a   : > { %4481 = vmatpush.msrb.mxu0 %v13497_v16  ;;  %4521 = vmatpush.msrb.mxu2 %v13498_v4  ;;  %v13508_v16 = vld [vmem:[#allocation28_spill] sm:$0xff]  ;;  %v13509_v4 = vld [vmem:[#allocation46_spill] sm:$0xff] }
 0x68b   : > { %4499 = vmatpush.msrb.mxu1 %v13502_v30  ;;  %4539 = vmatpush.msrb.mxu3 %v13504_v63  ;;  %v13513_v30 = vld [vmem:[#allocation25_spill] sm:$0xff]  ;;  %v13515_v63 = vld [vmem:[#allocation23_spill] sm:$0xff] }
 0x68c   : > { %4482 = vmatpush.msrb.mxu0 %v13501_v56  ;;  %4522 = vmatpush.msrb.mxu2 %v13503_v1  ;;  %v13512_v56 = vld [vmem:[#allocation48_spill] sm:$0xff]  ;;  %v13514_v1 = vld [vmem:[#allocation50_spill] sm:$0xff] }
 0x68d   : > { %4500 = vmatpush.msrb.mxu1 %v13506_v31  ;;  %4540 = vmatpush.msrb.mxu3 %v13508_v16  ;;  %v13517_v31 = vld [vmem:[#allocation32_spill] sm:$0xff]  ;;  %v13519_v16 = vld [vmem:[#allocation30_spill] sm:$0xff] }
 0x68e   : > { %4483 = vmatpush.msrb.mxu0 %v13505_v11  ;;  %4523 = vmatpush.msrb.mxu2 %v13507_v2  ;;  %v13516_v11 = vld [vmem:[#allocation52_spill] sm:$0xff]  ;;  %v13518_v2 = vld [vmem:[#allocation54_spill] sm:$0xff] }
 0x68f   : > { %4501 = vmatpush.msrb.mxu1 %v13510_v14  ;;  %4541 = vmatpush.msrb.mxu3 %v13512_v56  ;;  %v13521_v14 = vld [vmem:[#allocation36_spill] sm:$0xff] }
 0x690   : > { %4484 = vmatpush.msrb.mxu0 %v13509_v4  ;;  %4524 = vmatpush.msrb.mxu2 %v13511_v18  ;;  %v13520_v4 = vld [vmem:[#allocation56_spill] sm:$0xff]  ;;  %v13522_v18 = vld [vmem:[#allocation58_spill] sm:$0xff] }
 0x691   : > { %4502 = vmatpush.msrb.mxu1 %v13514_v1  ;;  %4542 = vmatpush.msrb.mxu3 %v13516_v11  ;;  %v13523_v56 = vld [vmem:[#allocation60_spill] sm:$0xff]  ;;  %v13525_v1 = vld [vmem:[#allocation62_spill] sm:$0xff]  ;;  %v13527_v11 = vld [vmem:[#allocation65_spill] sm:$0xff] }
 0x692   : > { %4485 = vmatpush.msrb.mxu0 %v13513_v30  ;;  %4525 = vmatpush.msrb.mxu2 %v13515_v63  ;;  %v13524_v30 = vld [vmem:[#allocation177_spill] sm:$0xff]  ;;  %v13526_v63 = vld [vmem:[#allocation64_spill] sm:$0xff] }
 0x693   : > { %4503 = vmatpush.msrb.mxu1 %v13518_v2  ;;  %4543 = vmatpush.msrb.mxu3 %v13520_v4  ;;  %v13529_v2 = vld [vmem:[#allocation69_spill] sm:$0xff]  ;;  %v13531_v4 = vld [vmem:[#allocation47_spill] sm:$0xff] }
 0x694   : > { %4486 = vmatpush.msrb.mxu0 %v13517_v31  ;;  %4526 = vmatpush.msrb.mxu2 %v13519_v16  ;;  %v13528_v31 = vld [vmem:[#allocation67_spill] sm:$0xff] }
 0x695   : > { %4504 = vmatpush.msrb.mxu1 %v13522_v18  ;;  %4544 = vmatpush.msrb.mxu3 %v13524_v30  ;;  %v13530_v16 = vld [vmem:[#allocation71_spill] sm:$0xff]  ;;  %v13533_v18 = vld [vmem:[#allocation49_spill] sm:$0xff] }
 0x696   : > { %4487 = vmatpush.msrb.mxu0 %v13521_v14  ;;  %4527 = vmatpush.msrb.mxu2 %v13523_v56  ;;  %v13532_v14 = vld [vmem:[#allocation73_spill] sm:$0xff]  ;;  %v13534_v56 = vld [vmem:[#allocation76_spill] sm:$0xff]  ;;  %v13535_v30 = vld [vmem:[#allocation51_spill] sm:$0xff] }
 0x697   : > { %4505 = vmatpush.msrb.mxu1 %v13526_v63  ;;  %4545 = vmatpush.msrb.mxu3 %v13528_v31  ;;  %v13537_v63 = vld [vmem:[#allocation81_spill] sm:$0xff] }
 0x698   : > { %4488 = vmatpush.msrb.mxu0 %v13525_v1  ;;  %4528 = vmatpush.msrb.mxu2 %v13527_v11  ;;  %v13536_v1 = vld [vmem:[#allocation79_spill] sm:$0xff]  ;;  %v13538_v11 = vld [vmem:[#allocation53_spill] sm:$0xff] }
 0x699   : > { %4506 = vmatpush.msrb.mxu1 %v13530_v16  ;;  %4546 = vmatpush.msrb.mxu3 %v13532_v14  ;;  %v13539_v31 = vld [vmem:[#allocation89_spill] sm:$0xff]  ;;  %v13541_v16 = vld [vmem:[#allocation55_spill] sm:$0xff] }
 0x69a   : > { %4489 = vmatpush.msrb.mxu0 %v13529_v2  ;;  %4529 = vmatpush.msrb.mxu2 %v13531_v4  ;;  %v13540_v2 = vld [vmem:[#allocation93_spill] sm:$0xff]  ;;  %v13542_v4 = vld [vmem:[#allocation99_spill] sm:$0xff] }
 0x69b   : > { %4507 = vmatpush.msrb.mxu1 %v13534_v56  ;;  %4547 = vmatpush.msrb.mxu3 %v13536_v1  ;;  %v13543_v14 = vld [vmem:[#allocation105_spill] sm:$0xff]  ;;  %v13545_v56 = vld [vmem:[#allocation108_spill] sm:$0xff]  ;;  %v13547_v1 = vld [vmem:[#allocation59_spill] sm:$0xff] }
 0x69c   : > { %4490 = vmatpush.msrb.mxu0 %v13533_v18  ;;  %4530 = vmatpush.msrb.mxu2 %v13535_v30  ;;  %v13544_v18 = vld [vmem:[#allocation57_spill] sm:$0xff]  ;;  %v13546_v30 = vld [vmem:[#allocation111_spill] sm:$0xff] }
 0x69d   : > { %4508 = vmatpush.msrb.mxu1 %v13538_v11  ;;  %4548 = vmatpush.msrb.mxu3 %v13540_v2  ;;  %v13549_v11 = vld [vmem:[#allocation85_spill] sm:$0xff]  ;;  %v13551_v2 = vld [vmem:[#allocation95_spill] sm:$0xff] }
 0x69e   : > { %4491 = vmatpush.msrb.mxu0 %v13537_v63  ;;  %4531 = vmatpush.msrb.mxu2 %v13539_v31  ;;  %v13548_v63 = vld [vmem:[#allocation114_spill] sm:$0xff]  ;;  %v13550_v31 = vld [vmem:[#allocation61_spill] sm:$0xff] }
 0x69f   : > { %4509 = vmatpush.msrb.mxu1 %v13542_v4  ;;  %4549 = vmatpush.msrb.mxu3 %v13544_v18  ;;  %v13553_v4 = vld [vmem:[#allocation63_spill] sm:$0xff]  ;;  %v13555_v18 = vld [vmem:[#allocation104_spill] sm:$0xff] }
 0x6a0   : > { %4492 = vmatpush.msrb.mxu0 %v13541_v16  ;;  %4532 = vmatpush.msrb.mxu2 %v13543_v14  ;;  %v13552_v16 = vld [vmem:[#allocation98_spill] sm:$0xff]  ;;  %v13554_v14 = vld [vmem:[#allocation101_spill] sm:$0xff] }
 0x6a1   : > { %4510 = vmatpush.msrb.mxu1 %v13546_v30  ;;  %4550 = vmatpush.msrb.mxu3 %v13548_v63  ;;  %v13557_v30 = vld [vmem:[#allocation107_spill] sm:$0xff]  ;;  %v3944_v63 = vpop.f32.mrf.mxu1 }
 0x6a2   : > { %4493 = vmatpush.msrb.mxu0 %v13545_v56  ;;  %4533 = vmatpush.msrb.mxu2 %v13547_v1  ;;  %v13556_v56 = vld [vmem:[#allocation66_spill] sm:$0xff] }
 0x6a3   : > { %4511 = vmatpush.msrb.mxu1 %v13550_v31  ;;  %4551 = vmatpush.msrb.mxu3 %v13552_v16  ;;  %v13558_v1 = vld [vmem:[#allocation110_spill] sm:$0xff]  ;;  %v3964_v31 = vpop.f32.mrf.mxu2 }
 0x6a4   : > { %4494 = vmatpush.msrb.mxu0 %v13549_v11  ;;  %4534 = vmatpush.msrb.mxu2 %v13551_v2  ;;  %v3924_v11 = vpop.f32.mrf.mxu0 }
 0x6a5   : > { %4512 = vmatpush.msrb.mxu1 %v13553_v4  ;;  %4552 = vmatpush.msrb.mxu3 %v13554_v14  ;;  %v3945_v2 = vadd.f32 %v3944_v63, %v3924_v11  ;;  %v13563_v63 = vld [vmem:[#allocation18_spill] sm:$0xff] }
 0x6a6   : > { %v3984_v38 = vpop.f32.mrf.mxu3  ;;  %v13564_v11 = vrot.slane %v13563_v63, 3 }
 0x6a7   : > { %4513 = vmatpush.msrb.mxu1 %v13555_v18  ;;  %4553 = vmatpush.msrb.mxu3 %v13556_v56  ;;  %v4235_v26 = vrot.slane %v3945_v2, 2  ;;  %v3985_v14 = vadd.f32 %v3984_v38, %v3964_v31 }
 0x6a9   : > { %4514 = vmatpush.msrb.mxu1 %v13557_v30  ;;  %4554 = vmatpush.msrb.mxu3 %v13558_v1  ;;  %v4251_v56 = vadd.f32 %v4235_v26, %v13559_v41  ;;  %v4236_v32 = vrot.slane %v3985_v14, 2 }
 0x6ab   : > { %v4024_v43 = vpop.f32.mrf.mxu1  ;;  %v4044_v49 = vpop.f32.mrf.mxu2  ;;  %v5141_v36 = vmul.f32 -1.442695, %v4251_v56  ;;  %v4252_v3 = vadd.f32 %v4236_v32, %v13562_v8 }
 0x6ac   : > { %v4004_v9 = vpop.f32.mrf.mxu0 }
 0x6ad   : > { %v4025_v16 = vadd.f32 %v4024_v43, %v4004_v9  ;;  %5425 = vpow2.f32 %v5141_v36  ;;  %v5142_v43 = vmul.f32 -1.442695, %v4252_v3 }
 0x6af   : > { %v4237_v6 = vrot.slane %v4025_v16, 2 }
 0x6b1   : > { %v4064_v4 = vpop.f32.mrf.mxu3  ;;  %v4253_v30 = vadd.f32 %v4237_v6, %v13560_v57  ;;  %v13565_v57 = vld [vmem:[#allocation17_spill] sm:$0xff] }
 0x6b2   : > { %v4065_v18 = vadd.f32 %v4064_v4, %v4044_v49 }
 0x6b3   : > { %v5143_v28 = vmul.f32 -1.442695, %v4253_v30  ;;  %v5426_v31 = vpop.eup %5425 }
 0x6b4   : > { %v4238_v1 = vrot.slane %v4065_v18, 2  ;;  %v11114_v26 = vadd.f32 1.0, %v5426_v31 }
 0x6b5   : > { %5427 = vpow2.f32 %v5143_v28 }
 0x6b6   : > { %v4254_v9 = vadd.f32 %v4238_v1, %v13564_v11  ;;  %5429 = vpow2.f32 %v5142_v43  ;;  %vm4272_vm4 = vweird.f32 %v11114_v26 }
 0x6b8   : > { %v5144_v38 = vmul.f32 -1.442695, %v4254_v9 }
 0x6ba   : > { %5431 = vpow2.f32 %v5144_v38 }
 0x6bb   : > { %v5428_v49 = vpop.eup %5427  ;;  %5433 = vrcp.f32 %v11114_v26 }
 0x6bc   : > { %v11116_v6 = vadd.f32 1.0, %v5428_v49  ;;  %v5430_v2 = vpop.eup %5429 }
 0x6bd   : > { %v11120_v8 = vadd.f32 1.0, %v5430_v2 }
 0x6be   : > { %5435 = vrcp.f32 %v11116_v6  ;;  %v4084_v36 = vpop.f32.mrf.mxu0  ;;  %vm4310_vm5 = vweird.f32 %v11116_v6 }
 0x6bf   : > { %5437 = vrcp.f32 %v11120_v8  ;;  %vm4287_vm9 = vweird.f32 %v11120_v8 }
 0x6c0   : > { %v5432_v16 = vpop.eup %5431 }
 0x6c1   : > { %v11122_v3 = vadd.f32 1.0, %v5432_v16  ;;  %v11124_v32 = vpop.eup %5433 }
 0x6c2   : > { %v4268_v30 = vmul.f32 %v11124_v32, %v11114_v26  ;;  %vm4273_vm2 = vweird.f32 %v11124_v32 }
 0x6c3   : > { %5439 = vrcp.f32 %v11122_v3  ;;  %vm11161_vm6 = vmor %vm4272_vm4, %vm4273_vm2  ;;  %vm4325_vm13 = vweird.f32 %v11122_v3 }
 0x6c4   : > { %v11127_v4 = vpop.eup %5435  ;;  %v4124_v14 = vpop.f32.mrf.mxu2  ;;  %v4269_v16 = vsub.f32 1.0, %v4268_v30 }
 0x6c5   : > { %v4104_v28 = vpop.f32.mrf.mxu1  ;;  %v4306_v1 = vmul.f32 %v11127_v4, %v11116_v6  ;;  %v11134_v38 = vpop.eup %5437  ;;  %vm4311_vm3 = vweird.f32 %v11127_v4 }
 0x6c6   : > { %v4105_v56 = vadd.f32 %v4104_v28, %v4084_v36  ;;  %v4283_v28 = vmul.f32 %v11134_v38, %v11120_v8  ;;  %v4270_v30 = vmul.f32 %v11124_v32, %v4269_v16  ;;  %vm11167_vm7 = vmor %vm4310_vm5, %vm4311_vm3  ;;  %vm4288_vm11 = vweird.f32 %v11134_v38 }
 0x6c7   : > { %v4307_v63 = vsub.f32 1.0, %v4306_v1  ;;  %vm11193_vm14 = vmor %vm4287_vm9, %vm4288_vm11 }
 0x6c8   : > { %v4239_v49 = vrot.slane %v4105_v56, 2 }
 0x6c9   : > { %v11136_v31 = vpop.eup %5439  ;;  %v4308_v56 = vmul.f32 %v11127_v4, %v4307_v63 }
 0x6ca   : > { %v4321_v41 = vmul.f32 %v11136_v31, %v11122_v3  ;;  %vm4326_vm12 = vweird.f32 %v11136_v31 }
 0x6cb   : > { %v4144_v18 = vpop.f32.mrf.mxu3  ;;  %vm4327_vm15 = vmor %vm4325_vm13, %vm4326_vm12 }
 0x6cc   : > { %v4145_v21 = vadd.f32 %v4144_v18, %v4124_v14  ;;  %v4284_v18 = vsub.f32 1.0, %v4283_v28 }
 0x6ce   : > { %v4240_v1 = vrot.slane %v4145_v21, 2  ;;  %v4314_v21 = vand.u32 2147483647, %v11116_v6 }
 0x6d0   : > { %vm4315_vm10 = vcmp.eq.f32.partialorder %v4314_v21, 8.507059e+37  ;;  %v4291_v21 = vand.u32 2147483647, %v11120_v8 }
 0x6d2   : > { %vm4292_vm0 = vcmp.eq.f32.partialorder %v4291_v21, 8.507059e+37 }
 0x6e0   : > { %v4164_v11 = vpop.f32.mrf.mxu0 }
 0x6e6   : > { %v4184_v9 = vpop.f32.mrf.mxu1  ;;  %v4204_v42 = vpop.f32.mrf.mxu2 }
 0x6e7   : > { %v4185_v43 = vadd.f32 %v4184_v9, %v4164_v11  ;;  %v4255_v11 = vadd.f32 %v4239_v49, %v7343_v46  ;;  %v13566_v49 = vrot.slane %v7375_v47, 3 }
 0x6e9   : > { %v4241_v2 = vrot.slane %v4185_v43, 2  ;;  %v4322_v43 = vsub.f32 1.0, %v4321_v41  ;;  %v13567_v41 = vrot.slane %v7382_v54, 3 }
 0x6eb   : > { %v4257_v36 = vadd.f32 %v4241_v2, %v13565_v57  ;;  %v4276_v2 = vand.u32 2147483647, %v11114_v26  ;;  %v4278_v57 = vand.u32 2147483648, %v11114_v26  ;;  %v4256_v63 = vadd.f32 %v4240_v1, %v13567_v41 }
 0x6ec   : > { %v4224_v10 = vpop.f32.mrf.mxu3  ;;  %v4323_v28 = vmul.f32 %v11136_v31, %v4322_v43  ;;  %v4285_v26 = vmul.f32 %v11134_v38, %v4284_v18  ;;  %v4329_v41 = vand.u32 2147483647, %v11122_v3 }
 0x6ed   : > { %v5145_v9 = vmul.f32 -1.442695, %v4257_v36  ;;  %v4225_v13 = vadd.f32 %v4224_v10, %v4204_v42  ;;  %v4271_v10 = vadd.f32 %v11124_v32, %v4270_v30  ;;  %v4316_v42 = vand.u32 2147483648, %v11116_v6 }
 0x6ee   : > { %vm11171_vm8 = vcmp.eq.f32.partialorder %v4276_v2, 8.507059e+37  ;;  %v4279_v6 = vor.u32 1.1754944e-38, %v4278_v57  ;;  %v4286_v57 = vadd.f32 %v11134_v38, %v4285_v26  ;;  %v4324_v2 = vadd.f32 %v11136_v31, %v4323_v28 }
 0x6ef   : > { %5441 = vpow2.f32 %v5145_v9  ;;  %v4242_v14 = vrot.slane %v4225_v13, 2  ;;  %v4309_v13 = vadd.f32 %v11127_v4, %v4308_v56  ;;  %v4377_v56 = vrot.slane %v10730_v19, 7 }
 0x6f0   : > { %5443 = vtanh.f32 %v4255_v11  ;;  %v4290_v28 = vsel %vm11193_vm14, %v11134_v38, %v4286_v57  ;;  %v4328_v11 = vsel %vm4327_vm15, %v11136_v31, %v4324_v2  ;;  %vm4330_vm1 = vcmp.eq.f32.partialorder %v4329_v41, 8.507059e+37 }
 0x6f1   : > { %v4258_v36 = vadd.f32 %v4242_v14, %v13566_v49  ;;  %v4275_v14 = vsel %vm11161_vm6, %v11124_v32, %v4271_v10  ;;  %v4313_v18 = vsel %vm11167_vm7, %v11127_v4, %v4309_v13  ;;  %v4317_v49 = vor.u32 1.1754944e-38, %v4316_v42 }
 0x6f2   : > { %v4331_v32 = vand.u32 2147483648, %v11122_v3  ;;  %v4280_v4 = vsel %vm11171_vm8, %v4279_v6, %v4275_v14  ;;  %v4293_v10 = vand.u32 2147483648, %v11120_v8 }
 0x6f3   : > { %v5146_v16 = vmul.f32 -1.442695, %v4258_v36  ;;  %v4318_v36 = vsel %vm4315_vm10, %v4317_v49, %v4313_v18 }
 0x6f4   : > { %v4332_v30 = vor.u32 1.1754944e-38, %v4331_v32  ;;  %v4294_v1 = vor.u32 1.1754944e-38, %v4293_v10 }
 0x6f5   : > { %v5442_v9 = vpop.eup %5441  ;;  %5445 = vpow2.f32 %v5146_v16  ;;  %v4381_v16 = vmul.f32 %v4377_v56, %v4318_v36  ;;  %v4378_v56 = vrot.slane %v10734_v39, 7 }
 0x6f6   : > { %v4343_v19 = vadd.f32 1.0, %v5442_v9  ;;  %v5444_v43 = vpop.eup %5443  ;;  %5447 = vtanh.f32 %v4256_v63  ;;  %v4295_v8 = vsel %vm4292_vm0, %v4294_v1, %v4290_v28  ;;  %v4333_v3 = vsel %vm4330_vm1, %v4332_v30, %v4328_v11 }
 0x6f7   : > { %v4383_v13 = vmul.f32 %v5444_v43, %v4280_v4  ;;  %v4382_v38 = vmul.f32 %v4378_v56, %v4333_v3  ;;  %v6283_v3 = vld [vmem:[#allocation6 + $0x3e0] sm:$0xff] }
 0x6f8   : > { %5449 = vrcp.f32 %v4343_v19  ;;  %v4356_v31 = vand.u32 2147483648, %v4343_v19  ;;  %v4354_v2 = vand.u32 2147483647, %v4343_v19  ;;  %vm4350_vm3 = vweird.f32 %v4343_v19  ;;  %v6284_v56 = vld [vmem:[#allocation6 + $0x3a0] sm:$0xff] }
 0x6f9   : > { %v11203_v14 = vadd.f32 %v4383_v13, %v4381_v16 }
 0x6fa   : > { %v4357_v13 = vor.u32 1.1754944e-38, %v4356_v31  ;;  %vm4355_vm5 = vcmp.eq.f32.partialorder %v4354_v2, 8.507059e+37  ;;  %v6291_v31 = vld [vmem:[#allocation6 + $0x7a8] sm:$0xff]  ;;  %v6293_v2 = vld [vmem:[#allocation6 + $0x760] sm:$0xff] }
 0x6fb   : > { %v5446_v63 = vpop.eup %5445 }
 0x6fc   : > { %v4344_v26 = vadd.f32 1.0, %v5446_v63  ;;  %v5448_v9 = vpop.eup %5447 }
 0x6fd   : > { %v4384_v43 = vmul.f32 %v5448_v9, %v4295_v8 }
 0x6fe   : > { %v5450_v6 = vpop.eup %5449  ;;  %5451 = vrcp.f32 %v4344_v26  ;;  %v4371_v63 = vand.u32 2147483648, %v4344_v26  ;;  %v4369_v11 = vand.u32 2147483647, %v4344_v26  ;;  %vm4365_vm7 = vweird.f32 %v4344_v26 }
 0x6ff   : > { %v4346_v18 = vmul.f32 %v5450_v6, %v4343_v19  ;;  %5453 = vtanh.f32 %v11203_v14  ;;  %vm4351_vm2 = vweird.f32 %v5450_v6  ;;  %v11207_v4 = vadd.f32 %v4384_v43, %v4382_v38  ;;  %v6285_v43 = vld [vmem:[#allocation6 + $0x360] sm:$0xff]  ;;  %v6288_v38 = vld [vmem:[#allocation6 + $0x7e8] sm:$0xff] }
 0x700   : > { %vm4352_vm4 = vmor %vm4350_vm3, %vm4351_vm2  ;;  %v4372_v19 = vor.u32 1.1754944e-38, %v4371_v63  ;;  %vm4370_vm9 = vcmp.eq.f32.partialorder %v4369_v11, 8.507059e+37  ;;  %v6306_v63 = vld [vmem:[#allocation6 + $0x668] sm:$0xff]  ;;  %v6310_v11 = vld [vmem:[#allocation6 + $0x120] sm:$0xff] }
 0x701   : > { %v4347_v49 = vsub.f32 1.0, %v4346_v18  ;;  %5455 = vtanh.f32 %v11207_v4 }
 0x703   : > { %v4348_v57 = vmul.f32 %v5450_v6, %v4347_v49  ;;  %v6286_v49 = vld [vmem:[#allocation6 + $0x320] sm:$0xff] }
 0x704   : > { %v5452_v32 = vpop.eup %5451 }
 0x705   : > { %v4349_v36 = vadd.f32 %v5450_v6, %v4348_v57  ;;  %v4361_v10 = vmul.f32 %v5452_v32, %v4344_v26  ;;  %v5454_v21 = vpop.eup %5453  ;;  %vm4366_vm6 = vweird.f32 %v5452_v32  ;;  %v6292_v57 = vld [vmem:[#allocation6 + $0x2a0] sm:$0xff] }
 0x706   : > { %vm4367_vm8 = vmor %vm4365_vm7, %vm4366_vm6 }
 0x707   : > { %v4353_v42 = vsel %vm4352_vm4, %v5450_v6, %v4349_v36  ;;  %v4362_v39 = vsub.f32 1.0, %v4361_v10  ;;  %v5456_v6 = vpop.eup %5455  ;;  %v6296_v36 = vld [vmem:[#allocation6 + $0x720] sm:$0xff]  ;;  %v6297_v10 = vld [vmem:[#allocation6 + $0x728] sm:$0xff] }
 0x708   : > { %v4358_v41 = vsel %vm4355_vm5, %v4357_v13, %v4353_v42  ;;  %v6299_v13 = vld [vmem:[#allocation6 + $0x6e0] sm:$0xff] }
 0x709   : > { %v4389_v16 = vmul.f32 %v5454_v21, %v4358_v41  ;;  %v4363_v28 = vmul.f32 %v5452_v32, %v4362_v39  ;;  %v6301_v42 = vld [vmem:[#allocation6 + $0x1e0] sm:$0xff] }
 0x70a   : > { %v6302_v39 = vld [vmem:[#allocation6 + $0x6a0] sm:$0xff] }
 0x70b   : > { %v11210_v9 = vrot.slane %v4389_v16, 6  ;;  %v4364_v30 = vadd.f32 %v5452_v32, %v4363_v28  ;;  %v6304_v21 = vld [vmem:[#allocation6 + $0x1a0] sm:$0xff]  ;;  %v6309_v28 = vld [vmem:[#allocation6 + $0x628] sm:$0xff] }
 0x70c   : > { %v6305_v41 = vld [vmem:[#allocation6 + $0x660] sm:$0xff] }
 0x70d   : > { %4394 = vst [vmem:[#allocation2 + $0x6] sm:$0x1] %v11210_v9  ;;  %v4368_v1 = vsel %vm4367_vm8, %v5452_v32, %v4364_v30  ;;  %4415 = vmatmul.f32.vlgmr.msra.gmra.mxu0 %v11210_v9  ;;  %4455 = vmatmul.f32.vlgmr.msra.gmra.mxu2 %v11210_v9  ;;  %v6295_v32 = vld [vmem:[#allocation6 + $0x260] sm:$0xff]  ;;  %v6312_v30 = vld [vmem:[#allocation6 + $0x5e8] sm:$0xff] }
 0x70e   : > { %v4373_v8 = vsel %vm4370_vm9, %v4372_v19, %v4368_v1  ;;  %4559 = vmatpush.msra.mxu0 %v6283_v3  ;;  %4599 = vmatpush.msra.mxu2 %v10743_v33  ;;  %v6287_v33 = vld [vmem:[#allocation6 + $0x7e0] sm:$0xff]  ;;  %v6315_v1 = vld [vmem:[#allocation6 + $0x5a8] sm:$0xff] }
 0x70f   : > { %v4390_v18 = vmul.f32 %v5456_v6, %v4373_v8  ;;  %v6307_v16 = vld [vmem:[#allocation6 + $0x160] sm:$0xff]  ;;  %v6318_v8 = vld [vmem:[#allocation6 + $0x568] sm:$0xff] }
 0x710   : > { %4560 = vmatpush.msra.mxu0 %v6284_v56  ;;  %4600 = vmatpush.msra.mxu2 %v10747_v7  ;;  %v6289_v7 = vld [vmem:[#allocation6 + $0x2e0] sm:$0xff] }
 0x711   : > { %v11217_v26 = vrot.slane %v4390_v18, 6  ;;  %v6313_v19 = vld [vmem:[#allocation6 + $0xe0] sm:$0xff]  ;;  %v6321_v18 = vld [vmem:[#allocation6 + $0x528] sm:$0xff] }
 0x712   : > { %4561 = vmatpush.msra.mxu0 %v6285_v43  ;;  %4601 = vmatpush.msra.mxu2 %v10753_v40  ;;  %v6290_v40 = vld [vmem:[#allocation6 + $0x7a0] sm:$0xff]  ;;  %v6324_v43 = vld [vmem:[#allocation6 + $0x4e8] sm:$0xff] }
 0x713   : > { %4398 = vst [vmem:[#allocation2 + $0x9] sm:$0x1] %v11217_v26  ;;  %4435 = vmatmul.f32.vlgmr.msra.gmra.mxu1 %v11217_v26  ;;  %4475 = vmatmul.f32.vlgmr.msra.gmra.mxu3 %v11217_v26  ;;  %v6316_v6 = vld [vmem:[#allocation6 + $0xa0] sm:$0xff] }
 0x714   : > { %4562 = vmatpush.msra.mxu0 %v6286_v49  ;;  %4579 = vmatpush.msra.mxu1 %v6287_v33  ;;  %v6319_v3 = vld [vmem:[#allocation6 + $0x60] sm:$0xff]  ;;  %v6328_v33 = vld [vmem:[#allocation6 + $0x3b0] sm:$0xff] }
 0x715   : > { %4602 = vmatpush.msra.mxu2 %v10761_v44  ;;  %4619 = vmatpush.msra.mxu3 %v6288_v38  ;;  %v6294_v44 = vld [vmem:[#allocation6 + $0x768] sm:$0xff]  ;;  %v6322_v56 = vld [vmem:[#allocation6 + $0x20] sm:$0xff] }
 0x716   : > { %4495 = vmatmul.f32.vlgmr.msrb.gmra.mxu0 %v11210_v9  ;;  %4535 = vmatmul.f32.vlgmr.msrb.gmra.mxu2 %v11210_v9  ;;  %v6326_v49 = vld [vmem:[#allocation6 + $0x4a0] sm:$0xff] }
 0x717   : > { %4563 = vmatpush.msra.mxu0 %v6289_v7  ;;  %4580 = vmatpush.msra.mxu1 %v6290_v40  ;;  %v6329_v38 = vld [vmem:[#allocation6 + $0x460] sm:$0xff]  ;;  %v6331_v7 = vld [vmem:[#allocation6 + $0x370] sm:$0xff] }
 0x718   : > { %4603 = vmatpush.msra.mxu2 %v10769_v62  ;;  %4620 = vmatpush.msra.mxu3 %v6291_v31  ;;  %v6298_v62 = vld [vmem:[#allocation6 + $0x220] sm:$0xff]  ;;  %v6333_v31 = vld [vmem:[#allocation6 + $0x428] sm:$0xff] }
 0x719   : > { %4564 = vmatpush.msra.mxu0 %v6292_v57  ;;  %4581 = vmatpush.msra.mxu1 %v6293_v2  ;;  %v6332_v40 = vld [vmem:[#allocation6 + $0x420] sm:$0xff]  ;;  %v6335_v57 = vld [vmem:[#allocation6 + $0x7f0] sm:$0xff] }
 0x71a   : > { %4604 = vmatpush.msra.mxu2 %v10775_v37  ;;  %4621 = vmatpush.msra.mxu3 %v6294_v44  ;;  %v6300_v37 = vld [vmem:[#allocation6 + $0x6e8] sm:$0xff]  ;;  %v6337_v2 = vld [vmem:[#allocation6 + $0x2f0] sm:$0xff] }
 0x71b   : > { %4565 = vmatpush.msra.mxu0 %v6295_v32  ;;  %4582 = vmatpush.msra.mxu1 %v6296_v36  ;;  %v6338_v44 = vld [vmem:[#allocation6 + $0x7b0] sm:$0xff] }
 0x71c   : > { %4605 = vmatpush.msra.mxu2 %v10781_v0  ;;  %4622 = vmatpush.msra.mxu3 %v6297_v10  ;;  %v6303_v0 = vld [vmem:[#allocation6 + $0x6a8] sm:$0xff]  ;;  %v6340_v32 = vld [vmem:[#allocation6 + $0x770] sm:$0xff] }
 0x71d   : > { %4515 = vmatmul.f32.vlgmr.msrb.gmra.mxu1 %v11217_v26  ;;  %4555 = vmatmul.f32.vlgmr.msrb.gmra.mxu3 %v11217_v26  ;;  %v6341_v36 = vld [vmem:[#allocation6 + $0x270] sm:$0xff] }
 0x71e   : > { %4566 = vmatpush.msra.mxu0 %v6298_v62  ;;  %4583 = vmatpush.msra.mxu1 %v6299_v13  ;;  %v6343_v10 = vld [vmem:[#allocation6 + $0x230] sm:$0xff]  ;;  %v13579_v13 = vld [vmem:[#allocation70_spill] sm:$0xff] }
 0x71f   : > { %4606 = vmatpush.msra.mxu2 %v10789_v59  ;;  %4623 = vmatpush.msra.mxu3 %v6300_v37  ;;  %v6308_v59 = vld [vmem:[#allocation6 + $0x620] sm:$0xff]  ;;  %v13577_v62 = vld [vmem:[#allocation113_spill] sm:$0xff] }
 0x720   : > { %4567 = vmatpush.msra.mxu0 %v6301_v42  ;;  %4584 = vmatpush.msra.mxu1 %v6302_v39  ;;  %v13580_v37 = vld [vmem:[#allocation117_spill] sm:$0xff]  ;;  %v13582_v42 = vld [vmem:[#allocation72_spill] sm:$0xff] }
 0x721   : > { %4607 = vmatpush.msra.mxu2 %v10795_v27  ;;  %4624 = vmatpush.msra.mxu3 %v6303_v0  ;;  %v6311_v27 = vld [vmem:[#allocation6 + $0x5e0] sm:$0xff]  ;;  %v13583_v39 = vld [vmem:[#allocation112_spill] sm:$0xff]  ;;  %v13584_v0 = vld [vmem:[#allocation118_spill] sm:$0xff] }
 0x722   : > { %4568 = vmatpush.msra.mxu0 %v6304_v21  ;;  %4585 = vmatpush.msra.mxu1 %v6305_v41  ;;  %v13585_v21 = vld [vmem:[#allocation74_spill] sm:$0xff]  ;;  %v13586_v41 = vld [vmem:[#allocation75_spill] sm:$0xff] }
 0x723   : > { %4608 = vmatpush.msra.mxu2 %v10801_v60  ;;  %4625 = vmatpush.msra.mxu3 %v6306_v63  ;;  %v6314_v60 = vld [vmem:[#allocation6 + $0x5a0] sm:$0xff]  ;;  %v6352_v63 = vld [vmem:[#allocation6 + $0x570] sm:$0xff] }
 0x724   : > { %4569 = vmatpush.msra.mxu0 %v6307_v16  ;;  %4586 = vmatpush.msra.mxu1 %v6308_v59  ;;  %v13587_v16 = vld [vmem:[#allocation121_spill] sm:$0xff]  ;;  %v13588_v59 = vld [vmem:[#allocation123_spill] sm:$0xff] }
 0x725   : > { %4609 = vmatpush.msra.mxu2 %v10807_v20  ;;  %4626 = vmatpush.msra.mxu3 %v6309_v28  ;;  %v6317_v20 = vld [vmem:[#allocation6 + $0x560] sm:$0xff]  ;;  %v13589_v28 = vld [vmem:[#allocation77_spill] sm:$0xff] }
 0x726   : > { %4570 = vmatpush.msra.mxu0 %v6310_v11  ;;  %4587 = vmatpush.msra.mxu1 %v6311_v27  ;;  %v6353_v11 = vld [vmem:[#allocation6 + $0x530] sm:$0xff]  ;;  %v13590_v27 = vld [vmem:[#allocation86_spill] sm:$0xff] }
 0x727   : > { %4610 = vmatpush.msra.mxu2 %v10813_v35  ;;  %4627 = vmatpush.msra.mxu3 %v6312_v30  ;;  %v6320_v35 = vld [vmem:[#allocation6 + $0x520] sm:$0xff]  ;;  %v13591_v30 = vld [vmem:[#allocation125_spill] sm:$0xff] }
 0x728   : > { %4571 = vmatpush.msra.mxu0 %v6313_v19  ;;  %4588 = vmatpush.msra.mxu1 %v6314_v60  ;;  %v13592_v19 = vld [vmem:[#allocation127_spill] sm:$0xff]  ;;  %v6354_v60 = vld [vmem:[#allocation6 + $0x4f0] sm:$0xff] }
 0x729   : > { %4611 = vmatpush.msra.mxu2 %v10819_v29  ;;  %4628 = vmatpush.msra.mxu3 %v6315_v1  ;;  %v6323_v29 = vld [vmem:[#allocation6 + $0x4e0] sm:$0xff] }
 0x72a   : > { %4572 = vmatpush.msra.mxu0 %v6316_v6  ;;  %4589 = vmatpush.msra.mxu1 %v6317_v20  ;;  %v13593_v1 = vld [vmem:[#allocation91_spill] sm:$0xff]  ;;  %v13594_v6 = vld [vmem:[#allocation96_spill] sm:$0xff]  ;;  %v6355_v20 = vld [vmem:[#allocation6 + $0x4b0] sm:$0xff] }
 0x72b   : > { %4612 = vmatpush.msra.mxu2 %v10825_v55  ;;  %4629 = vmatpush.msra.mxu3 %v6318_v8  ;;  %v6325_v55 = vld [vmem:[#allocation6 + $0x3f0] sm:$0xff]  ;;  %v13595_v8 = vld [vmem:[#allocation102_spill] sm:$0xff] }
 0x72c   : > { %4573 = vmatpush.msra.mxu0 %v6319_v3  ;;  %4590 = vmatpush.msra.mxu1 %v6320_v35  ;;  %v6356_v3 = vld [vmem:[#allocation6 + $0x470] sm:$0xff]  ;;  %v13596_v35 = vld [vmem:[#allocation78_spill] sm:$0xff] }
 0x72d   : > { %4613 = vmatpush.msra.mxu2 %v10831_v51  ;;  %4630 = vmatpush.msra.mxu3 %v6321_v18  ;;  %v6327_v51 = vld [vmem:[#allocation6 + $0x4a8] sm:$0xff]  ;;  %v6357_v18 = vld [vmem:[#allocation6 + $0x430] sm:$0xff] }
 0x72e   : > { %4574 = vmatpush.msra.mxu0 %v6322_v56  ;;  %4591 = vmatpush.msra.mxu1 %v6323_v29  ;;  %v13597_v56 = vld [vmem:[#allocation129_spill] sm:$0xff] }
 0x72f   : > { %4614 = vmatpush.msra.mxu2 %v10837_v52  ;;  %4631 = vmatpush.msra.mxu3 %v6324_v43  ;;  %v6330_v52 = vld [vmem:[#allocation6 + $0x468] sm:$0xff] }
 0x730   : > { %4575 = vmatmul.f32.vlgmr.msra.gmra.mxu0 %v11210_v9  ;;  %4615 = vmatmul.f32.vlgmr.msra.gmra.mxu2 %v11210_v9 }
 0x731   : > { %4639 = vmatpush.msrb.mxu0 %v6325_v55  ;;  %4679 = vmatpush.msrb.mxu2 %v10844_v15  ;;  %v6334_v15 = vld [vmem:[#allocation6 + $0x330] sm:$0xff] }
 0x732   : > { %4592 = vmatpush.msra.mxu1 %v6326_v49  ;;  %4632 = vmatpush.msra.mxu3 %v6327_v51 }
 0x733   : > { %4640 = vmatpush.msrb.mxu0 %v6328_v33  ;;  %4680 = vmatpush.msrb.mxu2 %v10850_v34  ;;  %v6336_v34 = vld [vmem:[#allocation6 + $0x7f8] sm:$0xff] }
 0x734   : > { %4593 = vmatpush.msra.mxu1 %v6329_v38  ;;  %4633 = vmatpush.msra.mxu3 %v6330_v52 }
 0x735   : > { %4641 = vmatpush.msrb.mxu0 %v6331_v7  ;;  %4681 = vmatpush.msrb.mxu2 %v10856_v17  ;;  %v6339_v17 = vld [vmem:[#allocation6 + $0x2b0] sm:$0xff] }
 0x736   : > { %4594 = vmatpush.msra.mxu1 %v6332_v40  ;;  %4634 = vmatpush.msra.mxu3 %v6333_v31 }
 0x737   : > { %4595 = vmatmul.f32.vlgmr.msra.gmra.mxu1 %v11217_v26  ;;  %4635 = vmatmul.f32.vlgmr.msra.gmra.mxu3 %v11217_v26 }
 0x738   : > { %4642 = vmatpush.msrb.mxu0 %v6334_v15  ;;  %4659 = vmatpush.msrb.mxu1 %v6335_v57 }
 0x739   : > { %4682 = vmatpush.msrb.mxu2 %v10865_v5  ;;  %4699 = vmatpush.msrb.mxu3 %v6336_v34  ;;  %v6342_v5 = vld [vmem:[#allocation6 + $0x730] sm:$0xff]  ;;  %v13598_v34 = vld [vmem:[#allocation14_spill] sm:$0xff] }
 0x73a   : > { %4643 = vmatpush.msrb.mxu0 %v6337_v2  ;;  %4660 = vmatpush.msrb.mxu1 %v6338_v44  ;;  %v13599_v44 = vld [vmem:[#allocation16_spill] sm:$0xff] }
 0x73b   : > { %4683 = vmatpush.msrb.mxu2 %v10871_v61  ;;  %4700 = vmatpush.msrb.mxu3 %v10874_v25  ;;  %v6344_v61 = vld [vmem:[#allocation6 + $0x6f0] sm:$0xff] }
 0x73c   : > { %4644 = vmatpush.msrb.mxu0 %v6339_v17  ;;  %4661 = vmatpush.msrb.mxu1 %v6340_v32  ;;  %v6345_v25 = vld [vmem:[#allocation6 + $0x1f0] sm:$0xff] }
 0x73d   : > { %4684 = vmatpush.msrb.mxu2 %v10879_v53  ;;  %4701 = vmatpush.msrb.mxu3 %v10882_v22  ;;  %v6346_v53 = vld [vmem:[#allocation6 + $0x6b0] sm:$0xff] }
 0x73e   : > { %4645 = vmatpush.msrb.mxu0 %v6341_v36  ;;  %4662 = vmatpush.msrb.mxu1 %v6342_v5  ;;  %v6347_v22 = vld [vmem:[#allocation6 + $0x1b0] sm:$0xff] }
 0x73f   : > { %4685 = vmatpush.msrb.mxu2 %v10887_v23  ;;  %4702 = vmatpush.msrb.mxu3 %v10890_v58  ;;  %v6348_v23 = vld [vmem:[#allocation6 + $0x670] sm:$0xff]  ;;  %v13576_v58 = vld [vmem:[#allocation68_spill] sm:$0xff] }
 0x740   : > { %4646 = vmatpush.msrb.mxu0 %v6343_v10  ;;  %4663 = vmatpush.msrb.mxu1 %v6344_v61  ;;  %v13600_v10 = vld [vmem:[#allocation13_spill] sm:$0xff] }
 0x741   : > { %4686 = vmatpush.msrb.mxu2 %v10895_v48  ;;  %4703 = vmatpush.msrb.mxu3 %v10898_v45  ;;  %v6349_v48 = vld [vmem:[#allocation6 + $0x630] sm:$0xff]  ;;  %v13578_v45 = vld [vmem:[#allocation116_spill] sm:$0xff]  ;;  %v13601_v61 = vrot.slane %v13600_v10, 1 }
 0x742   : > { %4647 = vmatpush.msrb.mxu0 %v6345_v25  ;;  %4664 = vmatpush.msrb.mxu1 %v6346_v53  ;;  %v13602_v53 = vld [vmem:[#allocation18_spill] sm:$0xff] }
 0x743   : > { %4687 = vmatpush.msrb.mxu2 %v10903_v50  ;;  %4704 = vmatpush.msrb.mxu3 %v10906_v12  ;;  %v6350_v50 = vld [vmem:[#allocation6 + $0x5f0] sm:$0xff]  ;;  %v13581_v12 = vld [vmem:[#allocation119_spill] sm:$0xff] }
 0x744   : > { %4648 = vmatpush.msrb.mxu0 %v6347_v22  ;;  %4665 = vmatpush.msrb.mxu1 %v6348_v23  ;;  %v13603_v22 = vrot.slane %v13602_v53, 1 }
 0x745   : > { %4688 = vmatpush.msrb.mxu2 %v10911_v24  ;;  %4705 = vmatpush.msrb.mxu3 %v13576_v58  ;;  %v6351_v24 = vld [vmem:[#allocation6 + $0x5b0] sm:$0xff] }
 0x746   : > { %4649 = vmatpush.msrb.mxu0 %v13577_v62  ;;  %4666 = vmatpush.msrb.mxu1 %v6349_v48 }
 0x747   : > { %4689 = vmatpush.msrb.mxu2 %v13578_v45  ;;  %4706 = vmatpush.msrb.mxu3 %v13579_v13  ;;  %v4908_v45 = vld [vmem:[#allocation8 + $0x78] sm:$0xff] }
 0x748   : > { %4650 = vmatpush.msrb.mxu0 %v13580_v37  ;;  %4667 = vmatpush.msrb.mxu1 %v6350_v50  ;;  %v4907_v37 = vld [vmem:[#allocation8 + $0x70] sm:$0xff] }
 0x749   : > { %4690 = vmatpush.msrb.mxu2 %v13581_v12  ;;  %4707 = vmatpush.msrb.mxu3 %v13582_v42  ;;  %v4906_v42 = vld [vmem:[#allocation8 + $0x68] sm:$0xff] }
 0x74a   : > { %4651 = vmatpush.msrb.mxu0 %v13583_v39  ;;  %4668 = vmatpush.msrb.mxu1 %v6351_v24  ;;  %v4905_v24 = vld [vmem:[#allocation8 + $0x60] sm:$0xff] }
 0x74b   : > { %4691 = vmatpush.msrb.mxu2 %v13584_v0  ;;  %4708 = vmatpush.msrb.mxu3 %v13585_v21  ;;  %v4924_v0 = vld [vmem:[#allocation8 + $0xf8] sm:$0xff] }
 0x74c   : > { %4652 = vmatpush.msrb.mxu0 %v13586_v41  ;;  %4669 = vmatpush.msrb.mxu1 %v6352_v63  ;;  %v4904_v41 = vld [vmem:[#allocation8 + $0x58] sm:$0xff]  ;;  %v4923_v63 = vld [vmem:[#allocation8 + $0xf0] sm:$0xff] }
 0x74d   : > { %4692 = vmatpush.msrb.mxu2 %v13587_v16  ;;  %4709 = vmatpush.msrb.mxu3 %v13588_v59 }
 0x74e   : > { %4653 = vmatpush.msrb.mxu0 %v13589_v28  ;;  %4670 = vmatpush.msrb.mxu1 %v6353_v11 }
 0x74f   : > { %4693 = vmatpush.msrb.mxu2 %v13590_v27  ;;  %4710 = vmatpush.msrb.mxu3 %v13591_v30  ;;  %v4903_v27 = vld [vmem:[#allocation8 + $0x50] sm:$0xff]  ;;  %v4922_v30 = vld [vmem:[#allocation8 + $0xe8] sm:$0xff] }
 0x750   : > { %4654 = vmatpush.msrb.mxu0 %v13592_v19  ;;  %4671 = vmatpush.msrb.mxu1 %v6354_v60  ;;  %v4902_v19 = vld [vmem:[#allocation8 + $0x48] sm:$0xff]  ;;  %v4921_v60 = vld [vmem:[#allocation8 + $0xe0] sm:$0xff] }
 0x751   : > { %4694 = vmatpush.msrb.mxu2 %v13593_v1  ;;  %4711 = vmatpush.msrb.mxu3 %v13594_v6 }
 0x752   : > { %4655 = vmatmul.f32.vlgmr.msrb.gmra.mxu0 %v11210_v9  ;;  %4695 = vmatmul.f32.vlgmr.msrb.gmra.mxu2 %v11210_v9 }
 0x753   : > { %4672 = vmatpush.msrb.mxu1 %v6355_v20  ;;  %4712 = vmatpush.msrb.mxu3 %v13595_v8  ;;  %v4901_v20 = vld [vmem:[#allocation8 + $0x40] sm:$0xff]  ;;  %v4920_v8 = vld [vmem:[#allocation8 + $0xd8] sm:$0xff] }
 0x754   : > { %4929 = vmatpush.msra.mxu0 %v4908_v45 }
 0x755   : > { %4673 = vmatpush.msrb.mxu1 %v6356_v3  ;;  %4713 = vmatpush.msrb.mxu3 %v13596_v35 }
 0x756   : > { %4930 = vmatpush.msra.mxu0 %v4907_v37 }
 0x757   : > { %4674 = vmatpush.msrb.mxu1 %v6357_v18  ;;  %4714 = vmatpush.msrb.mxu3 %v13597_v56  ;;  %v4900_v56 = vld [vmem:[#allocation8 + $0x38] sm:$0xff] }
 0x758   : > { %4675 = vmatmul.f32.vlgmr.msrb.gmra.mxu1 %v11217_v26  ;;  %4715 = vmatmul.f32.vlgmr.msrb.gmra.mxu3 %v11217_v26 }
 0x759   : > { %4931 = vmatpush.msra.mxu0 %v4906_v42  ;;  %4949 = vmatpush.msra.mxu1 %v4924_v0  ;;  %v4895_v42 = vld [vmem:[#allocation8 + $0x10] sm:$0xff] }
 0x75b   : > { %4932 = vmatpush.msra.mxu0 %v4905_v24  ;;  %4950 = vmatpush.msra.mxu1 %v4923_v63 }
 0x75d   : > { %4933 = vmatpush.msra.mxu0 %v4904_v41  ;;  %4951 = vmatpush.msra.mxu1 %v4922_v30  ;;  %v13605_v41 = vrot.slane %v7375_v47, 1 }
 0x75f   : > { %4934 = vmatpush.msra.mxu0 %v4903_v27  ;;  %4952 = vmatpush.msra.mxu1 %v4921_v60 }
 0x761   : > { %4935 = vmatpush.msra.mxu0 %v4902_v19  ;;  %4953 = vmatpush.msra.mxu1 %v4920_v8 }
 0x763   : > { %4936 = vmatpush.msra.mxu0 %v4901_v20  ;;  %v13606_v20 = vrot.slane %v7382_v54, 1  ;;  %v4869_v54 = vrot.slane %v11203_v14, 7 }
 0x765   : > { %4937 = vmatpush.msra.mxu0 %v4900_v56 }
 0x78a   : > { %v4416_v43 = vpop.f32.mrf.mxu0 }
 0x790   : > { %v4436_v29 = vpop.f32.mrf.mxu1  ;;  %v4456_v9 = vpop.f32.mrf.mxu2 }
 0x791   : > { %v4437_v51 = vadd.f32 %v4436_v29, %v4416_v43  ;;  %v4919_v29 = vld [vmem:[#allocation8 + $0xd0] sm:$0xff] }
 0x792   : > { %4954 = vmatpush.msra.mxu1 %v4919_v29 }
 0x793   : > { %v4496_v33 = vpop.f32.mrf.mxu0  ;;  %v4727_v52 = vrot.slane %v4437_v51, 1 }
 0x795   : > { %v4743_v2 = vadd.f32 %v4727_v52, %v13598_v34 }
 0x796   : > { %v4476_v55 = vpop.f32.mrf.mxu3 }
 0x797   : > { %v4477_v31 = vadd.f32 %v4476_v55, %v4456_v9  ;;  %v5147_v36 = vmul.f32 -1.442695, %v4743_v2 }
 0x799   : > { %v4536_v15 = vpop.f32.mrf.mxu2  ;;  %v4728_v32 = vrot.slane %v4477_v31, 1  ;;  %5457 = vpow2.f32 %v5147_v36  ;;  %v4916_v36 = vld [vmem:[#allocation8 + $0xb8] sm:$0xff] }
 0x79a   : > { %v4516_v49 = vpop.f32.mrf.mxu1 }
 0x79b   : > { %v4517_v38 = vadd.f32 %v4516_v49, %v4496_v33  ;;  %v4744_v25 = vadd.f32 %v4728_v32, %v13601_v61  ;;  %v4899_v33 = vld [vmem:[#allocation8 + $0x30] sm:$0xff] }
 0x79c   : > { %4938 = vmatpush.msra.mxu0 %v4899_v33 }
 0x79d   : > { %v4729_v40 = vrot.slane %v4517_v38, 1  ;;  %v5148_v58 = vmul.f32 -1.442695, %v4744_v25  ;;  %v4918_v38 = vld [vmem:[#allocation8 + $0xc8] sm:$0xff] }
 0x79e   : > { %4955 = vmatpush.msra.mxu1 %v4918_v38 }
 0x79f   : > { %v4745_v17 = vadd.f32 %v4729_v40, %v13599_v44  ;;  %v5458_v48 = vpop.eup %5457 }
 0x7a0   : > { %v4556_v7 = vpop.f32.mrf.mxu3  ;;  %v11291_v50 = vadd.f32 1.0, %v5458_v48 }
 0x7a1   : > { %v4557_v57 = vadd.f32 %v4556_v7, %v4536_v15  ;;  %v5149_v5 = vmul.f32 -1.442695, %v4745_v17  ;;  %v4898_v15 = vld [vmem:[#allocation8 + $0x28] sm:$0xff]  ;;  %v13604_v17 = vld [vmem:[#allocation17_spill] sm:$0xff] }
 0x7a2   : > { %4939 = vmatpush.msra.mxu0 %v4898_v15  ;;  %vm4764_vm12 = vweird.f32 %v11291_v50 }
 0x7a3   : > { %v4730_v26 = vrot.slane %v4557_v57, 1  ;;  %5459 = vpow2.f32 %v5149_v5  ;;  %v4917_v57 = vld [vmem:[#allocation8 + $0xc0] sm:$0xff] }
 0x7a4   : > { %5461 = vpow2.f32 %v5148_v58  ;;  %4956 = vmatpush.msra.mxu1 %v4917_v57  ;;  %v4896_v58 = vld [vmem:[#allocation8 + $0x18] sm:$0xff] }
 0x7a5   : > { %v4746_v23 = vadd.f32 %v4730_v26, %v13603_v22  ;;  %v4897_v26 = vld [vmem:[#allocation8 + $0x20] sm:$0xff] }
 0x7a6   : > { %4940 = vmatpush.msra.mxu0 %v4897_v26  ;;  %4957 = vmatpush.msra.mxu1 %v4916_v36 }
 0x7a7   : > { %v5150_v62 = vmul.f32 -1.442695, %v4746_v23 }
 0x7a8   : > { %4941 = vmatpush.msra.mxu0 %v4896_v58 }
 0x7a9   : > { %v5460_v13 = vpop.eup %5459  ;;  %5463 = vpow2.f32 %v5150_v62  ;;  %v4915_v62 = vld [vmem:[#allocation8 + $0xb0] sm:$0xff] }
 0x7aa   : > { %v11293_v12 = vadd.f32 1.0, %v5460_v13  ;;  %v5462_v39 = vpop.eup %5461  ;;  %5465 = vrcp.f32 %v11291_v50  ;;  %4958 = vmatpush.msra.mxu1 %v4915_v62  ;;  %4942 = vmatpush.msra.mxu0 %v4895_v42 }
 0x7ab   : > { %v11297_v16 = vadd.f32 1.0, %v5462_v39  ;;  %v4914_v39 = vld [vmem:[#allocation8 + $0xa8] sm:$0xff] }
 0x7ac   : > { %5467 = vrcp.f32 %v11293_v12  ;;  %4959 = vmatpush.msra.mxu1 %v4914_v39  ;;  %v4808_v27 = vand.u32 2147483648, %v11293_v12  ;;  %v4806_v60 = vand.u32 2147483647, %v11293_v12  ;;  %vm4802_vm13 = vweird.f32 %v11293_v12 }
 0x7ad   : > { %v4576_v59 = vpop.f32.mrf.mxu0  ;;  %5469 = vrcp.f32 %v11297_v16  ;;  %vm4779_vm1 = vweird.f32 %v11297_v16 }
 0x7ae   : > { %vm4807_vm2 = vcmp.eq.f32.partialorder %v4806_v60, 8.507059e+37 }
 0x7af   : > { %v5464_v21 = vpop.eup %5463 }
 0x7b0   : > { %v11299_v11 = vadd.f32 1.0, %v5464_v21  ;;  %v11301_v1 = vpop.eup %5465  ;;  %v4768_v21 = vand.u32 2147483647, %v11291_v50 }
 0x7b1   : > { %v4760_v43 = vmul.f32 %v11301_v1, %v11291_v50  ;;  %vm4765_vm10 = vweird.f32 %v11301_v1 }
 0x7b2   : > { %v11304_v6 = vpop.eup %5467  ;;  %5471 = vrcp.f32 %v11299_v11  ;;  %vm11340_vm14 = vmor %vm4764_vm12, %vm4765_vm10  ;;  %vm11352_vm0 = vcmp.eq.f32.partialorder %v4768_v21, 8.507059e+37  ;;  %vm4817_vm5 = vweird.f32 %v11299_v11  ;;  %v4821_v26 = vand.u32 2147483647, %v11299_v11 }
 0x7b3   : > { %v4616_v3 = vpop.f32.mrf.mxu2  ;;  %v4798_v55 = vmul.f32 %v11304_v6, %v11293_v12  ;;  %v11311_v52 = vpop.eup %5469  ;;  %v4761_v34 = vsub.f32 1.0, %v4760_v43  ;;  %vm4803_vm11 = vweird.f32 %v11304_v6  ;;  %v5232_v43 = vld [vmem:[%s11427_s5] ss:$0 sm:$0xff] }
 0x7b4   : > { %v4596_v28 = vpop.f32.mrf.mxu1  ;;  %v4775_v5 = vmul.f32 %v11311_v52, %v11297_v16  ;;  %vm11348_vm15 = vmor %vm4802_vm13, %vm4803_vm11  ;;  %vm4780_vm3 = vweird.f32 %v11311_v52  ;;  %vm4822_vm9 = vcmp.eq.f32.partialorder %v4821_v26, 8.507059e+37 }
 0x7b5   : > { %v4597_v18 = vadd.f32 %v4596_v28, %v4576_v59  ;;  %v4799_v2 = vsub.f32 1.0, %v4798_v55  ;;  %v4762_v45 = vmul.f32 %v11301_v1, %v4761_v34  ;;  %v4894_v59 = vld [vmem:[#allocation8 + $0x8] sm:$0xff]  ;;  %v4913_v28 = vld [vmem:[#allocation8 + $0xa0] sm:$0xff]  ;;  %vm11374_vm6 = vmor %vm4779_vm1, %vm4780_vm3 }
 0x7b6   : > { %v4776_v24 = vsub.f32 1.0, %v4775_v5  ;;  %4943 = vmatpush.msra.mxu0 %v4894_v59  ;;  %4960 = vmatpush.msra.mxu1 %v4913_v28 }
 0x7b7   : > { %v4731_v40 = vrot.slane %v4597_v18, 1  ;;  %v4800_v48 = vmul.f32 %v11304_v6, %v4799_v2  ;;  %v4763_v30 = vadd.f32 %v11301_v1, %v4762_v45  ;;  %v4785_v2 = vand.u32 2147483648, %v11297_v16 }
 0x7b8   : > { %v11313_v7 = vpop.eup %5471  ;;  %v4870_v45 = vrot.slane %v11207_v4, 7 }
 0x7b9   : > { %v4813_v10 = vmul.f32 %v11313_v7, %v11299_v11  ;;  %v4747_v53 = vadd.f32 %v4731_v40, %v7343_v46  ;;  %v4770_v46 = vand.u32 2147483648, %v11291_v50  ;;  %v4801_v19 = vadd.f32 %v11304_v6, %v4800_v48 }
 0x7ba   : > { %v4636_v35 = vpop.f32.mrf.mxu3  ;;  %v4777_v50 = vmul.f32 %v11311_v52, %v4776_v24  ;;  %v4809_v40 = vor.u32 1.1754944e-38, %v4808_v27  ;;  %vm4818_vm4 = vweird.f32 %v11313_v7 }
 0x7bb   : > { %v4637_v44 = vadd.f32 %v4636_v35, %v4616_v3  ;;  %v4814_v0 = vsub.f32 1.0, %v4813_v10  ;;  %v4893_v3 = vld [vmem:[#allocation8] sm:$0xff]  ;;  %v4912_v35 = vld [vmem:[#allocation8 + $0x98] sm:$0xff]  ;;  %v4771_v55 = vor.u32 1.1754944e-38, %v4770_v46  ;;  %v4805_v14 = vsel %vm11348_vm15, %v11304_v6, %v4801_v19  ;;  %vm4819_vm7 = vmor %vm4817_vm5, %vm4818_vm4 }
 0x7bc   : > { %4944 = vmatpush.msra.mxu0 %v4893_v3  ;;  %4961 = vmatpush.msra.mxu1 %v4912_v35  ;;  %v4778_v15 = vadd.f32 %v11311_v52, %v4777_v50  ;;  %v4823_v6 = vand.u32 2147483648, %v11299_v11  ;;  %v4810_v34 = vsel %vm4807_vm2, %v4809_v40, %v4805_v14 }
 0x7bd   : > { %v4732_v13 = vrot.slane %v4637_v44, 1  ;;  %v4815_v18 = vmul.f32 %v11313_v7, %v4814_v0  ;;  %v4873_v5 = vmul.f32 %v4869_v54, %v4810_v34 }
 0x7be   : > { %v4782_v10 = vsel %vm11374_vm6, %v11311_v52, %v4778_v15 }
 0x7bf   : > { %v4748_v47 = vadd.f32 %v4732_v13, %v13606_v20 }
 0x7cf   : > { %v4656_v9 = vpop.f32.mrf.mxu0 }
 0x7d5   : > { %v4676_v49 = vpop.f32.mrf.mxu1  ;;  %v4696_v61 = vpop.f32.mrf.mxu2 }
 0x7d6   : > { %v4677_v51 = vadd.f32 %v4676_v49, %v4656_v9  ;;  %v4911_v9 = vld [vmem:[#allocation8 + $0x90] sm:$0xff]  ;;  %v4910_v49 = vld [vmem:[#allocation8 + $0x88] sm:$0xff] }
 0x7d7   : > { %4962 = vmatpush.msra.mxu1 %v4911_v9 }
 0x7d8   : > { %v4733_v31 = vrot.slane %v4677_v51, 1  ;;  %v4767_v51 = vsel %vm11340_vm14, %v11301_v1, %v4763_v30  ;;  %v4816_v1 = vadd.f32 %v11313_v7, %v4815_v18 }
 0x7d9   : > { %4963 = vmatpush.msra.mxu1 %v4910_v49  ;;  %v4772_v57 = vsel %vm11352_vm0, %v4771_v55, %v4767_v51 }
 0x7da   : > { %v4749_v32 = vadd.f32 %v4733_v31, %v13604_v17  ;;  %v4909_v31 = vld [vmem:[#allocation8 + $0x80] sm:$0xff] }
 0x7db   : > { %v4716_v25 = vpop.f32.mrf.mxu3  ;;  %4964 = vmatpush.msra.mxu1 %v4909_v31 }
 0x7dc   : > { %v5151_v22 = vmul.f32 -1.442695, %v4749_v32  ;;  %v4717_v23 = vadd.f32 %v4716_v25, %v4696_v61  ;;  %v4783_v32 = vand.u32 2147483647, %v11297_v16  ;;  %v4820_v61 = vsel %vm4819_vm7, %v11313_v7, %v4816_v1 }
 0x7de   : > { %5473 = vpow2.f32 %v5151_v22  ;;  %v4734_v37 = vrot.slane %v4717_v23, 1  ;;  %v4824_v22 = vor.u32 1.1754944e-38, %v4823_v6  ;;  %v4786_v23 = vor.u32 1.1754944e-38, %v4785_v2 }
 0x7df   : > { %5475 = vtanh.f32 %v4747_v53  ;;  %vm4784_vm8 = vcmp.eq.f32.partialorder %v4783_v32, 8.507059e+37 }
 0x7e0   : > { %v4750_v63 = vadd.f32 %v4734_v37, %v13605_v41  ;;  %v4787_v11 = vsel %vm4784_vm8, %v4786_v23, %v4782_v10  ;;  %v4825_v62 = vsel %vm4822_vm9, %v4824_v22, %v4820_v61 }
 0x7e1   : > { %v4874_v52 = vmul.f32 %v4870_v45, %v4825_v62 }
 0x7e2   : > { %v5152_v8 = vmul.f32 -1.442695, %v4750_v63 }
 0x7e4   : > { %v5474_v29 = vpop.eup %5473  ;;  %5477 = vpow2.f32 %v5152_v8 }
 0x7e5   : > { %v4835_v33 = vadd.f32 1.0, %v5474_v29  ;;  %v5476_v38 = vpop.eup %5475  ;;  %5479 = vtanh.f32 %v4748_v47 }
 0x7e6   : > { %v4875_v44 = vmul.f32 %v5476_v38, %v4772_v57 }
 0x7e7   : > { %5481 = vrcp.f32 %v4835_v33  ;;  %v4848_v42 = vand.u32 2147483648, %v4835_v33  ;;  %v4846_v39 = vand.u32 2147483647, %v4835_v33  ;;  %vm4842_vm11 = vweird.f32 %v4835_v33 }
 0x7e8   : > { %v4877_v16 = vadd.f32 %v4875_v44, %v4873_v5 }
 0x7e9   : > { %v4849_v41 = vor.u32 1.1754944e-38, %v4848_v42  ;;  %vm4847_vm13 = vcmp.eq.f32.partialorder %v4846_v39, 8.507059e+37 }
 0x7ea   : > { %v5478_v36 = vpop.eup %5477 }
 0x7eb   : > { %v4836_v25 = vadd.f32 1.0, %v5478_v36  ;;  %v5480_v53 = vpop.eup %5479 }
 0x7ec   : > { %v4876_v13 = vmul.f32 %v5480_v53, %v4787_v11 }
 0x7ed   : > { %v5482_v58 = vpop.eup %5481  ;;  %5483 = vrcp.f32 %v4836_v25  ;;  %v4863_v27 = vand.u32 2147483648, %v4836_v25  ;;  %v4861_v60 = vand.u32 2147483647, %v4836_v25  ;;  %vm4857_vm15 = vweird.f32 %v4836_v25 }
 0x7ee   : > { %v4838_v48 = vmul.f32 %v5482_v58, %v4835_v33  ;;  %5485 = vtanh.f32 %v4877_v16  ;;  %vm4843_vm10 = vweird.f32 %v5482_v58  ;;  %v4878_v0 = vadd.f32 %v4876_v13, %v4874_v52 }
 0x7ef   : > { %vm4844_vm12 = vmor %vm4842_vm11, %vm4843_vm10  ;;  %v4864_v8 = vor.u32 1.1754944e-38, %v4863_v27  ;;  %vm4862_vm1 = vcmp.eq.f32.partialorder %v4861_v60, 8.507059e+37 }
 0x7f0   : > { %v4839_v37 = vsub.f32 1.0, %v4838_v48  ;;  %5487 = vtanh.f32 %v4878_v0 }
 0x7f2   : > { %v4840_v7 = vmul.f32 %v5482_v58, %v4839_v37 }
 0x7f3   : > { %v5484_v24 = vpop.eup %5483 }
 0x7f4   : > { %v4841_v21 = vadd.f32 %v5482_v58, %v4840_v7  ;;  %v4853_v46 = vmul.f32 %v5484_v24, %v4836_v25  ;;  %v5486_v28 = vpop.eup %5485  ;;  %vm4858_vm14 = vweird.f32 %v5484_v24 }
 0x7f5   : > { %vm4859_vm0 = vmor %vm4857_vm15, %vm4858_vm14 }
 0x7f6   : > { %v4845_v63 = vsel %vm4844_vm12, %v5482_v58, %v4841_v21  ;;  %v4854_v59 = vsub.f32 1.0, %v4853_v46  ;;  %v5488_v35 = vpop.eup %5487 }
 0x7f7   : > { %v4850_v4 = vsel %vm4847_vm13, %v4849_v41, %v4845_v63 }
 0x7f8   : > { %v4881_v30 = vmul.f32 %v5486_v28, %v4850_v4  ;;  %v4855_v19 = vmul.f32 %v5484_v24, %v4854_v59 }
 0x7fa   : > { %v4884_v20 = vrot.slane %v4881_v30, 7  ;;  %v4856_v47 = vadd.f32 %v5484_v24, %v4855_v19 }
 0x7fc   : > { %4886 = vst [vmem:[#allocation2 + $0x7] sm:$0x1] %v4884_v20  ;;  %v4860_v3 = vsel %vm4859_vm0, %v5484_v24, %v4856_v47 }
 0x7fd   : > { %v4865_v18 = vsel %vm4862_vm1, %v4864_v8, %v4860_v3 }
 0x7fe   : > { %v4882_v56 = vmul.f32 %v5488_v35, %v4865_v18 }
 0x800   : > { %v4888_v50 = vrot.slane %v4882_v56, 7 }
 0x802   : > { %4890 = vst [vmem:[#allocation2 + $0x8] sm:$0x1] %v4888_v50 }
 0x803   : > { %v4891_v29 = vld [vmem:[#allocation2] sm:$0xff] }
 0x804   : > { %4945 = vmatmul.f32.vlgmr.msra.gmra.mxu0 %v4891_v29 }
 0x809   : > { %v4892_v54 = vld [vmem:[#allocation2 + $0x8] sm:$0xff] }
 0x80a   : > { %4965 = vmatmul.f32.vlgmr.msra.gmra.mxu1 %v4892_v54 }
 0x881   : > { %v4946_v12 = vpop.f32.mrf.mxu0 }
 0x882   : > { %v4947_v55 = vadd.f32 %v5232_v43, %v4946_v12 }
 0x887   : > { %v4966_v9 = vpop.f32.mrf.mxu1 }
 0x888   : > { %v4967_v49 = vadd.f32 %v4966_v9, %v4947_v55 }
 0x88a   : > { %v4969_v51 = vmax.f32 %v4967_v49, 0.0 }
 0x88c   : > { %4970 = vst [vmem:[%s290_s17] sm:$0xff] %v4969_v51 }
 0x88d   : > { %6475 = shalt.err (!%p6472_p8)
}
 0x88e   : > { %5169 = dma.vmem_to_hbm [thread:$0]  (%p6601_p5), %s4985_s12, 128, %s4987_s1, %s4972_s25  }
 0x88f PF: > { %p5191_p9 = scmp.ge.s32.totalorder %s6518_s24, 2  ;;  %s4998_s20 = sand.u32 1, %s6506_s21  }
 0x890   : > { %s4999_s29 = scalar_lea.sflag [#allocation5], %s4998_s20 }
 0x891   : > { %p5182_p10 = pnand %p5191_p9, %p6605_p6 }
 0x893   : > { %p5183_p11 = pneg %p5182_p10 }
 0x895   : > { %6501 = dma.done.wait (%p5183_p11), %s4999_s29, 128  }
 0x896   : > { %6503 = vsyncadd (%p5183_p11), %s4999_s29, 4294967168  ;;  %p18_p12 = scmp.ge.s32.totalorder %s6588_s27, 4   ;;  %s13615_s21 = smov %s6510_s22 }
 0x897   : > { %s13616_s22 = smov %s6514_s23  ;;  %s13617_s23 = smov %s6599_s30 }
 0x898   : > { %s13618_s24 = smov %s6588_s27  ;;  %20 = sbr.rel (!%p18_p12) target bundleno = 7 (0x7), region = 95 }
 0x89d   :  { %5005 = vsyncpa [#allocation4], 1 }
 0x89e   :  { %5007 = vsyncpa [#allocation4 + $0x1], 1 }
 0x89f   :  { %5008 = vsyncpa [#allocation7], 1 }
 0x8a0   :  { %5009 = vsyncpa [#allocation5], 1 }
 0x8a1   :  { %5011 = vsyncpa [#allocation5 + $0x1], 1 }

</bundles_post_ra>
